<compile_context>
chip_gen: v7x
topology: tpu7x:2x2x1
jax: 0.10.0
libtpu: 0.0.40
codegen_flags: <defaults>
</compile_context>

<pallas_src>
import functools

import jax
import jax.numpy as jnp
from jax.experimental import pallas as pl
from jax.experimental.pallas import tpu as pltpu


def _round_up(x, m):
    return ((x + m - 1) // m) * m


# --------------------------- Pallas matmul kernels ---------------------------

def _bmm_kernel(a_ref, w_ref, o_ref, *, activation):
    r = jnp.dot(a_ref[...], w_ref[...], preferred_element_type=jnp.float32)
    if activation == "tanh":
        r = jnp.tanh(r)
    o_ref[...] = r.astype(o_ref.dtype)


def _bmm_bias_kernel(a_ref, w_ref, b_ref, o_ref, *, activation):
    r = jnp.dot(a_ref[...], w_ref[...], preferred_element_type=jnp.float32)
    r = r + b_ref[...]
    if activation == "tanh":
        r = jnp.tanh(r)
    o_ref[...] = r.astype(o_ref.dtype)


def pallas_bmm(a, w, bias=None, activation=None):
    """Batched matmul out[b] = a[b] @ w[b] (+ bias[b]) (+ tanh).

    a: (B, M, K) f32.  w: (B, K, Np), pre-lowered / lane-padded.  bias: (B,1,Np).
    K is not tiled (largest K here is 4096), so no accumulator is needed and
    the full-extent K block is exempt from the 128-lane divisibility rule.
    """
    B, M, K = a.shape
    _, _, Np = w.shape

    # M tiling: tm always divides padded M (fixes the old row-drop hazard).
    if M <= 256:
        tm, Mp = M, M
    else:
        tm = 256
        Mp = _round_up(M, tm)
        if Mp != M:
            a = jnp.pad(a, ((0, 0), (0, Mp - M), (0, 0)))

    # Lane tile: 256 feeds the full v6e/v7x MXU width; 128 otherwise.
    if Np % 256 == 0:
        tn = 256
    elif Np % 128 == 0:
        tn = 128
    else:
        tn = Np

    grid = (B, Mp // tm, Np // tn)

    in_specs = [
        pl.BlockSpec((None, tm, K), lambda b, i, j: (b, i, 0)),
        pl.BlockSpec((None, K, tn), lambda b, i, j: (b, 0, j)),
    ]
    args = [a, w]
    if bias is not None:
        in_specs.append(pl.BlockSpec((None, 1, tn), lambda b, i, j: (b, 0, j)))
        args.append(bias)
        kernel = functools.partial(_bmm_bias_kernel, activation=activation)
    else:
        kernel = functools.partial(_bmm_kernel, activation=activation)

    out = pl.pallas_call(
        kernel,
        out_shape=jax.ShapeDtypeStruct((B, Mp, Np), jnp.float32),
        grid=grid,
        in_specs=in_specs,
        out_specs=pl.BlockSpec((None, tm, tn), lambda b, i, j: (b, i, j)),
        compiler_params=pltpu.CompilerParams(
            dimension_semantics=("parallel", "parallel", "parallel")),
    )(*args)
    if Mp != M:
        out = out[:, :M, :]
    return out


# ------------------------- Pallas BatchNorm + ReLU --------------------------

def _bn_stats_kernel(x_ref, sum_ref, sq_ref):
    m = pl.program_id(1)

    @pl.when(m == 0)
    def _():
        sum_ref[...] = jnp.zeros_like(sum_ref)
        sq_ref[...] = jnp.zeros_like(sq_ref)

    x = x_ref[...]
    sum_ref[...] += jnp.sum(x, axis=0, keepdims=True)
    sq_ref[...] += jnp.sum(x * x, axis=0, keepdims=True)


def _bn_apply_kernel(x_ref, sum_ref, sq_ref, g_ref, b_ref, o_ref, *, inv_count, eps):
    mean = sum_ref[...] * inv_count
    var = jnp.maximum(sq_ref[...] * inv_count - mean * mean, 0.0)
    scale = g_ref[...] * jax.lax.rsqrt(var + eps)
    shift = b_ref[...] - mean * scale
    o_ref[...] = jnp.maximum(x_ref[...] * scale + shift, 0.0)


def pallas_bn_relu(x, gamma, beta, eps=1e-5):
    """Training-mode (batch-stats) BatchNorm + ReLU.

    x: (M, Cp) with rows = batch * spatial positions, channels on lanes.
    gamma/beta: (1, Cp), pre-padded to the lane extent (padded lanes hold zero
    data end-to-end, so they are harmless).
    """
    M, Cp = x.shape
    count = M                                   # true row count (pad rows are zeros)

    if M <= 512:
        tm, Mp = M, M
    else:
        tm = 512
        Mp = _round_up(M, tm)
        if Mp != M:
            x = jnp.pad(x, ((0, Mp - M), (0, 0)))   # zero rows: exact stats w/ true count

    if Cp % 256 == 0:
        tc = 256
    elif Cp % 128 == 0:
        tc = 128
    else:
        tc = Cp
    mt, ct = Mp // tm, Cp // tc

    sums, sqs = pl.pallas_call(
        _bn_stats_kernel,
        out_shape=(jax.ShapeDtypeStruct((1, Cp), jnp.float32),
                   jax.ShapeDtypeStruct((1, Cp), jnp.float32)),
        grid=(ct, mt),
        in_specs=[pl.BlockSpec((tm, tc), lambda c, m: (m, c))],
        out_specs=(pl.BlockSpec((1, tc), lambda c, m: (0, c)),
                   pl.BlockSpec((1, tc), lambda c, m: (0, c))),
        compiler_params=pltpu.CompilerParams(
            dimension_semantics=("parallel", "arbitrary")),
    )(x)

    out = pl.pallas_call(
        functools.partial(_bn_apply_kernel, inv_count=1.0 / count, eps=eps),
        out_shape=jax.ShapeDtypeStruct((Mp, Cp), jnp.float32),
        grid=(mt, ct),
        in_specs=[pl.BlockSpec((tm, tc), lambda i, j: (i, j)),
                  pl.BlockSpec((1, tc), lambda i, j: (0, j)),
                  pl.BlockSpec((1, tc), lambda i, j: (0, j)),
                  pl.BlockSpec((1, tc), lambda i, j: (0, j)),
                  pl.BlockSpec((1, tc), lambda i, j: (0, j))],
        out_specs=pl.BlockSpec((tm, tc), lambda i, j: (i, j)),
        compiler_params=pltpu.CompilerParams(
            dimension_semantics=("parallel", "parallel")),
    )(x, sums, sqs, gamma, beta)

    if Mp != M:
        out = out[:M, :]
    return out


# ----------------- ConvTranspose2d lowering (layout glue, JAX) ----------------

def deconv_s2_patches(x_nhwc):
    """Phase-decomposed im2col for ConvTranspose2d(k=4, stride=2, pad=1).

    Returns (4, N*H*W, 4*Cin); phase p = ph*2+pw holds output pixels
    (2h+ph, 2w+pw).  Only the 4 structurally non-zero taps per output pixel
    are materialized (vs 16 in the naive zero-dilated im2col)."""
    N, H, W, Cin = x_nhwc.shape
    xp = jnp.pad(x_nhwc, ((0, 0), (1, 1), (1, 1), (0, 0)))
    phases = []
    for ph in range(2):
        for pw in range(2):
            taps = [xp[:, ph + dh:ph + dh + H, pw + dw:pw + dw + W, :]
                    for dh in range(2) for dw in range(2)]
            p = jnp.stack(taps, axis=3)                      # (N,H,W,4,Cin)
            phases.append(p.reshape(N * H * W, 4 * Cin))     # K order = (tap, ci)
    return jnp.stack(phases, axis=0), (N, H, W)


def conv_s1_patches(x_nhwc, k=3):
    """im2col for ConvTranspose2d(k=3, stride=1, pad=1) == conv w/ flipped kernel."""
    N, H, W, Cin = x_nhwc.shape
    xp = jnp.pad(x_nhwc, ((0, 0), (1, 1), (1, 1), (0, 0)))
    taps = [xp[:, d:d + H, e:e + W, :] for d in range(k) for e in range(k)]
    p = jnp.stack(taps, axis=3)                              # (N,H,W,9,Cin)
    return p.reshape(1, N * H * W, k * k * Cin)


def interleave_phases(y_flat, n, h, w, cout):
    """(4, n*h*w, Cp) phase-major -> (n, 2h, 2w, cout) NHWC (drops pad lanes)."""
    y = y_flat[:, :, :cout].reshape(2, 2, n, h, w, cout)
    return jnp.transpose(y, (2, 3, 0, 4, 1, 5)).reshape(n, 2 * h, 2 * w, cout)


# --------------------- Weight pre-lowering (done once) -----------------------

def lower_head_weight(w, k_pad=128):
    """ConvTranspose2d(4x4, s=1, p=0) on a 1x1 input == matmul.
    (Cin,Cout,4,4) -> (k_pad, 16*Cout), columns ordered (h, w, co)."""
    cin, cout, kh, kw = w.shape
    wm = jnp.transpose(w, (0, 2, 3, 1)).reshape(cin, kh * kw * cout)
    return jnp.pad(wm, ((0, k_pad - cin), (0, 0)))


def lower_deconv_s2_weight(w, np_pad):
    """ConvTranspose2d(4x4, s=2, p=1) weight -> four 2x2 phase matrices
    stacked: (4, 4*Cin, np_pad).  K order (tap=dh*2+dw, ci) matches
    deconv_s2_patches; phase order ph*2+pw matches interleave_phases."""
    cin, cout = w.shape[0], w.shape[1]
    phases = []
    for ph in range(2):
        for pw in range(2):
            taps = [w[:, :, 3 - ph - 2 * dh, 3 - pw - 2 * dw]
                    for dh in range(2) for dw in range(2)]       # each (Cin, Cout)
            wp = jnp.stack(taps, axis=0).reshape(4 * cin, cout)
            phases.append(jnp.pad(wp, ((0, 0), (0, np_pad - cout))))
    return jnp.stack(phases, axis=0)


def lower_conv_s1_weight(w, np_pad):
    """ConvTranspose2d(3x3, s=1, p=1) -> conv with flipped kernel: (1, 9*Cin, np_pad)."""
    cin, cout, kh, kw = w.shape
    taps = [w[:, :, kh - 1 - d, kw - 1 - e] for d in range(kh) for e in range(kw)]
    wm = jnp.stack(taps, axis=0).reshape(kh * kw * cin, cout)
    return jnp.pad(wm, ((0, 0), (0, np_pad - cout)))[None]


# ------------------------------ Parameters -----------------------------------

def xavier_uniform(key, shape):
    # shape = (Cin, Cout, kH, kW); PyTorch fans: fan_in=Cout*k*k, fan_out=Cin*k*k
    cin, cout, kh, kw = shape
    bound = (6.0 / (cout * kh * kw + cin * kh * kw)) ** 0.5
    return jax.random.uniform(key, shape, jnp.float32, -bound, bound)


def bias_uniform(key, cout, fan_in):
    bound = 1.0 / (fan_in ** 0.5)
    return jax.random.uniform(key, (cout,), jnp.float32, -bound, bound)


def make_params(key):
    ks = jax.random.split(key, 7)
    # Raw ConvTranspose2d weights in PyTorch layout (Cin, Cout, kH, kW).
    w1 = xavier_uniform(ks[0], (4, 512, 4, 4))
    w2 = xavier_uniform(ks[1], (4, 512, 4, 4))
    w3 = xavier_uniform(ks[2], (1024, 256, 4, 4))   # see TODO(synk) at top
    w4 = xavier_uniform(ks[3], (256, 128, 4, 4))
    w5 = xavier_uniform(ks[4], (128, 64, 4, 4))
    w6 = xavier_uniform(ks[5], (64, 3, 3, 3))
    b6 = bias_uniform(ks[6], 3, 3 * 9)
    # NOTE: conv biases b1..b5 are exactly cancelled by the following
    # training-mode BatchNorm (mean subtraction), so they are not materialized.

    p = {}
    # Pre-lowered, lane-padded matmul weights (built once, never per forward).
    p["w_head"] = jnp.stack([lower_head_weight(w1), lower_head_weight(w2)])  # (2,128,8192)
    p["w3"] = lower_deconv_s2_weight(w3, 256)    # (4, 4096, 256)
    p["w4"] = lower_deconv_s2_weight(w4, 128)    # (4, 1024, 128)
    p["w5"] = lower_deconv_s2_weight(w5, 128)    # (4,  512, 128)  (Cout 64 -> 128 lanes)
    p["w6"] = lower_conv_s1_weight(w6, 128)      # (1,  576, 128)  (Cout  3 -> 128 lanes)
    p["b6"] = jnp.zeros((1, 1, 128), jnp.float32).at[0, 0, :3].set(b6)

    # BatchNorm affine params (PyTorch init gamma=1, beta=0), pre-padded (1, Cp).
    p["g12"], p["be12"] = jnp.ones((1, 1024), jnp.float32), jnp.zeros((1, 1024), jnp.float32)
    p["g3"], p["be3"] = jnp.ones((1, 256), jnp.float32), jnp.zeros((1, 256), jnp.float32)
    p["g4"], p["be4"] = jnp.ones((1, 128), jnp.float32), jnp.zeros((1, 128), jnp.float32)
    p["g5"], p["be5"] = jnp.ones((1, 128), jnp.float32), jnp.zeros((1, 128), jnp.float32)
    return p


# -------------------------------- Forward ------------------------------------

def generator_forward(params, z, c):
    p = params
    N = z.shape[0]

    # ---- heads: conv_1(z) and conv_2(c) fused into one batched matmul ----
    a = jnp.zeros((2, N, 128), jnp.float32)
    a = a.at[0, :, :4].set(z.reshape(N, 4)).at[1, :, :4].set(c.reshape(N, 4))
    h = pallas_bmm(a, p["w_head"])                           # (2, N, 16*512), (h,w,co)
    h = h.reshape(2, N, 4, 4, 512)
    x = jnp.concatenate([h[0], h[1]], axis=-1)               # == torch.cat(dim=1) in NHWC
    x = pallas_bn_relu(x.reshape(N * 16, 1024), p["g12"], p["be12"])
    x = x.reshape(N, 4, 4, 1024)                             # NHWC

    # ---- conv_3/4/5: phase-decomposed stride-2 deconv + BN + ReLU ----
    for name, cout in (("3", 256), ("4", 128), ("5", 64)):
        patches, (n, hh, ww) = deconv_s2_patches(x)          # (4, n*hh*ww, 4*Cin)
        y = pallas_bmm(patches, p["w" + name])               # (4, n*hh*ww, Cp)
        cp = y.shape[-1]
        y = pallas_bn_relu(y.reshape(4 * n * hh * ww, cp),   # BN over all output pixels
                           p["g" + name], p["be" + name])
        x = interleave_phases(y.reshape(4, n * hh * ww, cp), n, hh, ww, cout)

    # ---- conv_6: stride-1 3x3 deconv + bias + tanh ----
    n, hh, ww, _ = x.shape
    patches = conv_s1_patches(x)                             # (1, n*hh*ww, 576)
    y = pallas_bmm(patches, p["w6"], bias=p["b6"], activation="tanh")
    y = y[0, :, :3].reshape(n, hh, ww, 3)
    return jnp.transpose(y, (0, 3, 1, 2))                    # back to NCHW


if __name__ == "__main__":
    key = jax.random.PRNGKey(0)
    kz, kc, kp = jax.random.split(key, 3)
    N = 2
    z = jax.random.normal(kz, (N, 4, 1, 1), jnp.float32)
    c = jax.random.normal(kc, (N, 4, 1, 1), jnp.float32)
    params = make_params(kp)

    fwd = jax.jit(generator_forward)
    out = jax.block_until_ready(fwd(params, z, c))

    assert out.shape == (N, 3, 32, 32), out.shape
    assert bool(jnp.all(jnp.isfinite(out)))
    assert bool(jnp.all(jnp.abs(out) <= 1.0 + 1e-6))   # tanh range
    print("KERNEL_OK")
</pallas_src>

<mosaic_0001>
module attributes {stable_mosaic.version = 11 : i64} {
  func.func @_bmm_kernel(%arg0: i32, %arg1: i32, %arg2: i32, %arg3: memref<1x2x128xf32, #tpu.memory_space<vmem>>, %arg4: memref<1x128x256xf32, #tpu.memory_space<vmem>>, %arg5: memref<1x2x256xf32, #tpu.memory_space<vmem>>) attributes {dimension_semantics = [#tpu.dimension_semantics<parallel>, #tpu.dimension_semantics<parallel>, #tpu.dimension_semantics<parallel>], iteration_bounds = array<i64: 2, 1, 32>, scalar_prefetch = 0 : i64, scratch_operands = 0 : i64, tpu.core_type = #tpu.core_type<tc>, window_params = [{transform_indices = @transform_0, window_bounds = array<i64: 1, 2, 128>}, {transform_indices = @transform_1, window_bounds = array<i64: 1, 128, 256>}, {transform_indices = @transform_2, window_bounds = array<i64: 1, 2, 256>}]} {
    %c0 = arith.constant 0 : index
    %c0_0 = arith.constant 0 : index
    %c0_1 = arith.constant 0 : index
    %0 = vector.load %arg3[%c0, %c0_0, %c0_1] : memref<1x2x128xf32, #tpu.memory_space<vmem>>, vector<1x2x128xf32>
    %1 = vector.shape_cast %0 : vector<1x2x128xf32> to vector<2x128xf32>
    %c0_2 = arith.constant 0 : index
    %c0_3 = arith.constant 0 : index
    %c0_4 = arith.constant 0 : index
    %2 = vector.load %arg4[%c0_2, %c0_3, %c0_4] : memref<1x128x256xf32, #tpu.memory_space<vmem>>, vector<1x128x256xf32>
    %3 = vector.shape_cast %2 : vector<1x128x256xf32> to vector<128x256xf32>
    %cst = arith.constant dense<0.000000e+00> : vector<2x256xf32>
    %4 = tpu.matmul %1, %3, %cst {dimension_numbers = #tpu.dot_dimension_numbers<[1], [0], [0], [1], [0, 0, 1, 1], [], []>} : vector<2x128xf32>, vector<128x256xf32>, vector<2x256xf32> -> vector<2x256xf32>
    %c0_5 = arith.constant 0 : index
    %c0_6 = arith.constant 0 : index
    %c0_7 = arith.constant 0 : index
    %5 = vector.load %arg5[%c0_5, %c0_6, %c0_7] : memref<1x2x256xf32, #tpu.memory_space<vmem>>, vector<1x2x256xf32>
    %6 = vector.shape_cast %5 : vector<1x2x256xf32> to vector<2x256xf32>
    %7 = vector.shape_cast %4 : vector<2x256xf32> to vector<1x2x256xf32>
    tpu.vector_store %arg5[%c0_5, %c0_6, %c0_7], %7 {strides = array<i32>} : memref<1x2x256xf32, #tpu.memory_space<vmem>>, vector<1x2x256xf32>,
    return
  }
  func.func @transform_0(%arg0: i32, %arg1: i32, %arg2: i32) -> (i32, i32, i32) {
    %c0_i32 = arith.constant 0 : i32
    %c0_i32_0 = arith.constant 0 : i32
    return %arg0, %arg1, %c0_i32 : i32, i32, i32
  }
  func.func @transform_1(%arg0: i32, %arg1: i32, %arg2: i32) -> (i32, i32, i32) {
    %c0_i32 = arith.constant 0 : i32
    %c0_i32_0 = arith.constant 0 : i32
    return %arg0, %c0_i32, %arg2 : i32, i32, i32
  }
  func.func @transform_2(%arg0: i32, %arg1: i32, %arg2: i32) -> (i32, i32, i32) {
    %c0_i32 = arith.constant 0 : i32
    return %arg0, %arg1, %arg2 : i32, i32, i32
  }
}

module attributes {stable_mosaic.version = 11 : i64} {
  func.func @_bn_stats_kernel(%arg0: i32, %arg1: i32, %arg2: memref<32x256xf32, #tpu.memory_space<vmem>>, %arg3: memref<1x256xf32, #tpu.memory_space<vmem>>, %arg4: memref<1x256xf32, #tpu.memory_space<vmem>>) attributes {dimension_semantics = [#tpu.dimension_semantics<parallel>, #tpu.dimension_semantics<arbitrary>], iteration_bounds = array<i64: 4, 1>, scalar_prefetch = 0 : i64, scratch_operands = 0 : i64, tpu.core_type = #tpu.core_type<tc>, window_params = [{transform_indices = @transform_0, window_bounds = array<i64: 32, 256>}, {transform_indices = @transform_1, window_bounds = array<i64: 1, 256>}, {transform_indices = @transform_2, window_bounds = array<i64: 1, 256>}]} {
    %c0_i32 = arith.constant 0 : i32
    %0 = arith.cmpi eq, %arg1, %c0_i32 : i32
    %1 = arith.extui %0 : i1 to i32
    %c0_i32_0 = arith.constant 0 : i32
    %2 = arith.cmpi ne, %1, %c0_i32_0 : i32
    scf.if %2 {
      %cst_11 = arith.constant 0.000000e+00 : f32
      %15 = vector.broadcast %cst_11 : f32 to vector<1x256xf32>
      %c0_12 = arith.constant 0 : index
      %c0_13 = arith.constant 0 : index
      %16 = vector.load %arg3[%c0_12, %c0_13] : memref<1x256xf32, #tpu.memory_space<vmem>>, vector<1x256xf32>
      tpu.vector_store %arg3[%c0_12, %c0_13], %15 {strides = array<i32>} : memref<1x256xf32, #tpu.memory_space<vmem>>, vector<1x256xf32>,
      %cst_14 = arith.constant 0.000000e+00 : f32
      %17 = vector.broadcast %cst_14 : f32 to vector<1x256xf32>
      %c0_15 = arith.constant 0 : index
      %c0_16 = arith.constant 0 : index
      %18 = vector.load %arg4[%c0_15, %c0_16] : memref<1x256xf32, #tpu.memory_space<vmem>>, vector<1x256xf32>
      tpu.vector_store %arg4[%c0_15, %c0_16], %17 {strides = array<i32>} : memref<1x256xf32, #tpu.memory_space<vmem>>, vector<1x256xf32>,
    } else {
    }
    %c0 = arith.constant 0 : index
    %c0_1 = arith.constant 0 : index
    %3 = vector.load %arg2[%c0, %c0_1] : memref<32x256xf32, #tpu.memory_space<vmem>>, vector<32x256xf32>
    %c0_2 = arith.constant 0 : index
    %c0_3 = arith.constant 0 : index
    %4 = vector.load %arg3[%c0_2, %c0_3] : memref<1x256xf32, #tpu.memory_space<vmem>>, vector<1x256xf32>
    %cst = arith.constant dense<0.000000e+00> : vector<256xf32>
    %5 = vector.multi_reduction <add>, %3, %cst [0] : vector<32x256xf32> to vector<256xf32>
    %6 = vector.shape_cast %5 : vector<256xf32> to vector<1x256xf32>
    %7 = arith.addf %4, %6 : vector<1x256xf32>
    %c0_4 = arith.constant 0 : index
    %c0_5 = arith.constant 0 : index
    %8 = vector.load %arg3[%c0_4, %c0_5] : memref<1x256xf32, #tpu.memory_space<vmem>>, vector<1x256xf32>
    tpu.vector_store %arg3[%c0_4, %c0_5], %7 {strides = array<i32>} : memref<1x256xf32, #tpu.memory_space<vmem>>, vector<1x256xf32>,
    %c0_6 = arith.constant 0 : index
    %c0_7 = arith.constant 0 : index
    %9 = vector.load %arg4[%c0_6, %c0_7] : memref<1x256xf32, #tpu.memory_space<vmem>>, vector<1x256xf32>
    %10 = arith.mulf %3, %3 : vector<32x256xf32>
    %cst_8 = arith.constant dense<0.000000e+00> : vector<256xf32>
    %11 = vector.multi_reduction <add>, %10, %cst_8 [0] : vector<32x256xf32> to vector<256xf32>
    %12 = vector.shape_cast %11 : vector<256xf32> to vector<1x256xf32>
    %13 = arith.addf %9, %12 : vector<1x256xf32>
    %c0_9 = arith.constant 0 : index
    %c0_10 = arith.constant 0 : index
    %14 = vector.load %arg4[%c0_9, %c0_10] : memref<1x256xf32, #tpu.memory_space<vmem>>, vector<1x256xf32>
    tpu.vector_store %arg4[%c0_9, %c0_10], %13 {strides = array<i32>} : memref<1x256xf32, #tpu.memory_space<vmem>>, vector<1x256xf32>,
    return
  }
  func.func @transform_0(%arg0: i32, %arg1: i32) -> (i32, i32) {
    %c0_i32 = arith.constant 0 : i32
    return %arg1, %arg0 : i32, i32
  }
  func.func @transform_1(%arg0: i32, %arg1: i32) -> (i32, i32) {
    %c0_i32 = arith.constant 0 : i32
    %c0_i32_0 = arith.constant 0 : i32
    return %c0_i32, %arg0 : i32, i32
  }
  func.func @transform_2(%arg0: i32, %arg1: i32) -> (i32, i32) {
    %c0_i32 = arith.constant 0 : i32
    %c0_i32_0 = arith.constant 0 : i32
    return %c0_i32, %arg0 : i32, i32
  }
}

module attributes {stable_mosaic.version = 11 : i64} {
  func.func @_bn_apply_kernel(%arg0: i32, %arg1: i32, %arg2: memref<32x256xf32, #tpu.memory_space<vmem>>, %arg3: memref<1x256xf32, #tpu.memory_space<vmem>>, %arg4: memref<1x256xf32, #tpu.memory_space<vmem>>, %arg5: memref<1x256xf32, #tpu.memory_space<vmem>>, %arg6: memref<1x256xf32, #tpu.memory_space<vmem>>, %arg7: memref<32x256xf32, #tpu.memory_space<vmem>>) attributes {dimension_semantics = [#tpu.dimension_semantics<parallel>, #tpu.dimension_semantics<parallel>], iteration_bounds = array<i64: 1, 4>, scalar_prefetch = 0 : i64, scratch_operands = 0 : i64, tpu.core_type = #tpu.core_type<tc>, window_params = [{transform_indices = @transform_0, window_bounds = array<i64: 32, 256>}, {transform_indices = @transform_1, window_bounds = array<i64: 1, 256>}, {transform_indices = @transform_2, window_bounds = array<i64: 1, 256>}, {transform_indices = @transform_3, window_bounds = array<i64: 1, 256>}, {transform_indices = @transform_4, window_bounds = array<i64: 1, 256>}, {transform_indices = @transform_5, window_bounds = array<i64: 32, 256>}]} {
    %c0 = arith.constant 0 : index
    %c0_0 = arith.constant 0 : index
    %0 = vector.load %arg3[%c0, %c0_0] : memref<1x256xf32, #tpu.memory_space<vmem>>, vector<1x256xf32>
    %cst = arith.constant 3.125000e-02 : f32
    %1 = vector.broadcast %cst : f32 to vector<1x256xf32>
    %2 = arith.mulf %0, %1 : vector<1x256xf32>
    %c0_1 = arith.constant 0 : index
    %c0_2 = arith.constant 0 : index
    %3 = vector.load %arg4[%c0_1, %c0_2] : memref<1x256xf32, #tpu.memory_space<vmem>>, vector<1x256xf32>
    %cst_3 = arith.constant 3.125000e-02 : f32
    %4 = vector.broadcast %cst_3 : f32 to vector<1x256xf32>
    %5 = arith.mulf %3, %4 : vector<1x256xf32>
    %6 = arith.mulf %2, %2 : vector<1x256xf32>
    %7 = arith.subf %5, %6 : vector<1x256xf32>
    %cst_4 = arith.constant 0.000000e+00 : f32
    %8 = vector.broadcast %cst_4 : f32 to vector<1x256xf32>
    %9 = arith.maximumf %7, %8 : vector<1x256xf32>
    %c0_5 = arith.constant 0 : index
    %c0_6 = arith.constant 0 : index
    %10 = vector.load %arg5[%c0_5, %c0_6] : memref<1x256xf32, #tpu.memory_space<vmem>>, vector<1x256xf32>
    %cst_7 = arith.constant 9.99999974E-6 : f32
    %11 = vector.broadcast %cst_7 : f32 to vector<1x256xf32>
    %12 = arith.addf %9, %11 : vector<1x256xf32>
    %13 = math.rsqrt %12 : vector<1x256xf32>
    %14 = arith.mulf %10, %13 : vector<1x256xf32>
    %c0_8 = arith.constant 0 : index
    %c0_9 = arith.constant 0 : index
    %15 = vector.load %arg6[%c0_8, %c0_9] : memref<1x256xf32, #tpu.memory_space<vmem>>, vector<1x256xf32>
    %16 = arith.mulf %2, %14 : vector<1x256xf32>
    %17 = arith.subf %15, %16 : vector<1x256xf32>
    %c0_10 = arith.constant 0 : index
    %c0_11 = arith.constant 0 : index
    %18 = vector.load %arg2[%c0_10, %c0_11] : memref<32x256xf32, #tpu.memory_space<vmem>>, vector<32x256xf32>
    %19 = vector.broadcast %14 : vector<1x256xf32> to vector<32x256xf32>
    %20 = arith.mulf %18, %19 : vector<32x256xf32>
    %21 = vector.broadcast %17 : vector<1x256xf32> to vector<32x256xf32>
    %22 = arith.addf %20, %21 : vector<32x256xf32>
    %cst_12 = arith.constant 0.000000e+00 : f32
    %23 = vector.broadcast %cst_12 : f32 to vector<32x256xf32>
    %24 = arith.maximumf %22, %23 : vector<32x256xf32>
    %c0_13 = arith.constant 0 : index
    %c0_14 = arith.constant 0 : index
    %25 = vector.load %arg7[%c0_13, %c0_14] : memref<32x256xf32, #tpu.memory_space<vmem>>, vector<32x256xf32>
    tpu.vector_store %arg7[%c0_13, %c0_14], %24 {strides = array<i32>} : memref<32x256xf32, #tpu.memory_space<vmem>>, vector<32x256xf32>,
    return
  }
  func.func @transform_0(%arg0: i32, %arg1: i32) -> (i32, i32) {
    %c0_i32 = arith.constant 0 : i32
    return %arg0, %arg1 : i32, i32
  }
  func.func @transform_1(%arg0: i32, %arg1: i32) -> (i32, i32) {
    %c0_i32 = arith.constant 0 : i32
    %c0_i32_0 = arith.constant 0 : i32
    return %c0_i32, %arg1 : i32, i32
  }
  func.func @transform_2(%arg0: i32, %arg1: i32) -> (i32, i32) {
    %c0_i32 = arith.constant 0 : i32
    %c0_i32_0 = arith.constant 0 : i32
    return %c0_i32, %arg1 : i32, i32
  }
  func.func @transform_3(%arg0: i32, %arg1: i32) -> (i32, i32) {
    %c0_i32 = arith.constant 0 : i32
    %c0_i32_0 = arith.constant 0 : i32
    return %c0_i32, %arg1 : i32, i32
  }
  func.func @transform_4(%arg0: i32, %arg1: i32) -> (i32, i32) {
    %c0_i32 = arith.constant 0 : i32
    %c0_i32_0 = arith.constant 0 : i32
    return %c0_i32, %arg1 : i32, i32
  }
  func.func @transform_5(%arg0: i32, %arg1: i32) -> (i32, i32) {
    %c0_i32 = arith.constant 0 : i32
    return %arg0, %arg1 : i32, i32
  }
}

module attributes {stable_mosaic.version = 11 : i64} {
  func.func @_bmm_kernel(%arg0: i32, %arg1: i32, %arg2: i32, %arg3: memref<1x32x4096xf32, #tpu.memory_space<vmem>>, %arg4: memref<1x4096x256xf32, #tpu.memory_space<vmem>>, %arg5: memref<1x32x256xf32, #tpu.memory_space<vmem>>) attributes {dimension_semantics = [#tpu.dimension_semantics<parallel>, #tpu.dimension_semantics<parallel>, #tpu.dimension_semantics<parallel>], iteration_bounds = array<i64: 4, 1, 1>, scalar_prefetch = 0 : i64, scratch_operands = 0 : i64, tpu.core_type = #tpu.core_type<tc>, window_params = [{transform_indices = @transform_0, window_bounds = array<i64: 1, 32, 4096>}, {transform_indices = @transform_1, window_bounds = array<i64: 1, 4096, 256>}, {transform_indices = @transform_2, window_bounds = array<i64: 1, 32, 256>}]} {
    %c0 = arith.constant 0 : index
    %c0_0 = arith.constant 0 : index
    %c0_1 = arith.constant 0 : index
    %0 = vector.load %arg3[%c0, %c0_0, %c0_1] : memref<1x32x4096xf32, #tpu.memory_space<vmem>>, vector<1x32x4096xf32>
    %1 = vector.shape_cast %0 : vector<1x32x4096xf32> to vector<32x4096xf32>
    %c0_2 = arith.constant 0 : index
    %c0_3 = arith.constant 0 : index
    %c0_4 = arith.constant 0 : index
    %2 = vector.load %arg4[%c0_2, %c0_3, %c0_4] : memref<1x4096x256xf32, #tpu.memory_space<vmem>>, vector<1x4096x256xf32>
    %3 = vector.shape_cast %2 : vector<1x4096x256xf32> to vector<4096x256xf32>
    %cst = arith.constant dense<0.000000e+00> : vector<32x256xf32>
    %4 = tpu.matmul %1, %3, %cst {dimension_numbers = #tpu.dot_dimension_numbers<[1], [0], [0], [1], [0, 0, 1, 1], [], []>} : vector<32x4096xf32>, vector<4096x256xf32>, vector<32x256xf32> -> vector<32x256xf32>
    %c0_5 = arith.constant 0 : index
    %c0_6 = arith.constant 0 : index
    %c0_7 = arith.constant 0 : index
    %5 = vector.load %arg5[%c0_5, %c0_6, %c0_7] : memref<1x32x256xf32, #tpu.memory_space<vmem>>, vector<1x32x256xf32>
    %6 = vector.shape_cast %5 : vector<1x32x256xf32> to vector<32x256xf32>
    %7 = vector.shape_cast %4 : vector<32x256xf32> to vector<1x32x256xf32>
    tpu.vector_store %arg5[%c0_5, %c0_6, %c0_7], %7 {strides = array<i32>} : memref<1x32x256xf32, #tpu.memory_space<vmem>>, vector<1x32x256xf32>,
    return
  }
  func.func @transform_0(%arg0: i32, %arg1: i32, %arg2: i32) -> (i32, i32, i32) {
    %c0_i32 = arith.constant 0 : i32
    %c0_i32_0 = arith.constant 0 : i32
    return %arg0, %arg1, %c0_i32 : i32, i32, i32
  }
  func.func @transform_1(%arg0: i32, %arg1: i32, %arg2: i32) -> (i32, i32, i32) {
    %c0_i32 = arith.constant 0 : i32
    %c0_i32_0 = arith.constant 0 : i32
    return %arg0, %c0_i32, %arg2 : i32, i32, i32
  }
  func.func @transform_2(%arg0: i32, %arg1: i32, %arg2: i32) -> (i32, i32, i32) {
    %c0_i32 = arith.constant 0 : i32
    return %arg0, %arg1, %arg2 : i32, i32, i32
  }
}

module attributes {stable_mosaic.version = 11 : i64} {
  func.func @_bn_stats_kernel(%arg0: i32, %arg1: i32, %arg2: memref<128x256xf32, #tpu.memory_space<vmem>>, %arg3: memref<1x256xf32, #tpu.memory_space<vmem>>, %arg4: memref<1x256xf32, #tpu.memory_space<vmem>>) attributes {dimension_semantics = [#tpu.dimension_semantics<parallel>, #tpu.dimension_semantics<arbitrary>], iteration_bounds = array<i64: 1, 1>, scalar_prefetch = 0 : i64, scratch_operands = 0 : i64, tpu.core_type = #tpu.core_type<tc>, window_params = [{transform_indices = @transform_0, window_bounds = array<i64: 128, 256>}, {transform_indices = @transform_1, window_bounds = array<i64: 1, 256>}, {transform_indices = @transform_2, window_bounds = array<i64: 1, 256>}]} {
    %c0_i32 = arith.constant 0 : i32
    %0 = arith.cmpi eq, %arg1, %c0_i32 : i32
    %1 = arith.extui %0 : i1 to i32
    %c0_i32_0 = arith.constant 0 : i32
    %2 = arith.cmpi ne, %1, %c0_i32_0 : i32
    scf.if %2 {
      %cst_11 = arith.constant 0.000000e+00 : f32
      %15 = vector.broadcast %cst_11 : f32 to vector<1x256xf32>
      %c0_12 = arith.constant 0 : index
      %c0_13 = arith.constant 0 : index
      %16 = vector.load %arg3[%c0_12, %c0_13] : memref<1x256xf32, #tpu.memory_space<vmem>>, vector<1x256xf32>
      tpu.vector_store %arg3[%c0_12, %c0_13], %15 {strides = array<i32>} : memref<1x256xf32, #tpu.memory_space<vmem>>, vector<1x256xf32>,
      %cst_14 = arith.constant 0.000000e+00 : f32
      %17 = vector.broadcast %cst_14 : f32 to vector<1x256xf32>
      %c0_15 = arith.constant 0 : index
      %c0_16 = arith.constant 0 : index
      %18 = vector.load %arg4[%c0_15, %c0_16] : memref<1x256xf32, #tpu.memory_space<vmem>>, vector<1x256xf32>
      tpu.vector_store %arg4[%c0_15, %c0_16], %17 {strides = array<i32>} : memref<1x256xf32, #tpu.memory_space<vmem>>, vector<1x256xf32>,
    } else {
    }
    %c0 = arith.constant 0 : index
    %c0_1 = arith.constant 0 : index
    %3 = vector.load %arg2[%c0, %c0_1] : memref<128x256xf32, #tpu.memory_space<vmem>>, vector<128x256xf32>
    %c0_2 = arith.constant 0 : index
    %c0_3 = arith.constant 0 : index
    %4 = vector.load %arg3[%c0_2, %c0_3] : memref<1x256xf32, #tpu.memory_space<vmem>>, vector<1x256xf32>
    %cst = arith.constant dense<0.000000e+00> : vector<256xf32>
    %5 = vector.multi_reduction <add>, %3, %cst [0] : vector<128x256xf32> to vector<256xf32>
    %6 = vector.shape_cast %5 : vector<256xf32> to vector<1x256xf32>
    %7 = arith.addf %4, %6 : vector<1x256xf32>
    %c0_4 = arith.constant 0 : index
    %c0_5 = arith.constant 0 : index
    %8 = vector.load %arg3[%c0_4, %c0_5] : memref<1x256xf32, #tpu.memory_space<vmem>>, vector<1x256xf32>
    tpu.vector_store %arg3[%c0_4, %c0_5], %7 {strides = array<i32>} : memref<1x256xf32, #tpu.memory_space<vmem>>, vector<1x256xf32>,
    %c0_6 = arith.constant 0 : index
    %c0_7 = arith.constant 0 : index
    %9 = vector.load %arg4[%c0_6, %c0_7] : memref<1x256xf32, #tpu.memory_space<vmem>>, vector<1x256xf32>
    %10 = arith.mulf %3, %3 : vector<128x256xf32>
    %cst_8 = arith.constant dense<0.000000e+00> : vector<256xf32>
    %11 = vector.multi_reduction <add>, %10, %cst_8 [0] : vector<128x256xf32> to vector<256xf32>
    %12 = vector.shape_cast %11 : vector<256xf32> to vector<1x256xf32>
    %13 = arith.addf %9, %12 : vector<1x256xf32>
    %c0_9 = arith.constant 0 : index
    %c0_10 = arith.constant 0 : index
    %14 = vector.load %arg4[%c0_9, %c0_10] : memref<1x256xf32, #tpu.memory_space<vmem>>, vector<1x256xf32>
    tpu.vector_store %arg4[%c0_9, %c0_10], %13 {strides = array<i32>} : memref<1x256xf32, #tpu.memory_space<vmem>>, vector<1x256xf32>,
    return
  }
  func.func @transform_0(%arg0: i32, %arg1: i32) -> (i32, i32) {
    %c0_i32 = arith.constant 0 : i32
    return %arg1, %arg0 : i32, i32
  }
  func.func @transform_1(%arg0: i32, %arg1: i32) -> (i32, i32) {
    %c0_i32 = arith.constant 0 : i32
    %c0_i32_0 = arith.constant 0 : i32
    return %c0_i32, %arg0 : i32, i32
  }
  func.func @transform_2(%arg0: i32, %arg1: i32) -> (i32, i32) {
    %c0_i32 = arith.constant 0 : i32
    %c0_i32_0 = arith.constant 0 : i32
    return %c0_i32, %arg0 : i32, i32
  }
}

module attributes {stable_mosaic.version = 11 : i64} {
  func.func @_bn_apply_kernel(%arg0: i32, %arg1: i32, %arg2: memref<128x256xf32, #tpu.memory_space<vmem>>, %arg3: memref<1x256xf32, #tpu.memory_space<vmem>>, %arg4: memref<1x256xf32, #tpu.memory_space<vmem>>, %arg5: memref<1x256xf32, #tpu.memory_space<vmem>>, %arg6: memref<1x256xf32, #tpu.memory_space<vmem>>, %arg7: memref<128x256xf32, #tpu.memory_space<vmem>>) attributes {dimension_semantics = [#tpu.dimension_semantics<parallel>, #tpu.dimension_semantics<parallel>], iteration_bounds = array<i64: 1, 1>, scalar_prefetch = 0 : i64, scratch_operands = 0 : i64, tpu.core_type = #tpu.core_type<tc>, window_params = [{transform_indices = @transform_0, window_bounds = array<i64: 128, 256>}, {transform_indices = @transform_1, window_bounds = array<i64: 1, 256>}, {transform_indices = @transform_2, window_bounds = array<i64: 1, 256>}, {transform_indices = @transform_3, window_bounds = array<i64: 1, 256>}, {transform_indices = @transform_4, window_bounds = array<i64: 1, 256>}, {transform_indices = @transform_5, window_bounds = array<i64: 128, 256>}]} {
    %c0 = arith.constant 0 : index
    %c0_0 = arith.constant 0 : index
    %0 = vector.load %arg3[%c0, %c0_0] : memref<1x256xf32, #tpu.memory_space<vmem>>, vector<1x256xf32>
    %cst = arith.constant 7.812500e-03 : f32
    %1 = vector.broadcast %cst : f32 to vector<1x256xf32>
    %2 = arith.mulf %0, %1 : vector<1x256xf32>
    %c0_1 = arith.constant 0 : index
    %c0_2 = arith.constant 0 : index
    %3 = vector.load %arg4[%c0_1, %c0_2] : memref<1x256xf32, #tpu.memory_space<vmem>>, vector<1x256xf32>
    %cst_3 = arith.constant 7.812500e-03 : f32
    %4 = vector.broadcast %cst_3 : f32 to vector<1x256xf32>
    %5 = arith.mulf %3, %4 : vector<1x256xf32>
    %6 = arith.mulf %2, %2 : vector<1x256xf32>
    %7 = arith.subf %5, %6 : vector<1x256xf32>
    %cst_4 = arith.constant 0.000000e+00 : f32
    %8 = vector.broadcast %cst_4 : f32 to vector<1x256xf32>
    %9 = arith.maximumf %7, %8 : vector<1x256xf32>
    %c0_5 = arith.constant 0 : index
    %c0_6 = arith.constant 0 : index
    %10 = vector.load %arg5[%c0_5, %c0_6] : memref<1x256xf32, #tpu.memory_space<vmem>>, vector<1x256xf32>
    %cst_7 = arith.constant 9.99999974E-6 : f32
    %11 = vector.broadcast %cst_7 : f32 to vector<1x256xf32>
    %12 = arith.addf %9, %11 : vector<1x256xf32>
    %13 = math.rsqrt %12 : vector<1x256xf32>
    %14 = arith.mulf %10, %13 : vector<1x256xf32>
    %c0_8 = arith.constant 0 : index
    %c0_9 = arith.constant 0 : index
    %15 = vector.load %arg6[%c0_8, %c0_9] : memref<1x256xf32, #tpu.memory_space<vmem>>, vector<1x256xf32>
    %16 = arith.mulf %2, %14 : vector<1x256xf32>
    %17 = arith.subf %15, %16 : vector<1x256xf32>
    %c0_10 = arith.constant 0 : index
    %c0_11 = arith.constant 0 : index
    %18 = vector.load %arg2[%c0_10, %c0_11] : memref<128x256xf32, #tpu.memory_space<vmem>>, vector<128x256xf32>
    %19 = vector.broadcast %14 : vector<1x256xf32> to vector<128x256xf32>
    %20 = arith.mulf %18, %19 : vector<128x256xf32>
    %21 = vector.broadcast %17 : vector<1x256xf32> to vector<128x256xf32>
    %22 = arith.addf %20, %21 : vector<128x256xf32>
    %cst_12 = arith.constant 0.000000e+00 : f32
    %23 = vector.broadcast %cst_12 : f32 to vector<128x256xf32>
    %24 = arith.maximumf %22, %23 : vector<128x256xf32>
    %c0_13 = arith.constant 0 : index
    %c0_14 = arith.constant 0 : index
    %25 = vector.load %arg7[%c0_13, %c0_14] : memref<128x256xf32, #tpu.memory_space<vmem>>, vector<128x256xf32>
    tpu.vector_store %arg7[%c0_13, %c0_14], %24 {strides = array<i32>} : memref<128x256xf32, #tpu.memory_space<vmem>>, vector<128x256xf32>,
    return
  }
  func.func @transform_0(%arg0: i32, %arg1: i32) -> (i32, i32) {
    %c0_i32 = arith.constant 0 : i32
    return %arg0, %arg1 : i32, i32
  }
  func.func @transform_1(%arg0: i32, %arg1: i32) -> (i32, i32) {
    %c0_i32 = arith.constant 0 : i32
    %c0_i32_0 = arith.constant 0 : i32
    return %c0_i32, %arg1 : i32, i32
  }
  func.func @transform_2(%arg0: i32, %arg1: i32) -> (i32, i32) {
    %c0_i32 = arith.constant 0 : i32
    %c0_i32_0 = arith.constant 0 : i32
    return %c0_i32, %arg1 : i32, i32
  }
  func.func @transform_3(%arg0: i32, %arg1: i32) -> (i32, i32) {
    %c0_i32 = arith.constant 0 : i32
    %c0_i32_0 = arith.constant 0 : i32
    return %c0_i32, %arg1 : i32, i32
  }
  func.func @transform_4(%arg0: i32, %arg1: i32) -> (i32, i32) {
    %c0_i32 = arith.constant 0 : i32
    %c0_i32_0 = arith.constant 0 : i32
    return %c0_i32, %arg1 : i32, i32
  }
  func.func @transform_5(%arg0: i32, %arg1: i32) -> (i32, i32) {
    %c0_i32 = arith.constant 0 : i32
    return %arg0, %arg1 : i32, i32
  }
}

module attributes {stable_mosaic.version = 11 : i64} {
  func.func @_bmm_kernel(%arg0: i32, %arg1: i32, %arg2: i32, %arg3: memref<1x128x1024xf32, #tpu.memory_space<vmem>>, %arg4: memref<1x1024x128xf32, #tpu.memory_space<vmem>>, %arg5: memref<1x128x128xf32, #tpu.memory_space<vmem>>) attributes {dimension_semantics = [#tpu.dimension_semantics<parallel>, #tpu.dimension_semantics<parallel>, #tpu.dimension_semantics<parallel>], iteration_bounds = array<i64: 4, 1, 1>, scalar_prefetch = 0 : i64, scratch_operands = 0 : i64, tpu.core_type = #tpu.core_type<tc>, window_params = [{transform_indices = @transform_0, window_bounds = array<i64: 1, 128, 1024>}, {transform_indices = @transform_1, window_bounds = array<i64: 1, 1024, 128>}, {transform_indices = @transform_2, window_bounds = array<i64: 1, 128, 128>}]} {
    %c0 = arith.constant 0 : index
    %c0_0 = arith.constant 0 : index
    %c0_1 = arith.constant 0 : index
    %0 = vector.load %arg3[%c0, %c0_0, %c0_1] : memref<1x128x1024xf32, #tpu.memory_space<vmem>>, vector<1x128x1024xf32>
    %1 = vector.shape_cast %0 : vector<1x128x1024xf32> to vector<128x1024xf32>
    %c0_2 = arith.constant 0 : index
    %c0_3 = arith.constant 0 : index
    %c0_4 = arith.constant 0 : index
    %2 = vector.load %arg4[%c0_2, %c0_3, %c0_4] : memref<1x1024x128xf32, #tpu.memory_space<vmem>>, vector<1x1024x128xf32>
    %3 = vector.shape_cast %2 : vector<1x1024x128xf32> to vector<1024x128xf32>
    %cst = arith.constant dense<0.000000e+00> : vector<128x128xf32>
    %4 = tpu.matmul %1, %3, %cst {dimension_numbers = #tpu.dot_dimension_numbers<[1], [0], [0], [1], [0, 0, 1, 1], [], []>} : vector<128x1024xf32>, vector<1024x128xf32>, vector<128x128xf32> -> vector<128x128xf32>
    %c0_5 = arith.constant 0 : index
    %c0_6 = arith.constant 0 : index
    %c0_7 = arith.constant 0 : index
    %5 = vector.load %arg5[%c0_5, %c0_6, %c0_7] : memref<1x128x128xf32, #tpu.memory_space<vmem>>, vector<1x128x128xf32>
    %6 = vector.shape_cast %5 : vector<1x128x128xf32> to vector<128x128xf32>
    %7 = vector.shape_cast %4 : vector<128x128xf32> to vector<1x128x128xf32>
    tpu.vector_store %arg5[%c0_5, %c0_6, %c0_7], %7 {strides = array<i32>} : memref<1x128x128xf32, #tpu.memory_space<vmem>>, vector<1x128x128xf32>,
    return
  }
  func.func @transform_0(%arg0: i32, %arg1: i32, %arg2: i32) -> (i32, i32, i32) {
    %c0_i32 = arith.constant 0 : i32
    %c0_i32_0 = arith.constant 0 : i32
    return %arg0, %arg1, %c0_i32 : i32, i32, i32
  }
  func.func @transform_1(%arg0: i32, %arg1: i32, %arg2: i32) -> (i32, i32, i32) {
    %c0_i32 = arith.constant 0 : i32
    %c0_i32_0 = arith.constant 0 : i32
    return %arg0, %c0_i32, %arg2 : i32, i32, i32
  }
  func.func @transform_2(%arg0: i32, %arg1: i32, %arg2: i32) -> (i32, i32, i32) {
    %c0_i32 = arith.constant 0 : i32
    return %arg0, %arg1, %arg2 : i32, i32, i32
  }
}

module attributes {stable_mosaic.version = 11 : i64} {
  func.func @_bn_stats_kernel(%arg0: i32, %arg1: i32, %arg2: memref<512x128xf32, #tpu.memory_space<vmem>>, %arg3: memref<1x128xf32, #tpu.memory_space<vmem>>, %arg4: memref<1x128xf32, #tpu.memory_space<vmem>>) attributes {dimension_semantics = [#tpu.dimension_semantics<parallel>, #tpu.dimension_semantics<arbitrary>], iteration_bounds = array<i64: 1, 1>, scalar_prefetch = 0 : i64, scratch_operands = 0 : i64, tpu.core_type = #tpu.core_type<tc>, window_params = [{transform_indices = @transform_0, window_bounds = array<i64: 512, 128>}, {transform_indices = @transform_1, window_bounds = array<i64: 1, 128>}, {transform_indices = @transform_2, window_bounds = array<i64: 1, 128>}]} {
    %c0_i32 = arith.constant 0 : i32
    %0 = arith.cmpi eq, %arg1, %c0_i32 : i32
    %1 = arith.extui %0 : i1 to i32
    %c0_i32_0 = arith.constant 0 : i32
    %2 = arith.cmpi ne, %1, %c0_i32_0 : i32
    scf.if %2 {
      %cst_11 = arith.constant 0.000000e+00 : f32
      %15 = vector.broadcast %cst_11 : f32 to vector<1x128xf32>
      %c0_12 = arith.constant 0 : index
      %c0_13 = arith.constant 0 : index
      %16 = vector.load %arg3[%c0_12, %c0_13] : memref<1x128xf32, #tpu.memory_space<vmem>>, vector<1x128xf32>
      tpu.vector_store %arg3[%c0_12, %c0_13], %15 {strides = array<i32>} : memref<1x128xf32, #tpu.memory_space<vmem>>, vector<1x128xf32>,
      %cst_14 = arith.constant 0.000000e+00 : f32
      %17 = vector.broadcast %cst_14 : f32 to vector<1x128xf32>
      %c0_15 = arith.constant 0 : index
      %c0_16 = arith.constant 0 : index
      %18 = vector.load %arg4[%c0_15, %c0_16] : memref<1x128xf32, #tpu.memory_space<vmem>>, vector<1x128xf32>
      tpu.vector_store %arg4[%c0_15, %c0_16], %17 {strides = array<i32>} : memref<1x128xf32, #tpu.memory_space<vmem>>, vector<1x128xf32>,
    } else {
    }
    %c0 = arith.constant 0 : index
    %c0_1 = arith.constant 0 : index
    %3 = vector.load %arg2[%c0, %c0_1] : memref<512x128xf32, #tpu.memory_space<vmem>>, vector<512x128xf32>
    %c0_2 = arith.constant 0 : index
    %c0_3 = arith.constant 0 : index
    %4 = vector.load %arg3[%c0_2, %c0_3] : memref<1x128xf32, #tpu.memory_space<vmem>>, vector<1x128xf32>
    %cst = arith.constant dense<0.000000e+00> : vector<128xf32>
    %5 = vector.multi_reduction <add>, %3, %cst [0] : vector<512x128xf32> to vector<128xf32>
    %6 = vector.shape_cast %5 : vector<128xf32> to vector<1x128xf32>
    %7 = arith.addf %4, %6 : vector<1x128xf32>
    %c0_4 = arith.constant 0 : index
    %c0_5 = arith.constant 0 : index
    %8 = vector.load %arg3[%c0_4, %c0_5] : memref<1x128xf32, #tpu.memory_space<vmem>>, vector<1x128xf32>
    tpu.vector_store %arg3[%c0_4, %c0_5], %7 {strides = array<i32>} : memref<1x128xf32, #tpu.memory_space<vmem>>, vector<1x128xf32>,
    %c0_6 = arith.constant 0 : index
    %c0_7 = arith.constant 0 : index
    %9 = vector.load %arg4[%c0_6, %c0_7] : memref<1x128xf32, #tpu.memory_space<vmem>>, vector<1x128xf32>
    %10 = arith.mulf %3, %3 : vector<512x128xf32>
    %cst_8 = arith.constant dense<0.000000e+00> : vector<128xf32>
    %11 = vector.multi_reduction <add>, %10, %cst_8 [0] : vector<512x128xf32> to vector<128xf32>
    %12 = vector.shape_cast %11 : vector<128xf32> to vector<1x128xf32>
    %13 = arith.addf %9, %12 : vector<1x128xf32>
    %c0_9 = arith.constant 0 : index
    %c0_10 = arith.constant 0 : index
    %14 = vector.load %arg4[%c0_9, %c0_10] : memref<1x128xf32, #tpu.memory_space<vmem>>, vector<1x128xf32>
    tpu.vector_store %arg4[%c0_9, %c0_10], %13 {strides = array<i32>} : memref<1x128xf32, #tpu.memory_space<vmem>>, vector<1x128xf32>,
    return
  }
  func.func @transform_0(%arg0: i32, %arg1: i32) -> (i32, i32) {
    %c0_i32 = arith.constant 0 : i32
    return %arg1, %arg0 : i32, i32
  }
  func.func @transform_1(%arg0: i32, %arg1: i32) -> (i32, i32) {
    %c0_i32 = arith.constant 0 : i32
    %c0_i32_0 = arith.constant 0 : i32
    return %c0_i32, %arg0 : i32, i32
  }
  func.func @transform_2(%arg0: i32, %arg1: i32) -> (i32, i32) {
    %c0_i32 = arith.constant 0 : i32
    %c0_i32_0 = arith.constant 0 : i32
    return %c0_i32, %arg0 : i32, i32
  }
}

module attributes {stable_mosaic.version = 11 : i64} {
  func.func @_bn_apply_kernel(%arg0: i32, %arg1: i32, %arg2: memref<512x128xf32, #tpu.memory_space<vmem>>, %arg3: memref<1x128xf32, #tpu.memory_space<vmem>>, %arg4: memref<1x128xf32, #tpu.memory_space<vmem>>, %arg5: memref<1x128xf32, #tpu.memory_space<vmem>>, %arg6: memref<1x128xf32, #tpu.memory_space<vmem>>, %arg7: memref<512x128xf32, #tpu.memory_space<vmem>>) attributes {dimension_semantics = [#tpu.dimension_semantics<parallel>, #tpu.dimension_semantics<parallel>], iteration_bounds = array<i64: 1, 1>, scalar_prefetch = 0 : i64, scratch_operands = 0 : i64, tpu.core_type = #tpu.core_type<tc>, window_params = [{transform_indices = @transform_0, window_bounds = array<i64: 512, 128>}, {transform_indices = @transform_1, window_bounds = array<i64: 1, 128>}, {transform_indices = @transform_2, window_bounds = array<i64: 1, 128>}, {transform_indices = @transform_3, window_bounds = array<i64: 1, 128>}, {transform_indices = @transform_4, window_bounds = array<i64: 1, 128>}, {transform_indices = @transform_5, window_bounds = array<i64: 512, 128>}]} {
    %c0 = arith.constant 0 : index
    %c0_0 = arith.constant 0 : index
    %0 = vector.load %arg3[%c0, %c0_0] : memref<1x128xf32, #tpu.memory_space<vmem>>, vector<1x128xf32>
    %cst = arith.constant 0.001953125 : f32
    %1 = vector.broadcast %cst : f32 to vector<1x128xf32>
    %2 = arith.mulf %0, %1 : vector<1x128xf32>
    %c0_1 = arith.constant 0 : index
    %c0_2 = arith.constant 0 : index
    %3 = vector.load %arg4[%c0_1, %c0_2] : memref<1x128xf32, #tpu.memory_space<vmem>>, vector<1x128xf32>
    %cst_3 = arith.constant 0.001953125 : f32
    %4 = vector.broadcast %cst_3 : f32 to vector<1x128xf32>
    %5 = arith.mulf %3, %4 : vector<1x128xf32>
    %6 = arith.mulf %2, %2 : vector<1x128xf32>
    %7 = arith.subf %5, %6 : vector<1x128xf32>
    %cst_4 = arith.constant 0.000000e+00 : f32
    %8 = vector.broadcast %cst_4 : f32 to vector<1x128xf32>
    %9 = arith.maximumf %7, %8 : vector<1x128xf32>
    %c0_5 = arith.constant 0 : index
    %c0_6 = arith.constant 0 : index
    %10 = vector.load %arg5[%c0_5, %c0_6] : memref<1x128xf32, #tpu.memory_space<vmem>>, vector<1x128xf32>
    %cst_7 = arith.constant 9.99999974E-6 : f32
    %11 = vector.broadcast %cst_7 : f32 to vector<1x128xf32>
    %12 = arith.addf %9, %11 : vector<1x128xf32>
    %13 = math.rsqrt %12 : vector<1x128xf32>
    %14 = arith.mulf %10, %13 : vector<1x128xf32>
    %c0_8 = arith.constant 0 : index
    %c0_9 = arith.constant 0 : index
    %15 = vector.load %arg6[%c0_8, %c0_9] : memref<1x128xf32, #tpu.memory_space<vmem>>, vector<1x128xf32>
    %16 = arith.mulf %2, %14 : vector<1x128xf32>
    %17 = arith.subf %15, %16 : vector<1x128xf32>
    %c0_10 = arith.constant 0 : index
    %c0_11 = arith.constant 0 : index
    %18 = vector.load %arg2[%c0_10, %c0_11] : memref<512x128xf32, #tpu.memory_space<vmem>>, vector<512x128xf32>
    %19 = vector.broadcast %14 : vector<1x128xf32> to vector<512x128xf32>
    %20 = arith.mulf %18, %19 : vector<512x128xf32>
    %21 = vector.broadcast %17 : vector<1x128xf32> to vector<512x128xf32>
    %22 = arith.addf %20, %21 : vector<512x128xf32>
    %cst_12 = arith.constant 0.000000e+00 : f32
    %23 = vector.broadcast %cst_12 : f32 to vector<512x128xf32>
    %24 = arith.maximumf %22, %23 : vector<512x128xf32>
    %c0_13 = arith.constant 0 : index
    %c0_14 = arith.constant 0 : index
    %25 = vector.load %arg7[%c0_13, %c0_14] : memref<512x128xf32, #tpu.memory_space<vmem>>, vector<512x128xf32>
    tpu.vector_store %arg7[%c0_13, %c0_14], %24 {strides = array<i32>} : memref<512x128xf32, #tpu.memory_space<vmem>>, vector<512x128xf32>,
    return
  }
  func.func @transform_0(%arg0: i32, %arg1: i32) -> (i32, i32) {
    %c0_i32 = arith.constant 0 : i32
    return %arg0, %arg1 : i32, i32
  }
  func.func @transform_1(%arg0: i32, %arg1: i32) -> (i32, i32) {
    %c0_i32 = arith.constant 0 : i32
    %c0_i32_0 = arith.constant 0 : i32
    return %c0_i32, %arg1 : i32, i32
  }
  func.func @transform_2(%arg0: i32, %arg1: i32) -> (i32, i32) {
    %c0_i32 = arith.constant 0 : i32
    %c0_i32_0 = arith.constant 0 : i32
    return %c0_i32, %arg1 : i32, i32
  }
  func.func @transform_3(%arg0: i32, %arg1: i32) -> (i32, i32) {
    %c0_i32 = arith.constant 0 : i32
    %c0_i32_0 = arith.constant 0 : i32
    return %c0_i32, %arg1 : i32, i32
  }
  func.func @transform_4(%arg0: i32, %arg1: i32) -> (i32, i32) {
    %c0_i32 = arith.constant 0 : i32
    %c0_i32_0 = arith.constant 0 : i32
    return %c0_i32, %arg1 : i32, i32
  }
  func.func @transform_5(%arg0: i32, %arg1: i32) -> (i32, i32) {
    %c0_i32 = arith.constant 0 : i32
    return %arg0, %arg1 : i32, i32
  }
}

module attributes {stable_mosaic.version = 11 : i64} {
  func.func @_bmm_kernel(%arg0: i32, %arg1: i32, %arg2: i32, %arg3: memref<1x256x512xf32, #tpu.memory_space<vmem>>, %arg4: memref<1x512x128xf32, #tpu.memory_space<vmem>>, %arg5: memref<1x256x128xf32, #tpu.memory_space<vmem>>) attributes {dimension_semantics = [#tpu.dimension_semantics<parallel>, #tpu.dimension_semantics<parallel>, #tpu.dimension_semantics<parallel>], iteration_bounds = array<i64: 4, 2, 1>, scalar_prefetch = 0 : i64, scratch_operands = 0 : i64, tpu.core_type = #tpu.core_type<tc>, window_params = [{transform_indices = @transform_0, window_bounds = array<i64: 1, 256, 512>}, {transform_indices = @transform_1, window_bounds = array<i64: 1, 512, 128>}, {transform_indices = @transform_2, window_bounds = array<i64: 1, 256, 128>}]} {
    %c0 = arith.constant 0 : index
    %c0_0 = arith.constant 0 : index
    %c0_1 = arith.constant 0 : index
    %0 = vector.load %arg3[%c0, %c0_0, %c0_1] : memref<1x256x512xf32, #tpu.memory_space<vmem>>, vector<1x256x512xf32>
    %1 = vector.shape_cast %0 : vector<1x256x512xf32> to vector<256x512xf32>
    %c0_2 = arith.constant 0 : index
    %c0_3 = arith.constant 0 : index
    %c0_4 = arith.constant 0 : index
    %2 = vector.load %arg4[%c0_2, %c0_3, %c0_4] : memref<1x512x128xf32, #tpu.memory_space<vmem>>, vector<1x512x128xf32>
    %3 = vector.shape_cast %2 : vector<1x512x128xf32> to vector<512x128xf32>
    %cst = arith.constant dense<0.000000e+00> : vector<256x128xf32>
    %4 = tpu.matmul %1, %3, %cst {dimension_numbers = #tpu.dot_dimension_numbers<[1], [0], [0], [1], [0, 0, 1, 1], [], []>} : vector<256x512xf32>, vector<512x128xf32>, vector<256x128xf32> -> vector<256x128xf32>
    %c0_5 = arith.constant 0 : index
    %c0_6 = arith.constant 0 : index
    %c0_7 = arith.constant 0 : index
    %5 = vector.load %arg5[%c0_5, %c0_6, %c0_7] : memref<1x256x128xf32, #tpu.memory_space<vmem>>, vector<1x256x128xf32>
    %6 = vector.shape_cast %5 : vector<1x256x128xf32> to vector<256x128xf32>
    %7 = vector.shape_cast %4 : vector<256x128xf32> to vector<1x256x128xf32>
    tpu.vector_store %arg5[%c0_5, %c0_6, %c0_7], %7 {strides = array<i32>} : memref<1x256x128xf32, #tpu.memory_space<vmem>>, vector<1x256x128xf32>,
    return
  }
  func.func @transform_0(%arg0: i32, %arg1: i32, %arg2: i32) -> (i32, i32, i32) {
    %c0_i32 = arith.constant 0 : i32
    %c0_i32_0 = arith.constant 0 : i32
    return %arg0, %arg1, %c0_i32 : i32, i32, i32
  }
  func.func @transform_1(%arg0: i32, %arg1: i32, %arg2: i32) -> (i32, i32, i32) {
    %c0_i32 = arith.constant 0 : i32
    %c0_i32_0 = arith.constant 0 : i32
    return %arg0, %c0_i32, %arg2 : i32, i32, i32
  }
  func.func @transform_2(%arg0: i32, %arg1: i32, %arg2: i32) -> (i32, i32, i32) {
    %c0_i32 = arith.constant 0 : i32
    return %arg0, %arg1, %arg2 : i32, i32, i32
  }
}

module attributes {stable_mosaic.version = 11 : i64} {
  func.func @_bn_stats_kernel(%arg0: i32, %arg1: i32, %arg2: memref<512x128xf32, #tpu.memory_space<vmem>>, %arg3: memref<1x128xf32, #tpu.memory_space<vmem>>, %arg4: memref<1x128xf32, #tpu.memory_space<vmem>>) attributes {dimension_semantics = [#tpu.dimension_semantics<parallel>, #tpu.dimension_semantics<arbitrary>], iteration_bounds = array<i64: 1, 4>, scalar_prefetch = 0 : i64, scratch_operands = 0 : i64, tpu.core_type = #tpu.core_type<tc>, window_params = [{transform_indices = @transform_0, window_bounds = array<i64: 512, 128>}, {transform_indices = @transform_1, window_bounds = array<i64: 1, 128>}, {transform_indices = @transform_2, window_bounds = array<i64: 1, 128>}]} {
    %c0_i32 = arith.constant 0 : i32
    %0 = arith.cmpi eq, %arg1, %c0_i32 : i32
    %1 = arith.extui %0 : i1 to i32
    %c0_i32_0 = arith.constant 0 : i32
    %2 = arith.cmpi ne, %1, %c0_i32_0 : i32
    scf.if %2 {
      %cst_11 = arith.constant 0.000000e+00 : f32
      %15 = vector.broadcast %cst_11 : f32 to vector<1x128xf32>
      %c0_12 = arith.constant 0 : index
      %c0_13 = arith.constant 0 : index
      %16 = vector.load %arg3[%c0_12, %c0_13] : memref<1x128xf32, #tpu.memory_space<vmem>>, vector<1x128xf32>
      tpu.vector_store %arg3[%c0_12, %c0_13], %15 {strides = array<i32>} : memref<1x128xf32, #tpu.memory_space<vmem>>, vector<1x128xf32>,
      %cst_14 = arith.constant 0.000000e+00 : f32
      %17 = vector.broadcast %cst_14 : f32 to vector<1x128xf32>
      %c0_15 = arith.constant 0 : index
      %c0_16 = arith.constant 0 : index
      %18 = vector.load %arg4[%c0_15, %c0_16] : memref<1x128xf32, #tpu.memory_space<vmem>>, vector<1x128xf32>
      tpu.vector_store %arg4[%c0_15, %c0_16], %17 {strides = array<i32>} : memref<1x128xf32, #tpu.memory_space<vmem>>, vector<1x128xf32>,
    } else {
    }
    %c0 = arith.constant 0 : index
    %c0_1 = arith.constant 0 : index
    %3 = vector.load %arg2[%c0, %c0_1] : memref<512x128xf32, #tpu.memory_space<vmem>>, vector<512x128xf32>
    %c0_2 = arith.constant 0 : index
    %c0_3 = arith.constant 0 : index
    %4 = vector.load %arg3[%c0_2, %c0_3] : memref<1x128xf32, #tpu.memory_space<vmem>>, vector<1x128xf32>
    %cst = arith.constant dense<0.000000e+00> : vector<128xf32>
    %5 = vector.multi_reduction <add>, %3, %cst [0] : vector<512x128xf32> to vector<128xf32>
    %6 = vector.shape_cast %5 : vector<128xf32> to vector<1x128xf32>
    %7 = arith.addf %4, %6 : vector<1x128xf32>
    %c0_4 = arith.constant 0 : index
    %c0_5 = arith.constant 0 : index
    %8 = vector.load %arg3[%c0_4, %c0_5] : memref<1x128xf32, #tpu.memory_space<vmem>>, vector<1x128xf32>
    tpu.vector_store %arg3[%c0_4, %c0_5], %7 {strides = array<i32>} : memref<1x128xf32, #tpu.memory_space<vmem>>, vector<1x128xf32>,
    %c0_6 = arith.constant 0 : index
    %c0_7 = arith.constant 0 : index
    %9 = vector.load %arg4[%c0_6, %c0_7] : memref<1x128xf32, #tpu.memory_space<vmem>>, vector<1x128xf32>
    %10 = arith.mulf %3, %3 : vector<512x128xf32>
    %cst_8 = arith.constant dense<0.000000e+00> : vector<128xf32>
    %11 = vector.multi_reduction <add>, %10, %cst_8 [0] : vector<512x128xf32> to vector<128xf32>
    %12 = vector.shape_cast %11 : vector<128xf32> to vector<1x128xf32>
    %13 = arith.addf %9, %12 : vector<1x128xf32>
    %c0_9 = arith.constant 0 : index
    %c0_10 = arith.constant 0 : index
    %14 = vector.load %arg4[%c0_9, %c0_10] : memref<1x128xf32, #tpu.memory_space<vmem>>, vector<1x128xf32>
    tpu.vector_store %arg4[%c0_9, %c0_10], %13 {strides = array<i32>} : memref<1x128xf32, #tpu.memory_space<vmem>>, vector<1x128xf32>,
    return
  }
  func.func @transform_0(%arg0: i32, %arg1: i32) -> (i32, i32) {
    %c0_i32 = arith.constant 0 : i32
    return %arg1, %arg0 : i32, i32
  }
  func.func @transform_1(%arg0: i32, %arg1: i32) -> (i32, i32) {
    %c0_i32 = arith.constant 0 : i32
    %c0_i32_0 = arith.constant 0 : i32
    return %c0_i32, %arg0 : i32, i32
  }
  func.func @transform_2(%arg0: i32, %arg1: i32) -> (i32, i32) {
    %c0_i32 = arith.constant 0 : i32
    %c0_i32_0 = arith.constant 0 : i32
    return %c0_i32, %arg0 : i32, i32
  }
}

module attributes {stable_mosaic.version = 11 : i64} {
  func.func @_bn_apply_kernel(%arg0: i32, %arg1: i32, %arg2: memref<512x128xf32, #tpu.memory_space<vmem>>, %arg3: memref<1x128xf32, #tpu.memory_space<vmem>>, %arg4: memref<1x128xf32, #tpu.memory_space<vmem>>, %arg5: memref<1x128xf32, #tpu.memory_space<vmem>>, %arg6: memref<1x128xf32, #tpu.memory_space<vmem>>, %arg7: memref<512x128xf32, #tpu.memory_space<vmem>>) attributes {dimension_semantics = [#tpu.dimension_semantics<parallel>, #tpu.dimension_semantics<parallel>], iteration_bounds = array<i64: 4, 1>, scalar_prefetch = 0 : i64, scratch_operands = 0 : i64, tpu.core_type = #tpu.core_type<tc>, window_params = [{transform_indices = @transform_0, window_bounds = array<i64: 512, 128>}, {transform_indices = @transform_1, window_bounds = array<i64: 1, 128>}, {transform_indices = @transform_2, window_bounds = array<i64: 1, 128>}, {transform_indices = @transform_3, window_bounds = array<i64: 1, 128>}, {transform_indices = @transform_4, window_bounds = array<i64: 1, 128>}, {transform_indices = @transform_5, window_bounds = array<i64: 512, 128>}]} {
    %c0 = arith.constant 0 : index
    %c0_0 = arith.constant 0 : index
    %0 = vector.load %arg3[%c0, %c0_0] : memref<1x128xf32, #tpu.memory_space<vmem>>, vector<1x128xf32>
    %cst = arith.constant 4.8828125E-4 : f32
    %1 = vector.broadcast %cst : f32 to vector<1x128xf32>
    %2 = arith.mulf %0, %1 : vector<1x128xf32>
    %c0_1 = arith.constant 0 : index
    %c0_2 = arith.constant 0 : index
    %3 = vector.load %arg4[%c0_1, %c0_2] : memref<1x128xf32, #tpu.memory_space<vmem>>, vector<1x128xf32>
    %cst_3 = arith.constant 4.8828125E-4 : f32
    %4 = vector.broadcast %cst_3 : f32 to vector<1x128xf32>
    %5 = arith.mulf %3, %4 : vector<1x128xf32>
    %6 = arith.mulf %2, %2 : vector<1x128xf32>
    %7 = arith.subf %5, %6 : vector<1x128xf32>
    %cst_4 = arith.constant 0.000000e+00 : f32
    %8 = vector.broadcast %cst_4 : f32 to vector<1x128xf32>
    %9 = arith.maximumf %7, %8 : vector<1x128xf32>
    %c0_5 = arith.constant 0 : index
    %c0_6 = arith.constant 0 : index
    %10 = vector.load %arg5[%c0_5, %c0_6] : memref<1x128xf32, #tpu.memory_space<vmem>>, vector<1x128xf32>
    %cst_7 = arith.constant 9.99999974E-6 : f32
    %11 = vector.broadcast %cst_7 : f32 to vector<1x128xf32>
    %12 = arith.addf %9, %11 : vector<1x128xf32>
    %13 = math.rsqrt %12 : vector<1x128xf32>
    %14 = arith.mulf %10, %13 : vector<1x128xf32>
    %c0_8 = arith.constant 0 : index
    %c0_9 = arith.constant 0 : index
    %15 = vector.load %arg6[%c0_8, %c0_9] : memref<1x128xf32, #tpu.memory_space<vmem>>, vector<1x128xf32>
    %16 = arith.mulf %2, %14 : vector<1x128xf32>
    %17 = arith.subf %15, %16 : vector<1x128xf32>
    %c0_10 = arith.constant 0 : index
    %c0_11 = arith.constant 0 : index
    %18 = vector.load %arg2[%c0_10, %c0_11] : memref<512x128xf32, #tpu.memory_space<vmem>>, vector<512x128xf32>
    %19 = vector.broadcast %14 : vector<1x128xf32> to vector<512x128xf32>
    %20 = arith.mulf %18, %19 : vector<512x128xf32>
    %21 = vector.broadcast %17 : vector<1x128xf32> to vector<512x128xf32>
    %22 = arith.addf %20, %21 : vector<512x128xf32>
    %cst_12 = arith.constant 0.000000e+00 : f32
    %23 = vector.broadcast %cst_12 : f32 to vector<512x128xf32>
    %24 = arith.maximumf %22, %23 : vector<512x128xf32>
    %c0_13 = arith.constant 0 : index
    %c0_14 = arith.constant 0 : index
    %25 = vector.load %arg7[%c0_13, %c0_14] : memref<512x128xf32, #tpu.memory_space<vmem>>, vector<512x128xf32>
    tpu.vector_store %arg7[%c0_13, %c0_14], %24 {strides = array<i32>} : memref<512x128xf32, #tpu.memory_space<vmem>>, vector<512x128xf32>,
    return
  }
  func.func @transform_0(%arg0: i32, %arg1: i32) -> (i32, i32) {
    %c0_i32 = arith.constant 0 : i32
    return %arg0, %arg1 : i32, i32
  }
  func.func @transform_1(%arg0: i32, %arg1: i32) -> (i32, i32) {
    %c0_i32 = arith.constant 0 : i32
    %c0_i32_0 = arith.constant 0 : i32
    return %c0_i32, %arg1 : i32, i32
  }
  func.func @transform_2(%arg0: i32, %arg1: i32) -> (i32, i32) {
    %c0_i32 = arith.constant 0 : i32
    %c0_i32_0 = arith.constant 0 : i32
    return %c0_i32, %arg1 : i32, i32
  }
  func.func @transform_3(%arg0: i32, %arg1: i32) -> (i32, i32) {
    %c0_i32 = arith.constant 0 : i32
    %c0_i32_0 = arith.constant 0 : i32
    return %c0_i32, %arg1 : i32, i32
  }
  func.func @transform_4(%arg0: i32, %arg1: i32) -> (i32, i32) {
    %c0_i32 = arith.constant 0 : i32
    %c0_i32_0 = arith.constant 0 : i32
    return %c0_i32, %arg1 : i32, i32
  }
  func.func @transform_5(%arg0: i32, %arg1: i32) -> (i32, i32) {
    %c0_i32 = arith.constant 0 : i32
    return %arg0, %arg1 : i32, i32
  }
}

module attributes {stable_mosaic.version = 11 : i64} {
  func.func @_bmm_bias_kernel(%arg0: i32, %arg1: i32, %arg2: i32, %arg3: memref<1x256x576xf32, #tpu.memory_space<vmem>>, %arg4: memref<1x576x128xf32, #tpu.memory_space<vmem>>, %arg5: memref<1x1x128xf32, #tpu.memory_space<vmem>>, %arg6: memref<1x256x128xf32, #tpu.memory_space<vmem>>) attributes {dimension_semantics = [#tpu.dimension_semantics<parallel>, #tpu.dimension_semantics<parallel>, #tpu.dimension_semantics<parallel>], iteration_bounds = array<i64: 1, 8, 1>, scalar_prefetch = 0 : i64, scratch_operands = 0 : i64, tpu.core_type = #tpu.core_type<tc>, window_params = [{transform_indices = @transform_0, window_bounds = array<i64: 1, 256, 576>}, {transform_indices = @transform_1, window_bounds = array<i64: 1, 576, 128>}, {transform_indices = @transform_2, window_bounds = array<i64: 1, 1, 128>}, {transform_indices = @transform_3, window_bounds = array<i64: 1, 256, 128>}]} {
    %c0 = arith.constant 0 : index
    %c0_0 = arith.constant 0 : index
    %c0_1 = arith.constant 0 : index
    %0 = vector.load %arg3[%c0, %c0_0, %c0_1] : memref<1x256x576xf32, #tpu.memory_space<vmem>>, vector<1x256x576xf32>
    %1 = vector.shape_cast %0 : vector<1x256x576xf32> to vector<256x576xf32>
    %c0_2 = arith.constant 0 : index
    %c0_3 = arith.constant 0 : index
    %c0_4 = arith.constant 0 : index
    %2 = vector.load %arg4[%c0_2, %c0_3, %c0_4] : memref<1x576x128xf32, #tpu.memory_space<vmem>>, vector<1x576x128xf32>
    %3 = vector.shape_cast %2 : vector<1x576x128xf32> to vector<576x128xf32>
    %cst = arith.constant dense<0.000000e+00> : vector<256x128xf32>
    %4 = tpu.matmul %1, %3, %cst {dimension_numbers = #tpu.dot_dimension_numbers<[1], [0], [0], [1], [0, 0, 1, 1], [], []>} : vector<256x576xf32>, vector<576x128xf32>, vector<256x128xf32> -> vector<256x128xf32>
    %c0_5 = arith.constant 0 : index
    %c0_6 = arith.constant 0 : index
    %c0_7 = arith.constant 0 : index
    %5 = vector.load %arg5[%c0_5, %c0_6, %c0_7] : memref<1x1x128xf32, #tpu.memory_space<vmem>>, vector<1x1x128xf32>
    %6 = vector.shape_cast %5 : vector<1x1x128xf32> to vector<1x128xf32>
    %7 = vector.broadcast %6 : vector<1x128xf32> to vector<256x128xf32>
    %8 = arith.addf %4, %7 : vector<256x128xf32>
    %9 = math.tanh %8 : vector<256x128xf32>
    %c0_8 = arith.constant 0 : index
    %c0_9 = arith.constant 0 : index
    %c0_10 = arith.constant 0 : index
    %10 = vector.load %arg6[%c0_8, %c0_9, %c0_10] : memref<1x256x128xf32, #tpu.memory_space<vmem>>, vector<1x256x128xf32>
    %11 = vector.shape_cast %10 : vector<1x256x128xf32> to vector<256x128xf32>
    %12 = vector.shape_cast %9 : vector<256x128xf32> to vector<1x256x128xf32>
    tpu.vector_store %arg6[%c0_8, %c0_9, %c0_10], %12 {strides = array<i32>} : memref<1x256x128xf32, #tpu.memory_space<vmem>>, vector<1x256x128xf32>,
    return
  }
  func.func @transform_0(%arg0: i32, %arg1: i32, %arg2: i32) -> (i32, i32, i32) {
    %c0_i32 = arith.constant 0 : i32
    %c0_i32_0 = arith.constant 0 : i32
    return %arg0, %arg1, %c0_i32 : i32, i32, i32
  }
  func.func @transform_1(%arg0: i32, %arg1: i32, %arg2: i32) -> (i32, i32, i32) {
    %c0_i32 = arith.constant 0 : i32
    %c0_i32_0 = arith.constant 0 : i32
    return %arg0, %c0_i32, %arg2 : i32, i32, i32
  }
  func.func @transform_2(%arg0: i32, %arg1: i32, %arg2: i32) -> (i32, i32, i32) {
    %c0_i32 = arith.constant 0 : i32
    %c0_i32_0 = arith.constant 0 : i32
    return %arg0, %c0_i32, %arg2 : i32, i32, i32
  }
  func.func @transform_3(%arg0: i32, %arg1: i32, %arg2: i32) -> (i32, i32, i32) {
    %c0_i32 = arith.constant 0 : i32
    return %arg0, %arg1, %arg2 : i32, i32, i32
  }
}

</mosaic_0001>

<bundles_post_ra>
// kernel: generator_forward.13
= control target key start
LH: loop header
LB: loop body
LE: loop exit
PB: predicated region body
PF: predicated region fallthrough
CT: control target
= control target key end

     0   :  { %7 = vsyncpa [#allocation3], 0  ;;  %s914_s0 = inlined_call_operand.vmem [shape: f32[2,2,128], index: 0, kind: input, shape index: {}]   ;;  %s915_s1 = inlined_call_operand.hbm [shape: f32[2,128,8192], index: 1, kind: input, shape index: {}]   ;;  %s916_s2 = inlined_call_operand.vmem [shape: f32[2,2,8192], index: 2, kind: output, shape index: {}]  }
   0x1   :  { %9 = vsyncpa [#allocation3 + $0x1], 0  ;;  %s727_s9 = smov 0   ;;  %s729_s10 = smov 0  }
   0x2   :  { %s731_s11 = smov 0   ;;  %s733_s12 = smov 0  }
   0x3   :  { %s735_s13 = smov 0   ;;  %s737_s14 = smov 0  }
   0x4   :  { %s739_s15 = smov 0   ;;  %s741_s16 = smov 0  }
   0x5 LB: > { %s485_s17 = sadd.s32 4294967295, %s705_s16   ;;  %s27_s18 = sadd.s32 1, %s697_s14  ;;  %s705_s16 = sphi %s741_s16, %s15_s16   ;;  %s701_s15 = sphi %s739_s15, %s926_s15   ;;  %s697_s14 = sphi %s737_s14, %s925_s14   ;;  %s693_s13 = sphi %s735_s13, %s924_s13   ;;  %s689_s12 = sphi %s733_s12, %s923_s12   ;;  %s685_s11 = sphi %s731_s11, %s922_s11   ;;  %s681_s10 = sphi %s729_s10, %s921_s10   ;;  %s677_s9 = sphi %s727_s9, %s920_s9  }
   0x6   : > { %p28_p0 = scmp.ge.s32.totalorder %s27_s18, 32  ;;  %s34_s19 = sadd.s32 1, %s701_s15 }
   0x7   : > { %s71_s20 = sadd.s32 1, %s685_s11  ;;  %p78_p1 = scmp.ne.s32.totalorder %s685_s11, %s681_s10 }
   0x8   : > { %s928_s18 = smov (%p28_p0, %s27_s18), 0  ;;  %s930_s19 = smov (!%p28_p0, %s34_s19), %s701_s15 }
   0x9   : > { %s67_s21 = ssub.s32 %s697_s14, %s928_s18  ;;  %p79_p2 = scmp.eq.s32.totalorder %s705_s16, 0 }
   0xa   : > { %p36_p3 = scmp.ge.s32.totalorder %s930_s19, 2  ;;  %p84_p4 = scmp.ne.s32.totalorder %s681_s10, %s677_s9 }
   0xb   : > { %p778_p5 = por %p79_p2, %p78_p1  ;;  %p85_p6 = scmp.eq.s32.totalorder %s485_s17, 0 }
   0xc   : > { %s932_s19 = smov (%p36_p3, %s930_s19), 0  ;;  %p540_p8 = scmp.lt.s32.totalorder %s705_s16, 64 }
   0xd   : > { %p784_p7 = por %p85_p6, %p84_p4  ;;  %s66_s24 = ssub.s32 %s701_s15, %s932_s19 }
   0xe   : > { %s68_s25 = sor.u32 %s67_s21, %s66_s24  ;;  %s148_s26 = sand.u32 1, %s685_s11  }
   0xf   : > { %p69_p9 = scmp.eq.s32.totalorder %s68_s25, 0  ;;  %s489_s27 = sshll.u32 %s148_s26, 8 }
  0x10   : > { %s490_s28 = sshll.u32 %s697_s14, 1  ;;  %s491_s30 = sshll.u32 %s701_s15, 10 }
  0x11   : > { %s794_s29 = scalar_select %p69_p9, %s685_s11, %s71_s20  }
  0x12   : > { %s158_s3 = sadd.s32 %s491_s30, %s490_s28  ;;  %s152_s4 = scalar_lea.vmem [#allocation2], %s489_s27 }
  0x13   : > { %s161_s5 = sshll.u32 %s152_s4, 4  ;;  %s492_s6 = sshll.u32 %s158_s3, 7  ;;  %s797_s5 = int_to_ptr.vmem [resolvable:$true] %s161_s5 }
  0x14   : > { %s802_s9 = scalar_lea.hbm %s915_s1, %s492_s6  ;;  %p808_p10 = pnand %p540_p8, %p778_p5 }
  0x15   : > { %s812_s20 = scalar_lea.sflag [#allocation3], %s148_s26  ;;  %s609_s21 = scalar_lea.hbm %s802_s9, 4096 }
  0x16   : > { %p610_p11 = scmp.ne.s32.totalorder %s802_s9, %s609_s21  ;;  %p611_p12 = pneg %p808_p10 }
  0x17   : > { %s614_s25 = scalar_lea.hbm %s915_s1, 262144  ;;  %p615_p1 = scmp.lt.u32.totalorder %s802_s9, %s915_s1 }
  0x18   : > { %p612_p13 = pnand %p611_p12, %p610_p11  ;;  %p616_p2 = scmp.lt.u32.totalorder %s614_s25, %s609_s21 }
  0x19   : > { %p618_p4 = scmp.lt.u32.totalorder %s609_s21, %s802_s9 }
  0x1a   : > { %p613_p0 = pneg %p612_p13  ;;  %p617_p3 = por %p616_p2, %p615_p1 }
  0x1c   : > { %p619_p5 = por %p618_p4, %p617_p3 }
  0x1e   : > { %p620_p6 = pnand %p619_p5, %p613_p0 }
  0x20   : > { %623 = shalt.err (!%p620_p6)
}
  0x21   : > { %s624_s26 = scalar_lea.vmem %s797_s5, 4096  ;;  %s707_s30 = smov [#allocation2]  }
  0x22   : > { %p625_p8 = scmp.ne.s32.totalorder %s797_s5, %s624_s26  ;;  %s629_s3 = sshll.u32 %s707_s30, 4  ;;  %s630_s3 = int_to_ptr.vmem [resolvable:$false] %s629_s3 }
  0x23   : > { %s631_s4 = scalar_lea.vmem %s630_s3, 8192  ;;  %p632_p13 = scmp.lt.s32.totalorder %s797_s5, %s630_s3 }
  0x24   : > { %p627_p9 = pnand %p625_p8, %p611_p12  ;;  %p633_p1 = scmp.lt.s32.totalorder %s631_s4, %s624_s26 }
  0x26   : > { %p628_p11 = pneg %p627_p9  ;;  %p634_p2 = por %p633_p1, %p632_p13 }
  0x28   : > { %p635_p3 = pnand %p634_p2, %p628_p11 }
  0x2a   : > { %638 = shalt.err (!%p635_p3)
}
  0x2b   : > { %s708_s6 = smov 8192   ;;  %s709_s7 = smov 256  }
  0x2c   : > { %s710_s8 = smov 16   ;;  %p493_p12 = scmp.ge.s32.totalorder %s705_s16, 1 }
  0x2d   : > { %539 = dma.hbm_to_vmem [thread:$0]  (!%p808_p10), %s802_s9, 4096, %s797_s5, %s812_s20, %s708_s6, %s709_s7, %s710_s8  }
  0x2e   : > { %p169_p0 = scmp.lt.s32.totalorder %s705_s16, 65 }
  0x30   : > { %p170_p4 = pnand %p493_p12, %p169_p0 }
  0x31   : > { %s175_s21 = sand.u32 (!%p170_p4), 1, %s681_s10  }
  0x32   : > { %173 = sbr.rel (%p170_p4) target bundleno = 309 (0x135), region = 28  ;;  %s494_s22 = sshll.u32 (!%p170_p4), %s175_s21, 8 }
  0x33   : > { %s176_s24 = scalar_lea.sflag (!%p170_p4), [#allocation3], %s175_s21  ;;  %s843_s25 = scalar_lea.vmem (!%p170_p4), [#allocation2], %s494_s22 }
  0x39   : > { %672 = dma.done.wait (%p784_p7), %s176_s24, 4096  }
  0x3a   : > { %674 = vsyncadd (%p784_p7), %s176_s24, 4294963200  ;;  %v711_v0 = vmov 0.0   ;;  %v239_v1 = vld [vmem:[%s843_s25 + $0x8] sm:$0xff]  ;;  %v241_v2 = vld [vmem:[%s843_s25 + $0x18] sm:$0xff]  ;;  %p215_p7 = scmp.lt.s32.totalorder %s693_s13, 1  ;;  %s496_s20 = sshll.u32 %s689_s12, 1 }
  0x3b   : > { %334 = vmatprep.mubr.f32.mxu0 %v711_v0  ;;  %v238_v3 = vld [vmem:[%s843_s25] sm:$0xff]  ;;  %v502_v4 = vpack.c.bf16 %v241_v2, %v239_v1  ;;  %v240_v5 = vld [vmem:[%s843_s25 + $0x10] sm:$0xff]  ;;  %v243_v6 = vld [vmem:[%s843_s25 + $0x28] sm:$0xff]  ;;  %p228_p10 = scmp.lt.s32.totalorder %s496_s20, 63 }
  0x3c   : > { %v245_v7 = vld [vmem:[%s843_s25 + $0x38] sm:$0xff]  ;;  %v504_v8 = vpack.c.bf16 %v240_v5, %v238_v3  ;;  %v242_v10 = vld [vmem:[%s843_s25 + $0x20] sm:$0xff]  ;;  %v244_v11 = vld [vmem:[%s843_s25 + $0x30] sm:$0xff]  ;;  %s934_s13 = smov (!%p215_p7, %s693_s13), 1 }
  0x3d   : > { %v506_v9 = vpack.c.bf16 %v245_v7, %v243_v6  ;;  %v247_v12 = vld [vmem:[%s843_s25 + $0x48] sm:$0xff]  ;;  %503 = vmatprep.subr.bf16.mxu0 %v502_v4  ;;  %v249_v13 = vld [vmem:[%s843_s25 + $0x58] sm:$0xff]  ;;  %v508_v14 = vpack.c.bf16 %v244_v11, %v242_v10  ;;  %v246_v16 = vld [vmem:[%s843_s25 + $0x40] sm:$0xff]  ;;  %s495_s23 = sshll.u32 %s934_s13, 1  ;;  %s936_s20 = smov (!%p228_p10, %s496_s20), 63 }
  0x3e   : > { %505 = vmatpush1.bf16.msra.mxu0 %v504_v8  ;;  %v510_v15 = vpack.c.bf16 %v249_v13, %v247_v12  ;;  %v248_v17 = vld [vmem:[%s843_s25 + $0x50] sm:$0xff]  ;;  %v251_v18 = vld [vmem:[%s843_s25 + $0x68] sm:$0xff]  ;;  %v253_v19 = vld [vmem:[%s843_s25 + $0x78] sm:$0xff]  ;;  %s221_s17 = scalar_lea.vmem %s914_s0, %s495_s23  ;;  %s497_s27 = sshll.u32 %s934_s13, 6 }
  0x3f   : > { %507 = vmatprep.subr.bf16.mxu0 %v506_v9  ;;  %v512_v20 = vpack.c.bf16 %v248_v17, %v246_v16  ;;  %v514_v21 = vpack.c.bf16 %v253_v19, %v251_v18  ;;  %v250_v22 = vld [vmem:[%s843_s25 + $0x60] sm:$0xff]  ;;  %v252_v23 = vld [vmem:[%s843_s25 + $0x70] sm:$0xff]  ;;  %v255_v24 = vld [vmem:[%s843_s25 + $0x88] sm:$0xff]  ;;  %s233_s28 = sadd.s32 %s497_s27, %s936_s20 }
  0x40   : > { %v257_v25 = vld [vmem:[%s843_s25 + $0x98] sm:$0xff]  ;;  %v516_v26 = vpack.c.bf16 %v252_v23, %v250_v22  ;;  %v254_v28 = vld [vmem:[%s843_s25 + $0x80] sm:$0xff]  ;;  %v256_v29 = vld [vmem:[%s843_s25 + $0x90] sm:$0xff]  ;;  %s498_s26 = sshll.u32 %s233_s28, 1 }
  0x41   : > { %v518_v27 = vpack.c.bf16 %v257_v25, %v255_v24  ;;  %v259_v30 = vld [vmem:[%s843_s25 + $0xa8] sm:$0xff]  ;;  %v261_v31 = vld [vmem:[%s843_s25 + $0xb8] sm:$0xff]  ;;  %v520_v32 = vpack.c.bf16 %v256_v29, %v254_v28  ;;  %v258_v34 = vld [vmem:[%s843_s25 + $0xa0] sm:$0xff]  ;;  %s235_s4 = scalar_lea.vmem %s916_s2, %s498_s26 }
  0x42   : > { %509 = vmatpush1.bf16.msra.mxu0 %v508_v14  ;;  %v522_v33 = vpack.c.bf16 %v261_v31, %v259_v30  ;;  %v260_v35 = vld [vmem:[%s843_s25 + $0xb0] sm:$0xff]  ;;  %v263_v36 = vld [vmem:[%s843_s25 + $0xc8] sm:$0xff]  ;;  %v265_v37 = vld [vmem:[%s843_s25 + $0xd8] sm:$0xff] }
  0x43   : > { %511 = vmatprep.subr.bf16.mxu0 %v510_v15  ;;  %v524_v38 = vpack.c.bf16 %v260_v35, %v258_v34  ;;  %v526_v39 = vpack.c.bf16 %v265_v37, %v263_v36  ;;  %v262_v40 = vld [vmem:[%s843_s25 + $0xc0] sm:$0xff]  ;;  %v264_v41 = vld [vmem:[%s843_s25 + $0xd0] sm:$0xff]  ;;  %v267_v42 = vld [vmem:[%s843_s25 + $0xe8] sm:$0xff] }
  0x44   : > { %v269_v43 = vld [vmem:[%s843_s25 + $0xf8] sm:$0xff]  ;;  %v528_v44 = vpack.c.bf16 %v264_v41, %v262_v40  ;;  %v266_v46 = vld [vmem:[%s843_s25 + $0xe0] sm:$0xff]  ;;  %v268_v47 = vld [vmem:[%s843_s25 + $0xf0] sm:$0xff] }
  0x45   : > { %v530_v45 = vpack.c.bf16 %v269_v43, %v267_v42  ;;  %v532_v48 = vpack.c.bf16 %v268_v47, %v266_v46  ;;  %v237_v49 = vld [vmem:[%s221_s17] sm:$0x3] }
  0x46   : > { %513 = vmatpush1.bf16.msra.mxu0 %v512_v20 }
  0x47   : > { %515 = vmatprep.subr.bf16.mxu0 %v514_v21 }
  0x4a   : > { %517 = vmatpush1.bf16.msra.mxu0 %v516_v26 }
  0x4b   : > { %519 = vmatprep.subr.bf16.mxu0 %v518_v27 }
  0x4e   : > { %521 = vmatpush1.bf16.msra.mxu0 %v520_v32 }
  0x4f   : > { %523 = vmatprep.subr.bf16.mxu0 %v522_v33 }
  0x52   : > { %525 = vmatpush1.bf16.msra.mxu0 %v524_v38 }
  0x53   : > { %527 = vmatprep.subr.bf16.mxu0 %v526_v39 }
  0x56   : > { %529 = vmatpush1.bf16.msra.mxu0 %v528_v44 }
  0x57   : > { %531 = vmatprep.subr.bf16.mxu0 %v530_v45 }
  0x5a   : > { %533 = vmatpush1.bf16.msra.mxu0 %v532_v48 }
  0x5d   : > { %335 = vmatmul.mubr.f32.vlgmr.msra.gmra.mrb[0].mxu0 %v237_v49 }
 0x130   : > { %v336_v50 = vpop.f32.mrb[0].mxu0 }
 0x131   : > { %v338_v51 = vpop.f32.mrb[1].mxu0 }
 0x132   : > { %v343_v52 = vcombine.low %v336_v50, %v338_v51 }
 0x134   : > { %499 = vst.sshfl [vmem:[%s235_s4] sm:$0x33 pattern:$0x76325410] %v343_v52 }
 0x135 PF: > { %s15_s16 = sadd.s32 1, %s705_s16   ;;  %s920_s9 = smov %s681_s10 }
 0x136   : > { %p12_p5 = scmp.ge.s32.totalorder %s15_s16, 66   ;;  %s921_s10 = smov %s685_s11 }
 0x137   : > { %s922_s11 = smov %s794_s29  ;;  %s923_s12 = smov %s697_s14 }
 0x138   : > { %s924_s13 = smov %s701_s15  ;;  %s925_s14 = smov %s928_s18 }
 0x139   : > { %s926_s15 = smov %s932_s19  ;;  %14 = sbr.rel (!%p12_p5) target bundleno = 5 (0x5), region = 71 }
 0x140   :  { %391 = vsyncpa [#allocation3], 1 }
 0x141   :  { %393 = vsyncpa [#allocation3 + $0x1], 1 }

// kernel: generator_forward.14
= control target key start
LH: loop header
LB: loop body
LE: loop exit
PB: predicated region body
PF: predicated region fallthrough
CT: control target
= control target key end

     0   :  { %s525_s9 = smov 0   ;;  %s527_s10 = smov 0   ;;  %s615_s0 = inlined_call_operand.vmem [shape: f32[32,1024], index: 0, kind: input, shape index: {}]   ;;  %s616_s1 = inlined_call_operand.vmem [shape: f32[1,1024], index: 1, kind: output, shape index: {0}]   ;;  %s617_s2 = inlined_call_operand.vmem [shape: f32[1,1024], index: 2, kind: output, shape index: {1}]  }
   0x1   :  { %s529_s11 = smov 0   ;;  %s531_s12 = smov 0  }
   0x2   :  { %s533_s13 = smov 0  }
   0x3 LB: > { %s25_s14 = sadd.s32 1, %s502_s12  ;;  %p41_p1 = scmp.ne.s32.totalorder %s494_s10, %s490_s9  ;;  %s506_s13 = sphi %s533_s13, %s13_s13   ;;  %s502_s12 = sphi %s531_s12, %s623_s12   ;;  %s498_s11 = sphi %s529_s11, %s622_s11   ;;  %s494_s10 = sphi %s527_s10, %s621_s10   ;;  %s490_s9 = sphi %s525_s9, %s620_s9  }
   0x4   : > { %p27_p0 = scmp.ge.s32.totalorder %s25_s14, 4  ;;  %p42_p2 = scmp.eq.s32.totalorder %s506_s13, 0 }
   0x5   : > { %s34_s16 = sadd.s32 1, %s494_s10  ;;  %p415_p5 = scmp.ge.s32.totalorder %s506_s13, 4 }
   0x6   : > { %s625_s14 = smov (%p27_p0, %s25_s14), 0  ;;  %p43_p3 = por %p42_p2, %p41_p1 }
   0x7   : > { %s30_s15 = ssub.s32 %s502_s12, %s625_s14  ;;  %119 = sbr.rel (%p415_p5) target bundleno = 22 (0x16), region = 16 }
   0x8   : > { %p32_p4 = scmp.eq.s32.totalorder %s30_s15, 0 }
   0xa   : > { %s560_s17 = scalar_select %p32_p4, %s494_s10, %s34_s16  }
   0xe   : > { %122 = sbr.rel (!%p43_p3) target bundleno = 22 (0x16), region = 20  ;;  %s124_s18 = sand.u32 (%p43_p3), 1, %s494_s10  }
   0xf   : > { %s425_s19 = sshll.u32 (%p43_p3), %s502_s12, 4  ;;  %s416_s20 = sshll.u32 (%p43_p3), %s124_s18, 6 }
  0x10   : > { %s132_s23 = scalar_lea.vmem (%p43_p3), %s615_s0, %s425_s19  ;;  %s126_s24 = scalar_lea.vmem (%p43_p3), [#allocation2], %s416_s20 }
  0x11   : > { %v145_v0 = vld [vmem:[%s132_s23] sm:$0xff] (%p43_p3)  ;;  %v147_v1 = vld [vmem:[%s132_s23 + $0x8] sm:$0xff] (%p43_p3) }
  0x12   : > { %v149_v2 = vld [vmem:[%s132_s23 + $0x40] sm:$0xff] (%p43_p3)  ;;  %146 = vst [vmem:[%s126_s24] sm:$0xff] (%p43_p3), %v145_v0  ;;  %148 = vst [vmem:[%s126_s24 + $0x8] sm:$0xff] (%p43_p3), %v147_v1  ;;  %v151_v3 = vld [vmem:[%s132_s23 + $0x48] sm:$0xff] (%p43_p3) }
  0x13   : > { %150 = vst [vmem:[%s126_s24 + $0x10] sm:$0xff] (%p43_p3), %v149_v2  ;;  %v153_v4 = vld [vmem:[%s132_s23 + $0x80] sm:$0xff] (%p43_p3)  ;;  %v155_v5 = vld [vmem:[%s132_s23 + $0x88] sm:$0xff] (%p43_p3)  ;;  %152 = vst [vmem:[%s126_s24 + $0x18] sm:$0xff] (%p43_p3), %v151_v3 }
  0x14   : > { %154 = vst [vmem:[%s126_s24 + $0x20] sm:$0xff] (%p43_p3), %v153_v4  ;;  %156 = vst [vmem:[%s126_s24 + $0x28] sm:$0xff] (%p43_p3), %v155_v5  ;;  %v157_v6 = vld [vmem:[%s132_s23 + $0xc0] sm:$0xff] (%p43_p3)  ;;  %v159_v7 = vld [vmem:[%s132_s23 + $0xc8] sm:$0xff] (%p43_p3) }
  0x15   : > { %158 = vst [vmem:[%s126_s24 + $0x30] sm:$0xff] %v157_v6  ;;  %160 = vst [vmem:[%s126_s24 + $0x38] sm:$0xff] %v159_v7 }
  0x16 PF: > { %p419_p6 = scmp.ge.s32.totalorder %s506_s13, 1  ;;  %p165_p7 = scmp.lt.s32.totalorder %s506_s13, 5 }
  0x18   : > { %p166_p8 = pnand %p419_p6, %p165_p7 }
  0x19   : > { %s172_s25 = sand.u32 (!%p166_p8), 1, %s490_s9   ;;  %s421_s26 = sshll.u32 (!%p166_p8), %s498_s11, 1  ;;  %v212_v8 = vlaneseq (!%p166_p8)  ;;  %v508_v25 = vmov (!%p166_p8), 0.0   ;;  %v509_v43 = vmov (!%p166_p8), 1966171168  }
  0x1a   : > { %169 = sbr.rel (%p166_p8) target bundleno = 59 (0x3b), region = 43  ;;  %s420_s27 = sshll.u32 (!%p166_p8), %s172_s25, 6  ;;  %v249_v44 = vunpack.c.l.s4 (!%p166_p8), %v509_v43 }
  0x1b   : > { %p199_p9 = scmp.lt.s32.totalorder (!%p166_p8), %s421_s26, 7  ;;  %vm572_vm0 = vcmp.lt.s32.totalorder (!%p166_p8), %v212_v8, 256  ;;  %s174_s28 = scalar_lea.vmem (!%p166_p8), [#allocation2], %s420_s27  ;;  %v252_v52 = vshrl.u32 (!%p166_p8), %v212_v8, 7 }
  0x1c   : > { %v218_v10 = vld [vmem:[%s174_s28] sm:$0xff] (!%p166_p8)  ;;  %v219_v11 = vld [vmem:[%s174_s28 + $0x8] sm:$0xff] (!%p166_p8)  ;;  %v220_v12 = vld [vmem:[%s174_s28 + $0x10] sm:$0xff] (!%p166_p8)  ;;  %v250_v54 = vunpack.c.0.s8 (!%p166_p8), %v249_v44 }
  0x1d   : > { %v221_v13 = vld [vmem:[%s174_s28 + $0x18] sm:$0xff] (!%p166_p8)  ;;  %v222_v14 = vld [vmem:[%s174_s28 + $0x20] sm:$0xff] (!%p166_p8)  ;;  %v223_v15 = vld [vmem:[%s174_s28 + $0x28] sm:$0xff] (!%p166_p8)  ;;  %v227_v16 = vadd.f32 (!%p166_p8), %v220_v12, %v218_v10  ;;  %v270_v17 = vmul.f32 (!%p166_p8), %v218_v10, %v218_v10  ;;  %v271_v18 = vmul.f32 (!%p166_p8), %v219_v11, %v219_v11  ;;  %v272_v19 = vmul.f32 (!%p166_p8), %v220_v12, %v220_v12 }
  0x1e   : > { %v224_v20 = vld [vmem:[%s174_s28 + $0x30] sm:$0xff] (!%p166_p8)  ;;  %v225_v21 = vld [vmem:[%s174_s28 + $0x38] sm:$0xff] (!%p166_p8)  ;;  %v236_v22 = vadd.f32 (!%p166_p8), %v221_v13, %v219_v11  ;;  %v273_v23 = vmul.f32 (!%p166_p8), %v221_v13, %v221_v13  ;;  %v274_v24 = vmul.f32 (!%p166_p8), %v222_v14, %v222_v14  ;;  %v275_v27 = vmul.f32 (!%p166_p8), %v223_v15, %v223_v15 }
  0x1f   : > { %v228_v26 = vadd.f32 (!%p166_p8), %v227_v16, %v222_v14  ;;  %v276_v28 = vmul.f32 (!%p166_p8), %v224_v20, %v224_v20  ;;  %v277_v30 = vmul.f32 (!%p166_p8), %v225_v21, %v225_v21  ;;  %v278_v31 = vadd.f32 (!%p166_p8), %v272_v19, %v270_v17 }
  0x20   : > { %v237_v29 = vadd.f32 (!%p166_p8), %v236_v22, %v223_v15  ;;  %v287_v32 = vadd.f32 (!%p166_p8), %v273_v23, %v271_v18  ;;  %v253_v63 = vsub.s32 (!%p166_p8), %v250_v54, %v252_v52 }
  0x21   : > { %s627_s26 = smov (!%p199_p9, %s421_s26), 7  ;;  %v229_v33 = vadd.f32 %v228_v26, %v224_v20  ;;  %v279_v35 = vadd.f32 %v278_v31, %v274_v24 }
  0x22   : > { %s579_s3 = scalar_lea.vmem %s616_s1, %s627_s26  ;;  %s584_s6 = scalar_lea.vmem %s617_s2, %s627_s26  ;;  %v238_v34 = vadd.f32 %v237_v29, %v225_v21  ;;  %v288_v36 = vadd.f32 %v287_v32, %v275_v27 }
  0x23   : > { %216 = vst.msk [vmem:[%s579_s3] sm:$0x3] %vm572_vm0, %v508_v25  ;;  %217 = vst.msk [vmem:[%s584_s6] sm:$0x3] %vm572_vm0, %v508_v25  ;;  %v230_v37 = vrot.slane %v229_v33, 4  ;;  %v280_v39 = vadd.f32 %v279_v35, %v276_v28 }
  0x24   : > { %v239_v38 = vrot.slane %v238_v34, 4  ;;  %v289_v40 = vadd.f32 %v288_v36, %v277_v30 }
  0x25   : > { %v231_v41 = vadd.f32 %v230_v37, %v229_v33  ;;  %v281_v45 = vrot.slane %v280_v39, 4 }
  0x26   : > { %v240_v42 = vadd.f32 %v239_v38, %v238_v34  ;;  %v290_v46 = vrot.slane %v289_v40, 4 }
  0x27   : > { %v232_v47 = vrot.slane %v231_v41, 2  ;;  %v282_v49 = vadd.f32 %v281_v45, %v280_v39 }
  0x28   : > { %v241_v48 = vrot.slane %v240_v42, 2  ;;  %v291_v50 = vadd.f32 %v290_v46, %v289_v40 }
  0x29   : > { %v233_v51 = vadd.f32 %v232_v47, %v231_v41  ;;  %v283_v55 = vrot.slane %v282_v49, 2 }
  0x2a   : > { %v242_v53 = vadd.f32 %v241_v48, %v240_v42  ;;  %v292_v56 = vrot.slane %v291_v50, 2  ;;  %v226_v7 = vld [vmem:[%s579_s3] sm:$0x3] }
  0x2b   : > { %v234_v57 = vrot.slane %v233_v51, 1  ;;  %v284_v59 = vadd.f32 %v283_v55, %v282_v49  ;;  %v269_v11 = vld [vmem:[%s584_s6] sm:$0x3] }
  0x2c   : > { %v243_v58 = vrot.slane %v242_v53, 1  ;;  %v293_v60 = vadd.f32 %v292_v56, %v291_v50 }
  0x2d   : > { %v235_v61 = vadd.f32 %v234_v57, %v233_v51  ;;  %v285_v0 = vrot.slane %v284_v59, 1 }
  0x2e   : > { %v244_v62 = vadd.f32 %v243_v58, %v242_v53  ;;  %v294_v1 = vrot.slane %v293_v60, 1 }
  0x2f   : > { %v286_v3 = vadd.f32 %v285_v0, %v284_v59 }
  0x30   : > { %v247_v2 = vcombine.low %v235_v61, %v244_v62  ;;  %v295_v4 = vadd.f32 %v294_v1, %v293_v60 }
  0x32   : > { %v254_v5 = vrot.slane %v247_v2, %v253_v63  ;;  %v298_v6 = vcombine.low %v286_v3, %v295_v4 }
  0x34   : > { %v261_v8 = vrot.slane %v254_v5, %v253_v63  ;;  %v305_v10 = vrot.slane %v298_v6, %v253_v63 }
  0x36   : > { %v263_v12 = vadd.f32 %v261_v8, %v226_v7  ;;  %v312_v13 = vrot.slane %v305_v10, %v253_v63 }
  0x38   : > { %268 = vst.msk [vmem:[%s579_s3] sm:$0x3] %vm572_vm0, %v263_v12  ;;  %v314_v14 = vadd.f32 %v312_v13, %v269_v11 }
  0x3a   : > { %315 = vst.msk [vmem:[%s584_s6] sm:$0x3] %vm572_vm0, %v314_v14 }
  0x3b PF: > { %s13_s13 = sadd.s32 1, %s506_s13   ;;  %s620_s9 = smov %s494_s10 }
  0x3c   : > { %p10_p10 = scmp.ge.s32.totalorder %s13_s13, 6   ;;  %s621_s10 = smov %s560_s17 }
  0x3d   : > { %s622_s11 = smov %s502_s12  ;;  %s623_s12 = smov %s625_s14 }
  0x3e   :  { %12 = sbr.rel (!%p10_p10) target bundleno = 3 (0x3), region = 98 }

// kernel: generator_forward.15
= control target key start
LH: loop header
LB: loop body
LE: loop exit
PB: predicated region body
PF: predicated region fallthrough
CT: control target
= control target key end

     0   :  { %s712_s18 = smov 0   ;;  %s714_s19 = smov 0   ;;  %s801_s0 = inlined_call_operand.vmem [shape: f32[32,1024], index: 0, kind: input, shape index: {}]   ;;  %s802_s1 = inlined_call_operand.vmem [shape: f32[1,1024], index: 1, kind: input, shape index: {}]   ;;  %s803_s2 = inlined_call_operand.vmem [shape: f32[1,1024], index: 2, kind: input, shape index: {}]   ;;  %s804_s3 = inlined_call_operand.vmem [shape: f32[1,1024], index: 3, kind: input, shape index: {}]   ;;  %s805_s4 = inlined_call_operand.vmem [shape: f32[1,1024], index: 4, kind: input, shape index: {}]   ;;  %s806_s5 = inlined_call_operand.vmem [shape: f32[32,1024], index: 5, kind: output, shape index: {}]  }
   0x1   :  { %s716_s20 = smov 0   ;;  %s718_s21 = smov 0  }
   0x2   :  { %s720_s22 = smov 0  }
   0x3 LB: > { %s24_s23 = sadd.s32 1, %s676_s21  ;;  %s579_s24 = sadd.s32 4294967295, %s680_s22   ;;  %s680_s22 = sphi %s720_s22, %s15_s22   ;;  %s676_s21 = sphi %s718_s21, %s811_s21   ;;  %s672_s20 = sphi %s716_s20, %s810_s20   ;;  %s668_s19 = sphi %s714_s19, %s809_s19   ;;  %s664_s18 = sphi %s712_s18, %s808_s18  }
   0x4   : > { %p25_p0 = scmp.ge.s32.totalorder %s24_s23, 4  ;;  %p43_p1 = scmp.ne.s32.totalorder %s668_s19, %s664_s18 }
   0x5   : > { %p44_p2 = scmp.eq.s32.totalorder %s680_s22, 0  ;;  %p179_p4 = scmp.eq.s32.totalorder %s579_s24, 3 }
   0x6   : > { %s813_s23 = smov (%p25_p0, %s24_s23), 0  ;;  %s36_s26 = sadd.s32 1, %s668_s19 }
   0x7   : > { %p45_p3 = por %p44_p2, %p43_p1  ;;  %s32_s25 = ssub.s32 %s676_s21, %s813_s23 }
   0x8   : > { %p34_p5 = scmp.eq.s32.totalorder %s32_s25, 0  ;;  %p747_p6 = por %p179_p4, %p43_p1 }
   0x9   : > { %p582_p7 = scmp.ge.s32.totalorder %s680_s22, 4 }
   0xa   : > { %s752_s28 = scalar_select %p34_p5, %s668_s19, %s36_s26  }
   0xb   : > { %201 = sbr.rel (%p582_p7) target bundleno = 26 (0x1a), region = 16 }
  0x12   : > { %204 = sbr.rel (!%p45_p3) target bundleno = 26 (0x1a), region = 20  ;;  %s206_s29 = sand.u32 (%p45_p3), 1, %s668_s19  }
  0x13   : > { %s598_s30 = sshll.u32 (%p45_p3), %s676_s21, 4  ;;  %s583_s6 = sshll.u32 (%p45_p3), %s206_s29, 6 }
  0x14   : > { %s214_s9 = scalar_lea.vmem (%p45_p3), %s801_s0, %s598_s30  ;;  %s208_s10 = scalar_lea.vmem (%p45_p3), [#allocation2], %s583_s6 }
  0x15   : > { %v227_v0 = vld [vmem:[%s214_s9] sm:$0xff] (%p45_p3)  ;;  %v229_v1 = vld [vmem:[%s214_s9 + $0x8] sm:$0xff] (%p45_p3) }
  0x16   : > { %v231_v2 = vld [vmem:[%s214_s9 + $0x40] sm:$0xff] (%p45_p3)  ;;  %228 = vst [vmem:[%s208_s10] sm:$0xff] (%p45_p3), %v227_v0  ;;  %230 = vst [vmem:[%s208_s10 + $0x8] sm:$0xff] (%p45_p3), %v229_v1  ;;  %v233_v3 = vld [vmem:[%s214_s9 + $0x48] sm:$0xff] (%p45_p3) }
  0x17   : > { %232 = vst [vmem:[%s208_s10 + $0x10] sm:$0xff] (%p45_p3), %v231_v2  ;;  %v235_v4 = vld [vmem:[%s214_s9 + $0x80] sm:$0xff] (%p45_p3)  ;;  %v237_v5 = vld [vmem:[%s214_s9 + $0x88] sm:$0xff] (%p45_p3)  ;;  %234 = vst [vmem:[%s208_s10 + $0x18] sm:$0xff] (%p45_p3), %v233_v3 }
  0x18   : > { %236 = vst [vmem:[%s208_s10 + $0x20] sm:$0xff] (%p45_p3), %v235_v4  ;;  %238 = vst [vmem:[%s208_s10 + $0x28] sm:$0xff] (%p45_p3), %v237_v5  ;;  %v239_v6 = vld [vmem:[%s214_s9 + $0xc0] sm:$0xff] (%p45_p3)  ;;  %v241_v7 = vld [vmem:[%s214_s9 + $0xc8] sm:$0xff] (%p45_p3) }
  0x19   : > { %240 = vst [vmem:[%s208_s10 + $0x30] sm:$0xff] %v239_v6  ;;  %242 = vst [vmem:[%s208_s10 + $0x38] sm:$0xff] %v241_v7 }
  0x1a PF: > { %p586_p8 = scmp.ge.s32.totalorder %s680_s22, 1  ;;  %p279_p9 = scmp.lt.s32.totalorder %s680_s22, 5 }
  0x1c   : > { %p280_p10 = pnand %p586_p8, %p279_p9 }
  0x1d   : > { %s589_s11 = sshll.u32 (!%p280_p10), %s672_s20, 1  ;;  %v375_v16 = vlaneseq (!%p280_p10)  ;;  %s286_s24 = sand.u32 (!%p280_p10), 1, %s664_s18  }
  0x1e   : > { %283 = sbr.rel (%p280_p10) target bundleno = 85 (0x55), region = 59  ;;  %p331_p11 = scmp.lt.s32.totalorder (!%p280_p10), %s589_s11, 7 }
  0x1f   : > { %s770_s25 = sshll.u32 (!%p280_p10), %s286_s24, 6  ;;  %v376_v17 = vshrl.u32 (!%p280_p10), %v375_v16, 7 }
  0x20   : > { %s288_s9 = scalar_lea.vmem (!%p280_p10), [#allocation2], %s770_s25  ;;  %s327_s18 = scalar_lea.vmem (!%p280_p10), [#allocation3], %s770_s25 }
  0x21   : > { %v377_v19 = vsub.s32 (!%p280_p10), 0, %v376_v17  ;;  %v381_v20 = vsub.s32 (!%p280_p10), 1, %v376_v17  ;;  %v366_v23 = vld [vmem:[%s288_s9] sm:$0xff] (!%p280_p10)  ;;  %v367_v24 = vld [vmem:[%s288_s9 + $0x8] sm:$0xff] (!%p280_p10)  ;;  %v368_v26 = vld [vmem:[%s288_s9 + $0x10] sm:$0xff] (!%p280_p10) }
  0x22   : > { %v369_v27 = vld [vmem:[%s288_s9 + $0x18] sm:$0xff] (!%p280_p10)  ;;  %v370_v31 = vld [vmem:[%s288_s9 + $0x20] sm:$0xff] (!%p280_p10)  ;;  %v371_v32 = vld [vmem:[%s288_s9 + $0x28] sm:$0xff] (!%p280_p10) }
  0x23   : > { %v372_v33 = vld [vmem:[%s288_s9 + $0x30] sm:$0xff] (!%p280_p10)  ;;  %v373_v34 = vld [vmem:[%s288_s9 + $0x38] sm:$0xff] (!%p280_p10) }
  0x25   : > { %s815_s11 = smov (!%p331_p11, %s589_s11), 7  ;;  %s599_s10 = sshll.u32 (%p747_p6), %s672_s20, 4 }
  0x26   : > { %s333_s14 = scalar_lea.vmem %s802_s1, %s815_s11  ;;  %s338_s17 = scalar_lea.vmem %s803_s2, %s815_s11 }
  0x27   : > { %v352_v8 = vld [vmem:[%s333_s14] sm:$0x3]  ;;  %s343_s30 = scalar_lea.vmem %s804_s3, %s815_s11  ;;  %s348_s8 = scalar_lea.vmem %s805_s4, %s815_s11 }
  0x28   : > { %v354_v9 = vld [vmem:[%s338_s17] sm:$0x3]  ;;  %v353_v10 = vmul.f32 0.03125, %v352_v8  ;;  %s440_s13 = scalar_lea.vmem (%p747_p6), %s806_s5, %s599_s10 }
  0x29   : > { %v355_v11 = vmul.f32 0.03125, %v354_v9  ;;  %v359_v18 = vld [vmem:[%s343_s30] sm:$0x3] }
  0x2a   : > { %v356_v12 = vmul.f32 %v353_v10, %v353_v10  ;;  %v363_v25 = vld [vmem:[%s348_s8] sm:$0x3] }
  0x2c   : > { %v357_v13 = vsub.f32 %v355_v11, %v356_v12 }
  0x2e   : > { %v358_v14 = vmax.f32 %v357_v13, 0.0 }
  0x30   : > { %v360_v15 = vadd.f32 1e-05, %v358_v14 }
  0x32   : > { %640 = vrsqrt.f32 %v360_v15 }
  0x3c   : > { %v641_v21 = vpop.eup %640 }
  0x3d   : > { %v362_v22 = vmul.f32 %v641_v21, %v359_v18 }
  0x3f   : > { %v364_v28 = vmul.f32 %v362_v22, %v353_v10  ;;  %v378_v29 = vrot.slane %v362_v22, %v377_v19  ;;  %v382_v30 = vrot.slane %v362_v22, %v381_v20 }
  0x41   : > { %v365_v35 = vsub.f32 %v363_v25, %v364_v28  ;;  %v385_v36 = vmul.f32 %v378_v29, %v366_v23  ;;  %v386_v37 = vmul.f32 %v382_v30, %v367_v24  ;;  %v387_v38 = vmul.f32 %v378_v29, %v368_v26 }
  0x42   : > { %v388_v39 = vmul.f32 %v382_v30, %v369_v27  ;;  %v389_v40 = vmul.f32 %v378_v29, %v370_v31  ;;  %v390_v41 = vmul.f32 %v382_v30, %v371_v32  ;;  %v391_v42 = vmul.f32 %v378_v29, %v372_v33 }
  0x43   : > { %v397_v43 = vrot.slane %v365_v35, %v377_v19  ;;  %v401_v44 = vrot.slane %v365_v35, %v381_v20  ;;  %v392_v45 = vmul.f32 %v382_v30, %v373_v34 }
  0x45   : > { %v404_v46 = vadd.f32 %v397_v43, %v385_v36  ;;  %v405_v47 = vadd.f32 %v401_v44, %v386_v37  ;;  %v406_v48 = vadd.f32 %v397_v43, %v387_v38  ;;  %v407_v49 = vadd.f32 %v401_v44, %v388_v39 }
  0x46   : > { %v408_v50 = vadd.f32 %v397_v43, %v389_v40  ;;  %v409_v51 = vadd.f32 %v401_v44, %v390_v41  ;;  %v410_v52 = vadd.f32 %v397_v43, %v391_v42  ;;  %v411_v53 = vadd.f32 %v401_v44, %v392_v45  ;;  %434 = sbr.rel (!%p747_p6) target bundleno = 85 (0x55), region = 67 }
  0x47   : > { %v412_v54 = vmax.f32 %v404_v46, 0.0  ;;  %v413_v55 = vmax.f32 %v405_v47, 0.0  ;;  %v414_v56 = vmax.f32 %v406_v48, 0.0  ;;  %v415_v57 = vmax.f32 %v407_v49, 0.0 }
  0x48   : > { %v416_v58 = vmax.f32 %v408_v50, 0.0  ;;  %v417_v59 = vmax.f32 %v409_v51, 0.0  ;;  %v418_v60 = vmax.f32 %v410_v52, 0.0  ;;  %v419_v61 = vmax.f32 %v411_v53, 0.0 }
  0x49   : > { %420 = vst [vmem:[%s327_s18] sm:$0xff] %v412_v54  ;;  %421 = vst [vmem:[%s327_s18 + $0x8] sm:$0xff] %v413_v55 }
  0x4a   : > { %422 = vst [vmem:[%s327_s18 + $0x10] sm:$0xff] %v414_v56  ;;  %423 = vst [vmem:[%s327_s18 + $0x18] sm:$0xff] %v415_v57 }
  0x4b   : > { %424 = vst [vmem:[%s327_s18 + $0x20] sm:$0xff] %v416_v58  ;;  %425 = vst [vmem:[%s327_s18 + $0x28] sm:$0xff] %v417_v59 }
  0x4c   : > { %426 = vst [vmem:[%s327_s18 + $0x30] sm:$0xff] %v418_v60  ;;  %427 = vst [vmem:[%s327_s18 + $0x38] sm:$0xff] %v419_v61 }
  0x50   : > { %v453_v62 = vld [vmem:[%s327_s18] sm:$0xff]  ;;  %v455_v63 = vld [vmem:[%s327_s18 + $0x8] sm:$0xff] }
  0x51   : > { %v457_v0 = vld [vmem:[%s327_s18 + $0x10] sm:$0xff]  ;;  %v459_v1 = vld [vmem:[%s327_s18 + $0x18] sm:$0xff]  ;;  %454 = vst [vmem:[%s440_s13] sm:$0xff] %v453_v62  ;;  %456 = vst [vmem:[%s440_s13 + $0x8] sm:$0xff] %v455_v63 }
  0x52   : > { %v461_v2 = vld [vmem:[%s327_s18 + $0x20] sm:$0xff]  ;;  %v463_v3 = vld [vmem:[%s327_s18 + $0x28] sm:$0xff]  ;;  %458 = vst [vmem:[%s440_s13 + $0x40] sm:$0xff] %v457_v0  ;;  %460 = vst [vmem:[%s440_s13 + $0x48] sm:$0xff] %v459_v1 }
  0x53   : > { %462 = vst [vmem:[%s440_s13 + $0x80] sm:$0xff] %v461_v2  ;;  %464 = vst [vmem:[%s440_s13 + $0x88] sm:$0xff] %v463_v3  ;;  %v465_v4 = vld [vmem:[%s327_s18 + $0x30] sm:$0xff]  ;;  %v467_v5 = vld [vmem:[%s327_s18 + $0x38] sm:$0xff] }
  0x54   : > { %466 = vst [vmem:[%s440_s13 + $0xc0] sm:$0xff] %v465_v4  ;;  %468 = vst [vmem:[%s440_s13 + $0xc8] sm:$0xff] %v467_v5 }
  0x55 PF: > { %s15_s22 = sadd.s32 1, %s680_s22   ;;  %s808_s18 = smov %s668_s19 }
  0x56   : > { %p12_p12 = scmp.ge.s32.totalorder %s15_s22, 6   ;;  %s809_s19 = smov %s752_s28 }
  0x57   : > { %s810_s20 = smov %s676_s21  ;;  %s811_s21 = smov %s813_s23 }
  0x58   :  { %14 = sbr.rel (!%p12_p12) target bundleno = 3 (0x3), region = 133 }

// kernel: generator_forward.17
= control target key start
LH: loop header
LB: loop body
LE: loop exit
PB: predicated region body
PF: predicated region fallthrough
CT: control target
= control target key end

     0   :  { %v14_v0 = vlaneseq  ;;  %v224_v7 = vmov 0.0   ;;  %s369_s0 = inlined_call_operand.vmem [shape: f32[128,256], index: 0, kind: input, shape index: {}]   ;;  %s370_s1 = inlined_call_operand.vmem [shape: f32[1,256], index: 1, kind: output, shape index: {0}]   ;;  %s371_s2 = inlined_call_operand.vmem [shape: f32[1,256], index: 2, kind: output, shape index: {1}]  }
   0x1   :  { %v20_v1 = vld [vmem:[%s369_s0] sm:$0xff]  ;;  %v22_v2 = vld [vmem:[%s369_s0 + $0x10] sm:$0xff]  ;;  %v21_v4 = vld [vmem:[%s369_s0 + $0x8] sm:$0xff] }
   0x2   :  { %vm248_vm0 = vcmp.lt.s32.totalorder %v14_v0, 256  ;;  %v23_v5 = vld [vmem:[%s369_s0 + $0x18] sm:$0xff]  ;;  %v53_v6 = vadd.f32 %v22_v2, %v20_v1  ;;  %v24_v8 = vld [vmem:[%s369_s0 + $0x20] sm:$0xff]  ;;  %v25_v10 = vld [vmem:[%s369_s0 + $0x28] sm:$0xff]  ;;  %v120_v22 = vmul.f32 %v20_v1, %v20_v1  ;;  %v121_v25 = vmul.f32 %v21_v4, %v21_v4 }
   0x3   :  { %18 = vst.msk [vmem:[%s370_s1] sm:$0x3] %vm248_vm0, %v224_v7  ;;  %v74_v9 = vadd.f32 %v23_v5, %v21_v4  ;;  %19 = vst.msk [vmem:[%s371_s2] sm:$0x3] %vm248_vm0, %v224_v7  ;;  %v26_v12 = vld [vmem:[%s369_s0 + $0x30] sm:$0xff]  ;;  %v27_v14 = vld [vmem:[%s369_s0 + $0x38] sm:$0xff]  ;;  %v122_v26 = vmul.f32 %v22_v2, %v22_v2  ;;  %v123_v27 = vmul.f32 %v23_v5, %v23_v5 }
   0x4   :  { %v54_v11 = vadd.f32 %v53_v6, %v24_v8  ;;  %v28_v16 = vld [vmem:[%s369_s0 + $0x40] sm:$0xff]  ;;  %v29_v18 = vld [vmem:[%s369_s0 + $0x48] sm:$0xff]  ;;  %v30_v20 = vld [vmem:[%s369_s0 + $0x50] sm:$0xff]  ;;  %v124_v32 = vmul.f32 %v24_v8, %v24_v8  ;;  %v125_v33 = vmul.f32 %v25_v10, %v25_v10  ;;  %v126_v36 = vmul.f32 %v26_v12, %v26_v12 }
   0x5   :  { %v75_v13 = vadd.f32 %v74_v9, %v25_v10  ;;  %v31_v23 = vld [vmem:[%s369_s0 + $0x58] sm:$0xff]  ;;  %v32_v28 = vld [vmem:[%s369_s0 + $0x60] sm:$0xff]  ;;  %v33_v30 = vld [vmem:[%s369_s0 + $0x68] sm:$0xff]  ;;  %v127_v39 = vmul.f32 %v27_v14, %v27_v14  ;;  %v152_v40 = vadd.f32 %v122_v26, %v120_v22  ;;  %v173_v41 = vadd.f32 %v123_v27, %v121_v25 }
   0x6   :  { %v55_v15 = vadd.f32 %v54_v11, %v26_v12  ;;  %v34_v34 = vld [vmem:[%s369_s0 + $0x70] sm:$0xff]  ;;  %v35_v37 = vld [vmem:[%s369_s0 + $0x78] sm:$0xff]  ;;  %v36_v42 = vld [vmem:[%s369_s0 + $0x80] sm:$0xff]  ;;  %v128_v44 = vmul.f32 %v28_v16, %v28_v16  ;;  %v129_v47 = vmul.f32 %v29_v18, %v29_v18  ;;  %v130_v52 = vmul.f32 %v30_v20, %v30_v20 }
   0x7   :  { %v76_v17 = vadd.f32 %v75_v13, %v27_v14  ;;  %v37_v45 = vld [vmem:[%s369_s0 + $0x88] sm:$0xff]  ;;  %v153_v48 = vadd.f32 %v152_v40, %v124_v32  ;;  %v174_v49 = vadd.f32 %v173_v41, %v125_v33  ;;  %v38_v50 = vld [vmem:[%s369_s0 + $0x90] sm:$0xff]  ;;  %v39_v53 = vld [vmem:[%s369_s0 + $0x98] sm:$0xff]  ;;  %v131_v55 = vmul.f32 %v31_v23, %v31_v23 }
   0x8   :  { %v56_v19 = vadd.f32 %v55_v15, %v28_v16  ;;  %v40_v58 = vld [vmem:[%s369_s0 + $0xa0] sm:$0xff]  ;;  %v132_v60 = vmul.f32 %v32_v28, %v32_v28  ;;  %v41_v61 = vld [vmem:[%s369_s0 + $0xa8] sm:$0xff]  ;;  %v133_v63 = vmul.f32 %v33_v30, %v33_v30  ;;  %v42_v4 = vld [vmem:[%s369_s0 + $0xb0] sm:$0xff]  ;;  %v134_v6 = vmul.f32 %v34_v34, %v34_v34 }
   0x9   :  { %v77_v21 = vadd.f32 %v76_v17, %v29_v18  ;;  %v154_v56 = vadd.f32 %v153_v48, %v126_v36  ;;  %v175_v57 = vadd.f32 %v174_v49, %v127_v39  ;;  %v43_v7 = vld [vmem:[%s369_s0 + $0xb8] sm:$0xff]  ;;  %v135_v9 = vmul.f32 %v35_v37, %v35_v37  ;;  %v44_v12 = vld [vmem:[%s369_s0 + $0xc0] sm:$0xff]  ;;  %v45_v15 = vld [vmem:[%s369_s0 + $0xc8] sm:$0xff] }
   0xa   :  { %v57_v24 = vadd.f32 %v56_v19, %v30_v20  ;;  %v136_v14 = vmul.f32 %v36_v42, %v36_v42  ;;  %v137_v17 = vmul.f32 %v37_v45, %v37_v45  ;;  %v46_v20 = vld [vmem:[%s369_s0 + $0xd0] sm:$0xff]  ;;  %v138_v22 = vmul.f32 %v38_v50, %v38_v50  ;;  %v51_v39 = vld [vmem:[%s369_s0 + $0xf8] sm:$0xff] }
   0xb   :  { %v78_v29 = vadd.f32 %v77_v21, %v31_v23  ;;  %v155_v1 = vadd.f32 %v154_v56, %v128_v44  ;;  %v176_v2 = vadd.f32 %v175_v57, %v129_v47  ;;  %v47_v23 = vld [vmem:[%s369_s0 + $0xd8] sm:$0xff]  ;;  %v139_v25 = vmul.f32 %v39_v53, %v39_v53  ;;  %v50_v36 = vld [vmem:[%s369_s0 + $0xf0] sm:$0xff] }
   0xc   :  { %v58_v31 = vadd.f32 %v57_v24, %v32_v28  ;;  %v48_v28 = vld [vmem:[%s369_s0 + $0xe0] sm:$0xff]  ;;  %v141_v33 = vmul.f32 %v41_v61, %v41_v61  ;;  %v143_v41 = vmul.f32 %v43_v7, %v43_v7  ;;  %v145_v47 = vmul.f32 %v45_v15, %v45_v15 }
   0xd   :  { %v79_v35 = vadd.f32 %v78_v29, %v33_v30  ;;  %v156_v10 = vadd.f32 %v155_v1, %v130_v52  ;;  %v177_v11 = vadd.f32 %v176_v2, %v131_v55  ;;  %v140_v30 = vmul.f32 %v40_v58, %v40_v58 }
   0xe   :  { %v59_v38 = vadd.f32 %v58_v31, %v34_v34  ;;  %v49_v31 = vld [vmem:[%s369_s0 + $0xe8] sm:$0xff]  ;;  %v225_v57 = vmov 1966171168   ;;  %v150_v2 = vmul.f32 %v50_v36, %v50_v36 }
   0xf   :  { %v80_v43 = vadd.f32 %v79_v35, %v35_v37  ;;  %v157_v18 = vadd.f32 %v156_v10, %v132_v60  ;;  %v178_v19 = vadd.f32 %v177_v11, %v133_v63  ;;  %v102_v10 = vshrl.u32 %v14_v0, 7 }
  0x10   :  { %v60_v46 = vadd.f32 %v59_v38, %v36_v42  ;;  %v142_v38 = vmul.f32 %v42_v4, %v42_v4 }
  0x11   :  { %v81_v51 = vadd.f32 %v80_v43, %v37_v45  ;;  %v158_v26 = vadd.f32 %v157_v18, %v134_v6  ;;  %v179_v27 = vadd.f32 %v178_v19, %v135_v9  ;;  %v144_v45 = vmul.f32 %v44_v12, %v44_v12 }
  0x12   :  { %v61_v54 = vadd.f32 %v60_v46, %v38_v50 }
  0x13   :  { %v82_v59 = vadd.f32 %v81_v51, %v39_v53  ;;  %v159_v34 = vadd.f32 %v158_v26, %v136_v14  ;;  %v180_v35 = vadd.f32 %v179_v27, %v137_v17  ;;  %v146_v51 = vmul.f32 %v46_v20, %v46_v20  ;;  %v52_v26 = vld [vmem:[%s370_s1] sm:$0x3] }
  0x14   :  { %v62_v62 = vadd.f32 %v61_v54, %v40_v58  ;;  %v147_v53 = vmul.f32 %v47_v23, %v47_v23  ;;  %v99_v58 = vunpack.c.l.s4 %v225_v57 }
  0x15   :  { %v83_v5 = vadd.f32 %v82_v59, %v41_v61  ;;  %v160_v42 = vadd.f32 %v159_v34, %v138_v22  ;;  %v181_v43 = vadd.f32 %v180_v35, %v139_v25  ;;  %v148_v59 = vmul.f32 %v48_v28, %v48_v28 }
  0x16   :  { %v63_v8 = vadd.f32 %v62_v62, %v42_v4  ;;  %v149_v61 = vmul.f32 %v49_v31, %v49_v31  ;;  %v100_v9 = vunpack.c.0.s8 %v99_v58 }
  0x17   :  { %v84_v13 = vadd.f32 %v83_v5, %v43_v7  ;;  %v161_v48 = vadd.f32 %v160_v42, %v140_v30  ;;  %v182_v49 = vadd.f32 %v181_v43, %v141_v33  ;;  %v151_v5 = vmul.f32 %v51_v39, %v51_v39 }
  0x18   :  { %v64_v16 = vadd.f32 %v63_v8, %v44_v12  ;;  %v103_v19 = vsub.s32 %v100_v9, %v102_v10 }
  0x19   :  { %v85_v21 = vadd.f32 %v84_v13, %v45_v15  ;;  %v162_v54 = vadd.f32 %v161_v48, %v142_v38  ;;  %v183_v55 = vadd.f32 %v182_v49, %v143_v41  ;;  %v119_v38 = vld [vmem:[%s371_s2] sm:$0x3] }
  0x1a   :  { %v65_v24 = vadd.f32 %v64_v16, %v46_v20 }
  0x1b   :  { %v86_v29 = vadd.f32 %v85_v21, %v47_v23  ;;  %v163_v62 = vadd.f32 %v162_v54, %v144_v45  ;;  %v184_v63 = vadd.f32 %v183_v55, %v145_v47 }
  0x1c   :  { %v66_v32 = vadd.f32 %v65_v24, %v48_v28 }
  0x1d   :  { %v87_v37 = vadd.f32 %v86_v29, %v49_v31  ;;  %v164_v6 = vadd.f32 %v163_v62, %v146_v51  ;;  %v185_v7 = vadd.f32 %v184_v63, %v147_v53 }
  0x1e   :  { %v67_v40 = vadd.f32 %v66_v32, %v50_v36 }
  0x1f   :  { %v88_v44 = vadd.f32 %v87_v37, %v51_v39  ;;  %v165_v12 = vadd.f32 %v164_v6, %v148_v59  ;;  %v186_v13 = vadd.f32 %v185_v7, %v149_v61 }
  0x20   :  { %v68_v46 = vrot.slane %v67_v40, 4 }
  0x21   :  { %v89_v50 = vrot.slane %v88_v44, 4  ;;  %v166_v16 = vadd.f32 %v165_v12, %v150_v2  ;;  %v187_v17 = vadd.f32 %v186_v13, %v151_v5 }
  0x22   :  { %v69_v52 = vadd.f32 %v68_v46, %v67_v40 }
  0x23   :  { %v90_v56 = vadd.f32 %v89_v50, %v88_v44  ;;  %v167_v20 = vrot.slane %v166_v16, 4  ;;  %v188_v21 = vrot.slane %v187_v17, 4 }
  0x24   :  { %v70_v60 = vrot.slane %v69_v52, 2 }
  0x25   :  { %v91_v1 = vrot.slane %v90_v56, 2  ;;  %v168_v23 = vadd.f32 %v167_v20, %v166_v16  ;;  %v189_v24 = vadd.f32 %v188_v21, %v187_v17 }
  0x26   :  { %v71_v4 = vadd.f32 %v70_v60, %v69_v52 }
  0x27   :  { %v92_v8 = vadd.f32 %v91_v1, %v90_v56  ;;  %v169_v0 = vrot.slane %v168_v23, 2  ;;  %v190_v27 = vrot.slane %v189_v24, 2 }
  0x28   :  { %v72_v11 = vrot.slane %v71_v4, 1 }
  0x29   :  { %v93_v14 = vrot.slane %v92_v8, 1  ;;  %v170_v29 = vadd.f32 %v169_v0, %v168_v23  ;;  %v191_v30 = vadd.f32 %v190_v27, %v189_v24 }
  0x2a   :  { %v73_v15 = vadd.f32 %v72_v11, %v71_v4 }
  0x2b   :  { %v94_v18 = vadd.f32 %v93_v14, %v92_v8  ;;  %v171_v32 = vrot.slane %v170_v29, 1  ;;  %v192_v33 = vrot.slane %v191_v30, 1 }
  0x2d   :  { %v97_v22 = vcombine.low %v73_v15, %v94_v18  ;;  %v172_v34 = vadd.f32 %v171_v32, %v170_v29  ;;  %v193_v35 = vadd.f32 %v192_v33, %v191_v30 }
  0x2f   :  { %v104_v25 = vrot.slane %v97_v22, %v103_v19  ;;  %v196_v36 = vcombine.low %v172_v34, %v193_v35 }
  0x31   :  { %v111_v28 = vrot.slane %v104_v25, %v103_v19  ;;  %v203_v37 = vrot.slane %v196_v36, %v103_v19 }
  0x33   :  { %v113_v31 = vadd.f32 %v111_v28, %v52_v26  ;;  %v210_v39 = vrot.slane %v203_v37, %v103_v19 }
  0x35   :  { %118 = vst.msk [vmem:[%s370_s1] sm:$0x3] %vm248_vm0, %v113_v31  ;;  %v212_v40 = vadd.f32 %v210_v39, %v119_v38 }
  0x37   :  { %213 = vst.msk [vmem:[%s371_s2] sm:$0x3] %vm248_vm0, %v212_v40 }

// kernel: generator_forward.18
= control target key start
LH: loop header
LB: loop body
LE: loop exit
PB: predicated region body
PF: predicated region fallthrough
CT: control target
= control target key end

     0   :  { %v67_v8 = vlaneseq  ;;  %s528_s1 = inlined_call_operand.vmem [shape: f32[1,256], index: 1, kind: input, shape index: {}]   ;;  %s529_s2 = inlined_call_operand.vmem [shape: f32[1,256], index: 2, kind: input, shape index: {}]   ;;  %s530_s3 = inlined_call_operand.vmem [shape: f32[1,256], index: 3, kind: input, shape index: {}]   ;;  %s531_s0 = inlined_call_operand.vmem [shape: f32[128,256], index: 0, kind: input, shape index: {}]   ;;  %s532_s4 = inlined_call_operand.vmem [shape: f32[1,256], index: 4, kind: input, shape index: {}]   ;;  %s533_s5 = inlined_call_operand.vmem [shape: f32[128,256], index: 5, kind: output, shape index: {}]  }
   0x1   :  { %v20_v0 = vld [vmem:[%s528_s1] sm:$0x3]  ;;  %v35_v17 = vld [vmem:[%s531_s0 + $0x8] sm:$0xff]  ;;  %v36_v18 = vld [vmem:[%s531_s0 + $0x10] sm:$0xff] }
   0x2   :  { %v22_v1 = vld [vmem:[%s529_s2] sm:$0x3]  ;;  %v21_v2 = vmul.f32 0.0078125, %v20_v0  ;;  %v68_v9 = vshrl.u32 %v67_v8, 7  ;;  %v37_v19 = vld [vmem:[%s531_s0 + $0x18] sm:$0xff]  ;;  %v39_v24 = vld [vmem:[%s531_s0 + $0x28] sm:$0xff] }
   0x3   :  { %v23_v3 = vmul.f32 0.0078125, %v22_v1  ;;  %v27_v10 = vld [vmem:[%s530_s3] sm:$0x3]  ;;  %v40_v25 = vld [vmem:[%s531_s0 + $0x30] sm:$0xff]  ;;  %v41_v26 = vld [vmem:[%s531_s0 + $0x38] sm:$0xff] }
   0x4   :  { %v24_v4 = vmul.f32 %v21_v2, %v21_v2  ;;  %v69_v11 = vsub.s32 0, %v68_v9  ;;  %v73_v12 = vsub.s32 1, %v68_v9  ;;  %v31_v15 = vld [vmem:[%s532_s4] sm:$0x3]  ;;  %v43_v28 = vld [vmem:[%s531_s0 + $0x48] sm:$0xff]  ;;  %v44_v33 = vld [vmem:[%s531_s0 + $0x50] sm:$0xff] }
   0x5   :  { %v34_v16 = vld [vmem:[%s531_s0] sm:$0xff]  ;;  %v45_v34 = vld [vmem:[%s531_s0 + $0x58] sm:$0xff]  ;;  %v47_v56 = vld [vmem:[%s531_s0 + $0x68] sm:$0xff] }
   0x6   :  { %v25_v5 = vsub.f32 %v23_v3, %v24_v4  ;;  %v38_v23 = vld [vmem:[%s531_s0 + $0x20] sm:$0xff]  ;;  %v48_v61 = vld [vmem:[%s531_s0 + $0x70] sm:$0xff]  ;;  %v49_v62 = vld [vmem:[%s531_s0 + $0x78] sm:$0xff] }
   0x7   :  { %v42_v27 = vld [vmem:[%s531_s0 + $0x40] sm:$0xff] }
   0x8   :  { %v26_v6 = vmax.f32 %v25_v5, 0.0  ;;  %v46_v35 = vld [vmem:[%s531_s0 + $0x60] sm:$0xff] }
   0xa   :  { %v28_v7 = vadd.f32 1e-05, %v26_v6 }
   0xc   :  { %220 = vrsqrt.f32 %v28_v7  ;;  %v50_v7 = vld [vmem:[%s531_s0 + $0x80] sm:$0xff] }
  0x16   :  { %v221_v13 = vpop.eup %220 }
  0x17   :  { %v30_v14 = vmul.f32 %v221_v13, %v27_v10  ;;  %v52_v13 = vld [vmem:[%s531_s0 + $0x90] sm:$0xff] }
  0x19   :  { %v32_v20 = vmul.f32 %v30_v14, %v21_v2  ;;  %v276_v21 = vrot.slane %v30_v14, %v69_v11  ;;  %v278_v22 = vrot.slane %v30_v14, %v73_v12  ;;  %v53_v14 = vld [vmem:[%s531_s0 + $0x98] sm:$0xff] }
  0x1b   :  { %v33_v29 = vsub.f32 %v31_v15, %v32_v20  ;;  %v77_v30 = vmul.f32 %v276_v21, %v34_v16  ;;  %v78_v31 = vmul.f32 %v278_v22, %v35_v17  ;;  %v79_v32 = vmul.f32 %v276_v21, %v36_v18 }
  0x1c   :  { %v80_v36 = vmul.f32 %v278_v22, %v37_v19  ;;  %v81_v37 = vmul.f32 %v276_v21, %v38_v23  ;;  %v82_v38 = vmul.f32 %v278_v22, %v39_v24  ;;  %v83_v39 = vmul.f32 %v276_v21, %v40_v25  ;;  %v54_v19 = vld [vmem:[%s531_s0 + $0xa0] sm:$0xff] }
  0x1d   :  { %v314_v40 = vrot.slane %v33_v29, %v69_v11  ;;  %v316_v41 = vrot.slane %v33_v29, %v73_v12  ;;  %v84_v42 = vmul.f32 %v278_v22, %v41_v26  ;;  %v85_v43 = vmul.f32 %v276_v21, %v42_v27  ;;  %v51_v12 = vld [vmem:[%s531_s0 + $0x88] sm:$0xff] }
  0x1e   :  { %v86_v44 = vmul.f32 %v278_v22, %v43_v28  ;;  %v87_v45 = vmul.f32 %v276_v21, %v44_v33  ;;  %v88_v46 = vmul.f32 %v278_v22, %v45_v34  ;;  %v89_v47 = vmul.f32 %v276_v21, %v46_v35 }
  0x1f   :  { %v120_v48 = vadd.f32 %v314_v40, %v77_v30  ;;  %v121_v49 = vadd.f32 %v316_v41, %v78_v31  ;;  %v122_v50 = vadd.f32 %v314_v40, %v79_v32  ;;  %v123_v51 = vadd.f32 %v316_v41, %v80_v36  ;;  %v55_v30 = vld [vmem:[%s531_s0 + $0xa8] sm:$0xff]  ;;  %v56_v31 = vld [vmem:[%s531_s0 + $0xb0] sm:$0xff]  ;;  %v57_v32 = vld [vmem:[%s531_s0 + $0xb8] sm:$0xff] }
  0x20   :  { %v124_v52 = vadd.f32 %v314_v40, %v81_v37  ;;  %v125_v53 = vadd.f32 %v316_v41, %v82_v38  ;;  %v126_v54 = vadd.f32 %v314_v40, %v83_v39  ;;  %v127_v55 = vadd.f32 %v316_v41, %v84_v42 }
  0x21   :  { %v152_v57 = vmax.f32 %v120_v48, 0.0  ;;  %v153_v58 = vmax.f32 %v121_v49, 0.0  ;;  %v154_v59 = vmax.f32 %v122_v50, 0.0  ;;  %v155_v60 = vmax.f32 %v123_v51, 0.0  ;;  %v59_v48 = vld [vmem:[%s531_s0 + $0xc8] sm:$0xff]  ;;  %v60_v49 = vld [vmem:[%s531_s0 + $0xd0] sm:$0xff] }
  0x22   :  { %v156_v63 = vmax.f32 %v124_v52, 0.0  ;;  %v157_v0 = vmax.f32 %v125_v53, 0.0  ;;  %v158_v1 = vmax.f32 %v126_v54, 0.0  ;;  %v159_v2 = vmax.f32 %v127_v55, 0.0  ;;  %v61_v50 = vld [vmem:[%s531_s0 + $0xd8] sm:$0xff]  ;;  %v62_v55 = vld [vmem:[%s531_s0 + $0xe0] sm:$0xff] }
  0x23   :  { %184 = vst [vmem:[%s533_s5] sm:$0xff] %v152_v57  ;;  %185 = vst [vmem:[%s533_s5 + $0x8] sm:$0xff] %v153_v58  ;;  %v128_v3 = vadd.f32 %v314_v40, %v85_v43  ;;  %v129_v4 = vadd.f32 %v316_v41, %v86_v44  ;;  %v130_v5 = vadd.f32 %v314_v40, %v87_v45  ;;  %v58_v43 = vld [vmem:[%s531_s0 + $0xc0] sm:$0xff] }
  0x24   :  { %186 = vst [vmem:[%s533_s5 + $0x10] sm:$0xff] %v154_v59  ;;  %187 = vst [vmem:[%s533_s5 + $0x18] sm:$0xff] %v155_v60  ;;  %v131_v6 = vadd.f32 %v316_v41, %v88_v46  ;;  %v132_v8 = vadd.f32 %v314_v40, %v89_v47  ;;  %v90_v9 = vmul.f32 %v278_v22, %v47_v56 }
  0x25   :  { %188 = vst [vmem:[%s533_s5 + $0x20] sm:$0xff] %v156_v63  ;;  %189 = vst [vmem:[%s533_s5 + $0x28] sm:$0xff] %v157_v0  ;;  %v91_v10 = vmul.f32 %v276_v21, %v48_v61  ;;  %v92_v11 = vmul.f32 %v278_v22, %v49_v62  ;;  %v160_v15 = vmax.f32 %v128_v3, 0.0  ;;  %v161_v16 = vmax.f32 %v129_v4, 0.0  ;;  %v63_v0 = vld [vmem:[%s531_s0 + $0xe8] sm:$0xff] }
  0x26   :  { %190 = vst [vmem:[%s533_s5 + $0x30] sm:$0xff] %v158_v1  ;;  %191 = vst [vmem:[%s533_s5 + $0x38] sm:$0xff] %v159_v2  ;;  %v162_v17 = vmax.f32 %v130_v5, 0.0  ;;  %v163_v18 = vmax.f32 %v131_v6, 0.0  ;;  %v164_v20 = vmax.f32 %v132_v8, 0.0  ;;  %v133_v23 = vadd.f32 %v316_v41, %v90_v9  ;;  %v64_v1 = vld [vmem:[%s531_s0 + $0xf0] sm:$0xff] }
  0x27   :  { %v134_v24 = vadd.f32 %v314_v40, %v91_v10  ;;  %v135_v25 = vadd.f32 %v316_v41, %v92_v11  ;;  %192 = vst [vmem:[%s533_s5 + $0x40] sm:$0xff] %v160_v15  ;;  %193 = vst [vmem:[%s533_s5 + $0x48] sm:$0xff] %v161_v16  ;;  %v93_v26 = vmul.f32 %v276_v21, %v50_v7  ;;  %v65_v2 = vld [vmem:[%s531_s0 + $0xf8] sm:$0xff] }
  0x28   :  { %194 = vst [vmem:[%s533_s5 + $0x50] sm:$0xff] %v162_v17  ;;  %195 = vst [vmem:[%s533_s5 + $0x58] sm:$0xff] %v163_v18  ;;  %v94_v27 = vmul.f32 %v278_v22, %v51_v12  ;;  %v95_v28 = vmul.f32 %v276_v21, %v52_v13  ;;  %v96_v29 = vmul.f32 %v278_v22, %v53_v14  ;;  %v165_v33 = vmax.f32 %v133_v23, 0.0 }
  0x29   :  { %196 = vst [vmem:[%s533_s5 + $0x60] sm:$0xff] %v164_v20  ;;  %v166_v34 = vmax.f32 %v134_v24, 0.0  ;;  %v167_v35 = vmax.f32 %v135_v25, 0.0  ;;  %v97_v36 = vmul.f32 %v276_v21, %v54_v19  ;;  %v136_v37 = vadd.f32 %v314_v40, %v93_v26 }
  0x2a   :  { %v137_v38 = vadd.f32 %v316_v41, %v94_v27  ;;  %v138_v39 = vadd.f32 %v314_v40, %v95_v28  ;;  %v139_v42 = vadd.f32 %v316_v41, %v96_v29  ;;  %197 = vst [vmem:[%s533_s5 + $0x68] sm:$0xff] %v165_v33  ;;  %v98_v45 = vmul.f32 %v278_v22, %v55_v30 }
  0x2b   :  { %198 = vst [vmem:[%s533_s5 + $0x70] sm:$0xff] %v166_v34  ;;  %199 = vst [vmem:[%s533_s5 + $0x78] sm:$0xff] %v167_v35  ;;  %v140_v44 = vadd.f32 %v314_v40, %v97_v36  ;;  %v99_v46 = vmul.f32 %v276_v21, %v56_v31  ;;  %v100_v47 = vmul.f32 %v278_v22, %v57_v32  ;;  %v168_v51 = vmax.f32 %v136_v37, 0.0 }
  0x2c   :  { %v169_v52 = vmax.f32 %v137_v38, 0.0  ;;  %v170_v53 = vmax.f32 %v138_v39, 0.0  ;;  %v171_v54 = vmax.f32 %v139_v42, 0.0  ;;  %v141_v57 = vadd.f32 %v316_v41, %v98_v45 }
  0x2d   :  { %v172_v56 = vmax.f32 %v140_v44, 0.0  ;;  %v142_v58 = vadd.f32 %v314_v40, %v99_v46  ;;  %v143_v59 = vadd.f32 %v316_v41, %v100_v47  ;;  %200 = vst [vmem:[%s533_s5 + $0x80] sm:$0xff] %v168_v51  ;;  %v101_v60 = vmul.f32 %v276_v21, %v58_v43 }
  0x2e   :  { %201 = vst [vmem:[%s533_s5 + $0x88] sm:$0xff] %v169_v52  ;;  %202 = vst [vmem:[%s533_s5 + $0x90] sm:$0xff] %v170_v53  ;;  %v102_v61 = vmul.f32 %v278_v22, %v59_v48  ;;  %v103_v62 = vmul.f32 %v276_v21, %v60_v49  ;;  %v104_v63 = vmul.f32 %v278_v22, %v61_v50  ;;  %v173_v3 = vmax.f32 %v141_v57, 0.0 }
  0x2f   :  { %203 = vst [vmem:[%s533_s5 + $0x98] sm:$0xff] %v171_v54  ;;  %204 = vst [vmem:[%s533_s5 + $0xa0] sm:$0xff] %v172_v56  ;;  %v174_v4 = vmax.f32 %v142_v58, 0.0  ;;  %v175_v5 = vmax.f32 %v143_v59, 0.0  ;;  %v105_v6 = vmul.f32 %v276_v21, %v62_v55  ;;  %v144_v7 = vadd.f32 %v314_v40, %v101_v60 }
  0x30   :  { %v145_v8 = vadd.f32 %v316_v41, %v102_v61  ;;  %v146_v9 = vadd.f32 %v314_v40, %v103_v62  ;;  %v147_v10 = vadd.f32 %v316_v41, %v104_v63  ;;  %205 = vst [vmem:[%s533_s5 + $0xa8] sm:$0xff] %v173_v3  ;;  %v106_v12 = vmul.f32 %v278_v22, %v63_v0 }
  0x31   :  { %206 = vst [vmem:[%s533_s5 + $0xb0] sm:$0xff] %v174_v4  ;;  %207 = vst [vmem:[%s533_s5 + $0xb8] sm:$0xff] %v175_v5  ;;  %v148_v11 = vadd.f32 %v314_v40, %v105_v6  ;;  %v107_v13 = vmul.f32 %v276_v21, %v64_v1  ;;  %v108_v14 = vmul.f32 %v278_v22, %v65_v2  ;;  %v176_v15 = vmax.f32 %v144_v7, 0.0 }
  0x32   :  { %v177_v16 = vmax.f32 %v145_v8, 0.0  ;;  %v178_v17 = vmax.f32 %v146_v9, 0.0  ;;  %v179_v18 = vmax.f32 %v147_v10, 0.0  ;;  %v149_v20 = vadd.f32 %v316_v41, %v106_v12 }
  0x33   :  { %v180_v19 = vmax.f32 %v148_v11, 0.0  ;;  %v150_v23 = vadd.f32 %v314_v40, %v107_v13  ;;  %v151_v24 = vadd.f32 %v316_v41, %v108_v14  ;;  %208 = vst [vmem:[%s533_s5 + $0xc0] sm:$0xff] %v176_v15 }
  0x34   :  { %209 = vst [vmem:[%s533_s5 + $0xc8] sm:$0xff] %v177_v16  ;;  %210 = vst [vmem:[%s533_s5 + $0xd0] sm:$0xff] %v178_v17  ;;  %v181_v21 = vmax.f32 %v149_v20, 0.0 }
  0x35   :  { %211 = vst [vmem:[%s533_s5 + $0xd8] sm:$0xff] %v179_v18  ;;  %212 = vst [vmem:[%s533_s5 + $0xe0] sm:$0xff] %v180_v19  ;;  %v182_v22 = vmax.f32 %v150_v23, 0.0  ;;  %v183_v40 = vmax.f32 %v151_v24, 0.0 }
  0x36   :  { %213 = vst [vmem:[%s533_s5 + $0xe8] sm:$0xff] %v181_v21 }
  0x37   :  { %214 = vst [vmem:[%s533_s5 + $0xf0] sm:$0xff] %v182_v22  ;;  %215 = vst [vmem:[%s533_s5 + $0xf8] sm:$0xff] %v183_v40 }

// kernel: generator_forward.16
= control target key start
LH: loop header
LB: loop body
LE: loop exit
PB: predicated region body
PF: predicated region fallthrough
CT: control target
= control target key end

     0   :  { %s4179_s9 = smov 0   ;;  %s4181_s10 = smov 0   ;;  %s5386_s0 = inlined_call_operand.vmem [shape: f32[4,32,4096], index: 0, kind: input, shape index: {}]   ;;  %s5387_s1 = inlined_call_operand.vmem [shape: f32[4,4096,256], index: 1, kind: input, shape index: {}]   ;;  %s5388_s2 = inlined_call_operand.vmem [shape: f32[4,32,256], index: 2, kind: output, shape index: {}]  }
   0x1   :  { %s4183_s11 = smov 0  }
   0x2 LB: > { %s31_s12 = sadd.s32 1, %s4158_s10  ;;  %p2960_p0 = scmp.ge.s32.totalorder %s4162_s11, 1  ;;  %s4162_s11 = sphi %s4183_s11, %s12_s11   ;;  %s4158_s10 = sphi %s4181_s10, %s5390_s10   ;;  %s4154_s9 = sphi %s4179_s9, %s5389_s9  }
   0x3   : > { %p33_p1 = scmp.ge.s32.totalorder %s31_s12, 4  ;;  %p160_p2 = scmp.lt.s32.totalorder %s4162_s11, 5 }
   0x5   : > { %s5392_s12 = smov (%p33_p1, %s31_s12), 0  ;;  %p161_p3 = pnand %p2960_p0, %p160_p2 }
   0x6   : > { %p206_p4 = scmp.lt.s32.totalorder (!%p161_p3), %s4154_s9, 3 }
   0x7   : > { %164 = sbr.rel (%p161_p3) target bundleno = 761 (0x2f9), region = 28 }
   0xe   : > { %s5394_s9 = smov (!%p206_p4, %s4154_s9), 3 }
   0xf   : > { %s2970_s13 = sshll.u32 %s5394_s9, 13  ;;  %s2969_s17 = sshll.u32 %s5394_s9, 10 }
  0x10   : > { %s4203_s16 = scalar_lea.vmem %s5387_s1, %s2970_s13  ;;  %s4301_s20 = scalar_lea.vmem %s5386_s0, %s2969_s17 }
  0x11   : > { %v371_v0 = vld [vmem:[%s4203_s16 + $0x8] sm:$0xff]  ;;  %v373_v1 = vld [vmem:[%s4203_s16 + $0x18] sm:$0xff]  ;;  %v370_v5 = vld [vmem:[%s4203_s16] sm:$0xff]  ;;  %s2971_s21 = sshll.u32 %s5394_s9, 6 }
  0x12   : > { %v883_v2 = vld [vmem:[%s4203_s16 + $0x1008] sm:$0xff]  ;;  %v2972_v3 = vpack.c.bf16 %v373_v1, %v371_v0  ;;  %v885_v4 = vld [vmem:[%s4203_s16 + $0x1018] sm:$0xff]  ;;  %v372_v6 = vld [vmem:[%s4203_s16 + $0x10] sm:$0xff]  ;;  %s5367_s24 = scalar_lea.vmem %s5388_s2, %s2971_s21 }
  0x13   : > { %v3484_v7 = vpack.c.bf16 %v885_v4, %v883_v2  ;;  %v2974_v8 = vpack.c.bf16 %v372_v6, %v370_v5  ;;  %v882_v9 = vld [vmem:[%s4203_s16 + $0x1000] sm:$0xff]  ;;  %v884_v10 = vld [vmem:[%s4203_s16 + $0x1010] sm:$0xff]  ;;  %v375_v11 = vld [vmem:[%s4203_s16 + $0x28] sm:$0xff] }
  0x14   : > { %2973 = vmatprep.subr.bf16.mxu1 %v2972_v3  ;;  %v3486_v12 = vpack.c.bf16 %v884_v10, %v882_v9  ;;  %v377_v13 = vld [vmem:[%s4203_s16 + $0x38] sm:$0xff]  ;;  %v887_v14 = vld [vmem:[%s4203_s16 + $0x1028] sm:$0xff]  ;;  %v374_v18 = vld [vmem:[%s4203_s16 + $0x20] sm:$0xff] }
  0x15   : > { %v889_v15 = vld [vmem:[%s4203_s16 + $0x1038] sm:$0xff]  ;;  %3485 = vmatprep.subr.bf16.mxu0 %v3484_v7  ;;  %2975 = vmatpush1.bf16.msra.mxu1 %v2974_v8  ;;  %v2976_v16 = vpack.c.bf16 %v377_v13, %v375_v11  ;;  %v376_v19 = vld [vmem:[%s4203_s16 + $0x30] sm:$0xff]  ;;  %v886_v20 = vld [vmem:[%s4203_s16 + $0x1020] sm:$0xff] }
  0x16   : > { %v3488_v17 = vpack.c.bf16 %v889_v15, %v887_v14  ;;  %3487 = vmatpush1.bf16.msra.mxu0 %v3486_v12  ;;  %v2978_v21 = vpack.c.bf16 %v376_v19, %v374_v18  ;;  %v888_v22 = vld [vmem:[%s4203_s16 + $0x1030] sm:$0xff]  ;;  %v379_v23 = vld [vmem:[%s4203_s16 + $0x48] sm:$0xff]  ;;  %v381_v24 = vld [vmem:[%s4203_s16 + $0x58] sm:$0xff] }
  0x17   : > { %2977 = vmatprep.subr.bf16.mxu1 %v2976_v16  ;;  %v3490_v25 = vpack.c.bf16 %v888_v22, %v886_v20  ;;  %v2980_v26 = vpack.c.bf16 %v381_v24, %v379_v23  ;;  %v891_v27 = vld [vmem:[%s4203_s16 + $0x1048] sm:$0xff]  ;;  %v893_v28 = vld [vmem:[%s4203_s16 + $0x1058] sm:$0xff]  ;;  %v378_v29 = vld [vmem:[%s4203_s16 + $0x40] sm:$0xff] }
  0x18   : > { %3489 = vmatprep.subr.bf16.mxu0 %v3488_v17  ;;  %v3492_v30 = vpack.c.bf16 %v893_v28, %v891_v27  ;;  %v380_v31 = vld [vmem:[%s4203_s16 + $0x50] sm:$0xff]  ;;  %v890_v32 = vld [vmem:[%s4203_s16 + $0x1040] sm:$0xff]  ;;  %v383_v35 = vld [vmem:[%s4203_s16 + $0x68] sm:$0xff] }
  0x19   : > { %v892_v33 = vld [vmem:[%s4203_s16 + $0x1050] sm:$0xff]  ;;  %2979 = vmatpush1.bf16.msra.mxu1 %v2978_v21  ;;  %v2982_v34 = vpack.c.bf16 %v380_v31, %v378_v29  ;;  %v385_v36 = vld [vmem:[%s4203_s16 + $0x78] sm:$0xff]  ;;  %v895_v37 = vld [vmem:[%s4203_s16 + $0x1068] sm:$0xff] }
  0x1a   : > { %3491 = vmatpush1.bf16.msra.mxu0 %v3490_v25  ;;  %2981 = vmatprep.subr.bf16.mxu1 %v2980_v26  ;;  %v3494_v38 = vpack.c.bf16 %v892_v33, %v890_v32  ;;  %v2984_v39 = vpack.c.bf16 %v385_v36, %v383_v35  ;;  %v897_v40 = vld [vmem:[%s4203_s16 + $0x1078] sm:$0xff]  ;;  %v382_v41 = vld [vmem:[%s4203_s16 + $0x60] sm:$0xff]  ;;  %v384_v42 = vld [vmem:[%s4203_s16 + $0x70] sm:$0xff] }
  0x1b   : > { %3493 = vmatprep.subr.bf16.mxu0 %v3492_v30  ;;  %v3496_v43 = vpack.c.bf16 %v897_v40, %v895_v37  ;;  %v894_v44 = vld [vmem:[%s4203_s16 + $0x1060] sm:$0xff]  ;;  %v896_v45 = vld [vmem:[%s4203_s16 + $0x1070] sm:$0xff]  ;;  %v387_v46 = vld [vmem:[%s4203_s16 + $0x88] sm:$0xff]  ;;  %v2986_v50 = vpack.c.bf16 %v384_v42, %v382_v41 }
  0x1c   : > { %v389_v47 = vld [vmem:[%s4203_s16 + $0x98] sm:$0xff]  ;;  %v899_v48 = vld [vmem:[%s4203_s16 + $0x1088] sm:$0xff]  ;;  %v3498_v51 = vpack.c.bf16 %v896_v45, %v894_v44  ;;  %v386_v53 = vld [vmem:[%s4203_s16 + $0x80] sm:$0xff] }
  0x1d   : > { %v901_v49 = vld [vmem:[%s4203_s16 + $0x1098] sm:$0xff]  ;;  %2983 = vmatpush1.bf16.msra.mxu1 %v2982_v34  ;;  %v2988_v52 = vpack.c.bf16 %v389_v47, %v387_v46  ;;  %v388_v54 = vld [vmem:[%s4203_s16 + $0x90] sm:$0xff]  ;;  %v898_v55 = vld [vmem:[%s4203_s16 + $0x1080] sm:$0xff] }
  0x1e   : > { %3495 = vmatpush1.bf16.msra.mxu0 %v3494_v38  ;;  %2985 = vmatprep.subr.bf16.mxu1 %v2984_v39  ;;  %v3500_v56 = vpack.c.bf16 %v901_v49, %v899_v48  ;;  %v900_v57 = vld [vmem:[%s4203_s16 + $0x1090] sm:$0xff]  ;;  %v391_v58 = vld [vmem:[%s4203_s16 + $0xa8] sm:$0xff]  ;;  %v393_v59 = vld [vmem:[%s4203_s16 + $0xb8] sm:$0xff]  ;;  %v2990_v62 = vpack.c.bf16 %v388_v54, %v386_v53 }
  0x1f   : > { %3497 = vmatprep.subr.bf16.mxu0 %v3496_v43  ;;  %v903_v60 = vld [vmem:[%s4203_s16 + $0x10a8] sm:$0xff]  ;;  %v905_v61 = vld [vmem:[%s4203_s16 + $0x10b8] sm:$0xff]  ;;  %v3502_v63 = vpack.c.bf16 %v900_v57, %v898_v55  ;;  %v2992_v0 = vpack.c.bf16 %v393_v59, %v391_v58  ;;  %v390_v1 = vld [vmem:[%s4203_s16 + $0xa0] sm:$0xff] }
  0x20   : > { %v392_v2 = vld [vmem:[%s4203_s16 + $0xb0] sm:$0xff]  ;;  %v902_v3 = vld [vmem:[%s4203_s16 + $0x10a0] sm:$0xff]  ;;  %v3504_v4 = vpack.c.bf16 %v905_v61, %v903_v60  ;;  %v395_v6 = vld [vmem:[%s4203_s16 + $0xc8] sm:$0xff] }
  0x21   : > { %2987 = vmatpush1.bf16.msra.mxu1 %v2986_v50  ;;  %v904_v5 = vld [vmem:[%s4203_s16 + $0x10b0] sm:$0xff]  ;;  %v397_v7 = vld [vmem:[%s4203_s16 + $0xd8] sm:$0xff]  ;;  %v907_v8 = vld [vmem:[%s4203_s16 + $0x10c8] sm:$0xff]  ;;  %v2994_v10 = vpack.c.bf16 %v392_v2, %v390_v1 }
  0x22   : > { %3499 = vmatpush1.bf16.msra.mxu0 %v3498_v51  ;;  %2989 = vmatprep.subr.bf16.mxu1 %v2988_v52  ;;  %v909_v9 = vld [vmem:[%s4203_s16 + $0x10d8] sm:$0xff]  ;;  %v3506_v11 = vpack.c.bf16 %v904_v5, %v902_v3  ;;  %v2996_v12 = vpack.c.bf16 %v397_v7, %v395_v6  ;;  %v394_v13 = vld [vmem:[%s4203_s16 + $0xc0] sm:$0xff]  ;;  %v396_v14 = vld [vmem:[%s4203_s16 + $0xd0] sm:$0xff] }
  0x23   : > { %3501 = vmatprep.subr.bf16.mxu0 %v3500_v56  ;;  %v906_v15 = vld [vmem:[%s4203_s16 + $0x10c0] sm:$0xff]  ;;  %v3508_v16 = vpack.c.bf16 %v909_v9, %v907_v8  ;;  %v908_v17 = vld [vmem:[%s4203_s16 + $0x10d0] sm:$0xff]  ;;  %v399_v18 = vld [vmem:[%s4203_s16 + $0xe8] sm:$0xff]  ;;  %v2998_v22 = vpack.c.bf16 %v396_v14, %v394_v13 }
  0x24   : > { %v401_v19 = vld [vmem:[%s4203_s16 + $0xf8] sm:$0xff]  ;;  %v911_v20 = vld [vmem:[%s4203_s16 + $0x10e8] sm:$0xff]  ;;  %v3510_v23 = vpack.c.bf16 %v908_v17, %v906_v15  ;;  %v398_v25 = vld [vmem:[%s4203_s16 + $0xe0] sm:$0xff] }
  0x25   : > { %2991 = vmatpush1.bf16.msra.mxu1 %v2990_v62  ;;  %v913_v21 = vld [vmem:[%s4203_s16 + $0x10f8] sm:$0xff]  ;;  %v3000_v24 = vpack.c.bf16 %v401_v19, %v399_v18  ;;  %v400_v26 = vld [vmem:[%s4203_s16 + $0xf0] sm:$0xff]  ;;  %v910_v27 = vld [vmem:[%s4203_s16 + $0x10e0] sm:$0xff] }
  0x26   : > { %3503 = vmatpush1.bf16.msra.mxu0 %v3502_v63  ;;  %2993 = vmatprep.subr.bf16.mxu1 %v2992_v0  ;;  %v3512_v28 = vpack.c.bf16 %v913_v21, %v911_v20  ;;  %v912_v29 = vld [vmem:[%s4203_s16 + $0x10f0] sm:$0xff]  ;;  %v403_v30 = vld [vmem:[%s4203_s16 + $0x108] sm:$0xff]  ;;  %v405_v31 = vld [vmem:[%s4203_s16 + $0x118] sm:$0xff]  ;;  %v3002_v34 = vpack.c.bf16 %v400_v26, %v398_v25 }
  0x27   : > { %3505 = vmatprep.subr.bf16.mxu0 %v3504_v4  ;;  %v915_v32 = vld [vmem:[%s4203_s16 + $0x1108] sm:$0xff]  ;;  %v917_v33 = vld [vmem:[%s4203_s16 + $0x1118] sm:$0xff]  ;;  %v3514_v35 = vpack.c.bf16 %v912_v29, %v910_v27  ;;  %v3004_v36 = vpack.c.bf16 %v405_v31, %v403_v30  ;;  %v402_v37 = vld [vmem:[%s4203_s16 + $0x100] sm:$0xff] }
  0x28   : > { %v404_v38 = vld [vmem:[%s4203_s16 + $0x110] sm:$0xff]  ;;  %v914_v39 = vld [vmem:[%s4203_s16 + $0x1100] sm:$0xff]  ;;  %v3516_v40 = vpack.c.bf16 %v917_v33, %v915_v32  ;;  %v407_v42 = vld [vmem:[%s4203_s16 + $0x128] sm:$0xff] }
  0x29   : > { %2995 = vmatpush1.bf16.msra.mxu1 %v2994_v10  ;;  %v916_v41 = vld [vmem:[%s4203_s16 + $0x1110] sm:$0xff]  ;;  %v409_v43 = vld [vmem:[%s4203_s16 + $0x138] sm:$0xff]  ;;  %v919_v44 = vld [vmem:[%s4203_s16 + $0x1128] sm:$0xff]  ;;  %v3006_v46 = vpack.c.bf16 %v404_v38, %v402_v37 }
  0x2a   : > { %3507 = vmatpush1.bf16.msra.mxu0 %v3506_v11  ;;  %2997 = vmatprep.subr.bf16.mxu1 %v2996_v12  ;;  %v921_v45 = vld [vmem:[%s4203_s16 + $0x1138] sm:$0xff]  ;;  %v3518_v47 = vpack.c.bf16 %v916_v41, %v914_v39  ;;  %v3008_v48 = vpack.c.bf16 %v409_v43, %v407_v42  ;;  %v406_v49 = vld [vmem:[%s4203_s16 + $0x120] sm:$0xff]  ;;  %v408_v50 = vld [vmem:[%s4203_s16 + $0x130] sm:$0xff] }
  0x2b   : > { %3509 = vmatprep.subr.bf16.mxu0 %v3508_v16  ;;  %v918_v51 = vld [vmem:[%s4203_s16 + $0x1120] sm:$0xff]  ;;  %v3520_v52 = vpack.c.bf16 %v921_v45, %v919_v44  ;;  %v920_v53 = vld [vmem:[%s4203_s16 + $0x1130] sm:$0xff]  ;;  %v411_v54 = vld [vmem:[%s4203_s16 + $0x148] sm:$0xff]  ;;  %v3010_v58 = vpack.c.bf16 %v408_v50, %v406_v49 }
  0x2c   : > { %v413_v55 = vld [vmem:[%s4203_s16 + $0x158] sm:$0xff]  ;;  %v923_v56 = vld [vmem:[%s4203_s16 + $0x1148] sm:$0xff]  ;;  %v3522_v59 = vpack.c.bf16 %v920_v53, %v918_v51  ;;  %v410_v61 = vld [vmem:[%s4203_s16 + $0x140] sm:$0xff] }
  0x2d   : > { %2999 = vmatpush1.bf16.msra.mxu1 %v2998_v22  ;;  %v925_v57 = vld [vmem:[%s4203_s16 + $0x1158] sm:$0xff]  ;;  %v3012_v60 = vpack.c.bf16 %v413_v55, %v411_v54  ;;  %v412_v62 = vld [vmem:[%s4203_s16 + $0x150] sm:$0xff]  ;;  %v922_v63 = vld [vmem:[%s4203_s16 + $0x1140] sm:$0xff] }
  0x2e   : > { %3511 = vmatpush1.bf16.msra.mxu0 %v3510_v23  ;;  %3001 = vmatprep.subr.bf16.mxu1 %v3000_v24  ;;  %v3524_v0 = vpack.c.bf16 %v925_v57, %v923_v56  ;;  %v924_v1 = vld [vmem:[%s4203_s16 + $0x1150] sm:$0xff]  ;;  %v415_v2 = vld [vmem:[%s4203_s16 + $0x168] sm:$0xff]  ;;  %v417_v3 = vld [vmem:[%s4203_s16 + $0x178] sm:$0xff]  ;;  %v3014_v6 = vpack.c.bf16 %v412_v62, %v410_v61 }
  0x2f   : > { %3513 = vmatprep.subr.bf16.mxu0 %v3512_v28  ;;  %v927_v4 = vld [vmem:[%s4203_s16 + $0x1168] sm:$0xff]  ;;  %v929_v5 = vld [vmem:[%s4203_s16 + $0x1178] sm:$0xff]  ;;  %v414_v7 = vld [vmem:[%s4203_s16 + $0x160] sm:$0xff]  ;;  %v3526_v8 = vpack.c.bf16 %v924_v1, %v922_v63  ;;  %v3016_v9 = vpack.c.bf16 %v417_v3, %v415_v2 }
  0x30   : > { %v416_v10 = vld [vmem:[%s4203_s16 + $0x170] sm:$0xff]  ;;  %v926_v11 = vld [vmem:[%s4203_s16 + $0x1160] sm:$0xff]  ;;  %v3528_v13 = vpack.c.bf16 %v929_v5, %v927_v4  ;;  %v419_v14 = vld [vmem:[%s4203_s16 + $0x188] sm:$0xff] }
  0x31   : > { %3003 = vmatpush1.bf16.msra.mxu1 %v3002_v34  ;;  %v928_v12 = vld [vmem:[%s4203_s16 + $0x1170] sm:$0xff]  ;;  %v421_v15 = vld [vmem:[%s4203_s16 + $0x198] sm:$0xff]  ;;  %v243_v16 = vld [vmem:[%s4301_s20 + $0x8] sm:$0xff]  ;;  %v3018_v20 = vpack.c.bf16 %v416_v10, %v414_v7 }
  0x32   : > { %3515 = vmatpush1.bf16.msra.mxu0 %v3514_v35  ;;  %3005 = vmatprep.subr.bf16.mxu1 %v3004_v36  ;;  %v931_v17 = vld [vmem:[%s4203_s16 + $0x1188] sm:$0xff]  ;;  %v933_v18 = vld [vmem:[%s4203_s16 + $0x1198] sm:$0xff]  ;;  %v3530_v21 = vpack.c.bf16 %v928_v12, %v926_v11  ;;  %v3020_v22 = vpack.c.bf16 %v421_v15, %v419_v14  ;;  %v418_v23 = vld [vmem:[%s4203_s16 + $0x180] sm:$0xff] }
  0x33   : > { %3517 = vmatprep.subr.bf16.mxu0 %v3516_v40  ;;  %1458 = vmatprep.mubr.f32.mxu1 %v243_v16  ;;  %v259_v19 = vld [vmem:[%s4301_s20 + $0x88] sm:$0xff]  ;;  %v420_v24 = vld [vmem:[%s4203_s16 + $0x190] sm:$0xff]  ;;  %v930_v25 = vld [vmem:[%s4203_s16 + $0x1180] sm:$0xff]  ;;  %v3532_v26 = vpack.c.bf16 %v933_v18, %v931_v17 }
  0x34   : > { %2170 = vmatprep.mubr.f32.mxu0 %v259_v19  ;;  %v932_v27 = vld [vmem:[%s4203_s16 + $0x1190] sm:$0xff]  ;;  %v423_v28 = vld [vmem:[%s4203_s16 + $0x1a8] sm:$0xff]  ;;  %v425_v29 = vld [vmem:[%s4203_s16 + $0x1b8] sm:$0xff]  ;;  %v3022_v32 = vpack.c.bf16 %v420_v24, %v418_v23 }
  0x35   : > { %3007 = vmatpush1.bf16.msra.mxu1 %v3006_v46  ;;  %v935_v30 = vld [vmem:[%s4203_s16 + $0x11a8] sm:$0xff]  ;;  %v937_v31 = vld [vmem:[%s4203_s16 + $0x11b8] sm:$0xff]  ;;  %v3534_v33 = vpack.c.bf16 %v932_v27, %v930_v25  ;;  %v3024_v34 = vpack.c.bf16 %v425_v29, %v423_v28  ;;  %v422_v35 = vld [vmem:[%s4203_s16 + $0x1a0] sm:$0xff] }
  0x36   : > { %3519 = vmatpush1.bf16.msra.mxu0 %v3518_v47  ;;  %3009 = vmatprep.subr.bf16.mxu1 %v3008_v48  ;;  %v424_v36 = vld [vmem:[%s4203_s16 + $0x1b0] sm:$0xff]  ;;  %v934_v37 = vld [vmem:[%s4203_s16 + $0x11a0] sm:$0xff]  ;;  %v3536_v38 = vpack.c.bf16 %v937_v31, %v935_v30  ;;  %v427_v40 = vld [vmem:[%s4203_s16 + $0x1c8] sm:$0xff] }
  0x37   : > { %3521 = vmatprep.subr.bf16.mxu0 %v3520_v52  ;;  %v936_v39 = vld [vmem:[%s4203_s16 + $0x11b0] sm:$0xff]  ;;  %v429_v41 = vld [vmem:[%s4203_s16 + $0x1d8] sm:$0xff]  ;;  %v939_v42 = vld [vmem:[%s4203_s16 + $0x11c8] sm:$0xff]  ;;  %v3026_v44 = vpack.c.bf16 %v424_v36, %v422_v35 }
  0x38   : > { %v941_v43 = vld [vmem:[%s4203_s16 + $0x11d8] sm:$0xff]  ;;  %v3538_v45 = vpack.c.bf16 %v936_v39, %v934_v37  ;;  %v3028_v46 = vpack.c.bf16 %v429_v41, %v427_v40  ;;  %v426_v47 = vld [vmem:[%s4203_s16 + $0x1c0] sm:$0xff]  ;;  %v428_v48 = vld [vmem:[%s4203_s16 + $0x1d0] sm:$0xff] }
  0x39   : > { %3011 = vmatpush1.bf16.msra.mxu1 %v3010_v58  ;;  %v938_v49 = vld [vmem:[%s4203_s16 + $0x11c0] sm:$0xff]  ;;  %v3540_v50 = vpack.c.bf16 %v941_v43, %v939_v42  ;;  %v940_v51 = vld [vmem:[%s4203_s16 + $0x11d0] sm:$0xff]  ;;  %v431_v52 = vld [vmem:[%s4203_s16 + $0x1e8] sm:$0xff]  ;;  %v3030_v56 = vpack.c.bf16 %v428_v48, %v426_v47 }
  0x3a   : > { %3523 = vmatpush1.bf16.msra.mxu0 %v3522_v59  ;;  %3013 = vmatprep.subr.bf16.mxu1 %v3012_v60  ;;  %v433_v53 = vld [vmem:[%s4203_s16 + $0x1f8] sm:$0xff]  ;;  %v943_v54 = vld [vmem:[%s4203_s16 + $0x11e8] sm:$0xff]  ;;  %v3542_v57 = vpack.c.bf16 %v940_v51, %v938_v49  ;;  %v430_v59 = vld [vmem:[%s4203_s16 + $0x1e0] sm:$0xff] }
  0x3b   : > { %3525 = vmatprep.subr.bf16.mxu0 %v3524_v0  ;;  %v945_v55 = vld [vmem:[%s4203_s16 + $0x11f8] sm:$0xff]  ;;  %v3032_v58 = vpack.c.bf16 %v433_v53, %v431_v52  ;;  %v432_v60 = vld [vmem:[%s4203_s16 + $0x1f0] sm:$0xff]  ;;  %v942_v61 = vld [vmem:[%s4203_s16 + $0x11e0] sm:$0xff] }
  0x3c   : > { %v3544_v62 = vpack.c.bf16 %v945_v55, %v943_v54  ;;  %v944_v63 = vld [vmem:[%s4203_s16 + $0x11f0] sm:$0xff]  ;;  %v435_v0 = vld [vmem:[%s4203_s16 + $0x208] sm:$0xff]  ;;  %v437_v1 = vld [vmem:[%s4203_s16 + $0x218] sm:$0xff]  ;;  %v3034_v4 = vpack.c.bf16 %v432_v60, %v430_v59 }
  0x3d   : > { %3015 = vmatpush1.bf16.msra.mxu1 %v3014_v6  ;;  %v947_v2 = vld [vmem:[%s4203_s16 + $0x1208] sm:$0xff]  ;;  %v949_v3 = vld [vmem:[%s4203_s16 + $0x1218] sm:$0xff]  ;;  %v3546_v5 = vpack.c.bf16 %v944_v63, %v942_v61  ;;  %v3036_v6 = vpack.c.bf16 %v437_v1, %v435_v0  ;;  %v434_v7 = vld [vmem:[%s4203_s16 + $0x200] sm:$0xff] }
  0x3e   : > { %3527 = vmatpush1.bf16.msra.mxu0 %v3526_v8  ;;  %3017 = vmatprep.subr.bf16.mxu1 %v3016_v9  ;;  %v436_v8 = vld [vmem:[%s4203_s16 + $0x210] sm:$0xff]  ;;  %v946_v9 = vld [vmem:[%s4203_s16 + $0x1200] sm:$0xff]  ;;  %v3548_v10 = vpack.c.bf16 %v949_v3, %v947_v2  ;;  %v439_v12 = vld [vmem:[%s4203_s16 + $0x228] sm:$0xff] }
  0x3f   : > { %3529 = vmatprep.subr.bf16.mxu0 %v3528_v13  ;;  %v948_v11 = vld [vmem:[%s4203_s16 + $0x1210] sm:$0xff]  ;;  %v441_v13 = vld [vmem:[%s4203_s16 + $0x238] sm:$0xff]  ;;  %v951_v14 = vld [vmem:[%s4203_s16 + $0x1228] sm:$0xff]  ;;  %v3038_v17 = vpack.c.bf16 %v436_v8, %v434_v7 }
  0x40   : > { %v953_v15 = vld [vmem:[%s4203_s16 + $0x1238] sm:$0xff]  ;;  %v242_v16 = vld [vmem:[%s4301_s20] sm:$0xff]  ;;  %v3550_v19 = vpack.c.bf16 %v948_v11, %v946_v9  ;;  %v952_v25 = vld [vmem:[%s4203_s16 + $0x1230] sm:$0xff] }
  0x41   : > { %3019 = vmatpush1.bf16.msra.mxu1 %v3018_v20  ;;  %v258_v18 = vld [vmem:[%s4301_s20 + $0x80] sm:$0xff]  ;;  %v3040_v20 = vpack.c.bf16 %v441_v13, %v439_v12  ;;  %v3552_v24 = vpack.c.bf16 %v953_v15, %v951_v14  ;;  %v445_v27 = vld [vmem:[%s4203_s16 + $0x258] sm:$0xff]  ;;  %v955_v28 = vld [vmem:[%s4203_s16 + $0x1248] sm:$0xff] }
  0x42   : > { %3531 = vmatpush1.bf16.msra.mxu0 %v3530_v21  ;;  %3021 = vmatprep.subr.bf16.mxu1 %v3020_v22  ;;  %v438_v21 = vld [vmem:[%s4203_s16 + $0x220] sm:$0xff]  ;;  %v440_v22 = vld [vmem:[%s4203_s16 + $0x230] sm:$0xff]  ;;  %v957_v29 = vld [vmem:[%s4203_s16 + $0x1258] sm:$0xff] }
  0x43   : > { %3533 = vmatprep.subr.bf16.mxu0 %v3532_v26  ;;  %v950_v23 = vld [vmem:[%s4203_s16 + $0x1220] sm:$0xff]  ;;  %v443_v26 = vld [vmem:[%s4203_s16 + $0x248] sm:$0xff]  ;;  %v3042_v30 = vpack.c.bf16 %v440_v22, %v438_v21  ;;  %v3556_v36 = vpack.c.bf16 %v957_v29, %v955_v28  ;;  %v956_v37 = vld [vmem:[%s4203_s16 + $0x1250] sm:$0xff] }
  0x44   : > { %v3554_v31 = vpack.c.bf16 %v952_v25, %v950_v23  ;;  %v954_v35 = vld [vmem:[%s4203_s16 + $0x1240] sm:$0xff]  ;;  %v449_v39 = vld [vmem:[%s4203_s16 + $0x278] sm:$0xff]  ;;  %v959_v40 = vld [vmem:[%s4203_s16 + $0x1268] sm:$0xff] }
  0x45   : > { %3023 = vmatpush1.bf16.msra.mxu1 %v3022_v32  ;;  %v3044_v32 = vpack.c.bf16 %v445_v27, %v443_v26  ;;  %v961_v41 = vld [vmem:[%s4203_s16 + $0x1278] sm:$0xff]  ;;  %v3558_v43 = vpack.c.bf16 %v956_v37, %v954_v35  ;;  %v958_v47 = vld [vmem:[%s4203_s16 + $0x1260] sm:$0xff]  ;;  %v960_v49 = vld [vmem:[%s4203_s16 + $0x1270] sm:$0xff] }
  0x46   : > { %3535 = vmatpush1.bf16.msra.mxu0 %v3534_v33  ;;  %3025 = vmatprep.subr.bf16.mxu1 %v3024_v34  ;;  %v442_v33 = vld [vmem:[%s4203_s16 + $0x240] sm:$0xff]  ;;  %v444_v34 = vld [vmem:[%s4203_s16 + $0x250] sm:$0xff]  ;;  %v3560_v48 = vpack.c.bf16 %v961_v41, %v959_v40  ;;  %v453_v51 = vld [vmem:[%s4203_s16 + $0x298] sm:$0xff] }
  0x47   : > { %3537 = vmatprep.subr.bf16.mxu0 %v3536_v38  ;;  %v447_v38 = vld [vmem:[%s4203_s16 + $0x268] sm:$0xff]  ;;  %v3046_v42 = vpack.c.bf16 %v444_v34, %v442_v33  ;;  %v965_v53 = vld [vmem:[%s4203_s16 + $0x1298] sm:$0xff]  ;;  %v450_v55 = vld [vmem:[%s4203_s16 + $0x280] sm:$0xff] }
  0x48   : > { %v963_v52 = vld [vmem:[%s4203_s16 + $0x1288] sm:$0xff]  ;;  %v962_v59 = vld [vmem:[%s4203_s16 + $0x1280] sm:$0xff]  ;;  %v964_v60 = vld [vmem:[%s4203_s16 + $0x1290] sm:$0xff] }
  0x49   : > { %3027 = vmatpush1.bf16.msra.mxu1 %v3026_v44  ;;  %v3048_v44 = vpack.c.bf16 %v449_v39, %v447_v38  ;;  %v3564_v61 = vpack.c.bf16 %v965_v53, %v963_v52  ;;  %v457_v63 = vld [vmem:[%s4203_s16 + $0x2b8] sm:$0xff]  ;;  %v275_v0 = vld [vmem:[%s4301_s20 + $0x108] sm:$0xff]  ;;  %v274_v7 = vld [vmem:[%s4301_s20 + $0x100] sm:$0xff]  ;;  %v3566_v8 = vpack.c.bf16 %v964_v60, %v962_v59 }
  0x4a   : > { %3539 = vmatpush1.bf16.msra.mxu0 %v3538_v45  ;;  %3029 = vmatprep.subr.bf16.mxu1 %v3028_v46  ;;  %v446_v45 = vld [vmem:[%s4203_s16 + $0x260] sm:$0xff]  ;;  %v448_v46 = vld [vmem:[%s4203_s16 + $0x270] sm:$0xff]  ;;  %v967_v1 = vld [vmem:[%s4203_s16 + $0x12a8] sm:$0xff] }
  0x4b   : > { %3541 = vmatprep.subr.bf16.mxu0 %v3540_v50  ;;  %v451_v50 = vld [vmem:[%s4203_s16 + $0x288] sm:$0xff]  ;;  %v3050_v54 = vpack.c.bf16 %v448_v46, %v446_v45  ;;  %v969_v2 = vld [vmem:[%s4203_s16 + $0x12b8] sm:$0xff]  ;;  %v968_v11 = vld [vmem:[%s4203_s16 + $0x12b0] sm:$0xff] }
  0x4c   : > { %v291_v3 = vld [vmem:[%s4301_s20 + $0x188] sm:$0xff]  ;;  %v290_v12 = vld [vmem:[%s4301_s20 + $0x180] sm:$0xff]  ;;  %v3568_v13 = vpack.c.bf16 %v969_v2, %v967_v1  ;;  %v461_v15 = vld [vmem:[%s4203_s16 + $0x2d8] sm:$0xff] }
  0x4d   : > { %3031 = vmatpush1.bf16.msra.mxu1 %v3030_v56  ;;  %v3562_v56 = vpack.c.bf16 %v960_v49, %v958_v47  ;;  %v459_v14 = vld [vmem:[%s4203_s16 + $0x2c8] sm:$0xff]  ;;  %v458_v21 = vld [vmem:[%s4203_s16 + $0x2c0] sm:$0xff]  ;;  %v460_v22 = vld [vmem:[%s4203_s16 + $0x2d0] sm:$0xff] }
  0x4e   : > { %3543 = vmatpush1.bf16.msra.mxu0 %v3542_v57  ;;  %3033 = vmatprep.subr.bf16.mxu1 %v3032_v58  ;;  %v3052_v57 = vpack.c.bf16 %v453_v51, %v451_v50  ;;  %v452_v58 = vld [vmem:[%s4203_s16 + $0x290] sm:$0xff]  ;;  %v306_v23 = vld [vmem:[%s4301_s20 + $0x200] sm:$0xff]  ;;  %v3060_v25 = vpack.c.bf16 %v461_v15, %v459_v14  ;;  %v975_v33 = vld [vmem:[%s4203_s16 + $0x12e8] sm:$0xff] }
  0x4f   : > { %3545 = vmatprep.subr.bf16.mxu0 %v3544_v62  ;;  %v455_v62 = vld [vmem:[%s4203_s16 + $0x2a8] sm:$0xff]  ;;  %v970_v26 = vld [vmem:[%s4203_s16 + $0x12c0] sm:$0xff]  ;;  %v972_v27 = vld [vmem:[%s4203_s16 + $0x12d0] sm:$0xff] }
  0x50   : > { %v3056_v9 = vpack.c.bf16 %v457_v63, %v455_v62  ;;  %v322_v28 = vld [vmem:[%s4301_s20 + $0x280] sm:$0xff]  ;;  %v977_v34 = vld [vmem:[%s4203_s16 + $0x12f8] sm:$0xff]  ;;  %v355_v35 = vld [vmem:[%s4301_s20 + $0x388] sm:$0xff]  ;;  %v3574_v40 = vpack.c.bf16 %v972_v27, %v970_v26 }
  0x51   : > { %3035 = vmatpush1.bf16.msra.mxu1 %v3034_v4  ;;  %v3054_v4 = vpack.c.bf16 %v452_v58, %v450_v55  ;;  %v462_v37 = vld [vmem:[%s4203_s16 + $0x2e0] sm:$0xff]  ;;  %v464_v38 = vld [vmem:[%s4203_s16 + $0x2f0] sm:$0xff]  ;;  %v3576_v45 = vpack.c.bf16 %v977_v34, %v975_v33  ;;  %v467_v46 = vld [vmem:[%s4203_s16 + $0x308] sm:$0xff] }
  0x52   : > { %3547 = vmatpush1.bf16.msra.mxu0 %v3546_v5  ;;  %3037 = vmatprep.subr.bf16.mxu1 %v3036_v6  ;;  %v454_v5 = vld [vmem:[%s4203_s16 + $0x2a0] sm:$0xff]  ;;  %v456_v6 = vld [vmem:[%s4203_s16 + $0x2b0] sm:$0xff]  ;;  %v469_v47 = vld [vmem:[%s4203_s16 + $0x318] sm:$0xff]  ;;  %v3066_v52 = vpack.c.bf16 %v464_v38, %v462_v37 }
  0x53   : > { %3549 = vmatprep.subr.bf16.mxu0 %v3548_v10  ;;  %v966_v10 = vld [vmem:[%s4203_s16 + $0x12a0] sm:$0xff]  ;;  %v979_v49 = vld [vmem:[%s4203_s16 + $0x1308] sm:$0xff]  ;;  %v981_v50 = vld [vmem:[%s4203_s16 + $0x1318] sm:$0xff] }
  0x54   : > { %1459 = vmatmul.mubr.f32.vlgmr.msra.gmra.mrb[0].mxu1 %v242_v16  ;;  %v307_v16 = vld [vmem:[%s4301_s20 + $0x208] sm:$0xff]  ;;  %v338_v39 = vld [vmem:[%s4301_s20 + $0x300] sm:$0xff]  ;;  %v261_v51 = vld [vmem:[%s4301_s20 + $0x98] sm:$0xff]  ;;  %v3580_v58 = vpack.c.bf16 %v981_v50, %v979_v49 }
  0x55   : > { %3039 = vmatpush1.bf16.msra.mxu1 %v3038_v17  ;;  %2171 = vmatmul.mubr.f32.vlgmr.msra.gmra.mrb[0].mxu0 %v258_v18  ;;  %v971_v17 = vld [vmem:[%s4203_s16 + $0x12c8] sm:$0xff]  ;;  %v973_v18 = vld [vmem:[%s4203_s16 + $0x12d8] sm:$0xff]  ;;  %v466_v55 = vld [vmem:[%s4203_s16 + $0x300] sm:$0xff] }
  0x56   : > { %3551 = vmatpush1.bf16.msra.mxu0 %v3550_v19  ;;  %3041 = vmatprep.subr.bf16.mxu1 %v3040_v20  ;;  %v323_v19 = vld [vmem:[%s4301_s20 + $0x288] sm:$0xff]  ;;  %v3058_v20 = vpack.c.bf16 %v456_v6, %v454_v5  ;;  %v3572_v29 = vpack.c.bf16 %v973_v18, %v971_v17  ;;  %v980_v59 = vld [vmem:[%s4203_s16 + $0x1310] sm:$0xff]  ;;  %v985_v63 = vld [vmem:[%s4203_s16 + $0x1338] sm:$0xff] }
  0x57   : > { %3553 = vmatprep.subr.bf16.mxu0 %v3552_v24  ;;  %1464 = vmatprep.mubr.f32.mxu1 %v275_v0  ;;  %v3570_v24 = vpack.c.bf16 %v968_v11, %v966_v10  ;;  %v471_v60 = vld [vmem:[%s4203_s16 + $0x328] sm:$0xff]  ;;  %v982_v5 = vld [vmem:[%s4203_s16 + $0x1320] sm:$0xff]  ;;  %v989_v11 = vld [vmem:[%s4203_s16 + $0x1358] sm:$0xff] }
  0x58   : > { %2176 = vmatprep.mubr.f32.mxu0 %v291_v3  ;;  %1465 = vmatmul.mubr.f32.gmra.mrb[2].mxu1 %v274_v7  ;;  %v983_v62 = vld [vmem:[%s4203_s16 + $0x1328] sm:$0xff]  ;;  %v470_v3 = vld [vmem:[%s4203_s16 + $0x320] sm:$0xff]  ;;  %v984_v7 = vld [vmem:[%s4203_s16 + $0x1330] sm:$0xff] }
  0x59   : > { %3043 = vmatpush1.bf16.msra.mxu1 %v3042_v30  ;;  %2177 = vmatmul.mubr.f32.gmra.mrb[2].mxu0 %v290_v12  ;;  %v463_v30 = vld [vmem:[%s4203_s16 + $0x2e8] sm:$0xff]  ;;  %v3584_v6 = vpack.c.bf16 %v985_v63, %v983_v62  ;;  %v474_v15 = vld [vmem:[%s4203_s16 + $0x340] sm:$0xff]  ;;  %v485_v33 = vld [vmem:[%s4203_s16 + $0x398] sm:$0xff] }
  0x5a   : > { %3555 = vmatpush1.bf16.msra.mxu0 %v3554_v31  ;;  %3045 = vmatprep.subr.bf16.mxu1 %v3044_v32  ;;  %v465_v31 = vld [vmem:[%s4203_s16 + $0x2f8] sm:$0xff]  ;;  %v339_v32 = vld [vmem:[%s4301_s20 + $0x308] sm:$0xff]  ;;  %v986_v17 = vld [vmem:[%s4203_s16 + $0x1340] sm:$0xff] }
  0x5b   : > { %3557 = vmatprep.subr.bf16.mxu0 %v3556_v36  ;;  %1470 = vmatprep.mubr.f32.mxu1 %v307_v16  ;;  %v3062_v36 = vpack.c.bf16 %v460_v22, %v458_v21  ;;  %v3064_v41 = vpack.c.bf16 %v465_v31, %v463_v30  ;;  %v987_v10 = vld [vmem:[%s4203_s16 + $0x1348] sm:$0xff]  ;;  %v476_v16 = vld [vmem:[%s4203_s16 + $0x350] sm:$0xff]  ;;  %v481_v21 = vld [vmem:[%s4203_s16 + $0x378] sm:$0xff] }
  0x5c   : > { %2182 = vmatprep.mubr.f32.mxu0 %v323_v19  ;;  %1471 = vmatmul.mubr.f32.gmra.mrb[4].mxu1 %v306_v23  ;;  %v3588_v18 = vpack.c.bf16 %v989_v11, %v987_v10  ;;  %v988_v19 = vld [vmem:[%s4203_s16 + $0x1350] sm:$0xff]  ;;  %v991_v22 = vld [vmem:[%s4203_s16 + $0x1368] sm:$0xff]  ;;  %v993_v23 = vld [vmem:[%s4203_s16 + $0x1378] sm:$0xff] }
  0x5d   : > { %3047 = vmatpush1.bf16.msra.mxu1 %v3046_v42  ;;  %2183 = vmatmul.mubr.f32.gmra.mrb[4].mxu0 %v322_v28  ;;  %v974_v42 = vld [vmem:[%s4203_s16 + $0x12e0] sm:$0xff]  ;;  %v480_v28 = vld [vmem:[%s4203_s16 + $0x370] sm:$0xff]  ;;  %v3592_v30 = vpack.c.bf16 %v993_v23, %v991_v22  ;;  %v995_v34 = vld [vmem:[%s4203_s16 + $0x1388] sm:$0xff] }
  0x5e   : > { %3559 = vmatpush1.bf16.msra.mxu0 %v3558_v43  ;;  %3049 = vmatprep.subr.bf16.mxu1 %v3048_v44  ;;  %v976_v43 = vld [vmem:[%s4203_s16 + $0x12f0] sm:$0xff]  ;;  %v354_v44 = vld [vmem:[%s4301_s20 + $0x380] sm:$0xff] }
  0x5f   : > { %3561 = vmatprep.subr.bf16.mxu0 %v3560_v48  ;;  %1476 = vmatprep.mubr.f32.mxu1 %v339_v32  ;;  %v245_v48 = vld [vmem:[%s4301_s20 + $0x18] sm:$0xff]  ;;  %v3578_v53 = vpack.c.bf16 %v976_v43, %v974_v42  ;;  %v478_v27 = vld [vmem:[%s4203_s16 + $0x360] sm:$0xff]  ;;  %v992_v31 = vld [vmem:[%s4203_s16 + $0x1370] sm:$0xff] }
  0x60   : > { %2188 = vmatprep.mubr.f32.mxu0 %v355_v35  ;;  %1477 = vmatmul.mubr.f32.gmra.mrb[6].mxu1 %v338_v39  ;;  %v483_v32 = vld [vmem:[%s4203_s16 + $0x388] sm:$0xff]  ;;  %v997_v35 = vld [vmem:[%s4203_s16 + $0x1398] sm:$0xff]  ;;  %v482_v39 = vld [vmem:[%s4203_s16 + $0x380] sm:$0xff] }
  0x61   : > { %3051 = vmatpush1.bf16.msra.mxu1 %v3050_v54  ;;  %2189 = vmatmul.mubr.f32.gmra.mrb[6].mxu0 %v354_v44  ;;  %v3068_v54 = vpack.c.bf16 %v469_v47, %v467_v46  ;;  %v3084_v38 = vpack.c.bf16 %v485_v33, %v483_v32  ;;  %v3596_v42 = vpack.c.bf16 %v997_v35, %v995_v34  ;;  %v996_v43 = vld [vmem:[%s4203_s16 + $0x1390] sm:$0xff]  ;;  %v487_v44 = vld [vmem:[%s4203_s16 + $0x3a8] sm:$0xff]  ;;  %v1001_v47 = vld [vmem:[%s4203_s16 + $0x13b8] sm:$0xff] }
  0x62   : > { %3563 = vmatpush1.bf16.msra.mxu0 %v3562_v56  ;;  %3053 = vmatprep.subr.bf16.mxu1 %v3052_v57  ;;  %v468_v56 = vld [vmem:[%s4203_s16 + $0x310] sm:$0xff]  ;;  %v978_v57 = vld [vmem:[%s4203_s16 + $0x1300] sm:$0xff]  ;;  %v999_v46 = vld [vmem:[%s4203_s16 + $0x13a8] sm:$0xff] }
  0x63   : > { %3565 = vmatprep.subr.bf16.mxu0 %v3564_v61  ;;  %1547 = vmatprep.mubr.f32.mxu1 %v245_v48  ;;  %v473_v61 = vld [vmem:[%s4203_s16 + $0x338] sm:$0xff]  ;;  %v3070_v0 = vpack.c.bf16 %v468_v56, %v466_v55  ;;  %v3582_v1 = vpack.c.bf16 %v980_v59, %v978_v57  ;;  %v1000_v55 = vld [vmem:[%s4203_s16 + $0x13b0] sm:$0xff]  ;;  %v491_v56 = vld [vmem:[%s4203_s16 + $0x3c8] sm:$0xff] }
  0x64   : > { %2259 = vmatprep.mubr.f32.mxu0 %v261_v51  ;;  %v3072_v2 = vpack.c.bf16 %v473_v61, %v471_v60  ;;  %v486_v51 = vld [vmem:[%s4203_s16 + $0x3a0] sm:$0xff]  ;;  %v493_v57 = vld [vmem:[%s4203_s16 + $0x3d8] sm:$0xff]  ;;  %v244_v32 = vld [vmem:[%s4301_s20 + $0x10] sm:$0xff] }
  0x65   : > { %3055 = vmatpush1.bf16.msra.mxu1 %v3054_v4  ;;  %v472_v4 = vld [vmem:[%s4203_s16 + $0x330] sm:$0xff]  ;;  %v1005_v59 = vld [vmem:[%s4203_s16 + $0x13d8] sm:$0xff]  ;;  %v3092_v62 = vpack.c.bf16 %v493_v57, %v491_v56  ;;  %v490_v63 = vld [vmem:[%s4203_s16 + $0x3c0] sm:$0xff] }
  0x66   : > { %3567 = vmatpush1.bf16.msra.mxu0 %v3566_v8  ;;  %3057 = vmatprep.subr.bf16.mxu1 %v3056_v9  ;;  %v475_v8 = vld [vmem:[%s4203_s16 + $0x348] sm:$0xff]  ;;  %v477_v9 = vld [vmem:[%s4203_s16 + $0x358] sm:$0xff]  ;;  %v3074_v12 = vpack.c.bf16 %v472_v4, %v470_v3  ;;  %v1004_v3 = vld [vmem:[%s4203_s16 + $0x13d0] sm:$0xff] }
  0x67   : > { %3569 = vmatprep.subr.bf16.mxu0 %v3568_v13  ;;  %v3586_v13 = vpack.c.bf16 %v984_v7, %v982_v5  ;;  %v3076_v14 = vpack.c.bf16 %v477_v9, %v475_v8  ;;  %v495_v4 = vld [vmem:[%s4203_s16 + $0x3e8] sm:$0xff]  ;;  %v497_v5 = vld [vmem:[%s4203_s16 + $0x3f8] sm:$0xff]  ;;  %v494_v11 = vld [vmem:[%s4203_s16 + $0x3e0] sm:$0xff] }
  0x68   : > { %v1009_v7 = vld [vmem:[%s4203_s16 + $0x13f8] sm:$0xff]  ;;  %v3096_v10 = vpack.c.bf16 %v497_v5, %v495_v4  ;;  %v498_v23 = vld [vmem:[%s4203_s16 + $0x400] sm:$0xff]  ;;  %v260_v34 = vld [vmem:[%s4301_s20 + $0x90] sm:$0xff] }
  0x69   : > { %3059 = vmatpush1.bf16.msra.mxu1 %v3058_v20  ;;  %v479_v20 = vld [vmem:[%s4203_s16 + $0x368] sm:$0xff]  ;;  %v1020_v57 = vld [vmem:[%s4203_s16 + $0x1450] sm:$0xff] }
  0x6a   : > { %3571 = vmatpush1.bf16.msra.mxu0 %v3570_v24  ;;  %3061 = vmatprep.subr.bf16.mxu1 %v3060_v25  ;;  %v3078_v24 = vpack.c.bf16 %v476_v16, %v474_v15  ;;  %v3590_v25 = vpack.c.bf16 %v988_v19, %v986_v17  ;;  %v3080_v26 = vpack.c.bf16 %v481_v21, %v479_v20  ;;  %v1008_v15 = vld [vmem:[%s4203_s16 + $0x13f0] sm:$0xff]  ;;  %v499_v16 = vld [vmem:[%s4203_s16 + $0x408] sm:$0xff]  ;;  %v501_v17 = vld [vmem:[%s4203_s16 + $0x418] sm:$0xff] }
  0x6b   : > { %3573 = vmatprep.subr.bf16.mxu0 %v3572_v29  ;;  %v990_v29 = vld [vmem:[%s4203_s16 + $0x1360] sm:$0xff]  ;;  %v1013_v19 = vld [vmem:[%s4203_s16 + $0x1418] sm:$0xff]  ;;  %v3100_v22 = vpack.c.bf16 %v501_v17, %v499_v16  ;;  %v512_v5 = vld [vmem:[%s4203_s16 + $0x470] sm:$0xff] }
  0x6c   : > { %v3594_v37 = vpack.c.bf16 %v992_v31, %v990_v29  ;;  %v505_v29 = vld [vmem:[%s4203_s16 + $0x438] sm:$0xff]  ;;  %v514_v16 = vld [vmem:[%s4203_s16 + $0x480] sm:$0xff] }
  0x6d   : > { %3063 = vmatpush1.bf16.msra.mxu1 %v3062_v36  ;;  %v3082_v36 = vpack.c.bf16 %v480_v28, %v478_v27  ;;  %v1012_v27 = vld [vmem:[%s4203_s16 + $0x1410] sm:$0xff]  ;;  %v503_v28 = vld [vmem:[%s4203_s16 + $0x428] sm:$0xff]  ;;  %v1017_v31 = vld [vmem:[%s4203_s16 + $0x1438] sm:$0xff] }
  0x6e   : > { %3575 = vmatpush1.bf16.msra.mxu0 %v3574_v40  ;;  %3065 = vmatprep.subr.bf16.mxu1 %v3064_v41  ;;  %v484_v40 = vld [vmem:[%s4203_s16 + $0x390] sm:$0xff]  ;;  %v994_v41 = vld [vmem:[%s4203_s16 + $0x1380] sm:$0xff]  ;;  %v357_v17 = vld [vmem:[%s4301_s20 + $0x398] sm:$0xff] }
  0x6f   : > { %3577 = vmatprep.subr.bf16.mxu0 %v3576_v45  ;;  %v489_v45 = vld [vmem:[%s4203_s16 + $0x3b8] sm:$0xff]  ;;  %v3086_v48 = vpack.c.bf16 %v484_v40, %v482_v39  ;;  %v3598_v49 = vpack.c.bf16 %v996_v43, %v994_v41  ;;  %v1014_v39 = vld [vmem:[%s4203_s16 + $0x1420] sm:$0xff]  ;;  %v1016_v41 = vld [vmem:[%s4203_s16 + $0x1430] sm:$0xff] }
  0x70   : > { %v3088_v50 = vpack.c.bf16 %v489_v45, %v487_v44  ;;  %v509_v43 = vld [vmem:[%s4203_s16 + $0x458] sm:$0xff]  ;;  %v1019_v44 = vld [vmem:[%s4203_s16 + $0x1448] sm:$0xff] }
  0x71   : > { %3067 = vmatpush1.bf16.msra.mxu1 %v3066_v52  ;;  %v488_v52 = vld [vmem:[%s4203_s16 + $0x3b0] sm:$0xff]  ;;  %v1021_v45 = vld [vmem:[%s4203_s16 + $0x1458] sm:$0xff] }
  0x72   : > { %3579 = vmatpush1.bf16.msra.mxu0 %v3578_v53  ;;  %3069 = vmatprep.subr.bf16.mxu1 %v3068_v54  ;;  %v998_v53 = vld [vmem:[%s4203_s16 + $0x13a0] sm:$0xff]  ;;  %v3600_v54 = vpack.c.bf16 %v1001_v47, %v999_v46  ;;  %v3090_v60 = vpack.c.bf16 %v488_v52, %v486_v51  ;;  %v277_v46 = vld [vmem:[%s4301_s20 + $0x118] sm:$0xff]  ;;  %v3618_v51 = vpack.c.bf16 %v1016_v41, %v1014_v39  ;;  %v1032_v39 = vld [vmem:[%s4203_s16 + $0x14b0] sm:$0xff] }
  0x73   : > { %3581 = vmatprep.subr.bf16.mxu0 %v3580_v58  ;;  %v1003_v58 = vld [vmem:[%s4203_s16 + $0x13c8] sm:$0xff]  ;;  %v3602_v61 = vpack.c.bf16 %v1000_v55, %v998_v53  ;;  %v508_v53 = vld [vmem:[%s4203_s16 + $0x450] sm:$0xff]  ;;  %v3620_v56 = vpack.c.bf16 %v1021_v45, %v1019_v44  ;;  %v525_v41 = vld [vmem:[%s4203_s16 + $0x4d8] sm:$0xff] }
  0x74   : > { %v292_v55 = vld [vmem:[%s4301_s20 + $0x190] sm:$0xff] }
  0x75   : > { %3071 = vmatpush1.bf16.msra.mxu1 %v3070_v0  ;;  %v492_v0 = vld [vmem:[%s4203_s16 + $0x3d0] sm:$0xff] }
  0x76   : > { %3583 = vmatpush1.bf16.msra.mxu0 %v3582_v1  ;;  %3073 = vmatprep.subr.bf16.mxu1 %v3072_v2  ;;  %v1002_v1 = vld [vmem:[%s4203_s16 + $0x13c0] sm:$0xff]  ;;  %v3604_v2 = vpack.c.bf16 %v1005_v59, %v1003_v58  ;;  %v3094_v8 = vpack.c.bf16 %v492_v0, %v490_v63  ;;  %v511_v58 = vld [vmem:[%s4203_s16 + $0x468] sm:$0xff]  ;;  %v513_v59 = vld [vmem:[%s4203_s16 + $0x478] sm:$0xff] }
  0x77   : > { %3585 = vmatprep.subr.bf16.mxu0 %v3584_v6  ;;  %v1007_v6 = vld [vmem:[%s4203_s16 + $0x13e8] sm:$0xff]  ;;  %v3606_v9 = vpack.c.bf16 %v1004_v3, %v1002_v1  ;;  %v510_v0 = vld [vmem:[%s4203_s16 + $0x460] sm:$0xff]  ;;  %v325_v1 = vld [vmem:[%s4301_s20 + $0x298] sm:$0xff]  ;;  %v3112_v4 = vpack.c.bf16 %v513_v59, %v511_v58 }
  0x78   : > { %v526_v59 = vld [vmem:[%s4203_s16 + $0x4e0] sm:$0xff] }
  0x79   : > { %3075 = vmatpush1.bf16.msra.mxu1 %v3074_v12  ;;  %v496_v12 = vld [vmem:[%s4203_s16 + $0x3f0] sm:$0xff] }
  0x7a   : > { %3587 = vmatpush1.bf16.msra.mxu0 %v3586_v13  ;;  %3077 = vmatprep.subr.bf16.mxu1 %v3076_v14  ;;  %v1006_v13 = vld [vmem:[%s4203_s16 + $0x13e0] sm:$0xff]  ;;  %v3608_v14 = vpack.c.bf16 %v1009_v7, %v1007_v6  ;;  %v3098_v20 = vpack.c.bf16 %v496_v12, %v494_v11  ;;  %v324_v7 = vld [vmem:[%s4301_s20 + $0x290] sm:$0xff]  ;;  %v517_v11 = vld [vmem:[%s4203_s16 + $0x498] sm:$0xff] }
  0x7b   : > { %3589 = vmatprep.subr.bf16.mxu0 %v3588_v18  ;;  %v1011_v18 = vld [vmem:[%s4203_s16 + $0x1408] sm:$0xff]  ;;  %v3610_v21 = vpack.c.bf16 %v1008_v15, %v1006_v13  ;;  %v1022_v6 = vld [vmem:[%s4203_s16 + $0x1460] sm:$0xff]  ;;  %v1029_v13 = vld [vmem:[%s4203_s16 + $0x1498] sm:$0xff]  ;;  %v3114_v15 = vpack.c.bf16 %v512_v5, %v510_v0 }
  0x7c   : > { %v1027_v12 = vld [vmem:[%s4203_s16 + $0x1488] sm:$0xff] }
  0x7d   : > { %3079 = vmatpush1.bf16.msra.mxu1 %v3078_v24  ;;  %v500_v24 = vld [vmem:[%s4203_s16 + $0x410] sm:$0xff]  ;;  %v531_v0 = vld [vmem:[%s4203_s16 + $0x508] sm:$0xff] }
  0x7e   : > { %3591 = vmatpush1.bf16.msra.mxu0 %v3590_v25  ;;  %3081 = vmatprep.subr.bf16.mxu1 %v3080_v26  ;;  %v1010_v25 = vld [vmem:[%s4203_s16 + $0x1400] sm:$0xff]  ;;  %v3612_v26 = vpack.c.bf16 %v1013_v19, %v1011_v18  ;;  %v3102_v33 = vpack.c.bf16 %v500_v24, %v498_v23  ;;  %v340_v18 = vld [vmem:[%s4301_s20 + $0x310] sm:$0xff]  ;;  %v3628_v24 = vpack.c.bf16 %v1029_v13, %v1027_v12  ;;  %v535_v12 = vld [vmem:[%s4203_s16 + $0x528] sm:$0xff] }
  0x7f   : > { %3593 = vmatprep.subr.bf16.mxu0 %v3592_v30  ;;  %v1015_v30 = vld [vmem:[%s4203_s16 + $0x1428] sm:$0xff]  ;;  %v3614_v35 = vpack.c.bf16 %v1012_v27, %v1010_v25  ;;  %v356_v23 = vld [vmem:[%s4301_s20 + $0x390] sm:$0xff]  ;;  %v521_v27 = vld [vmem:[%s4203_s16 + $0x4b8] sm:$0xff] }
  0x80   : > { %v3616_v40 = vpack.c.bf16 %v1017_v31, %v1015_v30  ;;  %v1028_v25 = vld [vmem:[%s4203_s16 + $0x1490] sm:$0xff]  ;;  %v247_v30 = vld [vmem:[%s4301_s20 + $0x28] sm:$0xff]  ;;  %v537_v13 = vld [vmem:[%s4203_s16 + $0x538] sm:$0xff] }
  0x81   : > { %3083 = vmatpush1.bf16.msra.mxu1 %v3082_v36  ;;  %v3104_v36 = vpack.c.bf16 %v505_v29, %v503_v28  ;;  %v1031_v28 = vld [vmem:[%s4203_s16 + $0x14a8] sm:$0xff]  ;;  %v1033_v29 = vld [vmem:[%s4203_s16 + $0x14b8] sm:$0xff] }
  0x82   : > { %3595 = vmatpush1.bf16.msra.mxu0 %v3594_v37  ;;  %3085 = vmatprep.subr.bf16.mxu1 %v3084_v38  ;;  %v502_v37 = vld [vmem:[%s4203_s16 + $0x420] sm:$0xff]  ;;  %v504_v38 = vld [vmem:[%s4203_s16 + $0x430] sm:$0xff] }
  0x83   : > { %3597 = vmatprep.subr.bf16.mxu0 %v3596_v42  ;;  %v507_v42 = vld [vmem:[%s4203_s16 + $0x448] sm:$0xff]  ;;  %v3106_v47 = vpack.c.bf16 %v504_v38, %v502_v37  ;;  %v1030_v37 = vld [vmem:[%s4203_s16 + $0x14a0] sm:$0xff]  ;;  %v3632_v38 = vpack.c.bf16 %v1033_v29, %v1031_v28 }
  0x84   : > { %v3108_v52 = vpack.c.bf16 %v509_v43, %v507_v42  ;;  %v1035_v42 = vld [vmem:[%s4203_s16 + $0x14c8] sm:$0xff]  ;;  %v1037_v43 = vld [vmem:[%s4203_s16 + $0x14d8] sm:$0xff]  ;;  %v3634_v45 = vpack.c.bf16 %v1032_v39, %v1030_v37 }
  0x85   : > { %3087 = vmatpush1.bf16.msra.mxu1 %v3086_v48  ;;  %v506_v48 = vld [vmem:[%s4203_s16 + $0x440] sm:$0xff]  ;;  %v545_v37 = vld [vmem:[%s4203_s16 + $0x578] sm:$0xff] }
  0x86   : > { %3599 = vmatpush1.bf16.msra.mxu0 %v3598_v49  ;;  %3089 = vmatprep.subr.bf16.mxu1 %v3088_v50  ;;  %v293_v49 = vld [vmem:[%s4301_s20 + $0x198] sm:$0xff]  ;;  %v276_v50 = vld [vmem:[%s4301_s20 + $0x110] sm:$0xff]  ;;  %v3110_v63 = vpack.c.bf16 %v508_v53, %v506_v48 }
  0x87   : > { %3601 = vmatprep.subr.bf16.mxu0 %v3600_v54  ;;  %v1018_v54 = vld [vmem:[%s4203_s16 + $0x1440] sm:$0xff]  ;;  %v524_v48 = vld [vmem:[%s4203_s16 + $0x4d0] sm:$0xff]  ;;  %v529_v53 = vld [vmem:[%s4203_s16 + $0x4f8] sm:$0xff] }
  0x88   : > { %v3622_v3 = vpack.c.bf16 %v1020_v57, %v1018_v54  ;;  %v1039_v54 = vld [vmem:[%s4203_s16 + $0x14e8] sm:$0xff]  ;;  %v1057_v39 = vld [vmem:[%s4203_s16 + $0x1578] sm:$0xff] }
  0x89   : > { %3091 = vmatpush1.bf16.msra.mxu1 %v3090_v60  ;;  %v1023_v60 = vld [vmem:[%s4203_s16 + $0x1468] sm:$0xff] }
  0x8a   : > { %3603 = vmatpush1.bf16.msra.mxu0 %v3602_v61  ;;  %3093 = vmatprep.subr.bf16.mxu1 %v3092_v62  ;;  %v1025_v61 = vld [vmem:[%s4203_s16 + $0x1478] sm:$0xff] }
  0x8b   : > { %3605 = vmatprep.subr.bf16.mxu0 %v3604_v2  ;;  %v309_v62 = vld [vmem:[%s4301_s20 + $0x218] sm:$0xff]  ;;  %v308_v2 = vld [vmem:[%s4301_s20 + $0x210] sm:$0xff] }
  0x8d   : > { %3095 = vmatpush1.bf16.msra.mxu1 %v3094_v8  ;;  %v3624_v8 = vpack.c.bf16 %v1025_v61, %v1023_v60  ;;  %v528_v60 = vld [vmem:[%s4203_s16 + $0x4f0] sm:$0xff]  ;;  %v1038_v61 = vld [vmem:[%s4203_s16 + $0x14e0] sm:$0xff] }
  0x8e   : > { %3607 = vmatpush1.bf16.msra.mxu0 %v3606_v9  ;;  %3097 = vmatprep.subr.bf16.mxu1 %v3096_v10  ;;  %v1024_v9 = vld [vmem:[%s4203_s16 + $0x1470] sm:$0xff]  ;;  %v515_v10 = vld [vmem:[%s4203_s16 + $0x488] sm:$0xff] }
  0x8f   : > { %3609 = vmatprep.subr.bf16.mxu0 %v3608_v14  ;;  %v341_v14 = vld [vmem:[%s4301_s20 + $0x318] sm:$0xff]  ;;  %v3626_v19 = vpack.c.bf16 %v1024_v9, %v1022_v6  ;;  %v1042_v9 = vld [vmem:[%s4203_s16 + $0x1500] sm:$0xff] }
  0x91   : > { %3099 = vmatpush1.bf16.msra.mxu1 %v3098_v20  ;;  %v3116_v20 = vpack.c.bf16 %v517_v11, %v515_v10  ;;  %v1044_v11 = vld [vmem:[%s4203_s16 + $0x1510] sm:$0xff] }
  0x92   : > { %3611 = vmatpush1.bf16.msra.mxu0 %v3610_v21  ;;  %3101 = vmatprep.subr.bf16.mxu1 %v3100_v22  ;;  %v516_v21 = vld [vmem:[%s4203_s16 + $0x490] sm:$0xff]  ;;  %v1026_v22 = vld [vmem:[%s4203_s16 + $0x1480] sm:$0xff] }
  0x93   : > { %3613 = vmatprep.subr.bf16.mxu0 %v3612_v26  ;;  %v519_v26 = vld [vmem:[%s4203_s16 + $0x4a8] sm:$0xff]  ;;  %v3118_v31 = vpack.c.bf16 %v516_v21, %v514_v16  ;;  %v1046_v21 = vld [vmem:[%s4203_s16 + $0x1520] sm:$0xff] }
  0x94   : > { %1548 = vmatmul.mubr.f32.vlgmr.msra.gmra.mrb[0].mxu1 %v244_v32  ;;  %v263_v32 = vld [vmem:[%s4301_s20 + $0xa8] sm:$0xff] }
  0x95   : > { %3103 = vmatpush1.bf16.msra.mxu1 %v3102_v33  ;;  %2260 = vmatmul.mubr.f32.vlgmr.msra.gmra.mrb[0].mxu0 %v260_v34  ;;  %v3630_v33 = vpack.c.bf16 %v1028_v25, %v1026_v22  ;;  %v3120_v34 = vpack.c.bf16 %v521_v27, %v519_v26  ;;  %v541_v25 = vld [vmem:[%s4203_s16 + $0x558] sm:$0xff]  ;;  %v1051_v26 = vld [vmem:[%s4203_s16 + $0x1548] sm:$0xff] }
  0x96   : > { %3615 = vmatpush1.bf16.msra.mxu0 %v3614_v35  ;;  %3105 = vmatprep.subr.bf16.mxu1 %v3104_v36  ;;  %v518_v35 = vld [vmem:[%s4203_s16 + $0x4a0] sm:$0xff]  ;;  %v520_v36 = vld [vmem:[%s4203_s16 + $0x4b0] sm:$0xff]  ;;  %v1053_v27 = vld [vmem:[%s4203_s16 + $0x1558] sm:$0xff] }
  0x97   : > { %3617 = vmatprep.subr.bf16.mxu0 %v3616_v40  ;;  %1553 = vmatprep.mubr.f32.mxu1 %v277_v46  ;;  %v523_v40 = vld [vmem:[%s4203_s16 + $0x4c8] sm:$0xff]  ;;  %v3122_v44 = vpack.c.bf16 %v520_v36, %v518_v35  ;;  %v1052_v35 = vld [vmem:[%s4203_s16 + $0x1550] sm:$0xff] }
  0x98   : > { %2265 = vmatprep.mubr.f32.mxu0 %v293_v49  ;;  %1554 = vmatmul.mubr.f32.gmra.mrb[2].mxu1 %v276_v50  ;;  %v3124_v46 = vpack.c.bf16 %v525_v41, %v523_v40  ;;  %v1034_v49 = vld [vmem:[%s4203_s16 + $0x14c0] sm:$0xff]  ;;  %v3636_v50 = vpack.c.bf16 %v1037_v43, %v1035_v42  ;;  %v543_v36 = vld [vmem:[%s4203_s16 + $0x568] sm:$0xff] }
  0x99   : > { %3107 = vmatpush1.bf16.msra.mxu1 %v3106_v47  ;;  %2266 = vmatmul.mubr.f32.gmra.mrb[2].mxu0 %v292_v55  ;;  %v522_v47 = vld [vmem:[%s4203_s16 + $0x4c0] sm:$0xff]  ;;  %v1041_v55 = vld [vmem:[%s4203_s16 + $0x14f8] sm:$0xff]  ;;  %v3144_v42 = vpack.c.bf16 %v545_v37, %v543_v36 }
  0x9a   : > { %3619 = vmatpush1.bf16.msra.mxu0 %v3618_v51  ;;  %3109 = vmatprep.subr.bf16.mxu1 %v3108_v52  ;;  %v1036_v51 = vld [vmem:[%s4203_s16 + $0x14d0] sm:$0xff]  ;;  %v527_v52 = vld [vmem:[%s4203_s16 + $0x4e8] sm:$0xff]  ;;  %v542_v43 = vld [vmem:[%s4203_s16 + $0x560] sm:$0xff] }
  0x9b   : > { %3621 = vmatprep.subr.bf16.mxu0 %v3620_v56  ;;  %1559 = vmatprep.mubr.f32.mxu1 %v309_v62  ;;  %v3126_v56 = vpack.c.bf16 %v524_v48, %v522_v47  ;;  %v3638_v57 = vpack.c.bf16 %v1036_v51, %v1034_v49  ;;  %v3128_v58 = vpack.c.bf16 %v529_v53, %v527_v52  ;;  %v1056_v47 = vld [vmem:[%s4203_s16 + $0x1570] sm:$0xff]  ;;  %v547_v48 = vld [vmem:[%s4203_s16 + $0x588] sm:$0xff]  ;;  %v549_v49 = vld [vmem:[%s4203_s16 + $0x598] sm:$0xff] }
  0x9c   : > { %2271 = vmatprep.mubr.f32.mxu0 %v325_v1  ;;  %1560 = vmatmul.mubr.f32.gmra.mrb[4].mxu1 %v308_v2  ;;  %v3640_v62 = vpack.c.bf16 %v1041_v55, %v1039_v54  ;;  %v533_v1 = vld [vmem:[%s4203_s16 + $0x518] sm:$0xff]  ;;  %v1043_v2 = vld [vmem:[%s4203_s16 + $0x1508] sm:$0xff]  ;;  %v3148_v54 = vpack.c.bf16 %v549_v49, %v547_v48  ;;  %v546_v55 = vld [vmem:[%s4203_s16 + $0x580] sm:$0xff] }
  0x9d   : > { %3111 = vmatpush1.bf16.msra.mxu1 %v3110_v63  ;;  %2272 = vmatmul.mubr.f32.gmra.mrb[4].mxu0 %v324_v7  ;;  %v1040_v63 = vld [vmem:[%s4203_s16 + $0x14f0] sm:$0xff]  ;;  %v3132_v6 = vpack.c.bf16 %v533_v1, %v531_v0  ;;  %v530_v7 = vld [vmem:[%s4203_s16 + $0x500] sm:$0xff]  ;;  %v1061_v51 = vld [vmem:[%s4203_s16 + $0x1598] sm:$0xff] }
  0x9e   : > { %3623 = vmatpush1.bf16.msra.mxu0 %v3622_v3  ;;  %3113 = vmatprep.subr.bf16.mxu1 %v3112_v4  ;;  %v1045_v3 = vld [vmem:[%s4203_s16 + $0x1518] sm:$0xff]  ;;  %v3130_v4 = vpack.c.bf16 %v528_v60, %v526_v59  ;;  %v3642_v5 = vpack.c.bf16 %v1040_v63, %v1038_v61  ;;  %v1060_v59 = vld [vmem:[%s4203_s16 + $0x1590] sm:$0xff]  ;;  %v551_v60 = vld [vmem:[%s4203_s16 + $0x5a8] sm:$0xff] }
  0x9f   : > { %3625 = vmatprep.subr.bf16.mxu0 %v3624_v8  ;;  %1565 = vmatprep.mubr.f32.mxu1 %v341_v14  ;;  %v532_v8 = vld [vmem:[%s4203_s16 + $0x510] sm:$0xff]  ;;  %v3644_v10 = vpack.c.bf16 %v1045_v3, %v1043_v2  ;;  %v1047_v14 = vld [vmem:[%s4203_s16 + $0x1528] sm:$0xff]  ;;  %v553_v61 = vld [vmem:[%s4203_s16 + $0x5b8] sm:$0xff] }
  0xa0   : > { %2277 = vmatprep.mubr.f32.mxu0 %v357_v17  ;;  %1566 = vmatmul.mubr.f32.gmra.mrb[6].mxu1 %v340_v18  ;;  %v3134_v16 = vpack.c.bf16 %v532_v8, %v530_v7  ;;  %v3646_v17 = vpack.c.bf16 %v1044_v11, %v1042_v9  ;;  %v3136_v18 = vpack.c.bf16 %v537_v13, %v535_v12  ;;  %v1065_v63 = vld [vmem:[%s4203_s16 + $0x15b8] sm:$0xff]  ;;  %v550_v3 = vld [vmem:[%s4203_s16 + $0x5a0] sm:$0xff]  ;;  %v1064_v7 = vld [vmem:[%s4203_s16 + $0x15b0] sm:$0xff] }
  0xa1   : > { %3115 = vmatpush1.bf16.msra.mxu1 %v3114_v15  ;;  %2278 = vmatmul.mubr.f32.gmra.mrb[6].mxu0 %v356_v23  ;;  %v1049_v15 = vld [vmem:[%s4203_s16 + $0x1538] sm:$0xff]  ;;  %v1048_v23 = vld [vmem:[%s4203_s16 + $0x1530] sm:$0xff]  ;;  %v3152_v2 = vpack.c.bf16 %v553_v61, %v551_v60  ;;  %v555_v8 = vld [vmem:[%s4203_s16 + $0x5c8] sm:$0xff] }
  0xa2   : > { %3627 = vmatpush1.bf16.msra.mxu0 %v3626_v19  ;;  %3117 = vmatprep.subr.bf16.mxu1 %v3116_v20  ;;  %v534_v19 = vld [vmem:[%s4203_s16 + $0x520] sm:$0xff]  ;;  %v536_v20 = vld [vmem:[%s4203_s16 + $0x530] sm:$0xff]  ;;  %v3648_v22 = vpack.c.bf16 %v1049_v15, %v1047_v14  ;;  %v3650_v29 = vpack.c.bf16 %v1048_v23, %v1046_v21  ;;  %v557_v9 = vld [vmem:[%s4203_s16 + $0x5d8] sm:$0xff] }
  0xa3   : > { %3629 = vmatprep.subr.bf16.mxu0 %v3628_v24  ;;  %1636 = vmatprep.mubr.f32.mxu1 %v247_v30  ;;  %v539_v24 = vld [vmem:[%s4203_s16 + $0x548] sm:$0xff]  ;;  %v3138_v28 = vpack.c.bf16 %v536_v20, %v534_v19  ;;  %v1069_v11 = vld [vmem:[%s4203_s16 + $0x15d8] sm:$0xff]  ;;  %v3156_v14 = vpack.c.bf16 %v557_v9, %v555_v8  ;;  %v554_v15 = vld [vmem:[%s4203_s16 + $0x5c0] sm:$0xff] }
  0xa4   : > { %2348 = vmatprep.mubr.f32.mxu0 %v263_v32  ;;  %v3140_v30 = vpack.c.bf16 %v541_v25, %v539_v24  ;;  %v540_v32 = vld [vmem:[%s4203_s16 + $0x550] sm:$0xff]  ;;  %v559_v20 = vld [vmem:[%s4203_s16 + $0x5e8] sm:$0xff]  ;;  %v561_v21 = vld [vmem:[%s4203_s16 + $0x5f8] sm:$0xff] }
  0xa5   : > { %3119 = vmatpush1.bf16.msra.mxu1 %v3118_v31  ;;  %v538_v31 = vld [vmem:[%s4203_s16 + $0x540] sm:$0xff]  ;;  %v1068_v19 = vld [vmem:[%s4203_s16 + $0x15d0] sm:$0xff]  ;;  %v1073_v23 = vld [vmem:[%s4203_s16 + $0x15f8] sm:$0xff] }
  0xa6   : > { %3631 = vmatpush1.bf16.msra.mxu0 %v3630_v33  ;;  %3121 = vmatprep.subr.bf16.mxu1 %v3120_v34  ;;  %v1050_v33 = vld [vmem:[%s4203_s16 + $0x1540] sm:$0xff]  ;;  %v3652_v34 = vpack.c.bf16 %v1053_v27, %v1051_v26  ;;  %v3142_v40 = vpack.c.bf16 %v540_v32, %v538_v31  ;;  %v3160_v26 = vpack.c.bf16 %v561_v21, %v559_v20  ;;  %v1072_v31 = vld [vmem:[%s4203_s16 + $0x15f0] sm:$0xff]  ;;  %v563_v32 = vld [vmem:[%s4203_s16 + $0x608] sm:$0xff] }
  0xa7   : > { %3633 = vmatprep.subr.bf16.mxu0 %v3632_v38  ;;  %v1055_v38 = vld [vmem:[%s4203_s16 + $0x1568] sm:$0xff]  ;;  %v3654_v41 = vpack.c.bf16 %v1052_v35, %v1050_v33  ;;  %v558_v27 = vld [vmem:[%s4203_s16 + $0x5e0] sm:$0xff]  ;;  %v565_v33 = vld [vmem:[%s4203_s16 + $0x618] sm:$0xff] }
  0xa8   : > { %v1077_v35 = vld [vmem:[%s4203_s16 + $0x1618] sm:$0xff]  ;;  %v246_v48 = vld [vmem:[%s4301_s20 + $0x20] sm:$0xff]  ;;  %v1083_v60 = vld [vmem:[%s4203_s16 + $0x1648] sm:$0xff] }
  0xa9   : > { %3123 = vmatpush1.bf16.msra.mxu1 %v3122_v44  ;;  %v544_v44 = vld [vmem:[%s4203_s16 + $0x570] sm:$0xff]  ;;  %v1085_v61 = vld [vmem:[%s4203_s16 + $0x1658] sm:$0xff] }
  0xaa   : > { %3635 = vmatpush1.bf16.msra.mxu0 %v3634_v45  ;;  %3125 = vmatprep.subr.bf16.mxu1 %v3124_v46  ;;  %v1054_v45 = vld [vmem:[%s4203_s16 + $0x1560] sm:$0xff]  ;;  %v3656_v46 = vpack.c.bf16 %v1057_v39, %v1055_v38  ;;  %v3146_v52 = vpack.c.bf16 %v544_v44, %v542_v43  ;;  %v3164_v38 = vpack.c.bf16 %v565_v33, %v563_v32  ;;  %v1076_v43 = vld [vmem:[%s4203_s16 + $0x1610] sm:$0xff]  ;;  %v567_v44 = vld [vmem:[%s4203_s16 + $0x628] sm:$0xff] }
  0xab   : > { %3637 = vmatprep.subr.bf16.mxu0 %v3636_v50  ;;  %v1059_v50 = vld [vmem:[%s4203_s16 + $0x1588] sm:$0xff]  ;;  %v3658_v53 = vpack.c.bf16 %v1056_v47, %v1054_v45  ;;  %v562_v39 = vld [vmem:[%s4203_s16 + $0x600] sm:$0xff]  ;;  %v569_v45 = vld [vmem:[%s4203_s16 + $0x638] sm:$0xff]  ;;  %v3684_v8 = vpack.c.bf16 %v1085_v61, %v1083_v60 }
  0xac   : > { %v1081_v47 = vld [vmem:[%s4203_s16 + $0x1638] sm:$0xff]  ;;  %v1084_v9 = vld [vmem:[%s4203_s16 + $0x1650] sm:$0xff]  ;;  %v578_v32 = vld [vmem:[%s4203_s16 + $0x680] sm:$0xff] }
  0xad   : > { %3127 = vmatpush1.bf16.msra.mxu1 %v3126_v56  ;;  %v548_v56 = vld [vmem:[%s4203_s16 + $0x590] sm:$0xff]  ;;  %v359_v33 = vld [vmem:[%s4301_s20 + $0x3a8] sm:$0xff] }
  0xae   : > { %3639 = vmatpush1.bf16.msra.mxu0 %v3638_v57  ;;  %3129 = vmatprep.subr.bf16.mxu1 %v3128_v58  ;;  %v1058_v57 = vld [vmem:[%s4203_s16 + $0x1580] sm:$0xff]  ;;  %v3660_v58 = vpack.c.bf16 %v1061_v51, %v1059_v50  ;;  %v3150_v0 = vpack.c.bf16 %v548_v56, %v546_v55  ;;  %v576_v21 = vld [vmem:[%s4203_s16 + $0x670] sm:$0xff] }
  0xaf   : > { %3641 = vmatprep.subr.bf16.mxu0 %v3640_v62  ;;  %v1063_v62 = vld [vmem:[%s4203_s16 + $0x15a8] sm:$0xff]  ;;  %v3662_v1 = vpack.c.bf16 %v1060_v59, %v1058_v57  ;;  %v262_v50 = vld [vmem:[%s4301_s20 + $0xa0] sm:$0xff]  ;;  %v1080_v57 = vld [vmem:[%s4203_s16 + $0x1630] sm:$0xff] }
  0xb0   : > { %v1078_v55 = vld [vmem:[%s4203_s16 + $0x1620] sm:$0xff]  ;;  %v573_v59 = vld [vmem:[%s4203_s16 + $0x658] sm:$0xff] }
  0xb1   : > { %3131 = vmatpush1.bf16.msra.mxu1 %v3130_v4  ;;  %v552_v4 = vld [vmem:[%s4203_s16 + $0x5b0] sm:$0xff] }
  0xb2   : > { %3643 = vmatpush1.bf16.msra.mxu0 %v3642_v5  ;;  %3133 = vmatprep.subr.bf16.mxu1 %v3132_v6  ;;  %v1062_v5 = vld [vmem:[%s4203_s16 + $0x15a0] sm:$0xff]  ;;  %v3664_v6 = vpack.c.bf16 %v1065_v63, %v1063_v62  ;;  %v3154_v12 = vpack.c.bf16 %v552_v4, %v550_v3  ;;  %v279_v62 = vld [vmem:[%s4301_s20 + $0x128] sm:$0xff]  ;;  %v3682_v3 = vpack.c.bf16 %v1080_v57, %v1078_v55  ;;  %v1096_v55 = vld [vmem:[%s4203_s16 + $0x16b0] sm:$0xff] }
  0xb3   : > { %3645 = vmatprep.subr.bf16.mxu0 %v3644_v10  ;;  %v1067_v10 = vld [vmem:[%s4203_s16 + $0x15c8] sm:$0xff]  ;;  %v3666_v13 = vpack.c.bf16 %v1064_v7, %v1062_v5  ;;  %v572_v5 = vld [vmem:[%s4203_s16 + $0x650] sm:$0xff]  ;;  %v294_v7 = vld [vmem:[%s4301_s20 + $0x1a0] sm:$0xff] }
  0xb4   : > { %v589_v57 = vld [vmem:[%s4203_s16 + $0x6d8] sm:$0xff] }
  0xb5   : > { %3135 = vmatpush1.bf16.msra.mxu1 %v3134_v16  ;;  %v556_v16 = vld [vmem:[%s4203_s16 + $0x5d0] sm:$0xff] }
  0xb6   : > { %3647 = vmatpush1.bf16.msra.mxu0 %v3646_v17  ;;  %3137 = vmatprep.subr.bf16.mxu1 %v3136_v18  ;;  %v1066_v17 = vld [vmem:[%s4203_s16 + $0x15c0] sm:$0xff]  ;;  %v3668_v18 = vpack.c.bf16 %v1069_v11, %v1067_v10  ;;  %v3158_v24 = vpack.c.bf16 %v556_v16, %v554_v15  ;;  %v575_v10 = vld [vmem:[%s4203_s16 + $0x668] sm:$0xff]  ;;  %v577_v11 = vld [vmem:[%s4203_s16 + $0x678] sm:$0xff] }
  0xb7   : > { %3649 = vmatprep.subr.bf16.mxu0 %v3648_v22  ;;  %v1071_v22 = vld [vmem:[%s4203_s16 + $0x15e8] sm:$0xff]  ;;  %v3670_v25 = vpack.c.bf16 %v1068_v19, %v1066_v17  ;;  %v574_v16 = vld [vmem:[%s4203_s16 + $0x660] sm:$0xff]  ;;  %v3176_v20 = vpack.c.bf16 %v577_v11, %v575_v10 }
  0xb8   : > { %v327_v17 = vld [vmem:[%s4301_s20 + $0x2a8] sm:$0xff]  ;;  %v590_v11 = vld [vmem:[%s4203_s16 + $0x6e0] sm:$0xff] }
  0xb9   : > { %3139 = vmatpush1.bf16.msra.mxu1 %v3138_v28  ;;  %v560_v28 = vld [vmem:[%s4203_s16 + $0x5f0] sm:$0xff] }
  0xba   : > { %3651 = vmatpush1.bf16.msra.mxu0 %v3650_v29  ;;  %3141 = vmatprep.subr.bf16.mxu1 %v3140_v30  ;;  %v1070_v29 = vld [vmem:[%s4203_s16 + $0x15e0] sm:$0xff]  ;;  %v3672_v30 = vpack.c.bf16 %v1073_v23, %v1071_v22  ;;  %v3162_v36 = vpack.c.bf16 %v560_v28, %v558_v27  ;;  %v581_v27 = vld [vmem:[%s4203_s16 + $0x698] sm:$0xff]  ;;  %v1091_v28 = vld [vmem:[%s4203_s16 + $0x1688] sm:$0xff] }
  0xbb   : > { %3653 = vmatprep.subr.bf16.mxu0 %v3652_v34  ;;  %v1075_v34 = vld [vmem:[%s4203_s16 + $0x1608] sm:$0xff]  ;;  %v3674_v37 = vpack.c.bf16 %v1072_v31, %v1070_v29  ;;  %v1086_v22 = vld [vmem:[%s4203_s16 + $0x1660] sm:$0xff]  ;;  %v1093_v29 = vld [vmem:[%s4203_s16 + $0x1698] sm:$0xff]  ;;  %v3178_v31 = vpack.c.bf16 %v576_v21, %v574_v16 }
  0xbc   : > { %v326_v23 = vld [vmem:[%s4301_s20 + $0x2a0] sm:$0xff]  ;;  %v595_v16 = vld [vmem:[%s4203_s16 + $0x708] sm:$0xff] }
  0xbd   : > { %3143 = vmatpush1.bf16.msra.mxu1 %v3142_v40  ;;  %v564_v40 = vld [vmem:[%s4203_s16 + $0x610] sm:$0xff] }
  0xbe   : > { %3655 = vmatpush1.bf16.msra.mxu0 %v3654_v41  ;;  %3145 = vmatprep.subr.bf16.mxu1 %v3144_v42  ;;  %v1074_v41 = vld [vmem:[%s4203_s16 + $0x1600] sm:$0xff]  ;;  %v3676_v42 = vpack.c.bf16 %v1077_v35, %v1075_v34  ;;  %v3166_v49 = vpack.c.bf16 %v564_v40, %v562_v39  ;;  %v3692_v40 = vpack.c.bf16 %v1093_v29, %v1091_v28  ;;  %v599_v28 = vld [vmem:[%s4203_s16 + $0x728] sm:$0xff]  ;;  %v601_v29 = vld [vmem:[%s4203_s16 + $0x738] sm:$0xff] }
  0xbf   : > { %3657 = vmatprep.subr.bf16.mxu0 %v3656_v46  ;;  %v1079_v46 = vld [vmem:[%s4203_s16 + $0x1628] sm:$0xff]  ;;  %v3678_v51 = vpack.c.bf16 %v1076_v43, %v1074_v41  ;;  %v342_v34 = vld [vmem:[%s4301_s20 + $0x320] sm:$0xff]  ;;  %v1092_v41 = vld [vmem:[%s4203_s16 + $0x1690] sm:$0xff] }
  0xc0   : > { %v3680_v56 = vpack.c.bf16 %v1081_v47, %v1079_v46  ;;  %v358_v39 = vld [vmem:[%s4301_s20 + $0x3a0] sm:$0xff]  ;;  %v585_v43 = vld [vmem:[%s4203_s16 + $0x6b8] sm:$0xff] }
  0xc1   : > { %3147 = vmatpush1.bf16.msra.mxu1 %v3146_v52  ;;  %v3168_v52 = vpack.c.bf16 %v569_v45, %v567_v44  ;;  %v1095_v44 = vld [vmem:[%s4203_s16 + $0x16a8] sm:$0xff]  ;;  %v1097_v45 = vld [vmem:[%s4203_s16 + $0x16b8] sm:$0xff] }
  0xc2   : > { %3659 = vmatpush1.bf16.msra.mxu0 %v3658_v53  ;;  %3149 = vmatprep.subr.bf16.mxu1 %v3148_v54  ;;  %v566_v53 = vld [vmem:[%s4203_s16 + $0x620] sm:$0xff]  ;;  %v568_v54 = vld [vmem:[%s4203_s16 + $0x630] sm:$0xff]  ;;  %v249_v46 = vld [vmem:[%s4301_s20 + $0x38] sm:$0xff] }
  0xc3   : > { %3661 = vmatprep.subr.bf16.mxu0 %v3660_v58  ;;  %v571_v58 = vld [vmem:[%s4203_s16 + $0x648] sm:$0xff]  ;;  %v3170_v63 = vpack.c.bf16 %v568_v54, %v566_v53  ;;  %v1094_v53 = vld [vmem:[%s4203_s16 + $0x16a0] sm:$0xff]  ;;  %v3696_v54 = vpack.c.bf16 %v1097_v45, %v1095_v44 }
  0xc4   : > { %v3172_v4 = vpack.c.bf16 %v573_v59, %v571_v58  ;;  %v1099_v58 = vld [vmem:[%s4203_s16 + $0x16c8] sm:$0xff]  ;;  %v1101_v59 = vld [vmem:[%s4203_s16 + $0x16d8] sm:$0xff]  ;;  %v3698_v61 = vpack.c.bf16 %v1096_v55, %v1094_v53 }
  0xc5   : > { %3151 = vmatpush1.bf16.msra.mxu1 %v3150_v0  ;;  %v570_v0 = vld [vmem:[%s4203_s16 + $0x640] sm:$0xff]  ;;  %v609_v53 = vld [vmem:[%s4203_s16 + $0x778] sm:$0xff] }
  0xc6   : > { %3663 = vmatpush1.bf16.msra.mxu0 %v3662_v1  ;;  %3153 = vmatprep.subr.bf16.mxu1 %v3152_v2  ;;  %v295_v1 = vld [vmem:[%s4301_s20 + $0x1a8] sm:$0xff]  ;;  %v278_v2 = vld [vmem:[%s4301_s20 + $0x120] sm:$0xff]  ;;  %v3174_v15 = vpack.c.bf16 %v572_v5, %v570_v0  ;;  %v588_v0 = vld [vmem:[%s4203_s16 + $0x6d0] sm:$0xff] }
  0xc7   : > { %3665 = vmatprep.subr.bf16.mxu0 %v3664_v6  ;;  %v1082_v6 = vld [vmem:[%s4203_s16 + $0x1640] sm:$0xff]  ;;  %v593_v5 = vld [vmem:[%s4203_s16 + $0x6f8] sm:$0xff] }
  0xc8   : > { %v3686_v19 = vpack.c.bf16 %v1084_v9, %v1082_v6  ;;  %v1103_v6 = vld [vmem:[%s4203_s16 + $0x16e8] sm:$0xff]  ;;  %v1121_v55 = vld [vmem:[%s4203_s16 + $0x1778] sm:$0xff] }
  0xc9   : > { %3155 = vmatpush1.bf16.msra.mxu1 %v3154_v12  ;;  %v1087_v12 = vld [vmem:[%s4203_s16 + $0x1668] sm:$0xff] }
  0xca   : > { %3667 = vmatpush1.bf16.msra.mxu0 %v3666_v13  ;;  %3157 = vmatprep.subr.bf16.mxu1 %v3156_v14  ;;  %v1089_v13 = vld [vmem:[%s4203_s16 + $0x1678] sm:$0xff]  ;;  %v311_v14 = vld [vmem:[%s4301_s20 + $0x228] sm:$0xff] }
  0xcb   : > { %3669 = vmatprep.subr.bf16.mxu0 %v3668_v18  ;;  %v310_v18 = vld [vmem:[%s4301_s20 + $0x220] sm:$0xff] }
  0xcd   : > { %3159 = vmatpush1.bf16.msra.mxu1 %v3158_v24  ;;  %v3688_v24 = vpack.c.bf16 %v1089_v13, %v1087_v12  ;;  %v592_v12 = vld [vmem:[%s4203_s16 + $0x6f0] sm:$0xff]  ;;  %v1102_v13 = vld [vmem:[%s4203_s16 + $0x16e0] sm:$0xff] }
  0xce   : > { %3671 = vmatpush1.bf16.msra.mxu0 %v3670_v25  ;;  %3161 = vmatprep.subr.bf16.mxu1 %v3160_v26  ;;  %v1088_v25 = vld [vmem:[%s4203_s16 + $0x1670] sm:$0xff]  ;;  %v579_v26 = vld [vmem:[%s4203_s16 + $0x688] sm:$0xff] }
  0xcf   : > { %3673 = vmatprep.subr.bf16.mxu0 %v3672_v30  ;;  %v343_v30 = vld [vmem:[%s4301_s20 + $0x328] sm:$0xff]  ;;  %v3690_v35 = vpack.c.bf16 %v1088_v25, %v1086_v22  ;;  %v1106_v25 = vld [vmem:[%s4203_s16 + $0x1700] sm:$0xff] }
  0xd1   : > { %3163 = vmatpush1.bf16.msra.mxu1 %v3162_v36  ;;  %v3180_v36 = vpack.c.bf16 %v581_v27, %v579_v26  ;;  %v1108_v27 = vld [vmem:[%s4203_s16 + $0x1710] sm:$0xff] }
  0xd2   : > { %3675 = vmatpush1.bf16.msra.mxu0 %v3674_v37  ;;  %3165 = vmatprep.subr.bf16.mxu1 %v3164_v38  ;;  %v580_v37 = vld [vmem:[%s4203_s16 + $0x690] sm:$0xff]  ;;  %v1090_v38 = vld [vmem:[%s4203_s16 + $0x1680] sm:$0xff] }
  0xd3   : > { %3677 = vmatprep.subr.bf16.mxu0 %v3676_v42  ;;  %v583_v42 = vld [vmem:[%s4203_s16 + $0x6a8] sm:$0xff]  ;;  %v3182_v47 = vpack.c.bf16 %v580_v37, %v578_v32  ;;  %v1110_v37 = vld [vmem:[%s4203_s16 + $0x1720] sm:$0xff] }
  0xd4   : > { %1637 = vmatmul.mubr.f32.vlgmr.msra.gmra.mrb[0].mxu1 %v246_v48  ;;  %v265_v48 = vld [vmem:[%s4301_s20 + $0xb8] sm:$0xff] }
  0xd5   : > { %3167 = vmatpush1.bf16.msra.mxu1 %v3166_v49  ;;  %2349 = vmatmul.mubr.f32.vlgmr.msra.gmra.mrb[0].mxu0 %v262_v50  ;;  %v3694_v49 = vpack.c.bf16 %v1092_v41, %v1090_v38  ;;  %v3184_v50 = vpack.c.bf16 %v585_v43, %v583_v42  ;;  %v605_v41 = vld [vmem:[%s4203_s16 + $0x758] sm:$0xff]  ;;  %v1115_v42 = vld [vmem:[%s4203_s16 + $0x1748] sm:$0xff] }
  0xd6   : > { %3679 = vmatpush1.bf16.msra.mxu0 %v3678_v51  ;;  %3169 = vmatprep.subr.bf16.mxu1 %v3168_v52  ;;  %v582_v51 = vld [vmem:[%s4203_s16 + $0x6a0] sm:$0xff]  ;;  %v584_v52 = vld [vmem:[%s4203_s16 + $0x6b0] sm:$0xff]  ;;  %v1117_v43 = vld [vmem:[%s4203_s16 + $0x1758] sm:$0xff] }
  0xd7   : > { %3681 = vmatprep.subr.bf16.mxu0 %v3680_v56  ;;  %1642 = vmatprep.mubr.f32.mxu1 %v279_v62  ;;  %v587_v56 = vld [vmem:[%s4203_s16 + $0x6c8] sm:$0xff]  ;;  %v3186_v60 = vpack.c.bf16 %v584_v52, %v582_v51  ;;  %v1116_v51 = vld [vmem:[%s4203_s16 + $0x1750] sm:$0xff] }
  0xd8   : > { %2354 = vmatprep.mubr.f32.mxu0 %v295_v1  ;;  %1643 = vmatmul.mubr.f32.gmra.mrb[2].mxu1 %v278_v2  ;;  %v3188_v62 = vpack.c.bf16 %v589_v57, %v587_v56  ;;  %v1098_v1 = vld [vmem:[%s4203_s16 + $0x16c0] sm:$0xff]  ;;  %v3700_v2 = vpack.c.bf16 %v1101_v59, %v1099_v58  ;;  %v607_v52 = vld [vmem:[%s4203_s16 + $0x768] sm:$0xff] }
  0xd9   : > { %3171 = vmatpush1.bf16.msra.mxu1 %v3170_v63  ;;  %2355 = vmatmul.mubr.f32.gmra.mrb[2].mxu0 %v294_v7  ;;  %v586_v63 = vld [vmem:[%s4203_s16 + $0x6c0] sm:$0xff]  ;;  %v1105_v7 = vld [vmem:[%s4203_s16 + $0x16f8] sm:$0xff]  ;;  %v3208_v58 = vpack.c.bf16 %v609_v53, %v607_v52 }
  0xda   : > { %3683 = vmatpush1.bf16.msra.mxu0 %v3682_v3  ;;  %3173 = vmatprep.subr.bf16.mxu1 %v3172_v4  ;;  %v1100_v3 = vld [vmem:[%s4203_s16 + $0x16d0] sm:$0xff]  ;;  %v591_v4 = vld [vmem:[%s4203_s16 + $0x6e8] sm:$0xff]  ;;  %v606_v59 = vld [vmem:[%s4203_s16 + $0x760] sm:$0xff] }
  0xdb   : > { %3685 = vmatprep.subr.bf16.mxu0 %v3684_v8  ;;  %1648 = vmatprep.mubr.f32.mxu1 %v311_v14  ;;  %v3190_v8 = vpack.c.bf16 %v588_v0, %v586_v63  ;;  %v3702_v9 = vpack.c.bf16 %v1100_v3, %v1098_v1  ;;  %v3192_v10 = vpack.c.bf16 %v593_v5, %v591_v4  ;;  %v1120_v63 = vld [vmem:[%s4203_s16 + $0x1770] sm:$0xff]  ;;  %v611_v0 = vld [vmem:[%s4203_s16 + $0x788] sm:$0xff]  ;;  %v613_v1 = vld [vmem:[%s4203_s16 + $0x798] sm:$0xff] }
  0xdc   : > { %2360 = vmatprep.mubr.f32.mxu0 %v327_v17  ;;  %1649 = vmatmul.mubr.f32.gmra.mrb[4].mxu1 %v310_v18  ;;  %v3704_v14 = vpack.c.bf16 %v1105_v7, %v1103_v6  ;;  %v597_v17 = vld [vmem:[%s4203_s16 + $0x718] sm:$0xff]  ;;  %v1107_v18 = vld [vmem:[%s4203_s16 + $0x1708] sm:$0xff]  ;;  %v3212_v6 = vpack.c.bf16 %v613_v1, %v611_v0  ;;  %v610_v7 = vld [vmem:[%s4203_s16 + $0x780] sm:$0xff] }
  0xdd   : > { %3175 = vmatpush1.bf16.msra.mxu1 %v3174_v15  ;;  %2361 = vmatmul.mubr.f32.gmra.mrb[4].mxu0 %v326_v23  ;;  %v1104_v15 = vld [vmem:[%s4203_s16 + $0x16f0] sm:$0xff]  ;;  %v3196_v22 = vpack.c.bf16 %v597_v17, %v595_v16  ;;  %v594_v23 = vld [vmem:[%s4203_s16 + $0x700] sm:$0xff]  ;;  %v1125_v3 = vld [vmem:[%s4203_s16 + $0x1798] sm:$0xff] }
  0xde   : > { %3687 = vmatpush1.bf16.msra.mxu0 %v3686_v19  ;;  %3177 = vmatprep.subr.bf16.mxu1 %v3176_v20  ;;  %v1109_v19 = vld [vmem:[%s4203_s16 + $0x1718] sm:$0xff]  ;;  %v3194_v20 = vpack.c.bf16 %v592_v12, %v590_v11  ;;  %v3706_v21 = vpack.c.bf16 %v1104_v15, %v1102_v13  ;;  %v1124_v11 = vld [vmem:[%s4203_s16 + $0x1790] sm:$0xff]  ;;  %v615_v12 = vld [vmem:[%s4203_s16 + $0x7a8] sm:$0xff] }
  0xdf   : > { %3689 = vmatprep.subr.bf16.mxu0 %v3688_v24  ;;  %1654 = vmatprep.mubr.f32.mxu1 %v343_v30  ;;  %v596_v24 = vld [vmem:[%s4203_s16 + $0x710] sm:$0xff]  ;;  %v3708_v26 = vpack.c.bf16 %v1109_v19, %v1107_v18  ;;  %v1111_v30 = vld [vmem:[%s4203_s16 + $0x1728] sm:$0xff]  ;;  %v617_v13 = vld [vmem:[%s4203_s16 + $0x7b8] sm:$0xff] }
  0xe0   : > { %2366 = vmatprep.mubr.f32.mxu0 %v359_v33  ;;  %1655 = vmatmul.mubr.f32.gmra.mrb[6].mxu1 %v342_v34  ;;  %v3198_v32 = vpack.c.bf16 %v596_v24, %v594_v23  ;;  %v3710_v33 = vpack.c.bf16 %v1108_v27, %v1106_v25  ;;  %v3200_v34 = vpack.c.bf16 %v601_v29, %v599_v28  ;;  %v1129_v15 = vld [vmem:[%s4203_s16 + $0x17b8] sm:$0xff]  ;;  %v614_v19 = vld [vmem:[%s4203_s16 + $0x7a0] sm:$0xff]  ;;  %v1128_v23 = vld [vmem:[%s4203_s16 + $0x17b0] sm:$0xff] }
  0xe1   : > { %3179 = vmatpush1.bf16.msra.mxu1 %v3178_v31  ;;  %2367 = vmatmul.mubr.f32.gmra.mrb[6].mxu0 %v358_v39  ;;  %v1113_v31 = vld [vmem:[%s4203_s16 + $0x1738] sm:$0xff]  ;;  %v1112_v39 = vld [vmem:[%s4203_s16 + $0x1730] sm:$0xff]  ;;  %v3216_v18 = vpack.c.bf16 %v617_v13, %v615_v12  ;;  %v619_v24 = vld [vmem:[%s4203_s16 + $0x7c8] sm:$0xff] }
  0xe2   : > { %3691 = vmatpush1.bf16.msra.mxu0 %v3690_v35  ;;  %3181 = vmatprep.subr.bf16.mxu1 %v3180_v36  ;;  %v598_v35 = vld [vmem:[%s4203_s16 + $0x720] sm:$0xff]  ;;  %v600_v36 = vld [vmem:[%s4203_s16 + $0x730] sm:$0xff]  ;;  %v3712_v38 = vpack.c.bf16 %v1113_v31, %v1111_v30  ;;  %v3714_v45 = vpack.c.bf16 %v1112_v39, %v1110_v37  ;;  %v621_v25 = vld [vmem:[%s4203_s16 + $0x7d8] sm:$0xff] }
  0xe3   : > { %3693 = vmatprep.subr.bf16.mxu0 %v3692_v40  ;;  %1725 = vmatprep.mubr.f32.mxu1 %v249_v46  ;;  %v603_v40 = vld [vmem:[%s4203_s16 + $0x748] sm:$0xff]  ;;  %v3202_v44 = vpack.c.bf16 %v600_v36, %v598_v35  ;;  %v1133_v27 = vld [vmem:[%s4203_s16 + $0x17d8] sm:$0xff]  ;;  %v3220_v30 = vpack.c.bf16 %v621_v25, %v619_v24  ;;  %v618_v31 = vld [vmem:[%s4203_s16 + $0x7c0] sm:$0xff] }
  0xe4   : > { %2437 = vmatprep.mubr.f32.mxu0 %v265_v48  ;;  %v3204_v46 = vpack.c.bf16 %v605_v41, %v603_v40  ;;  %v604_v48 = vld [vmem:[%s4203_s16 + $0x750] sm:$0xff]  ;;  %v623_v36 = vld [vmem:[%s4203_s16 + $0x7e8] sm:$0xff]  ;;  %v625_v37 = vld [vmem:[%s4203_s16 + $0x7f8] sm:$0xff] }
  0xe5   : > { %3183 = vmatpush1.bf16.msra.mxu1 %v3182_v47  ;;  %v602_v47 = vld [vmem:[%s4203_s16 + $0x740] sm:$0xff]  ;;  %v1132_v35 = vld [vmem:[%s4203_s16 + $0x17d0] sm:$0xff]  ;;  %v1137_v39 = vld [vmem:[%s4203_s16 + $0x17f8] sm:$0xff] }
  0xe6   : > { %3695 = vmatpush1.bf16.msra.mxu0 %v3694_v49  ;;  %3185 = vmatprep.subr.bf16.mxu1 %v3184_v50  ;;  %v1114_v49 = vld [vmem:[%s4203_s16 + $0x1740] sm:$0xff]  ;;  %v3716_v50 = vpack.c.bf16 %v1117_v43, %v1115_v42  ;;  %v3206_v56 = vpack.c.bf16 %v604_v48, %v602_v47  ;;  %v3224_v42 = vpack.c.bf16 %v625_v37, %v623_v36  ;;  %v1136_v47 = vld [vmem:[%s4203_s16 + $0x17f0] sm:$0xff]  ;;  %v627_v48 = vld [vmem:[%s4203_s16 + $0x808] sm:$0xff] }
  0xe7   : > { %3697 = vmatprep.subr.bf16.mxu0 %v3696_v54  ;;  %v1119_v54 = vld [vmem:[%s4203_s16 + $0x1768] sm:$0xff]  ;;  %v3718_v57 = vpack.c.bf16 %v1116_v51, %v1114_v49  ;;  %v622_v43 = vld [vmem:[%s4203_s16 + $0x7e0] sm:$0xff]  ;;  %v629_v49 = vld [vmem:[%s4203_s16 + $0x818] sm:$0xff] }
  0xe8   : > { %v1141_v51 = vld [vmem:[%s4203_s16 + $0x1818] sm:$0xff]  ;;  %v248_v0 = vld [vmem:[%s4301_s20 + $0x30] sm:$0xff]  ;;  %v1147_v12 = vld [vmem:[%s4203_s16 + $0x1848] sm:$0xff] }
  0xe9   : > { %3187 = vmatpush1.bf16.msra.mxu1 %v3186_v60  ;;  %v608_v60 = vld [vmem:[%s4203_s16 + $0x770] sm:$0xff]  ;;  %v1149_v13 = vld [vmem:[%s4203_s16 + $0x1858] sm:$0xff] }
  0xea   : > { %3699 = vmatpush1.bf16.msra.mxu0 %v3698_v61  ;;  %3189 = vmatprep.subr.bf16.mxu1 %v3188_v62  ;;  %v1118_v61 = vld [vmem:[%s4203_s16 + $0x1760] sm:$0xff]  ;;  %v3720_v62 = vpack.c.bf16 %v1121_v55, %v1119_v54  ;;  %v3210_v4 = vpack.c.bf16 %v608_v60, %v606_v59  ;;  %v3228_v54 = vpack.c.bf16 %v629_v49, %v627_v48  ;;  %v1140_v59 = vld [vmem:[%s4203_s16 + $0x1810] sm:$0xff]  ;;  %v631_v60 = vld [vmem:[%s4203_s16 + $0x828] sm:$0xff] }
  0xeb   : > { %3701 = vmatprep.subr.bf16.mxu0 %v3700_v2  ;;  %v1123_v2 = vld [vmem:[%s4203_s16 + $0x1788] sm:$0xff]  ;;  %v3722_v5 = vpack.c.bf16 %v1120_v63, %v1118_v61  ;;  %v626_v55 = vld [vmem:[%s4203_s16 + $0x800] sm:$0xff]  ;;  %v633_v61 = vld [vmem:[%s4203_s16 + $0x838] sm:$0xff]  ;;  %v3748_v24 = vpack.c.bf16 %v1149_v13, %v1147_v12 }
  0xec   : > { %v1145_v63 = vld [vmem:[%s4203_s16 + $0x1838] sm:$0xff]  ;;  %v1148_v25 = vld [vmem:[%s4203_s16 + $0x1850] sm:$0xff]  ;;  %v642_v48 = vld [vmem:[%s4203_s16 + $0x880] sm:$0xff] }
  0xed   : > { %3191 = vmatpush1.bf16.msra.mxu1 %v3190_v8  ;;  %v612_v8 = vld [vmem:[%s4203_s16 + $0x790] sm:$0xff]  ;;  %v361_v49 = vld [vmem:[%s4301_s20 + $0x3b8] sm:$0xff] }
  0xee   : > { %3703 = vmatpush1.bf16.msra.mxu0 %v3702_v9  ;;  %3193 = vmatprep.subr.bf16.mxu1 %v3192_v10  ;;  %v1122_v9 = vld [vmem:[%s4203_s16 + $0x1780] sm:$0xff]  ;;  %v3724_v10 = vpack.c.bf16 %v1125_v3, %v1123_v2  ;;  %v3214_v16 = vpack.c.bf16 %v612_v8, %v610_v7  ;;  %v264_v2 = vld [vmem:[%s4301_s20 + $0xb0] sm:$0xff] }
  0xef   : > { %3705 = vmatprep.subr.bf16.mxu0 %v3704_v14  ;;  %v1127_v14 = vld [vmem:[%s4203_s16 + $0x17a8] sm:$0xff]  ;;  %v3726_v17 = vpack.c.bf16 %v1124_v11, %v1122_v9  ;;  %v1142_v7 = vld [vmem:[%s4203_s16 + $0x1820] sm:$0xff]  ;;  %v1144_v9 = vld [vmem:[%s4203_s16 + $0x1830] sm:$0xff] }
  0xf0   : > { %v637_v11 = vld [vmem:[%s4203_s16 + $0x858] sm:$0xff]  ;;  %v640_v37 = vld [vmem:[%s4203_s16 + $0x870] sm:$0xff] }
  0xf1   : > { %3195 = vmatpush1.bf16.msra.mxu1 %v3194_v20  ;;  %v616_v20 = vld [vmem:[%s4203_s16 + $0x7b0] sm:$0xff] }
  0xf2   : > { %3707 = vmatpush1.bf16.msra.mxu0 %v3706_v21  ;;  %3197 = vmatprep.subr.bf16.mxu1 %v3196_v22  ;;  %v1126_v21 = vld [vmem:[%s4203_s16 + $0x17a0] sm:$0xff]  ;;  %v3728_v22 = vpack.c.bf16 %v1129_v15, %v1127_v14  ;;  %v3218_v28 = vpack.c.bf16 %v616_v20, %v614_v19  ;;  %v281_v14 = vld [vmem:[%s4301_s20 + $0x138] sm:$0xff]  ;;  %v3746_v19 = vpack.c.bf16 %v1144_v9, %v1142_v7  ;;  %v1160_v7 = vld [vmem:[%s4203_s16 + $0x18b0] sm:$0xff] }
  0xf3   : > { %3709 = vmatprep.subr.bf16.mxu0 %v3708_v26  ;;  %v1131_v26 = vld [vmem:[%s4203_s16 + $0x17c8] sm:$0xff]  ;;  %v3730_v29 = vpack.c.bf16 %v1128_v23, %v1126_v21  ;;  %v636_v21 = vld [vmem:[%s4203_s16 + $0x850] sm:$0xff]  ;;  %v653_v9 = vld [vmem:[%s4203_s16 + $0x8d8] sm:$0xff] }
  0xf4   : > { %v296_v23 = vld [vmem:[%s4301_s20 + $0x1b0] sm:$0xff] }
  0xf5   : > { %3199 = vmatpush1.bf16.msra.mxu1 %v3198_v32  ;;  %v620_v32 = vld [vmem:[%s4203_s16 + $0x7d0] sm:$0xff] }
  0xf6   : > { %3711 = vmatpush1.bf16.msra.mxu0 %v3710_v33  ;;  %3201 = vmatprep.subr.bf16.mxu1 %v3200_v34  ;;  %v1130_v33 = vld [vmem:[%s4203_s16 + $0x17c0] sm:$0xff]  ;;  %v3732_v34 = vpack.c.bf16 %v1133_v27, %v1131_v26  ;;  %v3222_v40 = vpack.c.bf16 %v620_v32, %v618_v31  ;;  %v639_v26 = vld [vmem:[%s4203_s16 + $0x868] sm:$0xff]  ;;  %v641_v27 = vld [vmem:[%s4203_s16 + $0x878] sm:$0xff] }
  0xf7   : > { %3713 = vmatprep.subr.bf16.mxu0 %v3712_v38  ;;  %v1135_v38 = vld [vmem:[%s4203_s16 + $0x17e8] sm:$0xff]  ;;  %v3734_v41 = vpack.c.bf16 %v1132_v35, %v1130_v33  ;;  %v638_v32 = vld [vmem:[%s4203_s16 + $0x860] sm:$0xff]  ;;  %v329_v33 = vld [vmem:[%s4301_s20 + $0x2b8] sm:$0xff]  ;;  %v3240_v36 = vpack.c.bf16 %v641_v27, %v639_v26 }
  0xf8   : > { %v654_v27 = vld [vmem:[%s4203_s16 + $0x8e0] sm:$0xff] }
  0xf9   : > { %3203 = vmatpush1.bf16.msra.mxu1 %v3202_v44  ;;  %v624_v44 = vld [vmem:[%s4203_s16 + $0x7f0] sm:$0xff] }
  0xfa   : > { %3715 = vmatpush1.bf16.msra.mxu0 %v3714_v45  ;;  %3205 = vmatprep.subr.bf16.mxu1 %v3204_v46  ;;  %v1134_v45 = vld [vmem:[%s4203_s16 + $0x17e0] sm:$0xff]  ;;  %v3736_v46 = vpack.c.bf16 %v1137_v39, %v1135_v38  ;;  %v3226_v52 = vpack.c.bf16 %v624_v44, %v622_v43  ;;  %v328_v39 = vld [vmem:[%s4301_s20 + $0x2b0] sm:$0xff]  ;;  %v645_v43 = vld [vmem:[%s4203_s16 + $0x898] sm:$0xff] }
  0xfb   : > { %3717 = vmatprep.subr.bf16.mxu0 %v3716_v50  ;;  %v1139_v50 = vld [vmem:[%s4203_s16 + $0x1808] sm:$0xff]  ;;  %v3738_v53 = vpack.c.bf16 %v1136_v47, %v1134_v45  ;;  %v1150_v38 = vld [vmem:[%s4203_s16 + $0x1860] sm:$0xff]  ;;  %v1157_v45 = vld [vmem:[%s4203_s16 + $0x1898] sm:$0xff]  ;;  %v3242_v47 = vpack.c.bf16 %v640_v37, %v638_v32 }
  0xfc   : > { %v1155_v44 = vld [vmem:[%s4203_s16 + $0x1888] sm:$0xff] }
  0xfd   : > { %3207 = vmatpush1.bf16.msra.mxu1 %v3206_v56  ;;  %v628_v56 = vld [vmem:[%s4203_s16 + $0x810] sm:$0xff]  ;;  %v659_v32 = vld [vmem:[%s4203_s16 + $0x908] sm:$0xff] }
  0xfe   : > { %3719 = vmatpush1.bf16.msra.mxu0 %v3718_v57  ;;  %3209 = vmatprep.subr.bf16.mxu1 %v3208_v58  ;;  %v1138_v57 = vld [vmem:[%s4203_s16 + $0x1800] sm:$0xff]  ;;  %v3740_v58 = vpack.c.bf16 %v1141_v51, %v1139_v50  ;;  %v3230_v1 = vpack.c.bf16 %v628_v56, %v626_v55  ;;  %v344_v50 = vld [vmem:[%s4301_s20 + $0x330] sm:$0xff]  ;;  %v3756_v56 = vpack.c.bf16 %v1157_v45, %v1155_v44  ;;  %v663_v44 = vld [vmem:[%s4203_s16 + $0x928] sm:$0xff] }
  0xff   : > { %3721 = vmatprep.subr.bf16.mxu0 %v3720_v62  ;;  %v1143_v62 = vld [vmem:[%s4203_s16 + $0x1828] sm:$0xff]  ;;  %v3742_v3 = vpack.c.bf16 %v1140_v59, %v1138_v57  ;;  %v360_v55 = vld [vmem:[%s4301_s20 + $0x3b0] sm:$0xff]  ;;  %v649_v59 = vld [vmem:[%s4203_s16 + $0x8b8] sm:$0xff] }
 0x100   : > { %v3744_v8 = vpack.c.bf16 %v1145_v63, %v1143_v62  ;;  %v1156_v57 = vld [vmem:[%s4203_s16 + $0x1890] sm:$0xff]  ;;  %v251_v62 = vld [vmem:[%s4301_s20 + $0x48] sm:$0xff]  ;;  %v665_v45 = vld [vmem:[%s4203_s16 + $0x938] sm:$0xff] }
 0x101   : > { %3211 = vmatpush1.bf16.msra.mxu1 %v3210_v4  ;;  %v3232_v4 = vpack.c.bf16 %v633_v61, %v631_v60  ;;  %v1159_v60 = vld [vmem:[%s4203_s16 + $0x18a8] sm:$0xff]  ;;  %v1161_v61 = vld [vmem:[%s4203_s16 + $0x18b8] sm:$0xff] }
 0x102   : > { %3723 = vmatpush1.bf16.msra.mxu0 %v3722_v5  ;;  %3213 = vmatprep.subr.bf16.mxu1 %v3212_v6  ;;  %v630_v5 = vld [vmem:[%s4203_s16 + $0x820] sm:$0xff]  ;;  %v632_v6 = vld [vmem:[%s4203_s16 + $0x830] sm:$0xff] }
 0x103   : > { %3725 = vmatprep.subr.bf16.mxu0 %v3724_v10  ;;  %v635_v10 = vld [vmem:[%s4203_s16 + $0x848] sm:$0xff]  ;;  %v3234_v15 = vpack.c.bf16 %v632_v6, %v630_v5  ;;  %v1158_v5 = vld [vmem:[%s4203_s16 + $0x18a0] sm:$0xff]  ;;  %v3760_v6 = vpack.c.bf16 %v1161_v61, %v1159_v60 }
 0x104   : > { %v3236_v20 = vpack.c.bf16 %v637_v11, %v635_v10  ;;  %v1163_v10 = vld [vmem:[%s4203_s16 + $0x18c8] sm:$0xff]  ;;  %v1165_v11 = vld [vmem:[%s4203_s16 + $0x18d8] sm:$0xff]  ;;  %v3762_v13 = vpack.c.bf16 %v1160_v7, %v1158_v5 }
 0x105   : > { %3215 = vmatpush1.bf16.msra.mxu1 %v3214_v16  ;;  %v634_v16 = vld [vmem:[%s4203_s16 + $0x840] sm:$0xff]  ;;  %v673_v5 = vld [vmem:[%s4203_s16 + $0x978] sm:$0xff] }
 0x106   : > { %3727 = vmatpush1.bf16.msra.mxu0 %v3726_v17  ;;  %3217 = vmatprep.subr.bf16.mxu1 %v3216_v18  ;;  %v297_v17 = vld [vmem:[%s4301_s20 + $0x1b8] sm:$0xff]  ;;  %v280_v18 = vld [vmem:[%s4301_s20 + $0x130] sm:$0xff]  ;;  %v3238_v31 = vpack.c.bf16 %v636_v21, %v634_v16 }
 0x107   : > { %3729 = vmatprep.subr.bf16.mxu0 %v3728_v22  ;;  %v1146_v22 = vld [vmem:[%s4203_s16 + $0x1840] sm:$0xff]  ;;  %v652_v16 = vld [vmem:[%s4203_s16 + $0x8d0] sm:$0xff]  ;;  %v657_v21 = vld [vmem:[%s4203_s16 + $0x8f8] sm:$0xff] }
 0x108   : > { %v3750_v35 = vpack.c.bf16 %v1148_v25, %v1146_v22  ;;  %v1167_v22 = vld [vmem:[%s4203_s16 + $0x18e8] sm:$0xff]  ;;  %v1185_v7 = vld [vmem:[%s4203_s16 + $0x1978] sm:$0xff] }
 0x109   : > { %3219 = vmatpush1.bf16.msra.mxu1 %v3218_v28  ;;  %v1151_v28 = vld [vmem:[%s4203_s16 + $0x1868] sm:$0xff] }
 0x10a   : > { %3731 = vmatpush1.bf16.msra.mxu0 %v3730_v29  ;;  %3221 = vmatprep.subr.bf16.mxu1 %v3220_v30  ;;  %v1153_v29 = vld [vmem:[%s4203_s16 + $0x1878] sm:$0xff] }
 0x10b   : > { %3733 = vmatprep.subr.bf16.mxu0 %v3732_v34  ;;  %v313_v30 = vld [vmem:[%s4301_s20 + $0x238] sm:$0xff]  ;;  %v312_v34 = vld [vmem:[%s4301_s20 + $0x230] sm:$0xff] }
 0x10d   : > { %3223 = vmatpush1.bf16.msra.mxu1 %v3222_v40  ;;  %v3752_v40 = vpack.c.bf16 %v1153_v29, %v1151_v28  ;;  %v656_v28 = vld [vmem:[%s4203_s16 + $0x8f0] sm:$0xff]  ;;  %v1166_v29 = vld [vmem:[%s4203_s16 + $0x18e0] sm:$0xff] }
 0x10e   : > { %3735 = vmatpush1.bf16.msra.mxu0 %v3734_v41  ;;  %3225 = vmatprep.subr.bf16.mxu1 %v3224_v42  ;;  %v1152_v41 = vld [vmem:[%s4203_s16 + $0x1870] sm:$0xff]  ;;  %v643_v42 = vld [vmem:[%s4203_s16 + $0x888] sm:$0xff] }
 0x10f   : > { %3737 = vmatprep.subr.bf16.mxu0 %v3736_v46  ;;  %v345_v46 = vld [vmem:[%s4301_s20 + $0x338] sm:$0xff]  ;;  %v3754_v51 = vpack.c.bf16 %v1152_v41, %v1150_v38  ;;  %v1170_v41 = vld [vmem:[%s4203_s16 + $0x1900] sm:$0xff] }
 0x111   : > { %3227 = vmatpush1.bf16.msra.mxu1 %v3226_v52  ;;  %v3244_v52 = vpack.c.bf16 %v645_v43, %v643_v42  ;;  %v1172_v43 = vld [vmem:[%s4203_s16 + $0x1910] sm:$0xff] }
 0x112   : > { %3739 = vmatpush1.bf16.msra.mxu0 %v3738_v53  ;;  %3229 = vmatprep.subr.bf16.mxu1 %v3228_v54  ;;  %v644_v53 = vld [vmem:[%s4203_s16 + $0x890] sm:$0xff]  ;;  %v1154_v54 = vld [vmem:[%s4203_s16 + $0x1880] sm:$0xff] }
 0x113   : > { %3741 = vmatprep.subr.bf16.mxu0 %v3740_v58  ;;  %v647_v58 = vld [vmem:[%s4203_s16 + $0x8a8] sm:$0xff]  ;;  %v3246_v63 = vpack.c.bf16 %v644_v53, %v642_v48  ;;  %v1174_v53 = vld [vmem:[%s4203_s16 + $0x1920] sm:$0xff] }
 0x114   : > { %1726 = vmatmul.mubr.f32.vlgmr.msra.gmra.mrb[0].mxu1 %v248_v0  ;;  %v267_v0 = vld [vmem:[%s4301_s20 + $0xc8] sm:$0xff] }
 0x115   : > { %3231 = vmatpush1.bf16.msra.mxu1 %v3230_v1  ;;  %2438 = vmatmul.mubr.f32.vlgmr.msra.gmra.mrb[0].mxu0 %v264_v2  ;;  %v3758_v1 = vpack.c.bf16 %v1156_v57, %v1154_v54  ;;  %v3248_v2 = vpack.c.bf16 %v649_v59, %v647_v58  ;;  %v669_v57 = vld [vmem:[%s4203_s16 + $0x958] sm:$0xff]  ;;  %v1179_v58 = vld [vmem:[%s4203_s16 + $0x1948] sm:$0xff] }
 0x116   : > { %3743 = vmatpush1.bf16.msra.mxu0 %v3742_v3  ;;  %3233 = vmatprep.subr.bf16.mxu1 %v3232_v4  ;;  %v646_v3 = vld [vmem:[%s4203_s16 + $0x8a0] sm:$0xff]  ;;  %v648_v4 = vld [vmem:[%s4203_s16 + $0x8b0] sm:$0xff]  ;;  %v1181_v59 = vld [vmem:[%s4203_s16 + $0x1958] sm:$0xff] }
 0x117   : > { %3745 = vmatprep.subr.bf16.mxu0 %v3744_v8  ;;  %1731 = vmatprep.mubr.f32.mxu1 %v281_v14  ;;  %v651_v8 = vld [vmem:[%s4203_s16 + $0x8c8] sm:$0xff]  ;;  %v3250_v12 = vpack.c.bf16 %v648_v4, %v646_v3  ;;  %v1180_v3 = vld [vmem:[%s4203_s16 + $0x1950] sm:$0xff] }
 0x118   : > { %2443 = vmatprep.mubr.f32.mxu0 %v297_v17  ;;  %1732 = vmatmul.mubr.f32.gmra.mrb[2].mxu1 %v280_v18  ;;  %v3252_v14 = vpack.c.bf16 %v653_v9, %v651_v8  ;;  %v1162_v17 = vld [vmem:[%s4203_s16 + $0x18c0] sm:$0xff]  ;;  %v3764_v18 = vpack.c.bf16 %v1165_v11, %v1163_v10  ;;  %v671_v4 = vld [vmem:[%s4203_s16 + $0x968] sm:$0xff] }
 0x119   : > { %3235 = vmatpush1.bf16.msra.mxu1 %v3234_v15  ;;  %2444 = vmatmul.mubr.f32.gmra.mrb[2].mxu0 %v296_v23  ;;  %v650_v15 = vld [vmem:[%s4203_s16 + $0x8c0] sm:$0xff]  ;;  %v1169_v23 = vld [vmem:[%s4203_s16 + $0x18f8] sm:$0xff]  ;;  %v3272_v10 = vpack.c.bf16 %v673_v5, %v671_v4 }
 0x11a   : > { %3747 = vmatpush1.bf16.msra.mxu0 %v3746_v19  ;;  %3237 = vmatprep.subr.bf16.mxu1 %v3236_v20  ;;  %v1164_v19 = vld [vmem:[%s4203_s16 + $0x18d0] sm:$0xff]  ;;  %v655_v20 = vld [vmem:[%s4203_s16 + $0x8e8] sm:$0xff]  ;;  %v670_v11 = vld [vmem:[%s4203_s16 + $0x960] sm:$0xff] }
 0x11b   : > { %3749 = vmatprep.subr.bf16.mxu0 %v3748_v24  ;;  %1737 = vmatprep.mubr.f32.mxu1 %v313_v30  ;;  %v3254_v24 = vpack.c.bf16 %v652_v16, %v650_v15  ;;  %v3766_v25 = vpack.c.bf16 %v1164_v19, %v1162_v17  ;;  %v3256_v26 = vpack.c.bf16 %v657_v21, %v655_v20  ;;  %v1184_v15 = vld [vmem:[%s4203_s16 + $0x1970] sm:$0xff]  ;;  %v675_v16 = vld [vmem:[%s4203_s16 + $0x988] sm:$0xff]  ;;  %v677_v17 = vld [vmem:[%s4203_s16 + $0x998] sm:$0xff] }
 0x11c   : > { %2449 = vmatprep.mubr.f32.mxu0 %v329_v33  ;;  %1738 = vmatmul.mubr.f32.gmra.mrb[4].mxu1 %v312_v34  ;;  %v3768_v30 = vpack.c.bf16 %v1169_v23, %v1167_v22  ;;  %v661_v33 = vld [vmem:[%s4203_s16 + $0x918] sm:$0xff]  ;;  %v1171_v34 = vld [vmem:[%s4203_s16 + $0x1908] sm:$0xff]  ;;  %v3276_v22 = vpack.c.bf16 %v677_v17, %v675_v16  ;;  %v674_v23 = vld [vmem:[%s4203_s16 + $0x980] sm:$0xff] }
 0x11d   : > { %3239 = vmatpush1.bf16.msra.mxu1 %v3238_v31  ;;  %2450 = vmatmul.mubr.f32.gmra.mrb[4].mxu0 %v328_v39  ;;  %v1168_v31 = vld [vmem:[%s4203_s16 + $0x18f0] sm:$0xff]  ;;  %v3260_v38 = vpack.c.bf16 %v661_v33, %v659_v32  ;;  %v658_v39 = vld [vmem:[%s4203_s16 + $0x900] sm:$0xff]  ;;  %v1189_v19 = vld [vmem:[%s4203_s16 + $0x1998] sm:$0xff] }
 0x11e   : > { %3751 = vmatpush1.bf16.msra.mxu0 %v3750_v35  ;;  %3241 = vmatprep.subr.bf16.mxu1 %v3240_v36  ;;  %v1173_v35 = vld [vmem:[%s4203_s16 + $0x1918] sm:$0xff]  ;;  %v3258_v36 = vpack.c.bf16 %v656_v28, %v654_v27  ;;  %v3770_v37 = vpack.c.bf16 %v1168_v31, %v1166_v29  ;;  %v1188_v27 = vld [vmem:[%s4203_s16 + $0x1990] sm:$0xff]  ;;  %v679_v28 = vld [vmem:[%s4203_s16 + $0x9a8] sm:$0xff] }
 0x11f   : > { %3753 = vmatprep.subr.bf16.mxu0 %v3752_v40  ;;  %1743 = vmatprep.mubr.f32.mxu1 %v345_v46  ;;  %v660_v40 = vld [vmem:[%s4203_s16 + $0x910] sm:$0xff]  ;;  %v3772_v42 = vpack.c.bf16 %v1173_v35, %v1171_v34  ;;  %v1175_v46 = vld [vmem:[%s4203_s16 + $0x1928] sm:$0xff]  ;;  %v681_v29 = vld [vmem:[%s4203_s16 + $0x9b8] sm:$0xff] }
 0x120   : > { %2455 = vmatprep.mubr.f32.mxu0 %v361_v49  ;;  %1744 = vmatmul.mubr.f32.gmra.mrb[6].mxu1 %v344_v50  ;;  %v3262_v48 = vpack.c.bf16 %v660_v40, %v658_v39  ;;  %v3774_v49 = vpack.c.bf16 %v1172_v43, %v1170_v41  ;;  %v3264_v50 = vpack.c.bf16 %v665_v45, %v663_v44  ;;  %v1193_v31 = vld [vmem:[%s4203_s16 + $0x19b8] sm:$0xff]  ;;  %v678_v35 = vld [vmem:[%s4203_s16 + $0x9a0] sm:$0xff]  ;;  %v1192_v39 = vld [vmem:[%s4203_s16 + $0x19b0] sm:$0xff] }
 0x121   : > { %3243 = vmatpush1.bf16.msra.mxu1 %v3242_v47  ;;  %2456 = vmatmul.mubr.f32.gmra.mrb[6].mxu0 %v360_v55  ;;  %v1177_v47 = vld [vmem:[%s4203_s16 + $0x1938] sm:$0xff]  ;;  %v1176_v55 = vld [vmem:[%s4203_s16 + $0x1930] sm:$0xff]  ;;  %v3280_v34 = vpack.c.bf16 %v681_v29, %v679_v28  ;;  %v683_v40 = vld [vmem:[%s4203_s16 + $0x9c8] sm:$0xff] }
 0x122   : > { %3755 = vmatpush1.bf16.msra.mxu0 %v3754_v51  ;;  %3245 = vmatprep.subr.bf16.mxu1 %v3244_v52  ;;  %v662_v51 = vld [vmem:[%s4203_s16 + $0x920] sm:$0xff]  ;;  %v664_v52 = vld [vmem:[%s4203_s16 + $0x930] sm:$0xff]  ;;  %v3776_v54 = vpack.c.bf16 %v1177_v47, %v1175_v46  ;;  %v3778_v61 = vpack.c.bf16 %v1176_v55, %v1174_v53  ;;  %v685_v41 = vld [vmem:[%s4203_s16 + $0x9d8] sm:$0xff] }
 0x123   : > { %3757 = vmatprep.subr.bf16.mxu0 %v3756_v56  ;;  %1814 = vmatprep.mubr.f32.mxu1 %v251_v62  ;;  %v667_v56 = vld [vmem:[%s4203_s16 + $0x948] sm:$0xff]  ;;  %v3266_v60 = vpack.c.bf16 %v664_v52, %v662_v51  ;;  %v1197_v43 = vld [vmem:[%s4203_s16 + $0x19d8] sm:$0xff]  ;;  %v3284_v46 = vpack.c.bf16 %v685_v41, %v683_v40  ;;  %v682_v47 = vld [vmem:[%s4203_s16 + $0x9c0] sm:$0xff] }
 0x124   : > { %2526 = vmatprep.mubr.f32.mxu0 %v267_v0  ;;  %v3268_v62 = vpack.c.bf16 %v669_v57, %v667_v56  ;;  %v668_v0 = vld [vmem:[%s4203_s16 + $0x950] sm:$0xff]  ;;  %v687_v52 = vld [vmem:[%s4203_s16 + $0x9e8] sm:$0xff]  ;;  %v689_v53 = vld [vmem:[%s4203_s16 + $0x9f8] sm:$0xff] }
 0x125   : > { %3247 = vmatpush1.bf16.msra.mxu1 %v3246_v63  ;;  %v666_v63 = vld [vmem:[%s4203_s16 + $0x940] sm:$0xff]  ;;  %v1196_v51 = vld [vmem:[%s4203_s16 + $0x19d0] sm:$0xff]  ;;  %v1201_v55 = vld [vmem:[%s4203_s16 + $0x19f8] sm:$0xff] }
 0x126   : > { %3759 = vmatpush1.bf16.msra.mxu0 %v3758_v1  ;;  %3249 = vmatprep.subr.bf16.mxu1 %v3248_v2  ;;  %v1178_v1 = vld [vmem:[%s4203_s16 + $0x1940] sm:$0xff]  ;;  %v3780_v2 = vpack.c.bf16 %v1181_v59, %v1179_v58  ;;  %v3270_v8 = vpack.c.bf16 %v668_v0, %v666_v63  ;;  %v3288_v58 = vpack.c.bf16 %v689_v53, %v687_v52  ;;  %v1200_v63 = vld [vmem:[%s4203_s16 + $0x19f0] sm:$0xff]  ;;  %v691_v0 = vld [vmem:[%s4203_s16 + $0xa08] sm:$0xff] }
 0x127   : > { %3761 = vmatprep.subr.bf16.mxu0 %v3760_v6  ;;  %v1183_v6 = vld [vmem:[%s4203_s16 + $0x1968] sm:$0xff]  ;;  %v3782_v9 = vpack.c.bf16 %v1180_v3, %v1178_v1  ;;  %v686_v59 = vld [vmem:[%s4203_s16 + $0x9e0] sm:$0xff]  ;;  %v693_v1 = vld [vmem:[%s4203_s16 + $0xa18] sm:$0xff] }
 0x128   : > { %v1205_v3 = vld [vmem:[%s4203_s16 + $0x1a18] sm:$0xff]  ;;  %v250_v16 = vld [vmem:[%s4301_s20 + $0x40] sm:$0xff]  ;;  %v1211_v28 = vld [vmem:[%s4203_s16 + $0x1a48] sm:$0xff] }
 0x129   : > { %3251 = vmatpush1.bf16.msra.mxu1 %v3250_v12  ;;  %v672_v12 = vld [vmem:[%s4203_s16 + $0x970] sm:$0xff]  ;;  %v1213_v29 = vld [vmem:[%s4203_s16 + $0x1a58] sm:$0xff] }
 0x12a   : > { %3763 = vmatpush1.bf16.msra.mxu0 %v3762_v13  ;;  %3253 = vmatprep.subr.bf16.mxu1 %v3252_v14  ;;  %v1182_v13 = vld [vmem:[%s4203_s16 + $0x1960] sm:$0xff]  ;;  %v3784_v14 = vpack.c.bf16 %v1185_v7, %v1183_v6  ;;  %v3274_v20 = vpack.c.bf16 %v672_v12, %v670_v11  ;;  %v3292_v6 = vpack.c.bf16 %v693_v1, %v691_v0  ;;  %v1204_v11 = vld [vmem:[%s4203_s16 + $0x1a10] sm:$0xff]  ;;  %v695_v12 = vld [vmem:[%s4203_s16 + $0xa28] sm:$0xff] }
 0x12b   : > { %3765 = vmatprep.subr.bf16.mxu0 %v3764_v18  ;;  %v1187_v18 = vld [vmem:[%s4203_s16 + $0x1988] sm:$0xff]  ;;  %v3786_v21 = vpack.c.bf16 %v1184_v15, %v1182_v13  ;;  %v690_v7 = vld [vmem:[%s4203_s16 + $0xa00] sm:$0xff]  ;;  %v697_v13 = vld [vmem:[%s4203_s16 + $0xa38] sm:$0xff]  ;;  %v3812_v40 = vpack.c.bf16 %v1213_v29, %v1211_v28 }
 0x12c   : > { %v1209_v15 = vld [vmem:[%s4203_s16 + $0x1a38] sm:$0xff]  ;;  %v1212_v41 = vld [vmem:[%s4203_s16 + $0x1a50] sm:$0xff]  ;;  %v706_v0 = vld [vmem:[%s4203_s16 + $0xa80] sm:$0xff] }
 0x12d   : > { %3255 = vmatpush1.bf16.msra.mxu1 %v3254_v24  ;;  %v676_v24 = vld [vmem:[%s4203_s16 + $0x990] sm:$0xff]  ;;  %v363_v1 = vld [vmem:[%s4301_s20 + $0x3c8] sm:$0xff] }
 0x12e   : > { %3767 = vmatpush1.bf16.msra.mxu0 %v3766_v25  ;;  %3257 = vmatprep.subr.bf16.mxu1 %v3256_v26  ;;  %v1186_v25 = vld [vmem:[%s4203_s16 + $0x1980] sm:$0xff]  ;;  %v3788_v26 = vpack.c.bf16 %v1189_v19, %v1187_v18  ;;  %v3278_v32 = vpack.c.bf16 %v676_v24, %v674_v23  ;;  %v704_v53 = vld [vmem:[%s4203_s16 + $0xa70] sm:$0xff] }
 0x12f   : > { %3769 = vmatprep.subr.bf16.mxu0 %v3768_v30  ;;  %v1191_v30 = vld [vmem:[%s4203_s16 + $0x19a8] sm:$0xff]  ;;  %v3790_v33 = vpack.c.bf16 %v1188_v27, %v1186_v25  ;;  %v266_v18 = vld [vmem:[%s4301_s20 + $0xc0] sm:$0xff]  ;;  %v1208_v25 = vld [vmem:[%s4203_s16 + $0x1a30] sm:$0xff] }
 0x130   : > { %v1206_v23 = vld [vmem:[%s4203_s16 + $0x1a20] sm:$0xff]  ;;  %v701_v27 = vld [vmem:[%s4203_s16 + $0xa58] sm:$0xff] }
 0x131   : > { %3259 = vmatpush1.bf16.msra.mxu1 %v3258_v36  ;;  %v680_v36 = vld [vmem:[%s4203_s16 + $0x9b0] sm:$0xff] }
 0x132   : > { %3771 = vmatpush1.bf16.msra.mxu0 %v3770_v37  ;;  %3261 = vmatprep.subr.bf16.mxu1 %v3260_v38  ;;  %v1190_v37 = vld [vmem:[%s4203_s16 + $0x19a0] sm:$0xff]  ;;  %v3792_v38 = vpack.c.bf16 %v1193_v31, %v1191_v30  ;;  %v3282_v44 = vpack.c.bf16 %v680_v36, %v678_v35  ;;  %v283_v30 = vld [vmem:[%s4301_s20 + $0x148] sm:$0xff]  ;;  %v3810_v35 = vpack.c.bf16 %v1208_v25, %v1206_v23  ;;  %v1224_v23 = vld [vmem:[%s4203_s16 + $0x1ab0] sm:$0xff] }
 0x133   : > { %3773 = vmatprep.subr.bf16.mxu0 %v3772_v42  ;;  %v1195_v42 = vld [vmem:[%s4203_s16 + $0x19c8] sm:$0xff]  ;;  %v3794_v45 = vpack.c.bf16 %v1192_v39, %v1190_v37  ;;  %v700_v37 = vld [vmem:[%s4203_s16 + $0xa50] sm:$0xff]  ;;  %v298_v39 = vld [vmem:[%s4301_s20 + $0x1c0] sm:$0xff] }
 0x134   : > { %v717_v25 = vld [vmem:[%s4203_s16 + $0xad8] sm:$0xff] }
 0x135   : > { %3263 = vmatpush1.bf16.msra.mxu1 %v3262_v48  ;;  %v684_v48 = vld [vmem:[%s4203_s16 + $0x9d0] sm:$0xff] }
 0x136   : > { %3775 = vmatpush1.bf16.msra.mxu0 %v3774_v49  ;;  %3265 = vmatprep.subr.bf16.mxu1 %v3264_v50  ;;  %v1194_v49 = vld [vmem:[%s4203_s16 + $0x19c0] sm:$0xff]  ;;  %v3796_v50 = vpack.c.bf16 %v1197_v43, %v1195_v42  ;;  %v3286_v56 = vpack.c.bf16 %v684_v48, %v682_v47  ;;  %v703_v42 = vld [vmem:[%s4203_s16 + $0xa68] sm:$0xff]  ;;  %v705_v43 = vld [vmem:[%s4203_s16 + $0xa78] sm:$0xff] }
 0x137   : > { %3777 = vmatprep.subr.bf16.mxu0 %v3776_v54  ;;  %v1199_v54 = vld [vmem:[%s4203_s16 + $0x19e8] sm:$0xff]  ;;  %v3798_v57 = vpack.c.bf16 %v1196_v51, %v1194_v49  ;;  %v702_v48 = vld [vmem:[%s4203_s16 + $0xa60] sm:$0xff]  ;;  %v3304_v52 = vpack.c.bf16 %v705_v43, %v703_v42 }
 0x138   : > { %v331_v49 = vld [vmem:[%s4301_s20 + $0x2c8] sm:$0xff]  ;;  %v718_v43 = vld [vmem:[%s4203_s16 + $0xae0] sm:$0xff] }
 0x139   : > { %3267 = vmatpush1.bf16.msra.mxu1 %v3266_v60  ;;  %v688_v60 = vld [vmem:[%s4203_s16 + $0x9f0] sm:$0xff] }
 0x13a   : > { %3779 = vmatpush1.bf16.msra.mxu0 %v3778_v61  ;;  %3269 = vmatprep.subr.bf16.mxu1 %v3268_v62  ;;  %v1198_v61 = vld [vmem:[%s4203_s16 + $0x19e0] sm:$0xff]  ;;  %v3800_v62 = vpack.c.bf16 %v1201_v55, %v1199_v54  ;;  %v3290_v4 = vpack.c.bf16 %v688_v60, %v686_v59  ;;  %v709_v59 = vld [vmem:[%s4203_s16 + $0xa98] sm:$0xff]  ;;  %v1219_v60 = vld [vmem:[%s4203_s16 + $0x1a88] sm:$0xff] }
 0x13b   : > { %3781 = vmatprep.subr.bf16.mxu0 %v3780_v2  ;;  %v1203_v2 = vld [vmem:[%s4203_s16 + $0x1a08] sm:$0xff]  ;;  %v3802_v5 = vpack.c.bf16 %v1200_v63, %v1198_v61  ;;  %v1214_v54 = vld [vmem:[%s4203_s16 + $0x1a60] sm:$0xff]  ;;  %v1221_v61 = vld [vmem:[%s4203_s16 + $0x1a98] sm:$0xff]  ;;  %v3306_v63 = vpack.c.bf16 %v704_v53, %v702_v48 }
 0x13c   : > { %v330_v55 = vld [vmem:[%s4301_s20 + $0x2c0] sm:$0xff]  ;;  %v723_v48 = vld [vmem:[%s4203_s16 + $0xb08] sm:$0xff] }
 0x13d   : > { %3271 = vmatpush1.bf16.msra.mxu1 %v3270_v8  ;;  %v692_v8 = vld [vmem:[%s4203_s16 + $0xa10] sm:$0xff] }
 0x13e   : > { %3783 = vmatpush1.bf16.msra.mxu0 %v3782_v9  ;;  %3273 = vmatprep.subr.bf16.mxu1 %v3272_v10  ;;  %v1202_v9 = vld [vmem:[%s4203_s16 + $0x1a00] sm:$0xff]  ;;  %v3804_v10 = vpack.c.bf16 %v1205_v3, %v1203_v2  ;;  %v3294_v17 = vpack.c.bf16 %v692_v8, %v690_v7  ;;  %v3820_v8 = vpack.c.bf16 %v1221_v61, %v1219_v60  ;;  %v727_v60 = vld [vmem:[%s4203_s16 + $0xb28] sm:$0xff]  ;;  %v729_v61 = vld [vmem:[%s4203_s16 + $0xb38] sm:$0xff] }
 0x13f   : > { %3785 = vmatprep.subr.bf16.mxu0 %v3784_v14  ;;  %v1207_v14 = vld [vmem:[%s4203_s16 + $0x1a28] sm:$0xff]  ;;  %v3806_v19 = vpack.c.bf16 %v1204_v11, %v1202_v9  ;;  %v346_v2 = vld [vmem:[%s4301_s20 + $0x340] sm:$0xff]  ;;  %v1220_v9 = vld [vmem:[%s4203_s16 + $0x1a90] sm:$0xff] }
 0x140   : > { %v3808_v24 = vpack.c.bf16 %v1209_v15, %v1207_v14  ;;  %v362_v7 = vld [vmem:[%s4301_s20 + $0x3c0] sm:$0xff]  ;;  %v713_v11 = vld [vmem:[%s4203_s16 + $0xab8] sm:$0xff] }
 0x141   : > { %3275 = vmatpush1.bf16.msra.mxu1 %v3274_v20  ;;  %v3296_v20 = vpack.c.bf16 %v697_v13, %v695_v12  ;;  %v1223_v12 = vld [vmem:[%s4203_s16 + $0x1aa8] sm:$0xff]  ;;  %v1225_v13 = vld [vmem:[%s4203_s16 + $0x1ab8] sm:$0xff] }
 0x142   : > { %3787 = vmatpush1.bf16.msra.mxu0 %v3786_v21  ;;  %3277 = vmatprep.subr.bf16.mxu1 %v3276_v22  ;;  %v694_v21 = vld [vmem:[%s4203_s16 + $0xa20] sm:$0xff]  ;;  %v696_v22 = vld [vmem:[%s4203_s16 + $0xa30] sm:$0xff]  ;;  %v253_v14 = vld [vmem:[%s4301_s20 + $0x58] sm:$0xff] }
 0x143   : > { %3789 = vmatprep.subr.bf16.mxu0 %v3788_v26  ;;  %v699_v26 = vld [vmem:[%s4203_s16 + $0xa48] sm:$0xff]  ;;  %v3298_v31 = vpack.c.bf16 %v696_v22, %v694_v21  ;;  %v1222_v21 = vld [vmem:[%s4203_s16 + $0x1aa0] sm:$0xff]  ;;  %v3824_v22 = vpack.c.bf16 %v1225_v13, %v1223_v12 }
 0x144   : > { %v3300_v36 = vpack.c.bf16 %v701_v27, %v699_v26  ;;  %v1227_v26 = vld [vmem:[%s4203_s16 + $0x1ac8] sm:$0xff]  ;;  %v1229_v27 = vld [vmem:[%s4203_s16 + $0x1ad8] sm:$0xff]  ;;  %v3826_v29 = vpack.c.bf16 %v1224_v23, %v1222_v21 }
 0x145   : > { %3279 = vmatpush1.bf16.msra.mxu1 %v3278_v32  ;;  %v698_v32 = vld [vmem:[%s4203_s16 + $0xa40] sm:$0xff]  ;;  %v737_v21 = vld [vmem:[%s4203_s16 + $0xb78] sm:$0xff] }
 0x146   : > { %3791 = vmatpush1.bf16.msra.mxu0 %v3790_v33  ;;  %3281 = vmatprep.subr.bf16.mxu1 %v3280_v34  ;;  %v299_v33 = vld [vmem:[%s4301_s20 + $0x1c8] sm:$0xff]  ;;  %v282_v34 = vld [vmem:[%s4301_s20 + $0x140] sm:$0xff]  ;;  %v3302_v47 = vpack.c.bf16 %v700_v37, %v698_v32  ;;  %v716_v32 = vld [vmem:[%s4203_s16 + $0xad0] sm:$0xff] }
 0x147   : > { %3793 = vmatprep.subr.bf16.mxu0 %v3792_v38  ;;  %v1210_v38 = vld [vmem:[%s4203_s16 + $0x1a40] sm:$0xff]  ;;  %v721_v37 = vld [vmem:[%s4203_s16 + $0xaf8] sm:$0xff] }
 0x148   : > { %v3814_v51 = vpack.c.bf16 %v1212_v41, %v1210_v38  ;;  %v1231_v38 = vld [vmem:[%s4203_s16 + $0x1ae8] sm:$0xff]  ;;  %v1249_v23 = vld [vmem:[%s4203_s16 + $0x1b78] sm:$0xff] }
 0x149   : > { %3283 = vmatpush1.bf16.msra.mxu1 %v3282_v44  ;;  %v1215_v44 = vld [vmem:[%s4203_s16 + $0x1a68] sm:$0xff] }
 0x14a   : > { %3795 = vmatpush1.bf16.msra.mxu0 %v3794_v45  ;;  %3285 = vmatprep.subr.bf16.mxu1 %v3284_v46  ;;  %v1217_v45 = vld [vmem:[%s4203_s16 + $0x1a78] sm:$0xff]  ;;  %v315_v46 = vld [vmem:[%s4301_s20 + $0x248] sm:$0xff] }
 0x14b   : > { %3797 = vmatprep.subr.bf16.mxu0 %v3796_v50  ;;  %v314_v50 = vld [vmem:[%s4301_s20 + $0x240] sm:$0xff] }
 0x14d   : > { %3287 = vmatpush1.bf16.msra.mxu1 %v3286_v56  ;;  %v3816_v56 = vpack.c.bf16 %v1217_v45, %v1215_v44  ;;  %v720_v44 = vld [vmem:[%s4203_s16 + $0xaf0] sm:$0xff]  ;;  %v1230_v45 = vld [vmem:[%s4203_s16 + $0x1ae0] sm:$0xff] }
 0x14e   : > { %3799 = vmatpush1.bf16.msra.mxu0 %v3798_v57  ;;  %3289 = vmatprep.subr.bf16.mxu1 %v3288_v58  ;;  %v1216_v57 = vld [vmem:[%s4203_s16 + $0x1a70] sm:$0xff]  ;;  %v707_v58 = vld [vmem:[%s4203_s16 + $0xa88] sm:$0xff] }
 0x14f   : > { %3801 = vmatprep.subr.bf16.mxu0 %v3800_v62  ;;  %v347_v62 = vld [vmem:[%s4301_s20 + $0x348] sm:$0xff]  ;;  %v3818_v3 = vpack.c.bf16 %v1216_v57, %v1214_v54  ;;  %v1234_v57 = vld [vmem:[%s4203_s16 + $0x1b00] sm:$0xff] }
 0x151   : > { %3291 = vmatpush1.bf16.msra.mxu1 %v3290_v4  ;;  %v3308_v4 = vpack.c.bf16 %v709_v59, %v707_v58  ;;  %v1236_v59 = vld [vmem:[%s4203_s16 + $0x1b10] sm:$0xff] }
 0x152   : > { %3803 = vmatpush1.bf16.msra.mxu0 %v3802_v5  ;;  %3293 = vmatprep.subr.bf16.mxu1 %v3292_v6  ;;  %v708_v5 = vld [vmem:[%s4203_s16 + $0xa90] sm:$0xff]  ;;  %v1218_v6 = vld [vmem:[%s4203_s16 + $0x1a80] sm:$0xff] }
 0x153   : > { %3805 = vmatprep.subr.bf16.mxu0 %v3804_v10  ;;  %v711_v10 = vld [vmem:[%s4203_s16 + $0xaa8] sm:$0xff]  ;;  %v3310_v15 = vpack.c.bf16 %v708_v5, %v706_v0  ;;  %v1238_v5 = vld [vmem:[%s4203_s16 + $0x1b20] sm:$0xff] }
 0x154   : > { %1815 = vmatmul.mubr.f32.vlgmr.msra.gmra.mrb[0].mxu1 %v250_v16  ;;  %v269_v16 = vld [vmem:[%s4301_s20 + $0xd8] sm:$0xff] }
 0x155   : > { %3295 = vmatpush1.bf16.msra.mxu1 %v3294_v17  ;;  %2527 = vmatmul.mubr.f32.vlgmr.msra.gmra.mrb[0].mxu0 %v266_v18  ;;  %v3822_v17 = vpack.c.bf16 %v1220_v9, %v1218_v6  ;;  %v3312_v18 = vpack.c.bf16 %v713_v11, %v711_v10  ;;  %v733_v9 = vld [vmem:[%s4203_s16 + $0xb58] sm:$0xff]  ;;  %v1243_v10 = vld [vmem:[%s4203_s16 + $0x1b48] sm:$0xff] }
 0x156   : > { %3807 = vmatpush1.bf16.msra.mxu0 %v3806_v19  ;;  %3297 = vmatprep.subr.bf16.mxu1 %v3296_v20  ;;  %v710_v19 = vld [vmem:[%s4203_s16 + $0xaa0] sm:$0xff]  ;;  %v712_v20 = vld [vmem:[%s4203_s16 + $0xab0] sm:$0xff]  ;;  %v1245_v11 = vld [vmem:[%s4203_s16 + $0x1b58] sm:$0xff] }
 0x157   : > { %3809 = vmatprep.subr.bf16.mxu0 %v3808_v24  ;;  %1820 = vmatprep.mubr.f32.mxu1 %v283_v30  ;;  %v715_v24 = vld [vmem:[%s4203_s16 + $0xac8] sm:$0xff]  ;;  %v3314_v28 = vpack.c.bf16 %v712_v20, %v710_v19  ;;  %v1244_v19 = vld [vmem:[%s4203_s16 + $0x1b50] sm:$0xff] }
 0x158   : > { %2532 = vmatprep.mubr.f32.mxu0 %v299_v33  ;;  %1821 = vmatmul.mubr.f32.gmra.mrb[2].mxu1 %v282_v34  ;;  %v3316_v30 = vpack.c.bf16 %v717_v25, %v715_v24  ;;  %v1226_v33 = vld [vmem:[%s4203_s16 + $0x1ac0] sm:$0xff]  ;;  %v3828_v34 = vpack.c.bf16 %v1229_v27, %v1227_v26  ;;  %v735_v20 = vld [vmem:[%s4203_s16 + $0xb68] sm:$0xff] }
 0x159   : > { %3299 = vmatpush1.bf16.msra.mxu1 %v3298_v31  ;;  %2533 = vmatmul.mubr.f32.gmra.mrb[2].mxu0 %v298_v39  ;;  %v714_v31 = vld [vmem:[%s4203_s16 + $0xac0] sm:$0xff]  ;;  %v1233_v39 = vld [vmem:[%s4203_s16 + $0x1af8] sm:$0xff]  ;;  %v3336_v26 = vpack.c.bf16 %v737_v21, %v735_v20 }
 0x15a   : > { %3811 = vmatpush1.bf16.msra.mxu0 %v3810_v35  ;;  %3301 = vmatprep.subr.bf16.mxu1 %v3300_v36  ;;  %v1228_v35 = vld [vmem:[%s4203_s16 + $0x1ad0] sm:$0xff]  ;;  %v719_v36 = vld [vmem:[%s4203_s16 + $0xae8] sm:$0xff]  ;;  %v734_v27 = vld [vmem:[%s4203_s16 + $0xb60] sm:$0xff] }
 0x15b   : > { %3813 = vmatprep.subr.bf16.mxu0 %v3812_v40  ;;  %1826 = vmatprep.mubr.f32.mxu1 %v315_v46  ;;  %v3318_v40 = vpack.c.bf16 %v716_v32, %v714_v31  ;;  %v3830_v41 = vpack.c.bf16 %v1228_v35, %v1226_v33  ;;  %v3320_v42 = vpack.c.bf16 %v721_v37, %v719_v36  ;;  %v1248_v31 = vld [vmem:[%s4203_s16 + $0x1b70] sm:$0xff]  ;;  %v739_v32 = vld [vmem:[%s4203_s16 + $0xb88] sm:$0xff]  ;;  %v741_v33 = vld [vmem:[%s4203_s16 + $0xb98] sm:$0xff] }
 0x15c   : > { %2538 = vmatprep.mubr.f32.mxu0 %v331_v49  ;;  %1827 = vmatmul.mubr.f32.gmra.mrb[4].mxu1 %v314_v50  ;;  %v3832_v46 = vpack.c.bf16 %v1233_v39, %v1231_v38  ;;  %v725_v49 = vld [vmem:[%s4203_s16 + $0xb18] sm:$0xff]  ;;  %v1235_v50 = vld [vmem:[%s4203_s16 + $0x1b08] sm:$0xff]  ;;  %v3340_v38 = vpack.c.bf16 %v741_v33, %v739_v32  ;;  %v738_v39 = vld [vmem:[%s4203_s16 + $0xb80] sm:$0xff] }
 0x15d   : > { %3303 = vmatpush1.bf16.msra.mxu1 %v3302_v47  ;;  %2539 = vmatmul.mubr.f32.gmra.mrb[4].mxu0 %v330_v55  ;;  %v1232_v47 = vld [vmem:[%s4203_s16 + $0x1af0] sm:$0xff]  ;;  %v3324_v54 = vpack.c.bf16 %v725_v49, %v723_v48  ;;  %v722_v55 = vld [vmem:[%s4203_s16 + $0xb00] sm:$0xff]  ;;  %v1253_v35 = vld [vmem:[%s4203_s16 + $0x1b98] sm:$0xff] }
 0x15e   : > { %3815 = vmatpush1.bf16.msra.mxu0 %v3814_v51  ;;  %3305 = vmatprep.subr.bf16.mxu1 %v3304_v52  ;;  %v1237_v51 = vld [vmem:[%s4203_s16 + $0x1b18] sm:$0xff]  ;;  %v3322_v52 = vpack.c.bf16 %v720_v44, %v718_v43  ;;  %v3834_v53 = vpack.c.bf16 %v1232_v47, %v1230_v45  ;;  %v1252_v43 = vld [vmem:[%s4203_s16 + $0x1b90] sm:$0xff]  ;;  %v743_v44 = vld [vmem:[%s4203_s16 + $0xba8] sm:$0xff] }
 0x15f   : > { %3817 = vmatprep.subr.bf16.mxu0 %v3816_v56  ;;  %1832 = vmatprep.mubr.f32.mxu1 %v347_v62  ;;  %v724_v56 = vld [vmem:[%s4203_s16 + $0xb10] sm:$0xff]  ;;  %v3836_v58 = vpack.c.bf16 %v1237_v51, %v1235_v50  ;;  %v1239_v62 = vld [vmem:[%s4203_s16 + $0x1b28] sm:$0xff]  ;;  %v745_v45 = vld [vmem:[%s4203_s16 + $0xbb8] sm:$0xff] }
 0x160   : > { %2544 = vmatprep.mubr.f32.mxu0 %v363_v1  ;;  %1833 = vmatmul.mubr.f32.gmra.mrb[6].mxu1 %v346_v2  ;;  %v3326_v0 = vpack.c.bf16 %v724_v56, %v722_v55  ;;  %v3838_v1 = vpack.c.bf16 %v1236_v59, %v1234_v57  ;;  %v3328_v2 = vpack.c.bf16 %v729_v61, %v727_v60  ;;  %v1257_v47 = vld [vmem:[%s4203_s16 + $0x1bb8] sm:$0xff]  ;;  %v742_v51 = vld [vmem:[%s4203_s16 + $0xba0] sm:$0xff]  ;;  %v1256_v55 = vld [vmem:[%s4203_s16 + $0x1bb0] sm:$0xff] }
 0x161   : > { %3307 = vmatpush1.bf16.msra.mxu1 %v3306_v63  ;;  %2545 = vmatmul.mubr.f32.gmra.mrb[6].mxu0 %v362_v7  ;;  %v1241_v63 = vld [vmem:[%s4203_s16 + $0x1b38] sm:$0xff]  ;;  %v1240_v7 = vld [vmem:[%s4203_s16 + $0x1b30] sm:$0xff]  ;;  %v3344_v50 = vpack.c.bf16 %v745_v45, %v743_v44  ;;  %v747_v56 = vld [vmem:[%s4203_s16 + $0xbc8] sm:$0xff] }
 0x162   : > { %3819 = vmatpush1.bf16.msra.mxu0 %v3818_v3  ;;  %3309 = vmatprep.subr.bf16.mxu1 %v3308_v4  ;;  %v726_v3 = vld [vmem:[%s4203_s16 + $0xb20] sm:$0xff]  ;;  %v728_v4 = vld [vmem:[%s4203_s16 + $0xb30] sm:$0xff]  ;;  %v3840_v6 = vpack.c.bf16 %v1241_v63, %v1239_v62  ;;  %v3842_v13 = vpack.c.bf16 %v1240_v7, %v1238_v5  ;;  %v749_v57 = vld [vmem:[%s4203_s16 + $0xbd8] sm:$0xff] }
 0x163   : > { %3821 = vmatprep.subr.bf16.mxu0 %v3820_v8  ;;  %1903 = vmatprep.mubr.f32.mxu1 %v253_v14  ;;  %v731_v8 = vld [vmem:[%s4203_s16 + $0xb48] sm:$0xff]  ;;  %v3330_v12 = vpack.c.bf16 %v728_v4, %v726_v3  ;;  %v1261_v59 = vld [vmem:[%s4203_s16 + $0x1bd8] sm:$0xff]  ;;  %v3348_v62 = vpack.c.bf16 %v749_v57, %v747_v56  ;;  %v746_v63 = vld [vmem:[%s4203_s16 + $0xbc0] sm:$0xff] }
 0x164   : > { %2615 = vmatprep.mubr.f32.mxu0 %v269_v16  ;;  %v3332_v14 = vpack.c.bf16 %v733_v9, %v731_v8  ;;  %v732_v16 = vld [vmem:[%s4203_s16 + $0xb50] sm:$0xff]  ;;  %v751_v4 = vld [vmem:[%s4203_s16 + $0xbe8] sm:$0xff]  ;;  %v753_v5 = vld [vmem:[%s4203_s16 + $0xbf8] sm:$0xff] }
 0x165   : > { %3311 = vmatpush1.bf16.msra.mxu1 %v3310_v15  ;;  %v730_v15 = vld [vmem:[%s4203_s16 + $0xb40] sm:$0xff]  ;;  %v1260_v3 = vld [vmem:[%s4203_s16 + $0x1bd0] sm:$0xff]  ;;  %v1265_v7 = vld [vmem:[%s4203_s16 + $0x1bf8] sm:$0xff] }
 0x166   : > { %3823 = vmatpush1.bf16.msra.mxu0 %v3822_v17  ;;  %3313 = vmatprep.subr.bf16.mxu1 %v3312_v18  ;;  %v1242_v17 = vld [vmem:[%s4203_s16 + $0x1b40] sm:$0xff]  ;;  %v3844_v18 = vpack.c.bf16 %v1245_v11, %v1243_v10  ;;  %v3334_v24 = vpack.c.bf16 %v732_v16, %v730_v15  ;;  %v3352_v10 = vpack.c.bf16 %v753_v5, %v751_v4  ;;  %v1264_v15 = vld [vmem:[%s4203_s16 + $0x1bf0] sm:$0xff]  ;;  %v755_v16 = vld [vmem:[%s4203_s16 + $0xc08] sm:$0xff] }
 0x167   : > { %3825 = vmatprep.subr.bf16.mxu0 %v3824_v22  ;;  %v1247_v22 = vld [vmem:[%s4203_s16 + $0x1b68] sm:$0xff]  ;;  %v3846_v25 = vpack.c.bf16 %v1244_v19, %v1242_v17  ;;  %v750_v11 = vld [vmem:[%s4203_s16 + $0xbe0] sm:$0xff]  ;;  %v757_v17 = vld [vmem:[%s4203_s16 + $0xc18] sm:$0xff] }
 0x168   : > { %v1269_v19 = vld [vmem:[%s4203_s16 + $0x1c18] sm:$0xff]  ;;  %v252_v32 = vld [vmem:[%s4301_s20 + $0x50] sm:$0xff]  ;;  %v1275_v44 = vld [vmem:[%s4203_s16 + $0x1c48] sm:$0xff] }
 0x169   : > { %3315 = vmatpush1.bf16.msra.mxu1 %v3314_v28  ;;  %v736_v28 = vld [vmem:[%s4203_s16 + $0xb70] sm:$0xff]  ;;  %v1277_v45 = vld [vmem:[%s4203_s16 + $0x1c58] sm:$0xff] }
 0x16a   : > { %3827 = vmatpush1.bf16.msra.mxu0 %v3826_v29  ;;  %3317 = vmatprep.subr.bf16.mxu1 %v3316_v30  ;;  %v1246_v29 = vld [vmem:[%s4203_s16 + $0x1b60] sm:$0xff]  ;;  %v3848_v30 = vpack.c.bf16 %v1249_v23, %v1247_v22  ;;  %v3338_v36 = vpack.c.bf16 %v736_v28, %v734_v27  ;;  %v3356_v22 = vpack.c.bf16 %v757_v17, %v755_v16  ;;  %v1268_v27 = vld [vmem:[%s4203_s16 + $0x1c10] sm:$0xff]  ;;  %v759_v28 = vld [vmem:[%s4203_s16 + $0xc28] sm:$0xff] }
 0x16b   : > { %3829 = vmatprep.subr.bf16.mxu0 %v3828_v34  ;;  %v1251_v34 = vld [vmem:[%s4203_s16 + $0x1b88] sm:$0xff]  ;;  %v3850_v37 = vpack.c.bf16 %v1248_v31, %v1246_v29  ;;  %v754_v23 = vld [vmem:[%s4203_s16 + $0xc00] sm:$0xff]  ;;  %v761_v29 = vld [vmem:[%s4203_s16 + $0xc38] sm:$0xff]  ;;  %v3876_v56 = vpack.c.bf16 %v1277_v45, %v1275_v44 }
 0x16c   : > { %v1273_v31 = vld [vmem:[%s4203_s16 + $0x1c38] sm:$0xff]  ;;  %v1276_v57 = vld [vmem:[%s4203_s16 + $0x1c50] sm:$0xff]  ;;  %v770_v16 = vld [vmem:[%s4203_s16 + $0xc80] sm:$0xff] }
 0x16d   : > { %3319 = vmatpush1.bf16.msra.mxu1 %v3318_v40  ;;  %v740_v40 = vld [vmem:[%s4203_s16 + $0xb90] sm:$0xff]  ;;  %v365_v17 = vld [vmem:[%s4301_s20 + $0x3d8] sm:$0xff] }
 0x16e   : > { %3831 = vmatpush1.bf16.msra.mxu0 %v3830_v41  ;;  %3321 = vmatprep.subr.bf16.mxu1 %v3320_v42  ;;  %v1250_v41 = vld [vmem:[%s4203_s16 + $0x1b80] sm:$0xff]  ;;  %v3852_v42 = vpack.c.bf16 %v1253_v35, %v1251_v34  ;;  %v3342_v48 = vpack.c.bf16 %v740_v40, %v738_v39  ;;  %v268_v34 = vld [vmem:[%s4301_s20 + $0xd0] sm:$0xff] }
 0x16f   : > { %3833 = vmatprep.subr.bf16.mxu0 %v3832_v46  ;;  %v1255_v46 = vld [vmem:[%s4203_s16 + $0x1ba8] sm:$0xff]  ;;  %v3854_v49 = vpack.c.bf16 %v1252_v43, %v1250_v41  ;;  %v1270_v39 = vld [vmem:[%s4203_s16 + $0x1c20] sm:$0xff]  ;;  %v1272_v41 = vld [vmem:[%s4203_s16 + $0x1c30] sm:$0xff] }
 0x170   : > { %v765_v43 = vld [vmem:[%s4203_s16 + $0xc58] sm:$0xff]  ;;  %v768_v5 = vld [vmem:[%s4203_s16 + $0xc70] sm:$0xff] }
 0x171   : > { %3323 = vmatpush1.bf16.msra.mxu1 %v3322_v52  ;;  %v744_v52 = vld [vmem:[%s4203_s16 + $0xbb0] sm:$0xff] }
 0x172   : > { %3835 = vmatpush1.bf16.msra.mxu0 %v3834_v53  ;;  %3325 = vmatprep.subr.bf16.mxu1 %v3324_v54  ;;  %v1254_v53 = vld [vmem:[%s4203_s16 + $0x1ba0] sm:$0xff]  ;;  %v3856_v54 = vpack.c.bf16 %v1257_v47, %v1255_v46  ;;  %v3346_v60 = vpack.c.bf16 %v744_v52, %v742_v51  ;;  %v285_v46 = vld [vmem:[%s4301_s20 + $0x158] sm:$0xff]  ;;  %v3874_v51 = vpack.c.bf16 %v1272_v41, %v1270_v39  ;;  %v1288_v39 = vld [vmem:[%s4203_s16 + $0x1cb0] sm:$0xff] }
 0x173   : > { %3837 = vmatprep.subr.bf16.mxu0 %v3836_v58  ;;  %v1259_v58 = vld [vmem:[%s4203_s16 + $0x1bc8] sm:$0xff]  ;;  %v3858_v61 = vpack.c.bf16 %v1256_v55, %v1254_v53  ;;  %v764_v53 = vld [vmem:[%s4203_s16 + $0xc50] sm:$0xff]  ;;  %v781_v41 = vld [vmem:[%s4203_s16 + $0xcd8] sm:$0xff] }
 0x174   : > { %v300_v55 = vld [vmem:[%s4301_s20 + $0x1d0] sm:$0xff] }
 0x175   : > { %3327 = vmatpush1.bf16.msra.mxu1 %v3326_v0  ;;  %v748_v0 = vld [vmem:[%s4203_s16 + $0xbd0] sm:$0xff] }
 0x176   : > { %3839 = vmatpush1.bf16.msra.mxu0 %v3838_v1  ;;  %3329 = vmatprep.subr.bf16.mxu1 %v3328_v2  ;;  %v1258_v1 = vld [vmem:[%s4203_s16 + $0x1bc0] sm:$0xff]  ;;  %v3860_v2 = vpack.c.bf16 %v1261_v59, %v1259_v58  ;;  %v3350_v8 = vpack.c.bf16 %v748_v0, %v746_v63  ;;  %v767_v58 = vld [vmem:[%s4203_s16 + $0xc68] sm:$0xff]  ;;  %v769_v59 = vld [vmem:[%s4203_s16 + $0xc78] sm:$0xff] }
 0x177   : > { %3841 = vmatprep.subr.bf16.mxu0 %v3840_v6  ;;  %v1263_v6 = vld [vmem:[%s4203_s16 + $0x1be8] sm:$0xff]  ;;  %v3862_v9 = vpack.c.bf16 %v1260_v3, %v1258_v1  ;;  %v766_v0 = vld [vmem:[%s4203_s16 + $0xc60] sm:$0xff]  ;;  %v333_v1 = vld [vmem:[%s4301_s20 + $0x2d8] sm:$0xff]  ;;  %v3368_v4 = vpack.c.bf16 %v769_v59, %v767_v58 }
 0x178   : > { %v782_v59 = vld [vmem:[%s4203_s16 + $0xce0] sm:$0xff] }
 0x179   : > { %3331 = vmatpush1.bf16.msra.mxu1 %v3330_v12  ;;  %v752_v12 = vld [vmem:[%s4203_s16 + $0xbf0] sm:$0xff] }
 0x17a   : > { %3843 = vmatpush1.bf16.msra.mxu0 %v3842_v13  ;;  %3333 = vmatprep.subr.bf16.mxu1 %v3332_v14  ;;  %v1262_v13 = vld [vmem:[%s4203_s16 + $0x1be0] sm:$0xff]  ;;  %v3864_v14 = vpack.c.bf16 %v1265_v7, %v1263_v6  ;;  %v3354_v20 = vpack.c.bf16 %v752_v12, %v750_v11  ;;  %v332_v7 = vld [vmem:[%s4301_s20 + $0x2d0] sm:$0xff]  ;;  %v773_v11 = vld [vmem:[%s4203_s16 + $0xc98] sm:$0xff] }
 0x17b   : > { %3845 = vmatprep.subr.bf16.mxu0 %v3844_v18  ;;  %v1267_v18 = vld [vmem:[%s4203_s16 + $0x1c08] sm:$0xff]  ;;  %v3866_v21 = vpack.c.bf16 %v1264_v15, %v1262_v13  ;;  %v1278_v6 = vld [vmem:[%s4203_s16 + $0x1c60] sm:$0xff]  ;;  %v1285_v13 = vld [vmem:[%s4203_s16 + $0x1c98] sm:$0xff]  ;;  %v3370_v15 = vpack.c.bf16 %v768_v5, %v766_v0 }
 0x17c   : > { %v1283_v12 = vld [vmem:[%s4203_s16 + $0x1c88] sm:$0xff] }
 0x17d   : > { %3335 = vmatpush1.bf16.msra.mxu1 %v3334_v24  ;;  %v756_v24 = vld [vmem:[%s4203_s16 + $0xc10] sm:$0xff]  ;;  %v787_v0 = vld [vmem:[%s4203_s16 + $0xd08] sm:$0xff] }
 0x17e   : > { %3847 = vmatpush1.bf16.msra.mxu0 %v3846_v25  ;;  %3337 = vmatprep.subr.bf16.mxu1 %v3336_v26  ;;  %v1266_v25 = vld [vmem:[%s4203_s16 + $0x1c00] sm:$0xff]  ;;  %v3868_v26 = vpack.c.bf16 %v1269_v19, %v1267_v18  ;;  %v3358_v33 = vpack.c.bf16 %v756_v24, %v754_v23  ;;  %v348_v18 = vld [vmem:[%s4301_s20 + $0x350] sm:$0xff]  ;;  %v3884_v24 = vpack.c.bf16 %v1285_v13, %v1283_v12  ;;  %v791_v12 = vld [vmem:[%s4203_s16 + $0xd28] sm:$0xff] }
 0x17f   : > { %3849 = vmatprep.subr.bf16.mxu0 %v3848_v30  ;;  %v1271_v30 = vld [vmem:[%s4203_s16 + $0x1c28] sm:$0xff]  ;;  %v3870_v35 = vpack.c.bf16 %v1268_v27, %v1266_v25  ;;  %v364_v23 = vld [vmem:[%s4301_s20 + $0x3d0] sm:$0xff]  ;;  %v777_v27 = vld [vmem:[%s4203_s16 + $0xcb8] sm:$0xff] }
 0x180   : > { %v3872_v40 = vpack.c.bf16 %v1273_v31, %v1271_v30  ;;  %v1284_v25 = vld [vmem:[%s4203_s16 + $0x1c90] sm:$0xff]  ;;  %v255_v30 = vld [vmem:[%s4301_s20 + $0x68] sm:$0xff]  ;;  %v793_v13 = vld [vmem:[%s4203_s16 + $0xd38] sm:$0xff] }
 0x181   : > { %3339 = vmatpush1.bf16.msra.mxu1 %v3338_v36  ;;  %v3360_v36 = vpack.c.bf16 %v761_v29, %v759_v28  ;;  %v1287_v28 = vld [vmem:[%s4203_s16 + $0x1ca8] sm:$0xff]  ;;  %v1289_v29 = vld [vmem:[%s4203_s16 + $0x1cb8] sm:$0xff] }
 0x182   : > { %3851 = vmatpush1.bf16.msra.mxu0 %v3850_v37  ;;  %3341 = vmatprep.subr.bf16.mxu1 %v3340_v38  ;;  %v758_v37 = vld [vmem:[%s4203_s16 + $0xc20] sm:$0xff]  ;;  %v760_v38 = vld [vmem:[%s4203_s16 + $0xc30] sm:$0xff] }
 0x183   : > { %3853 = vmatprep.subr.bf16.mxu0 %v3852_v42  ;;  %v763_v42 = vld [vmem:[%s4203_s16 + $0xc48] sm:$0xff]  ;;  %v3362_v47 = vpack.c.bf16 %v760_v38, %v758_v37  ;;  %v1286_v37 = vld [vmem:[%s4203_s16 + $0x1ca0] sm:$0xff]  ;;  %v3888_v38 = vpack.c.bf16 %v1289_v29, %v1287_v28 }
 0x184   : > { %v3364_v52 = vpack.c.bf16 %v765_v43, %v763_v42  ;;  %v1291_v42 = vld [vmem:[%s4203_s16 + $0x1cc8] sm:$0xff]  ;;  %v1293_v43 = vld [vmem:[%s4203_s16 + $0x1cd8] sm:$0xff]  ;;  %v3890_v45 = vpack.c.bf16 %v1288_v39, %v1286_v37 }
 0x185   : > { %3343 = vmatpush1.bf16.msra.mxu1 %v3342_v48  ;;  %v762_v48 = vld [vmem:[%s4203_s16 + $0xc40] sm:$0xff]  ;;  %v801_v37 = vld [vmem:[%s4203_s16 + $0xd78] sm:$0xff] }
 0x186   : > { %3855 = vmatpush1.bf16.msra.mxu0 %v3854_v49  ;;  %3345 = vmatprep.subr.bf16.mxu1 %v3344_v50  ;;  %v301_v49 = vld [vmem:[%s4301_s20 + $0x1d8] sm:$0xff]  ;;  %v284_v50 = vld [vmem:[%s4301_s20 + $0x150] sm:$0xff]  ;;  %v3366_v63 = vpack.c.bf16 %v764_v53, %v762_v48 }
 0x187   : > { %3857 = vmatprep.subr.bf16.mxu0 %v3856_v54  ;;  %v1274_v54 = vld [vmem:[%s4203_s16 + $0x1c40] sm:$0xff]  ;;  %v780_v48 = vld [vmem:[%s4203_s16 + $0xcd0] sm:$0xff]  ;;  %v785_v53 = vld [vmem:[%s4203_s16 + $0xcf8] sm:$0xff] }
 0x188   : > { %v3878_v3 = vpack.c.bf16 %v1276_v57, %v1274_v54  ;;  %v1295_v54 = vld [vmem:[%s4203_s16 + $0x1ce8] sm:$0xff]  ;;  %v1313_v39 = vld [vmem:[%s4203_s16 + $0x1d78] sm:$0xff] }
 0x189   : > { %3347 = vmatpush1.bf16.msra.mxu1 %v3346_v60  ;;  %v1279_v60 = vld [vmem:[%s4203_s16 + $0x1c68] sm:$0xff] }
 0x18a   : > { %3859 = vmatpush1.bf16.msra.mxu0 %v3858_v61  ;;  %3349 = vmatprep.subr.bf16.mxu1 %v3348_v62  ;;  %v1281_v61 = vld [vmem:[%s4203_s16 + $0x1c78] sm:$0xff] }
 0x18b   : > { %3861 = vmatprep.subr.bf16.mxu0 %v3860_v2  ;;  %v317_v62 = vld [vmem:[%s4301_s20 + $0x258] sm:$0xff]  ;;  %v316_v2 = vld [vmem:[%s4301_s20 + $0x250] sm:$0xff] }
 0x18d   : > { %3351 = vmatpush1.bf16.msra.mxu1 %v3350_v8  ;;  %v3880_v8 = vpack.c.bf16 %v1281_v61, %v1279_v60  ;;  %v784_v60 = vld [vmem:[%s4203_s16 + $0xcf0] sm:$0xff]  ;;  %v1294_v61 = vld [vmem:[%s4203_s16 + $0x1ce0] sm:$0xff] }
 0x18e   : > { %3863 = vmatpush1.bf16.msra.mxu0 %v3862_v9  ;;  %3353 = vmatprep.subr.bf16.mxu1 %v3352_v10  ;;  %v1280_v9 = vld [vmem:[%s4203_s16 + $0x1c70] sm:$0xff]  ;;  %v771_v10 = vld [vmem:[%s4203_s16 + $0xc88] sm:$0xff] }
 0x18f   : > { %3865 = vmatprep.subr.bf16.mxu0 %v3864_v14  ;;  %v349_v14 = vld [vmem:[%s4301_s20 + $0x358] sm:$0xff]  ;;  %v3882_v19 = vpack.c.bf16 %v1280_v9, %v1278_v6  ;;  %v1298_v9 = vld [vmem:[%s4203_s16 + $0x1d00] sm:$0xff] }
 0x191   : > { %3355 = vmatpush1.bf16.msra.mxu1 %v3354_v20  ;;  %v3372_v20 = vpack.c.bf16 %v773_v11, %v771_v10  ;;  %v1300_v11 = vld [vmem:[%s4203_s16 + $0x1d10] sm:$0xff] }
 0x192   : > { %3867 = vmatpush1.bf16.msra.mxu0 %v3866_v21  ;;  %3357 = vmatprep.subr.bf16.mxu1 %v3356_v22  ;;  %v772_v21 = vld [vmem:[%s4203_s16 + $0xc90] sm:$0xff]  ;;  %v1282_v22 = vld [vmem:[%s4203_s16 + $0x1c80] sm:$0xff] }
 0x193   : > { %3869 = vmatprep.subr.bf16.mxu0 %v3868_v26  ;;  %v775_v26 = vld [vmem:[%s4203_s16 + $0xca8] sm:$0xff]  ;;  %v3374_v31 = vpack.c.bf16 %v772_v21, %v770_v16  ;;  %v1302_v21 = vld [vmem:[%s4203_s16 + $0x1d20] sm:$0xff] }
 0x194   : > { %1904 = vmatmul.mubr.f32.vlgmr.msra.gmra.mrb[0].mxu1 %v252_v32  ;;  %v271_v32 = vld [vmem:[%s4301_s20 + $0xe8] sm:$0xff] }
 0x195   : > { %3359 = vmatpush1.bf16.msra.mxu1 %v3358_v33  ;;  %2616 = vmatmul.mubr.f32.vlgmr.msra.gmra.mrb[0].mxu0 %v268_v34  ;;  %v3886_v33 = vpack.c.bf16 %v1284_v25, %v1282_v22  ;;  %v3376_v34 = vpack.c.bf16 %v777_v27, %v775_v26  ;;  %v797_v25 = vld [vmem:[%s4203_s16 + $0xd58] sm:$0xff]  ;;  %v1307_v26 = vld [vmem:[%s4203_s16 + $0x1d48] sm:$0xff] }
 0x196   : > { %3871 = vmatpush1.bf16.msra.mxu0 %v3870_v35  ;;  %3361 = vmatprep.subr.bf16.mxu1 %v3360_v36  ;;  %v774_v35 = vld [vmem:[%s4203_s16 + $0xca0] sm:$0xff]  ;;  %v776_v36 = vld [vmem:[%s4203_s16 + $0xcb0] sm:$0xff]  ;;  %v1309_v27 = vld [vmem:[%s4203_s16 + $0x1d58] sm:$0xff] }
 0x197   : > { %3873 = vmatprep.subr.bf16.mxu0 %v3872_v40  ;;  %1909 = vmatprep.mubr.f32.mxu1 %v285_v46  ;;  %v779_v40 = vld [vmem:[%s4203_s16 + $0xcc8] sm:$0xff]  ;;  %v3378_v44 = vpack.c.bf16 %v776_v36, %v774_v35  ;;  %v1308_v35 = vld [vmem:[%s4203_s16 + $0x1d50] sm:$0xff] }
 0x198   : > { %2621 = vmatprep.mubr.f32.mxu0 %v301_v49  ;;  %1910 = vmatmul.mubr.f32.gmra.mrb[2].mxu1 %v284_v50  ;;  %v3380_v46 = vpack.c.bf16 %v781_v41, %v779_v40  ;;  %v1290_v49 = vld [vmem:[%s4203_s16 + $0x1cc0] sm:$0xff]  ;;  %v3892_v50 = vpack.c.bf16 %v1293_v43, %v1291_v42  ;;  %v799_v36 = vld [vmem:[%s4203_s16 + $0xd68] sm:$0xff] }
 0x199   : > { %3363 = vmatpush1.bf16.msra.mxu1 %v3362_v47  ;;  %2622 = vmatmul.mubr.f32.gmra.mrb[2].mxu0 %v300_v55  ;;  %v778_v47 = vld [vmem:[%s4203_s16 + $0xcc0] sm:$0xff]  ;;  %v1297_v55 = vld [vmem:[%s4203_s16 + $0x1cf8] sm:$0xff]  ;;  %v3400_v42 = vpack.c.bf16 %v801_v37, %v799_v36 }
 0x19a   : > { %3875 = vmatpush1.bf16.msra.mxu0 %v3874_v51  ;;  %3365 = vmatprep.subr.bf16.mxu1 %v3364_v52  ;;  %v1292_v51 = vld [vmem:[%s4203_s16 + $0x1cd0] sm:$0xff]  ;;  %v783_v52 = vld [vmem:[%s4203_s16 + $0xce8] sm:$0xff]  ;;  %v798_v43 = vld [vmem:[%s4203_s16 + $0xd60] sm:$0xff] }
 0x19b   : > { %3877 = vmatprep.subr.bf16.mxu0 %v3876_v56  ;;  %1915 = vmatprep.mubr.f32.mxu1 %v317_v62  ;;  %v3382_v56 = vpack.c.bf16 %v780_v48, %v778_v47  ;;  %v3894_v57 = vpack.c.bf16 %v1292_v51, %v1290_v49  ;;  %v3384_v58 = vpack.c.bf16 %v785_v53, %v783_v52  ;;  %v1312_v47 = vld [vmem:[%s4203_s16 + $0x1d70] sm:$0xff]  ;;  %v803_v48 = vld [vmem:[%s4203_s16 + $0xd88] sm:$0xff]  ;;  %v805_v49 = vld [vmem:[%s4203_s16 + $0xd98] sm:$0xff] }
 0x19c   : > { %2627 = vmatprep.mubr.f32.mxu0 %v333_v1  ;;  %1916 = vmatmul.mubr.f32.gmra.mrb[4].mxu1 %v316_v2  ;;  %v3896_v62 = vpack.c.bf16 %v1297_v55, %v1295_v54  ;;  %v789_v1 = vld [vmem:[%s4203_s16 + $0xd18] sm:$0xff]  ;;  %v1299_v2 = vld [vmem:[%s4203_s16 + $0x1d08] sm:$0xff]  ;;  %v3404_v54 = vpack.c.bf16 %v805_v49, %v803_v48  ;;  %v802_v55 = vld [vmem:[%s4203_s16 + $0xd80] sm:$0xff] }
 0x19d   : > { %3367 = vmatpush1.bf16.msra.mxu1 %v3366_v63  ;;  %2628 = vmatmul.mubr.f32.gmra.mrb[4].mxu0 %v332_v7  ;;  %v1296_v63 = vld [vmem:[%s4203_s16 + $0x1cf0] sm:$0xff]  ;;  %v3388_v6 = vpack.c.bf16 %v789_v1, %v787_v0  ;;  %v786_v7 = vld [vmem:[%s4203_s16 + $0xd00] sm:$0xff]  ;;  %v1317_v51 = vld [vmem:[%s4203_s16 + $0x1d98] sm:$0xff] }
 0x19e   : > { %3879 = vmatpush1.bf16.msra.mxu0 %v3878_v3  ;;  %3369 = vmatprep.subr.bf16.mxu1 %v3368_v4  ;;  %v1301_v3 = vld [vmem:[%s4203_s16 + $0x1d18] sm:$0xff]  ;;  %v3386_v4 = vpack.c.bf16 %v784_v60, %v782_v59  ;;  %v3898_v5 = vpack.c.bf16 %v1296_v63, %v1294_v61  ;;  %v1316_v59 = vld [vmem:[%s4203_s16 + $0x1d90] sm:$0xff]  ;;  %v807_v60 = vld [vmem:[%s4203_s16 + $0xda8] sm:$0xff] }
 0x19f   : > { %3881 = vmatprep.subr.bf16.mxu0 %v3880_v8  ;;  %1921 = vmatprep.mubr.f32.mxu1 %v349_v14  ;;  %v788_v8 = vld [vmem:[%s4203_s16 + $0xd10] sm:$0xff]  ;;  %v3900_v10 = vpack.c.bf16 %v1301_v3, %v1299_v2  ;;  %v1303_v14 = vld [vmem:[%s4203_s16 + $0x1d28] sm:$0xff]  ;;  %v809_v61 = vld [vmem:[%s4203_s16 + $0xdb8] sm:$0xff] }
 0x1a0   : > { %2633 = vmatprep.mubr.f32.mxu0 %v365_v17  ;;  %1922 = vmatmul.mubr.f32.gmra.mrb[6].mxu1 %v348_v18  ;;  %v3390_v16 = vpack.c.bf16 %v788_v8, %v786_v7  ;;  %v3902_v17 = vpack.c.bf16 %v1300_v11, %v1298_v9  ;;  %v3392_v18 = vpack.c.bf16 %v793_v13, %v791_v12  ;;  %v1321_v63 = vld [vmem:[%s4203_s16 + $0x1db8] sm:$0xff]  ;;  %v806_v3 = vld [vmem:[%s4203_s16 + $0xda0] sm:$0xff]  ;;  %v1320_v7 = vld [vmem:[%s4203_s16 + $0x1db0] sm:$0xff] }
 0x1a1   : > { %3371 = vmatpush1.bf16.msra.mxu1 %v3370_v15  ;;  %2634 = vmatmul.mubr.f32.gmra.mrb[6].mxu0 %v364_v23  ;;  %v1305_v15 = vld [vmem:[%s4203_s16 + $0x1d38] sm:$0xff]  ;;  %v1304_v23 = vld [vmem:[%s4203_s16 + $0x1d30] sm:$0xff]  ;;  %v3408_v2 = vpack.c.bf16 %v809_v61, %v807_v60  ;;  %v811_v8 = vld [vmem:[%s4203_s16 + $0xdc8] sm:$0xff] }
 0x1a2   : > { %3883 = vmatpush1.bf16.msra.mxu0 %v3882_v19  ;;  %3373 = vmatprep.subr.bf16.mxu1 %v3372_v20  ;;  %v790_v19 = vld [vmem:[%s4203_s16 + $0xd20] sm:$0xff]  ;;  %v792_v20 = vld [vmem:[%s4203_s16 + $0xd30] sm:$0xff]  ;;  %v3904_v22 = vpack.c.bf16 %v1305_v15, %v1303_v14  ;;  %v3906_v29 = vpack.c.bf16 %v1304_v23, %v1302_v21  ;;  %v813_v9 = vld [vmem:[%s4203_s16 + $0xdd8] sm:$0xff] }
 0x1a3   : > { %3885 = vmatprep.subr.bf16.mxu0 %v3884_v24  ;;  %1992 = vmatprep.mubr.f32.mxu1 %v255_v30  ;;  %v795_v24 = vld [vmem:[%s4203_s16 + $0xd48] sm:$0xff]  ;;  %v3394_v28 = vpack.c.bf16 %v792_v20, %v790_v19  ;;  %v1325_v11 = vld [vmem:[%s4203_s16 + $0x1dd8] sm:$0xff]  ;;  %v3412_v14 = vpack.c.bf16 %v813_v9, %v811_v8  ;;  %v810_v15 = vld [vmem:[%s4203_s16 + $0xdc0] sm:$0xff] }
 0x1a4   : > { %2704 = vmatprep.mubr.f32.mxu0 %v271_v32  ;;  %v3396_v30 = vpack.c.bf16 %v797_v25, %v795_v24  ;;  %v796_v32 = vld [vmem:[%s4203_s16 + $0xd50] sm:$0xff]  ;;  %v815_v20 = vld [vmem:[%s4203_s16 + $0xde8] sm:$0xff]  ;;  %v817_v21 = vld [vmem:[%s4203_s16 + $0xdf8] sm:$0xff] }
 0x1a5   : > { %3375 = vmatpush1.bf16.msra.mxu1 %v3374_v31  ;;  %v794_v31 = vld [vmem:[%s4203_s16 + $0xd40] sm:$0xff]  ;;  %v1324_v19 = vld [vmem:[%s4203_s16 + $0x1dd0] sm:$0xff]  ;;  %v1329_v23 = vld [vmem:[%s4203_s16 + $0x1df8] sm:$0xff] }
 0x1a6   : > { %3887 = vmatpush1.bf16.msra.mxu0 %v3886_v33  ;;  %3377 = vmatprep.subr.bf16.mxu1 %v3376_v34  ;;  %v1306_v33 = vld [vmem:[%s4203_s16 + $0x1d40] sm:$0xff]  ;;  %v3908_v34 = vpack.c.bf16 %v1309_v27, %v1307_v26  ;;  %v3398_v40 = vpack.c.bf16 %v796_v32, %v794_v31  ;;  %v3416_v26 = vpack.c.bf16 %v817_v21, %v815_v20  ;;  %v1328_v31 = vld [vmem:[%s4203_s16 + $0x1df0] sm:$0xff]  ;;  %v819_v32 = vld [vmem:[%s4203_s16 + $0xe08] sm:$0xff] }
 0x1a7   : > { %3889 = vmatprep.subr.bf16.mxu0 %v3888_v38  ;;  %v1311_v38 = vld [vmem:[%s4203_s16 + $0x1d68] sm:$0xff]  ;;  %v3910_v41 = vpack.c.bf16 %v1308_v35, %v1306_v33  ;;  %v814_v27 = vld [vmem:[%s4203_s16 + $0xde0] sm:$0xff]  ;;  %v821_v33 = vld [vmem:[%s4203_s16 + $0xe18] sm:$0xff] }
 0x1a8   : > { %v1333_v35 = vld [vmem:[%s4203_s16 + $0x1e18] sm:$0xff]  ;;  %v254_v48 = vld [vmem:[%s4301_s20 + $0x60] sm:$0xff]  ;;  %v1339_v60 = vld [vmem:[%s4203_s16 + $0x1e48] sm:$0xff] }
 0x1a9   : > { %3379 = vmatpush1.bf16.msra.mxu1 %v3378_v44  ;;  %v800_v44 = vld [vmem:[%s4203_s16 + $0xd70] sm:$0xff]  ;;  %v1341_v61 = vld [vmem:[%s4203_s16 + $0x1e58] sm:$0xff] }
 0x1aa   : > { %3891 = vmatpush1.bf16.msra.mxu0 %v3890_v45  ;;  %3381 = vmatprep.subr.bf16.mxu1 %v3380_v46  ;;  %v1310_v45 = vld [vmem:[%s4203_s16 + $0x1d60] sm:$0xff]  ;;  %v3912_v46 = vpack.c.bf16 %v1313_v39, %v1311_v38  ;;  %v3402_v52 = vpack.c.bf16 %v800_v44, %v798_v43  ;;  %v3420_v38 = vpack.c.bf16 %v821_v33, %v819_v32  ;;  %v1332_v43 = vld [vmem:[%s4203_s16 + $0x1e10] sm:$0xff]  ;;  %v823_v44 = vld [vmem:[%s4203_s16 + $0xe28] sm:$0xff] }
 0x1ab   : > { %3893 = vmatprep.subr.bf16.mxu0 %v3892_v50  ;;  %v1315_v50 = vld [vmem:[%s4203_s16 + $0x1d88] sm:$0xff]  ;;  %v3914_v53 = vpack.c.bf16 %v1312_v47, %v1310_v45  ;;  %v818_v39 = vld [vmem:[%s4203_s16 + $0xe00] sm:$0xff]  ;;  %v825_v45 = vld [vmem:[%s4203_s16 + $0xe38] sm:$0xff]  ;;  %v3940_v8 = vpack.c.bf16 %v1341_v61, %v1339_v60 }
 0x1ac   : > { %v1337_v47 = vld [vmem:[%s4203_s16 + $0x1e38] sm:$0xff]  ;;  %v1340_v9 = vld [vmem:[%s4203_s16 + $0x1e50] sm:$0xff]  ;;  %v834_v32 = vld [vmem:[%s4203_s16 + $0xe80] sm:$0xff] }
 0x1ad   : > { %3383 = vmatpush1.bf16.msra.mxu1 %v3382_v56  ;;  %v804_v56 = vld [vmem:[%s4203_s16 + $0xd90] sm:$0xff]  ;;  %v367_v33 = vld [vmem:[%s4301_s20 + $0x3e8] sm:$0xff] }
 0x1ae   : > { %3895 = vmatpush1.bf16.msra.mxu0 %v3894_v57  ;;  %3385 = vmatprep.subr.bf16.mxu1 %v3384_v58  ;;  %v1314_v57 = vld [vmem:[%s4203_s16 + $0x1d80] sm:$0xff]  ;;  %v3916_v58 = vpack.c.bf16 %v1317_v51, %v1315_v50  ;;  %v3406_v0 = vpack.c.bf16 %v804_v56, %v802_v55  ;;  %v832_v21 = vld [vmem:[%s4203_s16 + $0xe70] sm:$0xff] }
 0x1af   : > { %3897 = vmatprep.subr.bf16.mxu0 %v3896_v62  ;;  %v1319_v62 = vld [vmem:[%s4203_s16 + $0x1da8] sm:$0xff]  ;;  %v3918_v1 = vpack.c.bf16 %v1316_v59, %v1314_v57  ;;  %v270_v50 = vld [vmem:[%s4301_s20 + $0xe0] sm:$0xff]  ;;  %v1336_v57 = vld [vmem:[%s4203_s16 + $0x1e30] sm:$0xff] }
 0x1b0   : > { %v1334_v55 = vld [vmem:[%s4203_s16 + $0x1e20] sm:$0xff]  ;;  %v829_v59 = vld [vmem:[%s4203_s16 + $0xe58] sm:$0xff] }
 0x1b1   : > { %3387 = vmatpush1.bf16.msra.mxu1 %v3386_v4  ;;  %v808_v4 = vld [vmem:[%s4203_s16 + $0xdb0] sm:$0xff] }
 0x1b2   : > { %3899 = vmatpush1.bf16.msra.mxu0 %v3898_v5  ;;  %3389 = vmatprep.subr.bf16.mxu1 %v3388_v6  ;;  %v1318_v5 = vld [vmem:[%s4203_s16 + $0x1da0] sm:$0xff]  ;;  %v3920_v6 = vpack.c.bf16 %v1321_v63, %v1319_v62  ;;  %v3410_v12 = vpack.c.bf16 %v808_v4, %v806_v3  ;;  %v287_v62 = vld [vmem:[%s4301_s20 + $0x168] sm:$0xff]  ;;  %v3938_v3 = vpack.c.bf16 %v1336_v57, %v1334_v55  ;;  %v1352_v55 = vld [vmem:[%s4203_s16 + $0x1eb0] sm:$0xff] }
 0x1b3   : > { %3901 = vmatprep.subr.bf16.mxu0 %v3900_v10  ;;  %v1323_v10 = vld [vmem:[%s4203_s16 + $0x1dc8] sm:$0xff]  ;;  %v3922_v13 = vpack.c.bf16 %v1320_v7, %v1318_v5  ;;  %v828_v5 = vld [vmem:[%s4203_s16 + $0xe50] sm:$0xff]  ;;  %v302_v7 = vld [vmem:[%s4301_s20 + $0x1e0] sm:$0xff] }
 0x1b4   : > { %v845_v57 = vld [vmem:[%s4203_s16 + $0xed8] sm:$0xff] }
 0x1b5   : > { %3391 = vmatpush1.bf16.msra.mxu1 %v3390_v16  ;;  %v812_v16 = vld [vmem:[%s4203_s16 + $0xdd0] sm:$0xff] }
 0x1b6   : > { %3903 = vmatpush1.bf16.msra.mxu0 %v3902_v17  ;;  %3393 = vmatprep.subr.bf16.mxu1 %v3392_v18  ;;  %v1322_v17 = vld [vmem:[%s4203_s16 + $0x1dc0] sm:$0xff]  ;;  %v3924_v18 = vpack.c.bf16 %v1325_v11, %v1323_v10  ;;  %v3414_v24 = vpack.c.bf16 %v812_v16, %v810_v15  ;;  %v831_v10 = vld [vmem:[%s4203_s16 + $0xe68] sm:$0xff]  ;;  %v833_v11 = vld [vmem:[%s4203_s16 + $0xe78] sm:$0xff] }
 0x1b7   : > { %3905 = vmatprep.subr.bf16.mxu0 %v3904_v22  ;;  %v1327_v22 = vld [vmem:[%s4203_s16 + $0x1de8] sm:$0xff]  ;;  %v3926_v25 = vpack.c.bf16 %v1324_v19, %v1322_v17  ;;  %v830_v16 = vld [vmem:[%s4203_s16 + $0xe60] sm:$0xff]  ;;  %v3432_v20 = vpack.c.bf16 %v833_v11, %v831_v10 }
 0x1b8   : > { %v335_v17 = vld [vmem:[%s4301_s20 + $0x2e8] sm:$0xff]  ;;  %v846_v11 = vld [vmem:[%s4203_s16 + $0xee0] sm:$0xff] }
 0x1b9   : > { %3395 = vmatpush1.bf16.msra.mxu1 %v3394_v28  ;;  %v816_v28 = vld [vmem:[%s4203_s16 + $0xdf0] sm:$0xff] }
 0x1ba   : > { %3907 = vmatpush1.bf16.msra.mxu0 %v3906_v29  ;;  %3397 = vmatprep.subr.bf16.mxu1 %v3396_v30  ;;  %v1326_v29 = vld [vmem:[%s4203_s16 + $0x1de0] sm:$0xff]  ;;  %v3928_v30 = vpack.c.bf16 %v1329_v23, %v1327_v22  ;;  %v3418_v36 = vpack.c.bf16 %v816_v28, %v814_v27  ;;  %v837_v27 = vld [vmem:[%s4203_s16 + $0xe98] sm:$0xff]  ;;  %v1347_v28 = vld [vmem:[%s4203_s16 + $0x1e88] sm:$0xff] }
 0x1bb   : > { %3909 = vmatprep.subr.bf16.mxu0 %v3908_v34  ;;  %v1331_v34 = vld [vmem:[%s4203_s16 + $0x1e08] sm:$0xff]  ;;  %v3930_v37 = vpack.c.bf16 %v1328_v31, %v1326_v29  ;;  %v1342_v22 = vld [vmem:[%s4203_s16 + $0x1e60] sm:$0xff]  ;;  %v1349_v29 = vld [vmem:[%s4203_s16 + $0x1e98] sm:$0xff]  ;;  %v3434_v31 = vpack.c.bf16 %v832_v21, %v830_v16 }
 0x1bc   : > { %v334_v23 = vld [vmem:[%s4301_s20 + $0x2e0] sm:$0xff]  ;;  %v851_v16 = vld [vmem:[%s4203_s16 + $0xf08] sm:$0xff] }
 0x1bd   : > { %3399 = vmatpush1.bf16.msra.mxu1 %v3398_v40  ;;  %v820_v40 = vld [vmem:[%s4203_s16 + $0xe10] sm:$0xff] }
 0x1be   : > { %3911 = vmatpush1.bf16.msra.mxu0 %v3910_v41  ;;  %3401 = vmatprep.subr.bf16.mxu1 %v3400_v42  ;;  %v1330_v41 = vld [vmem:[%s4203_s16 + $0x1e00] sm:$0xff]  ;;  %v3932_v42 = vpack.c.bf16 %v1333_v35, %v1331_v34  ;;  %v3422_v49 = vpack.c.bf16 %v820_v40, %v818_v39  ;;  %v3948_v40 = vpack.c.bf16 %v1349_v29, %v1347_v28  ;;  %v855_v28 = vld [vmem:[%s4203_s16 + $0xf28] sm:$0xff]  ;;  %v857_v29 = vld [vmem:[%s4203_s16 + $0xf38] sm:$0xff] }
 0x1bf   : > { %3913 = vmatprep.subr.bf16.mxu0 %v3912_v46  ;;  %v1335_v46 = vld [vmem:[%s4203_s16 + $0x1e28] sm:$0xff]  ;;  %v3934_v51 = vpack.c.bf16 %v1332_v43, %v1330_v41  ;;  %v350_v34 = vld [vmem:[%s4301_s20 + $0x360] sm:$0xff]  ;;  %v1348_v41 = vld [vmem:[%s4203_s16 + $0x1e90] sm:$0xff] }
 0x1c0   : > { %v3936_v56 = vpack.c.bf16 %v1337_v47, %v1335_v46  ;;  %v366_v39 = vld [vmem:[%s4301_s20 + $0x3e0] sm:$0xff]  ;;  %v841_v43 = vld [vmem:[%s4203_s16 + $0xeb8] sm:$0xff] }
 0x1c1   : > { %3403 = vmatpush1.bf16.msra.mxu1 %v3402_v52  ;;  %v3424_v52 = vpack.c.bf16 %v825_v45, %v823_v44  ;;  %v1351_v44 = vld [vmem:[%s4203_s16 + $0x1ea8] sm:$0xff]  ;;  %v1353_v45 = vld [vmem:[%s4203_s16 + $0x1eb8] sm:$0xff] }
 0x1c2   : > { %3915 = vmatpush1.bf16.msra.mxu0 %v3914_v53  ;;  %3405 = vmatprep.subr.bf16.mxu1 %v3404_v54  ;;  %v822_v53 = vld [vmem:[%s4203_s16 + $0xe20] sm:$0xff]  ;;  %v824_v54 = vld [vmem:[%s4203_s16 + $0xe30] sm:$0xff]  ;;  %v257_v46 = vld [vmem:[%s4301_s20 + $0x78] sm:$0xff] }
 0x1c3   : > { %3917 = vmatprep.subr.bf16.mxu0 %v3916_v58  ;;  %v827_v58 = vld [vmem:[%s4203_s16 + $0xe48] sm:$0xff]  ;;  %v3426_v63 = vpack.c.bf16 %v824_v54, %v822_v53  ;;  %v1350_v53 = vld [vmem:[%s4203_s16 + $0x1ea0] sm:$0xff]  ;;  %v3952_v54 = vpack.c.bf16 %v1353_v45, %v1351_v44 }
 0x1c4   : > { %v3428_v4 = vpack.c.bf16 %v829_v59, %v827_v58  ;;  %v1355_v58 = vld [vmem:[%s4203_s16 + $0x1ec8] sm:$0xff]  ;;  %v1357_v59 = vld [vmem:[%s4203_s16 + $0x1ed8] sm:$0xff]  ;;  %v3954_v61 = vpack.c.bf16 %v1352_v55, %v1350_v53 }
 0x1c5   : > { %3407 = vmatpush1.bf16.msra.mxu1 %v3406_v0  ;;  %v826_v0 = vld [vmem:[%s4203_s16 + $0xe40] sm:$0xff]  ;;  %v865_v53 = vld [vmem:[%s4203_s16 + $0xf78] sm:$0xff] }
 0x1c6   : > { %3919 = vmatpush1.bf16.msra.mxu0 %v3918_v1  ;;  %3409 = vmatprep.subr.bf16.mxu1 %v3408_v2  ;;  %v303_v1 = vld [vmem:[%s4301_s20 + $0x1e8] sm:$0xff]  ;;  %v286_v2 = vld [vmem:[%s4301_s20 + $0x160] sm:$0xff]  ;;  %v3430_v15 = vpack.c.bf16 %v828_v5, %v826_v0  ;;  %v844_v0 = vld [vmem:[%s4203_s16 + $0xed0] sm:$0xff] }
 0x1c7   : > { %3921 = vmatprep.subr.bf16.mxu0 %v3920_v6  ;;  %v1338_v6 = vld [vmem:[%s4203_s16 + $0x1e40] sm:$0xff]  ;;  %v849_v5 = vld [vmem:[%s4203_s16 + $0xef8] sm:$0xff] }
 0x1c8   : > { %v3942_v19 = vpack.c.bf16 %v1340_v9, %v1338_v6  ;;  %v1359_v6 = vld [vmem:[%s4203_s16 + $0x1ee8] sm:$0xff]  ;;  %v1377_v55 = vld [vmem:[%s4203_s16 + $0x1f78] sm:$0xff] }
 0x1c9   : > { %3411 = vmatpush1.bf16.msra.mxu1 %v3410_v12  ;;  %v1343_v12 = vld [vmem:[%s4203_s16 + $0x1e68] sm:$0xff] }
 0x1ca   : > { %3923 = vmatpush1.bf16.msra.mxu0 %v3922_v13  ;;  %3413 = vmatprep.subr.bf16.mxu1 %v3412_v14  ;;  %v1345_v13 = vld [vmem:[%s4203_s16 + $0x1e78] sm:$0xff]  ;;  %v319_v14 = vld [vmem:[%s4301_s20 + $0x268] sm:$0xff] }
 0x1cb   : > { %3925 = vmatprep.subr.bf16.mxu0 %v3924_v18  ;;  %v318_v18 = vld [vmem:[%s4301_s20 + $0x260] sm:$0xff] }
 0x1cd   : > { %3415 = vmatpush1.bf16.msra.mxu1 %v3414_v24  ;;  %v3944_v24 = vpack.c.bf16 %v1345_v13, %v1343_v12  ;;  %v848_v12 = vld [vmem:[%s4203_s16 + $0xef0] sm:$0xff]  ;;  %v1358_v13 = vld [vmem:[%s4203_s16 + $0x1ee0] sm:$0xff] }
 0x1ce   : > { %3927 = vmatpush1.bf16.msra.mxu0 %v3926_v25  ;;  %3417 = vmatprep.subr.bf16.mxu1 %v3416_v26  ;;  %v1344_v25 = vld [vmem:[%s4203_s16 + $0x1e70] sm:$0xff]  ;;  %v835_v26 = vld [vmem:[%s4203_s16 + $0xe88] sm:$0xff] }
 0x1cf   : > { %3929 = vmatprep.subr.bf16.mxu0 %v3928_v30  ;;  %v351_v30 = vld [vmem:[%s4301_s20 + $0x368] sm:$0xff]  ;;  %v3946_v35 = vpack.c.bf16 %v1344_v25, %v1342_v22  ;;  %v1362_v25 = vld [vmem:[%s4203_s16 + $0x1f00] sm:$0xff] }
 0x1d1   : > { %3419 = vmatpush1.bf16.msra.mxu1 %v3418_v36  ;;  %v3436_v36 = vpack.c.bf16 %v837_v27, %v835_v26  ;;  %v1364_v27 = vld [vmem:[%s4203_s16 + $0x1f10] sm:$0xff] }
 0x1d2   : > { %3931 = vmatpush1.bf16.msra.mxu0 %v3930_v37  ;;  %3421 = vmatprep.subr.bf16.mxu1 %v3420_v38  ;;  %v836_v37 = vld [vmem:[%s4203_s16 + $0xe90] sm:$0xff]  ;;  %v1346_v38 = vld [vmem:[%s4203_s16 + $0x1e80] sm:$0xff] }
 0x1d3   : > { %3933 = vmatprep.subr.bf16.mxu0 %v3932_v42  ;;  %v839_v42 = vld [vmem:[%s4203_s16 + $0xea8] sm:$0xff]  ;;  %v3438_v47 = vpack.c.bf16 %v836_v37, %v834_v32  ;;  %v1366_v37 = vld [vmem:[%s4203_s16 + $0x1f20] sm:$0xff] }
 0x1d4   : > { %1993 = vmatmul.mubr.f32.vlgmr.msra.gmra.mrb[0].mxu1 %v254_v48  ;;  %v273_v48 = vld [vmem:[%s4301_s20 + $0xf8] sm:$0xff] }
 0x1d5   : > { %3423 = vmatpush1.bf16.msra.mxu1 %v3422_v49  ;;  %2705 = vmatmul.mubr.f32.vlgmr.msra.gmra.mrb[0].mxu0 %v270_v50  ;;  %v3950_v49 = vpack.c.bf16 %v1348_v41, %v1346_v38  ;;  %v3440_v50 = vpack.c.bf16 %v841_v43, %v839_v42  ;;  %v861_v41 = vld [vmem:[%s4203_s16 + $0xf58] sm:$0xff]  ;;  %v1371_v42 = vld [vmem:[%s4203_s16 + $0x1f48] sm:$0xff] }
 0x1d6   : > { %3935 = vmatpush1.bf16.msra.mxu0 %v3934_v51  ;;  %3425 = vmatprep.subr.bf16.mxu1 %v3424_v52  ;;  %v838_v51 = vld [vmem:[%s4203_s16 + $0xea0] sm:$0xff]  ;;  %v840_v52 = vld [vmem:[%s4203_s16 + $0xeb0] sm:$0xff]  ;;  %v1373_v43 = vld [vmem:[%s4203_s16 + $0x1f58] sm:$0xff] }
 0x1d7   : > { %3937 = vmatprep.subr.bf16.mxu0 %v3936_v56  ;;  %1998 = vmatprep.mubr.f32.mxu1 %v287_v62  ;;  %v843_v56 = vld [vmem:[%s4203_s16 + $0xec8] sm:$0xff]  ;;  %v3442_v60 = vpack.c.bf16 %v840_v52, %v838_v51  ;;  %v1372_v51 = vld [vmem:[%s4203_s16 + $0x1f50] sm:$0xff] }
 0x1d8   : > { %2710 = vmatprep.mubr.f32.mxu0 %v303_v1  ;;  %1999 = vmatmul.mubr.f32.gmra.mrb[2].mxu1 %v286_v2  ;;  %v3444_v62 = vpack.c.bf16 %v845_v57, %v843_v56  ;;  %v1354_v1 = vld [vmem:[%s4203_s16 + $0x1ec0] sm:$0xff]  ;;  %v3956_v2 = vpack.c.bf16 %v1357_v59, %v1355_v58  ;;  %v863_v52 = vld [vmem:[%s4203_s16 + $0xf68] sm:$0xff] }
 0x1d9   : > { %3427 = vmatpush1.bf16.msra.mxu1 %v3426_v63  ;;  %2711 = vmatmul.mubr.f32.gmra.mrb[2].mxu0 %v302_v7  ;;  %v842_v63 = vld [vmem:[%s4203_s16 + $0xec0] sm:$0xff]  ;;  %v1361_v7 = vld [vmem:[%s4203_s16 + $0x1ef8] sm:$0xff]  ;;  %v3464_v58 = vpack.c.bf16 %v865_v53, %v863_v52 }
 0x1da   : > { %3939 = vmatpush1.bf16.msra.mxu0 %v3938_v3  ;;  %3429 = vmatprep.subr.bf16.mxu1 %v3428_v4  ;;  %v1356_v3 = vld [vmem:[%s4203_s16 + $0x1ed0] sm:$0xff]  ;;  %v847_v4 = vld [vmem:[%s4203_s16 + $0xee8] sm:$0xff]  ;;  %v862_v59 = vld [vmem:[%s4203_s16 + $0xf60] sm:$0xff] }
 0x1db   : > { %3941 = vmatprep.subr.bf16.mxu0 %v3940_v8  ;;  %2004 = vmatprep.mubr.f32.mxu1 %v319_v14  ;;  %v3446_v8 = vpack.c.bf16 %v844_v0, %v842_v63  ;;  %v3958_v9 = vpack.c.bf16 %v1356_v3, %v1354_v1  ;;  %v3448_v10 = vpack.c.bf16 %v849_v5, %v847_v4  ;;  %v1376_v63 = vld [vmem:[%s4203_s16 + $0x1f70] sm:$0xff]  ;;  %v867_v0 = vld [vmem:[%s4203_s16 + $0xf88] sm:$0xff]  ;;  %v869_v1 = vld [vmem:[%s4203_s16 + $0xf98] sm:$0xff] }
 0x1dc   : > { %2716 = vmatprep.mubr.f32.mxu0 %v335_v17  ;;  %2005 = vmatmul.mubr.f32.gmra.mrb[4].mxu1 %v318_v18  ;;  %v3960_v14 = vpack.c.bf16 %v1361_v7, %v1359_v6  ;;  %v853_v17 = vld [vmem:[%s4203_s16 + $0xf18] sm:$0xff]  ;;  %v1363_v18 = vld [vmem:[%s4203_s16 + $0x1f08] sm:$0xff]  ;;  %v3468_v6 = vpack.c.bf16 %v869_v1, %v867_v0  ;;  %v866_v7 = vld [vmem:[%s4203_s16 + $0xf80] sm:$0xff] }
 0x1dd   : > { %3431 = vmatpush1.bf16.msra.mxu1 %v3430_v15  ;;  %2717 = vmatmul.mubr.f32.gmra.mrb[4].mxu0 %v334_v23  ;;  %v1360_v15 = vld [vmem:[%s4203_s16 + $0x1ef0] sm:$0xff]  ;;  %v3452_v22 = vpack.c.bf16 %v853_v17, %v851_v16  ;;  %v850_v23 = vld [vmem:[%s4203_s16 + $0xf00] sm:$0xff]  ;;  %v1381_v3 = vld [vmem:[%s4203_s16 + $0x1f98] sm:$0xff] }
 0x1de   : > { %3943 = vmatpush1.bf16.msra.mxu0 %v3942_v19  ;;  %3433 = vmatprep.subr.bf16.mxu1 %v3432_v20  ;;  %v1365_v19 = vld [vmem:[%s4203_s16 + $0x1f18] sm:$0xff]  ;;  %v3450_v20 = vpack.c.bf16 %v848_v12, %v846_v11  ;;  %v3962_v21 = vpack.c.bf16 %v1360_v15, %v1358_v13  ;;  %v1380_v11 = vld [vmem:[%s4203_s16 + $0x1f90] sm:$0xff]  ;;  %v871_v12 = vld [vmem:[%s4203_s16 + $0xfa8] sm:$0xff] }
 0x1df   : > { %3945 = vmatprep.subr.bf16.mxu0 %v3944_v24  ;;  %2010 = vmatprep.mubr.f32.mxu1 %v351_v30  ;;  %v852_v24 = vld [vmem:[%s4203_s16 + $0xf10] sm:$0xff]  ;;  %v3964_v26 = vpack.c.bf16 %v1365_v19, %v1363_v18  ;;  %v1367_v30 = vld [vmem:[%s4203_s16 + $0x1f28] sm:$0xff]  ;;  %v873_v13 = vld [vmem:[%s4203_s16 + $0xfb8] sm:$0xff] }
 0x1e0   : > { %2722 = vmatprep.mubr.f32.mxu0 %v367_v33  ;;  %2011 = vmatmul.mubr.f32.gmra.mrb[6].mxu1 %v350_v34  ;;  %v3454_v32 = vpack.c.bf16 %v852_v24, %v850_v23  ;;  %v3966_v33 = vpack.c.bf16 %v1364_v27, %v1362_v25  ;;  %v3456_v34 = vpack.c.bf16 %v857_v29, %v855_v28  ;;  %v1385_v15 = vld [vmem:[%s4203_s16 + $0x1fb8] sm:$0xff]  ;;  %v870_v19 = vld [vmem:[%s4203_s16 + $0xfa0] sm:$0xff]  ;;  %v1384_v23 = vld [vmem:[%s4203_s16 + $0x1fb0] sm:$0xff] }
 0x1e1   : > { %3435 = vmatpush1.bf16.msra.mxu1 %v3434_v31  ;;  %2723 = vmatmul.mubr.f32.gmra.mrb[6].mxu0 %v366_v39  ;;  %v1369_v31 = vld [vmem:[%s4203_s16 + $0x1f38] sm:$0xff]  ;;  %v1368_v39 = vld [vmem:[%s4203_s16 + $0x1f30] sm:$0xff]  ;;  %v3472_v18 = vpack.c.bf16 %v873_v13, %v871_v12  ;;  %v875_v24 = vld [vmem:[%s4203_s16 + $0xfc8] sm:$0xff] }
 0x1e2   : > { %3947 = vmatpush1.bf16.msra.mxu0 %v3946_v35  ;;  %3437 = vmatprep.subr.bf16.mxu1 %v3436_v36  ;;  %v854_v35 = vld [vmem:[%s4203_s16 + $0xf20] sm:$0xff]  ;;  %v856_v36 = vld [vmem:[%s4203_s16 + $0xf30] sm:$0xff]  ;;  %v3968_v38 = vpack.c.bf16 %v1369_v31, %v1367_v30  ;;  %v3970_v45 = vpack.c.bf16 %v1368_v39, %v1366_v37  ;;  %v877_v25 = vld [vmem:[%s4203_s16 + $0xfd8] sm:$0xff] }
 0x1e3   : > { %3949 = vmatprep.subr.bf16.mxu0 %v3948_v40  ;;  %2081 = vmatprep.mubr.f32.mxu1 %v257_v46  ;;  %v859_v40 = vld [vmem:[%s4203_s16 + $0xf48] sm:$0xff]  ;;  %v3458_v44 = vpack.c.bf16 %v856_v36, %v854_v35  ;;  %v1389_v27 = vld [vmem:[%s4203_s16 + $0x1fd8] sm:$0xff]  ;;  %v3476_v30 = vpack.c.bf16 %v877_v25, %v875_v24  ;;  %v874_v31 = vld [vmem:[%s4203_s16 + $0xfc0] sm:$0xff] }
 0x1e4   : > { %2793 = vmatprep.mubr.f32.mxu0 %v273_v48  ;;  %v3460_v46 = vpack.c.bf16 %v861_v41, %v859_v40  ;;  %v860_v48 = vld [vmem:[%s4203_s16 + $0xf50] sm:$0xff]  ;;  %v879_v36 = vld [vmem:[%s4203_s16 + $0xfe8] sm:$0xff]  ;;  %v881_v37 = vld [vmem:[%s4203_s16 + $0xff8] sm:$0xff] }
 0x1e5   : > { %3439 = vmatpush1.bf16.msra.mxu1 %v3438_v47  ;;  %v858_v47 = vld [vmem:[%s4203_s16 + $0xf40] sm:$0xff]  ;;  %v1388_v35 = vld [vmem:[%s4203_s16 + $0x1fd0] sm:$0xff]  ;;  %v1393_v39 = vld [vmem:[%s4203_s16 + $0x1ff8] sm:$0xff] }
 0x1e6   : > { %3951 = vmatpush1.bf16.msra.mxu0 %v3950_v49  ;;  %3441 = vmatprep.subr.bf16.mxu1 %v3440_v50  ;;  %v1370_v49 = vld [vmem:[%s4203_s16 + $0x1f40] sm:$0xff]  ;;  %v3972_v50 = vpack.c.bf16 %v1373_v43, %v1371_v42  ;;  %v3462_v56 = vpack.c.bf16 %v860_v48, %v858_v47  ;;  %v3480_v42 = vpack.c.bf16 %v881_v37, %v879_v36  ;;  %v1392_v47 = vld [vmem:[%s4203_s16 + $0x1ff0] sm:$0xff]  ;;  %v289_v52 = vld [vmem:[%s4301_s20 + $0x178] sm:$0xff] }
 0x1e7   : > { %3953 = vmatprep.subr.bf16.mxu0 %v3952_v54  ;;  %v1375_v54 = vld [vmem:[%s4203_s16 + $0x1f68] sm:$0xff]  ;;  %v3974_v57 = vpack.c.bf16 %v1372_v51, %v1370_v49  ;;  %v878_v43 = vld [vmem:[%s4203_s16 + $0xfe0] sm:$0xff]  ;;  %v272_v51 = vld [vmem:[%s4301_s20 + $0xf0] sm:$0xff] }
 0x1e8   : > { %v305_v53 = vld [vmem:[%s4301_s20 + $0x1f8] sm:$0xff] }
 0x1e9   : > { %3443 = vmatpush1.bf16.msra.mxu1 %v3442_v60  ;;  %v864_v60 = vld [vmem:[%s4203_s16 + $0xf70] sm:$0xff] }
 0x1ea   : > { %3955 = vmatpush1.bf16.msra.mxu0 %v3954_v61  ;;  %3445 = vmatprep.subr.bf16.mxu1 %v3444_v62  ;;  %v1374_v61 = vld [vmem:[%s4203_s16 + $0x1f60] sm:$0xff]  ;;  %v3976_v62 = vpack.c.bf16 %v1377_v55, %v1375_v54  ;;  %v3466_v4 = vpack.c.bf16 %v864_v60, %v862_v59  ;;  %v288_v54 = vld [vmem:[%s4301_s20 + $0x170] sm:$0xff]  ;;  %v353_v60 = vld [vmem:[%s4301_s20 + $0x378] sm:$0xff] }
 0x1eb   : > { %3957 = vmatprep.subr.bf16.mxu0 %v3956_v2  ;;  %v1379_v2 = vld [vmem:[%s4203_s16 + $0x1f88] sm:$0xff]  ;;  %v3978_v5 = vpack.c.bf16 %v1376_v63, %v1374_v61  ;;  %v304_v55 = vld [vmem:[%s4301_s20 + $0x1f0] sm:$0xff]  ;;  %v369_v61 = vld [vmem:[%s4301_s20 + $0x3f8] sm:$0xff] }
 0x1ec   : > { %v336_v59 = vld [vmem:[%s4301_s20 + $0x2f0] sm:$0xff] }
 0x1ed   : > { %3447 = vmatpush1.bf16.msra.mxu1 %v3446_v8  ;;  %v868_v8 = vld [vmem:[%s4203_s16 + $0xf90] sm:$0xff] }
 0x1ee   : > { %3959 = vmatpush1.bf16.msra.mxu0 %v3958_v9  ;;  %3449 = vmatprep.subr.bf16.mxu1 %v3448_v10  ;;  %v1378_v9 = vld [vmem:[%s4203_s16 + $0x1f80] sm:$0xff]  ;;  %v3980_v10 = vpack.c.bf16 %v1381_v3, %v1379_v2  ;;  %v3470_v16 = vpack.c.bf16 %v868_v8, %v866_v7  ;;  %v368_v63 = vld [vmem:[%s4301_s20 + $0x3f0] sm:$0xff] }
 0x1ef   : > { %3961 = vmatprep.subr.bf16.mxu0 %v3960_v14  ;;  %v1383_v14 = vld [vmem:[%s4203_s16 + $0x1fa8] sm:$0xff]  ;;  %v3982_v17 = vpack.c.bf16 %v1380_v11, %v1378_v9 }
 0x1f1   : > { %3451 = vmatpush1.bf16.msra.mxu1 %v3450_v20  ;;  %v872_v20 = vld [vmem:[%s4203_s16 + $0xfb0] sm:$0xff] }
 0x1f2   : > { %3963 = vmatpush1.bf16.msra.mxu0 %v3962_v21  ;;  %3453 = vmatprep.subr.bf16.mxu1 %v3452_v22  ;;  %v1382_v21 = vld [vmem:[%s4203_s16 + $0x1fa0] sm:$0xff]  ;;  %v3984_v22 = vpack.c.bf16 %v1385_v15, %v1383_v14  ;;  %v3474_v28 = vpack.c.bf16 %v872_v20, %v870_v19 }
 0x1f3   : > { %3965 = vmatprep.subr.bf16.mxu0 %v3964_v26  ;;  %v1387_v26 = vld [vmem:[%s4203_s16 + $0x1fc8] sm:$0xff]  ;;  %v3986_v29 = vpack.c.bf16 %v1384_v23, %v1382_v21 }
 0x1f5   : > { %3455 = vmatpush1.bf16.msra.mxu1 %v3454_v32  ;;  %v876_v32 = vld [vmem:[%s4203_s16 + $0xfd0] sm:$0xff] }
 0x1f6   : > { %3967 = vmatpush1.bf16.msra.mxu0 %v3966_v33  ;;  %3457 = vmatprep.subr.bf16.mxu1 %v3456_v34  ;;  %v1386_v33 = vld [vmem:[%s4203_s16 + $0x1fc0] sm:$0xff]  ;;  %v3988_v34 = vpack.c.bf16 %v1389_v27, %v1387_v26  ;;  %v3478_v40 = vpack.c.bf16 %v876_v32, %v874_v31 }
 0x1f7   : > { %3969 = vmatprep.subr.bf16.mxu0 %v3968_v38  ;;  %v1391_v38 = vld [vmem:[%s4203_s16 + $0x1fe8] sm:$0xff]  ;;  %v3990_v41 = vpack.c.bf16 %v1388_v35, %v1386_v33 }
 0x1f9   : > { %3459 = vmatpush1.bf16.msra.mxu1 %v3458_v44  ;;  %v880_v44 = vld [vmem:[%s4203_s16 + $0xff0] sm:$0xff] }
 0x1fa   : > { %3971 = vmatpush1.bf16.msra.mxu0 %v3970_v45  ;;  %3461 = vmatprep.subr.bf16.mxu1 %v3460_v46  ;;  %v3992_v45 = vpack.c.bf16 %v1393_v39, %v1391_v38  ;;  %v1390_v46 = vld [vmem:[%s4203_s16 + $0x1fe0] sm:$0xff]  ;;  %v3482_v48 = vpack.c.bf16 %v880_v44, %v878_v43 }
 0x1fb   : > { %3973 = vmatprep.subr.bf16.mxu0 %v3972_v50  ;;  %v3994_v49 = vpack.c.bf16 %v1392_v47, %v1390_v46  ;;  %v256_v50 = vld [vmem:[%s4301_s20 + $0x70] sm:$0xff] }
 0x1fd   : > { %3463 = vmatpush1.bf16.msra.mxu1 %v3462_v56  ;;  %v321_v56 = vld [vmem:[%s4301_s20 + $0x278] sm:$0xff] }
 0x1fe   : > { %3975 = vmatpush1.bf16.msra.mxu0 %v3974_v57  ;;  %3465 = vmatprep.subr.bf16.mxu1 %v3464_v58  ;;  %v337_v57 = vld [vmem:[%s4301_s20 + $0x2f8] sm:$0xff]  ;;  %v320_v58 = vld [vmem:[%s4301_s20 + $0x270] sm:$0xff] }
 0x1ff   : > { %3977 = vmatprep.subr.bf16.mxu0 %v3976_v62  ;;  %v352_v62 = vld [vmem:[%s4301_s20 + $0x370] sm:$0xff] }
 0x201   : > { %3467 = vmatpush1.bf16.msra.mxu1 %v3466_v4 }
 0x202   : > { %3979 = vmatpush1.bf16.msra.mxu0 %v3978_v5  ;;  %3469 = vmatprep.subr.bf16.mxu1 %v3468_v6 }
 0x203   : > { %3981 = vmatprep.subr.bf16.mxu0 %v3980_v10 }
 0x205   : > { %3471 = vmatpush1.bf16.msra.mxu1 %v3470_v16 }
 0x206   : > { %3983 = vmatpush1.bf16.msra.mxu0 %v3982_v17  ;;  %3473 = vmatprep.subr.bf16.mxu1 %v3472_v18 }
 0x207   : > { %3985 = vmatprep.subr.bf16.mxu0 %v3984_v22 }
 0x209   : > { %3475 = vmatpush1.bf16.msra.mxu1 %v3474_v28 }
 0x20a   : > { %3987 = vmatpush1.bf16.msra.mxu0 %v3986_v29  ;;  %3477 = vmatprep.subr.bf16.mxu1 %v3476_v30 }
 0x20b   : > { %3989 = vmatprep.subr.bf16.mxu0 %v3988_v34 }
 0x20d   : > { %3479 = vmatpush1.bf16.msra.mxu1 %v3478_v40 }
 0x20e   : > { %3991 = vmatpush1.bf16.msra.mxu0 %v3990_v41  ;;  %3481 = vmatprep.subr.bf16.mxu1 %v3480_v42 }
 0x20f   : > { %3993 = vmatprep.subr.bf16.mxu0 %v3992_v45 }
 0x211   : > { %3483 = vmatpush1.bf16.msra.mxu1 %v3482_v48 }
 0x212   : > { %3995 = vmatpush1.bf16.msra.mxu0 %v3994_v49 }
 0x214   : > { %2082 = vmatmul.mubr.f32.vlgmr.msra.gmra.mrb[0].mxu1 %v256_v50 }
 0x215   : > { %2794 = vmatmul.mubr.f32.vlgmr.msra.gmra.mrb[0].mxu0 %v272_v51  ;;  %2087 = vmatprep.mubr.f32.mxu1 %v289_v52 }
 0x216   : > { %2799 = vmatprep.mubr.f32.mxu0 %v305_v53 }
 0x218   : > { %2088 = vmatmul.mubr.f32.gmra.mrb[2].mxu1 %v288_v54 }
 0x219   : > { %2800 = vmatmul.mubr.f32.gmra.mrb[2].mxu0 %v304_v55  ;;  %2093 = vmatprep.mubr.f32.mxu1 %v321_v56 }
 0x21a   : > { %2805 = vmatprep.mubr.f32.mxu0 %v337_v57 }
 0x21c   : > { %2094 = vmatmul.mubr.f32.gmra.mrb[4].mxu1 %v320_v58 }
 0x21d   : > { %2806 = vmatmul.mubr.f32.gmra.mrb[4].mxu0 %v336_v59  ;;  %2099 = vmatprep.mubr.f32.mxu1 %v353_v60 }
 0x21e   : > { %2811 = vmatprep.mubr.f32.mxu0 %v369_v61 }
 0x220   : > { %2100 = vmatmul.mubr.f32.gmra.mrb[6].mxu1 %v352_v62 }
 0x221   : > { %2812 = vmatmul.mubr.f32.gmra.mrb[6].mxu0 %v368_v63 }
 0x2e7   : > { %v2083_v0 = vpop.f32.mrb[0].mxu1 }
 0x2e8   : > { %v2795_v1 = vpop.f32.mrb[0].mxu0  ;;  %v2085_v2 = vpop.f32.mrb[1].mxu1 }
 0x2e9   : > { %v3996_v3 = vadd.f32 %v2795_v1, %v2083_v0  ;;  %v2797_v4 = vpop.f32.mrb[1].mxu0 }
 0x2ea   : > { %v3997_v5 = vadd.f32 %v2797_v4, %v2085_v2 }
 0x2eb   : > { %2818 = vst [vmem:[%s5367_s24] sm:$0xff] %v3996_v3  ;;  %v2089_v6 = vpop.f32.mrb[2].mxu1 }
 0x2ec   : > { %2819 = vst [vmem:[%s5367_s24 + $0x8] sm:$0xff] %v3997_v5  ;;  %v2801_v7 = vpop.f32.mrb[2].mxu0  ;;  %v2091_v8 = vpop.f32.mrb[3].mxu1 }
 0x2ed   : > { %v3998_v9 = vadd.f32 %v2801_v7, %v2089_v6  ;;  %v2803_v10 = vpop.f32.mrb[3].mxu0 }
 0x2ee   : > { %v3999_v11 = vadd.f32 %v2803_v10, %v2091_v8 }
 0x2ef   : > { %2820 = vst [vmem:[%s5367_s24 + $0x10] sm:$0xff] %v3998_v9  ;;  %v2095_v12 = vpop.f32.mrb[4].mxu1 }
 0x2f0   : > { %2821 = vst [vmem:[%s5367_s24 + $0x18] sm:$0xff] %v3999_v11  ;;  %v2807_v13 = vpop.f32.mrb[4].mxu0  ;;  %v2097_v14 = vpop.f32.mrb[5].mxu1 }
 0x2f1   : > { %v4000_v15 = vadd.f32 %v2807_v13, %v2095_v12  ;;  %v2809_v16 = vpop.f32.mrb[5].mxu0 }
 0x2f2   : > { %v4001_v17 = vadd.f32 %v2809_v16, %v2097_v14 }
 0x2f3   : > { %2822 = vst [vmem:[%s5367_s24 + $0x20] sm:$0xff] %v4000_v15  ;;  %v2101_v18 = vpop.f32.mrb[6].mxu1 }
 0x2f4   : > { %2823 = vst [vmem:[%s5367_s24 + $0x28] sm:$0xff] %v4001_v17  ;;  %v2813_v19 = vpop.f32.mrb[6].mxu0  ;;  %v2103_v20 = vpop.f32.mrb[7].mxu1 }
 0x2f5   : > { %v4002_v21 = vadd.f32 %v2813_v19, %v2101_v18  ;;  %v2815_v22 = vpop.f32.mrb[7].mxu0 }
 0x2f6   : > { %v4003_v23 = vadd.f32 %v2815_v22, %v2103_v20 }
 0x2f7   : > { %2824 = vst [vmem:[%s5367_s24 + $0x30] sm:$0xff] %v4002_v21 }
 0x2f8   : > { %2825 = vst [vmem:[%s5367_s24 + $0x38] sm:$0xff] %v4003_v23 }
 0x2f9 PF: > { %s12_s11 = sadd.s32 1, %s4162_s11   ;;  %s5389_s9 = smov %s4158_s10 }
 0x2fa   : > { %p9_p5 = scmp.ge.s32.totalorder %s12_s11, 6   ;;  %s5390_s10 = smov %s5392_s12 }
 0x2fc   :  { %11 = sbr.rel (!%p9_p5) target bundleno = 2 (0x2), region = 61 }

// kernel: generator_forward.19
= control target key start
LH: loop header
LB: loop body
LE: loop exit
PB: predicated region body
PF: predicated region fallthrough
CT: control target
= control target key end

     0   :  { %s1732_s9 = smov 0   ;;  %s1734_s10 = smov 0   ;;  %s2102_s0 = inlined_call_operand.vmem [shape: f32[4,128,1024], index: 0, kind: input, shape index: {}]   ;;  %s2103_s1 = inlined_call_operand.vmem [shape: f32[4,1024,128], index: 1, kind: input, shape index: {}]   ;;  %s2104_s2 = inlined_call_operand.vmem [shape: f32[4,128,128], index: 2, kind: output, shape index: {}]  }
   0x1   :  { %s1736_s11 = smov 0  }
   0x2 LB: > { %s31_s12 = sadd.s32 1, %s1711_s10  ;;  %p1209_p0 = scmp.ge.s32.totalorder %s1715_s11, 1  ;;  %s1715_s11 = sphi %s1736_s11, %s12_s11   ;;  %s1711_s10 = sphi %s1734_s10, %s2106_s10   ;;  %s1707_s9 = sphi %s1732_s9, %s2105_s9  }
   0x3   : > { %p33_p1 = scmp.ge.s32.totalorder %s31_s12, 4  ;;  %p158_p2 = scmp.lt.s32.totalorder %s1715_s11, 5 }
   0x5   : > { %s2108_s12 = smov (%p33_p1, %s31_s12), 0  ;;  %p159_p3 = pnand %p1209_p0, %p158_p2 }
   0x6   : > { %p201_p4 = scmp.lt.s32.totalorder (!%p159_p3), %s1707_s9, 3 }
   0x7   : > { %162 = sbr.rel (%p159_p3) target bundleno = 397 (0x18d), region = 28 }
   0xe   : > { %s2110_s9 = smov (!%p201_p4, %s1707_s9), 3 }
   0xf   : > { %s1218_s13 = sshll.u32 %s2110_s9, 10  ;;  %s1220_s20 = sshll.u32 %s2110_s9, 7 }
  0x10   : > { %s1758_s16 = scalar_lea.vmem %s2103_s1, %s1218_s13  ;;  %s1815_s19 = scalar_lea.vmem %s2102_s0, %s1218_s13 }
  0x11   : > { %v376_v0 = vld [vmem:[%s1758_s16 + $0x80] sm:$0xff]  ;;  %v377_v1 = vld [vmem:[%s1758_s16 + $0x88] sm:$0xff]  ;;  %v378_v11 = vld [vmem:[%s1758_s16 + $0x90] sm:$0xff]  ;;  %s2060_s23 = scalar_lea.vmem %s2104_s2, %s1220_s20 }
  0x12   : > { %v408_v2 = vld [vmem:[%s1758_s16 + $0x180] sm:$0xff]  ;;  %v1541_v3 = vpack.c.bf16 %v377_v1, %v376_v0  ;;  %v409_v4 = vld [vmem:[%s1758_s16 + $0x188] sm:$0xff]  ;;  %v379_v13 = vld [vmem:[%s1758_s16 + $0x98] sm:$0xff] }
  0x13   : > { %v360_v5 = vld [vmem:[%s1758_s16] sm:$0xff]  ;;  %v361_v6 = vld [vmem:[%s1758_s16 + $0x8] sm:$0xff]  ;;  %v1573_v7 = vpack.c.bf16 %v409_v4, %v408_v2  ;;  %v410_v14 = vld [vmem:[%s1758_s16 + $0x190] sm:$0xff]  ;;  %v1545_v16 = vpack.c.bf16 %v379_v13, %v378_v11 }
  0x14   : > { %v1543_v8 = vpack.c.bf16 %v361_v6, %v360_v5  ;;  %v392_v9 = vld [vmem:[%s1758_s16 + $0x100] sm:$0xff]  ;;  %v393_v10 = vld [vmem:[%s1758_s16 + $0x108] sm:$0xff]  ;;  %1542 = vmatprep.subr.bf16.mxu0 %v1541_v3  ;;  %v411_v15 = vld [vmem:[%s1758_s16 + $0x198] sm:$0xff] }
  0x15   : > { %v1575_v12 = vpack.c.bf16 %v393_v10, %v392_v9  ;;  %1574 = vmatprep.subr.bf16.mxu1 %v1573_v7  ;;  %v1577_v17 = vpack.c.bf16 %v411_v15, %v410_v14  ;;  %v362_v18 = vld [vmem:[%s1758_s16 + $0x10] sm:$0xff]  ;;  %v363_v19 = vld [vmem:[%s1758_s16 + $0x18] sm:$0xff]  ;;  %v380_v23 = vld [vmem:[%s1758_s16 + $0xa0] sm:$0xff] }
  0x16   : > { %1544 = vmatpush3.bf16.msra.mxu0 %v1543_v8  ;;  %v394_v20 = vld [vmem:[%s1758_s16 + $0x110] sm:$0xff]  ;;  %v1547_v21 = vpack.c.bf16 %v363_v19, %v362_v18  ;;  %v395_v22 = vld [vmem:[%s1758_s16 + $0x118] sm:$0xff]  ;;  %v381_v24 = vld [vmem:[%s1758_s16 + $0xa8] sm:$0xff] }
  0x17   : > { %1576 = vmatpush3.bf16.msra.mxu1 %v1575_v12  ;;  %1546 = vmatprep.subr.bf16.mxu0 %v1545_v16  ;;  %v1579_v25 = vpack.c.bf16 %v395_v22, %v394_v20  ;;  %v1549_v26 = vpack.c.bf16 %v381_v24, %v380_v23  ;;  %v412_v27 = vld [vmem:[%s1758_s16 + $0x1a0] sm:$0xff]  ;;  %v413_v28 = vld [vmem:[%s1758_s16 + $0x1a8] sm:$0xff]  ;;  %v382_v35 = vld [vmem:[%s1758_s16 + $0xb0] sm:$0xff] }
  0x18   : > { %1578 = vmatprep.subr.bf16.mxu1 %v1577_v17  ;;  %v364_v29 = vld [vmem:[%s1758_s16 + $0x20] sm:$0xff]  ;;  %v1581_v30 = vpack.c.bf16 %v413_v28, %v412_v27  ;;  %v365_v31 = vld [vmem:[%s1758_s16 + $0x28] sm:$0xff]  ;;  %v383_v36 = vld [vmem:[%s1758_s16 + $0xb8] sm:$0xff] }
  0x19   : > { %v396_v32 = vld [vmem:[%s1758_s16 + $0x120] sm:$0xff]  ;;  %v397_v33 = vld [vmem:[%s1758_s16 + $0x128] sm:$0xff]  ;;  %v1551_v34 = vpack.c.bf16 %v365_v31, %v364_v29  ;;  %v414_v37 = vld [vmem:[%s1758_s16 + $0x1b0] sm:$0xff]  ;;  %v1553_v39 = vpack.c.bf16 %v383_v36, %v382_v35 }
  0x1a   : > { %1548 = vmatpush3.bf16.msra.mxu0 %v1547_v21  ;;  %v1583_v38 = vpack.c.bf16 %v397_v33, %v396_v32  ;;  %v415_v40 = vld [vmem:[%s1758_s16 + $0x1b8] sm:$0xff]  ;;  %v366_v41 = vld [vmem:[%s1758_s16 + $0x30] sm:$0xff]  ;;  %v384_v46 = vld [vmem:[%s1758_s16 + $0xc0] sm:$0xff] }
  0x1b   : > { %1580 = vmatpush3.bf16.msra.mxu1 %v1579_v25  ;;  %1550 = vmatprep.subr.bf16.mxu0 %v1549_v26  ;;  %v367_v42 = vld [vmem:[%s1758_s16 + $0x38] sm:$0xff]  ;;  %v1585_v43 = vpack.c.bf16 %v415_v40, %v414_v37  ;;  %v398_v44 = vld [vmem:[%s1758_s16 + $0x130] sm:$0xff]  ;;  %v385_v47 = vld [vmem:[%s1758_s16 + $0xc8] sm:$0xff] }
  0x1c   : > { %1582 = vmatprep.subr.bf16.mxu1 %v1581_v30  ;;  %v399_v45 = vld [vmem:[%s1758_s16 + $0x138] sm:$0xff]  ;;  %v416_v48 = vld [vmem:[%s1758_s16 + $0x1c0] sm:$0xff]  ;;  %v417_v49 = vld [vmem:[%s1758_s16 + $0x1c8] sm:$0xff]  ;;  %v1555_v50 = vpack.c.bf16 %v367_v42, %v366_v41  ;;  %v1557_v52 = vpack.c.bf16 %v385_v47, %v384_v46 }
  0x1d   : > { %v1587_v51 = vpack.c.bf16 %v399_v45, %v398_v44  ;;  %v368_v53 = vld [vmem:[%s1758_s16 + $0x40] sm:$0xff]  ;;  %v369_v54 = vld [vmem:[%s1758_s16 + $0x48] sm:$0xff]  ;;  %v1589_v56 = vpack.c.bf16 %v417_v49, %v416_v48  ;;  %v386_v58 = vld [vmem:[%s1758_s16 + $0xd0] sm:$0xff] }
  0x1e   : > { %1552 = vmatpush3.bf16.msra.mxu0 %v1551_v34  ;;  %v400_v55 = vld [vmem:[%s1758_s16 + $0x140] sm:$0xff]  ;;  %v401_v57 = vld [vmem:[%s1758_s16 + $0x148] sm:$0xff]  ;;  %v387_v59 = vld [vmem:[%s1758_s16 + $0xd8] sm:$0xff]  ;;  %v1559_v62 = vpack.c.bf16 %v369_v54, %v368_v53 }
  0x1f   : > { %1584 = vmatpush3.bf16.msra.mxu1 %v1583_v38  ;;  %1554 = vmatprep.subr.bf16.mxu0 %v1553_v39  ;;  %v418_v60 = vld [vmem:[%s1758_s16 + $0x1d0] sm:$0xff]  ;;  %v419_v61 = vld [vmem:[%s1758_s16 + $0x1d8] sm:$0xff]  ;;  %v1591_v63 = vpack.c.bf16 %v401_v57, %v400_v55  ;;  %v1561_v0 = vpack.c.bf16 %v387_v59, %v386_v58  ;;  %v388_v6 = vld [vmem:[%s1758_s16 + $0xe0] sm:$0xff] }
  0x20   : > { %1586 = vmatprep.subr.bf16.mxu1 %v1585_v43  ;;  %v370_v1 = vld [vmem:[%s1758_s16 + $0x50] sm:$0xff]  ;;  %v371_v2 = vld [vmem:[%s1758_s16 + $0x58] sm:$0xff]  ;;  %v1593_v4 = vpack.c.bf16 %v419_v61, %v418_v60  ;;  %v389_v7 = vld [vmem:[%s1758_s16 + $0xe8] sm:$0xff] }
  0x21   : > { %v402_v3 = vld [vmem:[%s1758_s16 + $0x150] sm:$0xff]  ;;  %v403_v5 = vld [vmem:[%s1758_s16 + $0x158] sm:$0xff]  ;;  %v420_v8 = vld [vmem:[%s1758_s16 + $0x1e0] sm:$0xff]  ;;  %v1563_v10 = vpack.c.bf16 %v371_v2, %v370_v1  ;;  %v1565_v14 = vpack.c.bf16 %v389_v7, %v388_v6 }
  0x22   : > { %1556 = vmatpush3.bf16.msra.mxu0 %v1555_v50  ;;  %v421_v9 = vld [vmem:[%s1758_s16 + $0x1e8] sm:$0xff]  ;;  %v372_v11 = vld [vmem:[%s1758_s16 + $0x60] sm:$0xff]  ;;  %v1595_v13 = vpack.c.bf16 %v403_v5, %v402_v3  ;;  %v235_v17 = vld [vmem:[%s1815_s19 + $0x18] sm:$0xff] }
  0x23   : > { %1588 = vmatpush3.bf16.msra.mxu1 %v1587_v51  ;;  %1558 = vmatprep.subr.bf16.mxu0 %v1557_v52  ;;  %v373_v12 = vld [vmem:[%s1758_s16 + $0x68] sm:$0xff]  ;;  %v404_v15 = vld [vmem:[%s1758_s16 + $0x160] sm:$0xff]  ;;  %v1597_v18 = vpack.c.bf16 %v421_v9, %v420_v8  ;;  %v390_v20 = vld [vmem:[%s1758_s16 + $0xf0] sm:$0xff] }
  0x24   : > { %1590 = vmatprep.subr.bf16.mxu1 %v1589_v56  ;;  %v233_v16 = vld [vmem:[%s1815_s19 + $0x8] sm:$0xff]  ;;  %v391_v21 = vld [vmem:[%s1758_s16 + $0xf8] sm:$0xff]  ;;  %v422_v22 = vld [vmem:[%s1758_s16 + $0x1f0] sm:$0xff]  ;;  %697 = vmatprep.mubr.f32.mxu1 %v235_v17  ;;  %v1567_v24 = vpack.c.bf16 %v373_v12, %v372_v11 }
  0x25   : > { %v405_v19 = vld [vmem:[%s1758_s16 + $0x168] sm:$0xff]  ;;  %552 = vmatprep.mubr.f32.mxu0 %v233_v16  ;;  %v423_v23 = vld [vmem:[%s1758_s16 + $0x1f8] sm:$0xff]  ;;  %v1569_v26 = vpack.c.bf16 %v391_v21, %v390_v20  ;;  %v374_v27 = vld [vmem:[%s1758_s16 + $0x70] sm:$0xff] }
  0x26   : > { %1560 = vmatpush3.bf16.msra.mxu0 %v1559_v62  ;;  %v1599_v25 = vpack.c.bf16 %v405_v19, %v404_v15  ;;  %v375_v28 = vld [vmem:[%s1758_s16 + $0x78] sm:$0xff]  ;;  %v406_v29 = vld [vmem:[%s1758_s16 + $0x170] sm:$0xff]  ;;  %v1601_v30 = vpack.c.bf16 %v423_v23, %v422_v22  ;;  %v440_v32 = vld [vmem:[%s1758_s16 + $0x280] sm:$0xff] }
  0x27   : > { %1592 = vmatpush3.bf16.msra.mxu1 %v1591_v63  ;;  %1562 = vmatprep.subr.bf16.mxu0 %v1561_v0  ;;  %v407_v31 = vld [vmem:[%s1758_s16 + $0x178] sm:$0xff]  ;;  %v441_v33 = vld [vmem:[%s1758_s16 + $0x288] sm:$0xff]  ;;  %v472_v34 = vld [vmem:[%s1758_s16 + $0x380] sm:$0xff]  ;;  %v1571_v36 = vpack.c.bf16 %v375_v28, %v374_v27 }
  0x28   : > { %1594 = vmatprep.subr.bf16.mxu1 %v1593_v4  ;;  %v473_v35 = vld [vmem:[%s1758_s16 + $0x388] sm:$0xff]  ;;  %v1603_v37 = vpack.c.bf16 %v407_v31, %v406_v29  ;;  %v1605_v38 = vpack.c.bf16 %v441_v33, %v440_v32  ;;  %v424_v39 = vld [vmem:[%s1758_s16 + $0x200] sm:$0xff]  ;;  %v442_v44 = vld [vmem:[%s1758_s16 + $0x290] sm:$0xff] }
  0x29   : > { %v425_v40 = vld [vmem:[%s1758_s16 + $0x208] sm:$0xff]  ;;  %v1637_v41 = vpack.c.bf16 %v473_v35, %v472_v34  ;;  %v456_v42 = vld [vmem:[%s1758_s16 + $0x300] sm:$0xff]  ;;  %v443_v45 = vld [vmem:[%s1758_s16 + $0x298] sm:$0xff] }
  0x2a   : > { %1564 = vmatpush3.bf16.msra.mxu0 %v1563_v10  ;;  %v457_v43 = vld [vmem:[%s1758_s16 + $0x308] sm:$0xff]  ;;  %v232_v46 = vld [vmem:[%s1815_s19] sm:$0xff]  ;;  %v1607_v47 = vpack.c.bf16 %v425_v40, %v424_v39  ;;  %v474_v48 = vld [vmem:[%s1758_s16 + $0x390] sm:$0xff]  ;;  %v1609_v54 = vpack.c.bf16 %v443_v45, %v442_v44 }
  0x2b   : > { %1596 = vmatpush3.bf16.msra.mxu1 %v1595_v13  ;;  %1566 = vmatprep.subr.bf16.mxu0 %v1565_v14  ;;  %v475_v49 = vld [vmem:[%s1758_s16 + $0x398] sm:$0xff]  ;;  %v234_v50 = vld [vmem:[%s1815_s19 + $0x10] sm:$0xff]  ;;  %v241_v51 = vld [vmem:[%s1815_s19 + $0x48] sm:$0xff]  ;;  %v1639_v53 = vpack.c.bf16 %v457_v43, %v456_v42 }
  0x2c   : > { %1598 = vmatprep.subr.bf16.mxu1 %v1597_v18  ;;  %v243_v52 = vld [vmem:[%s1815_s19 + $0x58] sm:$0xff]  ;;  %v426_v55 = vld [vmem:[%s1758_s16 + $0x210] sm:$0xff]  ;;  %v1641_v58 = vpack.c.bf16 %v475_v49, %v474_v48  ;;  %v444_v60 = vld [vmem:[%s1758_s16 + $0x2a0] sm:$0xff] }
  0x2d   : > { %v427_v56 = vld [vmem:[%s1758_s16 + $0x218] sm:$0xff]  ;;  %v458_v57 = vld [vmem:[%s1758_s16 + $0x310] sm:$0xff]  ;;  %v445_v61 = vld [vmem:[%s1758_s16 + $0x2a8] sm:$0xff] }
  0x2e   : > { %1568 = vmatpush3.bf16.msra.mxu0 %v1567_v24  ;;  %v459_v59 = vld [vmem:[%s1758_s16 + $0x318] sm:$0xff]  ;;  %v240_v62 = vld [vmem:[%s1815_s19 + $0x40] sm:$0xff]  ;;  %v477_v0 = vld [vmem:[%s1758_s16 + $0x3a8] sm:$0xff]  ;;  %v1611_v4 = vpack.c.bf16 %v427_v56, %v426_v55  ;;  %v1613_v6 = vpack.c.bf16 %v445_v61, %v444_v60 }
  0x2f   : > { %1600 = vmatpush3.bf16.msra.mxu1 %v1599_v25  ;;  %1570 = vmatprep.subr.bf16.mxu0 %v1569_v26  ;;  %v476_v63 = vld [vmem:[%s1758_s16 + $0x3a0] sm:$0xff]  ;;  %v242_v1 = vld [vmem:[%s1815_s19 + $0x50] sm:$0xff]  ;;  %v249_v2 = vld [vmem:[%s1815_s19 + $0x88] sm:$0xff]  ;;  %v1643_v5 = vpack.c.bf16 %v459_v59, %v458_v57 }
  0x30   : > { %1602 = vmatprep.subr.bf16.mxu1 %v1601_v30  ;;  %v251_v3 = vld [vmem:[%s1815_s19 + $0x98] sm:$0xff]  ;;  %v428_v7 = vld [vmem:[%s1758_s16 + $0x220] sm:$0xff]  ;;  %v429_v8 = vld [vmem:[%s1758_s16 + $0x228] sm:$0xff]  ;;  %v1645_v10 = vpack.c.bf16 %v477_v0, %v476_v63 }
  0x31   : > { %v460_v9 = vld [vmem:[%s1758_s16 + $0x320] sm:$0xff]  ;;  %v461_v11 = vld [vmem:[%s1758_s16 + $0x328] sm:$0xff]  ;;  %v446_v12 = vld [vmem:[%s1758_s16 + $0x2b0] sm:$0xff]  ;;  %v1615_v19 = vpack.c.bf16 %v429_v8, %v428_v7 }
  0x32   : > { %1572 = vmatpush3.bf16.msra.mxu0 %v1571_v36  ;;  %v447_v13 = vld [vmem:[%s1758_s16 + $0x2b8] sm:$0xff]  ;;  %v248_v14 = vld [vmem:[%s1815_s19 + $0x80] sm:$0xff]  ;;  %v478_v15 = vld [vmem:[%s1758_s16 + $0x3b0] sm:$0xff]  ;;  %v1647_v21 = vpack.c.bf16 %v461_v11, %v460_v9 }
  0x33   : > { %1604 = vmatpush3.bf16.msra.mxu1 %v1603_v37  ;;  %1606 = vmatprep.subr.bf16.mxu0 %v1605_v38  ;;  %v479_v16 = vld [vmem:[%s1758_s16 + $0x3b8] sm:$0xff]  ;;  %v250_v17 = vld [vmem:[%s1815_s19 + $0x90] sm:$0xff]  ;;  %v257_v18 = vld [vmem:[%s1815_s19 + $0xc8] sm:$0xff]  ;;  %v1617_v22 = vpack.c.bf16 %v447_v13, %v446_v12 }
  0x34   : > { %1638 = vmatprep.subr.bf16.mxu1 %v1637_v41  ;;  %v259_v20 = vld [vmem:[%s1815_s19 + $0xd8] sm:$0xff]  ;;  %v430_v23 = vld [vmem:[%s1758_s16 + $0x230] sm:$0xff]  ;;  %v256_v25 = vld [vmem:[%s1815_s19 + $0xc0] sm:$0xff]  ;;  %v1649_v26 = vpack.c.bf16 %v479_v16, %v478_v15 }
  0x35   : > { %553 = vmatmul.mubr.f32.vlgmr.msra.gmra.mrb[0].mxu0 %v232_v46  ;;  %v431_v24 = vld [vmem:[%s1758_s16 + $0x238] sm:$0xff]  ;;  %v462_v27 = vld [vmem:[%s1758_s16 + $0x330] sm:$0xff]  ;;  %v448_v30 = vld [vmem:[%s1758_s16 + $0x2c0] sm:$0xff] }
  0x36   : > { %698 = vmatmul.mubr.f32.vlgmr.msra.gmra.mrb[0].mxu1 %v234_v50  ;;  %1608 = vmatpush3.bf16.msra.mxu0 %v1607_v47  ;;  %v463_v28 = vld [vmem:[%s1758_s16 + $0x338] sm:$0xff]  ;;  %v258_v29 = vld [vmem:[%s1815_s19 + $0xd0] sm:$0xff]  ;;  %v449_v31 = vld [vmem:[%s1758_s16 + $0x2c8] sm:$0xff]  ;;  %v1619_v33 = vpack.c.bf16 %v431_v24, %v430_v23 }
  0x37   : > { %557 = vmatprep.mubr.f32.mxu0 %v241_v51  ;;  %702 = vmatprep.mubr.f32.mxu1 %v243_v52  ;;  %v265_v32 = vld [vmem:[%s1815_s19 + $0x108] sm:$0xff]  ;;  %v480_v34 = vld [vmem:[%s1758_s16 + $0x3c0] sm:$0xff]  ;;  %v267_v36 = vld [vmem:[%s1815_s19 + $0x118] sm:$0xff]  ;;  %v1651_v37 = vpack.c.bf16 %v463_v28, %v462_v27  ;;  %v1621_v38 = vpack.c.bf16 %v449_v31, %v448_v30 }
  0x38   : > { %1640 = vmatpush3.bf16.msra.mxu1 %v1639_v53  ;;  %1610 = vmatprep.subr.bf16.mxu0 %v1609_v54  ;;  %v481_v35 = vld [vmem:[%s1758_s16 + $0x3c8] sm:$0xff]  ;;  %v432_v39 = vld [vmem:[%s1758_s16 + $0x240] sm:$0xff]  ;;  %v266_v45 = vld [vmem:[%s1815_s19 + $0x110] sm:$0xff] }
  0x39   : > { %558 = vmatmul.mubr.f32.gmra.mrb[2].mxu0 %v240_v62  ;;  %1642 = vmatprep.subr.bf16.mxu1 %v1641_v58  ;;  %v433_v40 = vld [vmem:[%s1758_s16 + $0x248] sm:$0xff]  ;;  %v1653_v41 = vpack.c.bf16 %v481_v35, %v480_v34  ;;  %v464_v42 = vld [vmem:[%s1758_s16 + $0x340] sm:$0xff]  ;;  %v275_v47 = vld [vmem:[%s1815_s19 + $0x158] sm:$0xff] }
  0x3a   : > { %703 = vmatmul.mubr.f32.gmra.mrb[2].mxu1 %v242_v1  ;;  %562 = vmatprep.mubr.f32.mxu0 %v249_v2  ;;  %v465_v43 = vld [vmem:[%s1758_s16 + $0x348] sm:$0xff]  ;;  %v264_v44 = vld [vmem:[%s1815_s19 + $0x100] sm:$0xff]  ;;  %v1623_v48 = vpack.c.bf16 %v433_v40, %v432_v39  ;;  %v450_v49 = vld [vmem:[%s1758_s16 + $0x2d0] sm:$0xff] }
  0x3b   : > { %707 = vmatprep.mubr.f32.mxu1 %v251_v3  ;;  %1612 = vmatpush3.bf16.msra.mxu0 %v1611_v4  ;;  %v273_v46 = vld [vmem:[%s1815_s19 + $0x148] sm:$0xff]  ;;  %v451_v50 = vld [vmem:[%s1758_s16 + $0x2d8] sm:$0xff]  ;;  %v1655_v51 = vpack.c.bf16 %v465_v43, %v464_v42  ;;  %v434_v53 = vld [vmem:[%s1758_s16 + $0x250] sm:$0xff] }
  0x3c   : > { %1644 = vmatpush3.bf16.msra.mxu1 %v1643_v5  ;;  %1614 = vmatprep.subr.bf16.mxu0 %v1613_v6  ;;  %v1625_v52 = vpack.c.bf16 %v451_v50, %v450_v49  ;;  %v435_v54 = vld [vmem:[%s1758_s16 + $0x258] sm:$0xff]  ;;  %v482_v55 = vld [vmem:[%s1758_s16 + $0x3d0] sm:$0xff]  ;;  %v272_v57 = vld [vmem:[%s1815_s19 + $0x140] sm:$0xff] }
  0x3d   : > { %563 = vmatmul.mubr.f32.gmra.mrb[4].mxu0 %v248_v14  ;;  %1646 = vmatprep.subr.bf16.mxu1 %v1645_v10  ;;  %v483_v56 = vld [vmem:[%s1758_s16 + $0x3d8] sm:$0xff]  ;;  %v466_v59 = vld [vmem:[%s1758_s16 + $0x350] sm:$0xff]  ;;  %v281_v62 = vld [vmem:[%s1815_s19 + $0x188] sm:$0xff]  ;;  %v1627_v63 = vpack.c.bf16 %v435_v54, %v434_v53 }
  0x3e   : > { %708 = vmatmul.mubr.f32.gmra.mrb[4].mxu1 %v250_v17  ;;  %567 = vmatprep.mubr.f32.mxu0 %v257_v18  ;;  %v1657_v58 = vpack.c.bf16 %v483_v56, %v482_v55  ;;  %v467_v60 = vld [vmem:[%s1758_s16 + $0x358] sm:$0xff]  ;;  %v274_v61 = vld [vmem:[%s1815_s19 + $0x150] sm:$0xff]  ;;  %v280_v1 = vld [vmem:[%s1815_s19 + $0x180] sm:$0xff] }
  0x3f   : > { %712 = vmatprep.mubr.f32.mxu1 %v259_v20  ;;  %1616 = vmatpush3.bf16.msra.mxu0 %v1615_v19  ;;  %v283_v0 = vld [vmem:[%s1815_s19 + $0x198] sm:$0xff]  ;;  %v1659_v2 = vpack.c.bf16 %v467_v60, %v466_v59  ;;  %v452_v3 = vld [vmem:[%s1758_s16 + $0x2e0] sm:$0xff]  ;;  %v453_v4 = vld [vmem:[%s1758_s16 + $0x2e8] sm:$0xff] }
  0x40   : > { %1648 = vmatpush3.bf16.msra.mxu1 %v1647_v21  ;;  %1618 = vmatprep.subr.bf16.mxu0 %v1617_v22  ;;  %v436_v5 = vld [vmem:[%s1758_s16 + $0x260] sm:$0xff]  ;;  %v437_v6 = vld [vmem:[%s1758_s16 + $0x268] sm:$0xff]  ;;  %v282_v7 = vld [vmem:[%s1815_s19 + $0x190] sm:$0xff]  ;;  %v1629_v8 = vpack.c.bf16 %v453_v4, %v452_v3 }
  0x41   : > { %568 = vmatmul.mubr.f32.gmra.mrb[6].mxu0 %v256_v25  ;;  %1650 = vmatprep.subr.bf16.mxu1 %v1649_v26  ;;  %v484_v9 = vld [vmem:[%s1758_s16 + $0x3e0] sm:$0xff]  ;;  %v485_v10 = vld [vmem:[%s1758_s16 + $0x3e8] sm:$0xff]  ;;  %v1631_v12 = vpack.c.bf16 %v437_v6, %v436_v5  ;;  %v291_v16 = vld [vmem:[%s1815_s19 + $0x1d8] sm:$0xff] }
  0x42   : > { %713 = vmatmul.mubr.f32.gmra.mrb[6].mxu1 %v258_v29  ;;  %572 = vmatprep.mubr.f32.mxu0 %v265_v32  ;;  %v289_v11 = vld [vmem:[%s1815_s19 + $0x1c8] sm:$0xff]  ;;  %v1661_v13 = vpack.c.bf16 %v485_v10, %v484_v9  ;;  %v468_v14 = vld [vmem:[%s1758_s16 + $0x360] sm:$0xff]  ;;  %v290_v19 = vld [vmem:[%s1815_s19 + $0x1d0] sm:$0xff] }
  0x43   : > { %717 = vmatprep.mubr.f32.mxu1 %v267_v36  ;;  %1620 = vmatpush3.bf16.msra.mxu0 %v1619_v33  ;;  %v469_v15 = vld [vmem:[%s1758_s16 + $0x368] sm:$0xff]  ;;  %v288_v18 = vld [vmem:[%s1815_s19 + $0x1c0] sm:$0xff]  ;;  %v454_v21 = vld [vmem:[%s1758_s16 + $0x2f0] sm:$0xff] }
  0x44   : > { %1652 = vmatpush3.bf16.msra.mxu1 %v1651_v37  ;;  %1622 = vmatprep.subr.bf16.mxu0 %v1621_v38  ;;  %v1663_v17 = vpack.c.bf16 %v469_v15, %v468_v14  ;;  %v297_v20 = vld [vmem:[%s1815_s19 + $0x208] sm:$0xff]  ;;  %v455_v22 = vld [vmem:[%s1758_s16 + $0x2f8] sm:$0xff]  ;;  %v438_v23 = vld [vmem:[%s1758_s16 + $0x270] sm:$0xff] }
  0x45   : > { %573 = vmatmul.mubr.f32.gmra.mrb[8].mxu0 %v264_v44  ;;  %1654 = vmatprep.subr.bf16.mxu1 %v1653_v41  ;;  %v1633_v24 = vpack.c.bf16 %v455_v22, %v454_v21  ;;  %v439_v25 = vld [vmem:[%s1758_s16 + $0x278] sm:$0xff]  ;;  %v486_v26 = vld [vmem:[%s1758_s16 + $0x3f0] sm:$0xff]  ;;  %v296_v33 = vld [vmem:[%s1815_s19 + $0x200] sm:$0xff] }
  0x46   : > { %718 = vmatmul.mubr.f32.gmra.mrb[8].mxu1 %v266_v45  ;;  %577 = vmatprep.mubr.f32.mxu0 %v273_v46  ;;  %v487_v27 = vld [vmem:[%s1758_s16 + $0x3f8] sm:$0xff]  ;;  %v1635_v29 = vpack.c.bf16 %v439_v25, %v438_v23  ;;  %v470_v31 = vld [vmem:[%s1758_s16 + $0x370] sm:$0xff]  ;;  %v305_v36 = vld [vmem:[%s1815_s19 + $0x248] sm:$0xff] }
  0x47   : > { %722 = vmatprep.mubr.f32.mxu1 %v275_v47  ;;  %1624 = vmatpush3.bf16.msra.mxu0 %v1623_v48  ;;  %v299_v28 = vld [vmem:[%s1815_s19 + $0x218] sm:$0xff]  ;;  %v1665_v30 = vpack.c.bf16 %v487_v27, %v486_v26  ;;  %v298_v35 = vld [vmem:[%s1815_s19 + $0x210] sm:$0xff]  ;;  %v304_v38 = vld [vmem:[%s1815_s19 + $0x240] sm:$0xff] }
  0x48   : > { %1656 = vmatpush3.bf16.msra.mxu1 %v1655_v51  ;;  %1626 = vmatprep.subr.bf16.mxu0 %v1625_v52  ;;  %v471_v32 = vld [vmem:[%s1758_s16 + $0x378] sm:$0xff]  ;;  %v306_v39 = vld [vmem:[%s1815_s19 + $0x250] sm:$0xff]  ;;  %v313_v40 = vld [vmem:[%s1815_s19 + $0x288] sm:$0xff] }
  0x49   : > { %578 = vmatmul.mubr.f32.gmra.mrb[10].mxu0 %v272_v57  ;;  %1658 = vmatprep.subr.bf16.mxu1 %v1657_v58  ;;  %v1667_v34 = vpack.c.bf16 %v471_v32, %v470_v31  ;;  %v307_v37 = vld [vmem:[%s1815_s19 + $0x258] sm:$0xff]  ;;  %v312_v42 = vld [vmem:[%s1815_s19 + $0x280] sm:$0xff]  ;;  %v314_v43 = vld [vmem:[%s1815_s19 + $0x290] sm:$0xff] }
  0x4a   : > { %723 = vmatmul.mubr.f32.gmra.mrb[10].mxu1 %v274_v61  ;;  %582 = vmatprep.mubr.f32.mxu0 %v281_v62  ;;  %v315_v41 = vld [vmem:[%s1815_s19 + $0x298] sm:$0xff]  ;;  %v321_v44 = vld [vmem:[%s1815_s19 + $0x2c8] sm:$0xff]  ;;  %v320_v46 = vld [vmem:[%s1815_s19 + $0x2c0] sm:$0xff] }
  0x4b   : > { %727 = vmatprep.mubr.f32.mxu1 %v283_v0  ;;  %1628 = vmatpush3.bf16.msra.mxu0 %v1627_v63  ;;  %v323_v45 = vld [vmem:[%s1815_s19 + $0x2d8] sm:$0xff]  ;;  %v322_v47 = vld [vmem:[%s1815_s19 + $0x2d0] sm:$0xff]  ;;  %v329_v48 = vld [vmem:[%s1815_s19 + $0x308] sm:$0xff] }
  0x4c   : > { %1660 = vmatpush3.bf16.msra.mxu1 %v1659_v2  ;;  %1630 = vmatprep.subr.bf16.mxu0 %v1629_v8  ;;  %v331_v49 = vld [vmem:[%s1815_s19 + $0x318] sm:$0xff]  ;;  %v328_v50 = vld [vmem:[%s1815_s19 + $0x300] sm:$0xff]  ;;  %v330_v51 = vld [vmem:[%s1815_s19 + $0x310] sm:$0xff] }
  0x4d   : > { %583 = vmatmul.mubr.f32.gmra.mrb[12].mxu0 %v280_v1  ;;  %1662 = vmatprep.subr.bf16.mxu1 %v1661_v13  ;;  %v337_v52 = vld [vmem:[%s1815_s19 + $0x348] sm:$0xff]  ;;  %v339_v53 = vld [vmem:[%s1815_s19 + $0x358] sm:$0xff]  ;;  %v336_v54 = vld [vmem:[%s1815_s19 + $0x340] sm:$0xff] }
  0x4e   : > { %728 = vmatmul.mubr.f32.gmra.mrb[12].mxu1 %v282_v7  ;;  %587 = vmatprep.mubr.f32.mxu0 %v289_v11  ;;  %v338_v55 = vld [vmem:[%s1815_s19 + $0x350] sm:$0xff]  ;;  %v345_v56 = vld [vmem:[%s1815_s19 + $0x388] sm:$0xff]  ;;  %v347_v57 = vld [vmem:[%s1815_s19 + $0x398] sm:$0xff] }
  0x4f   : > { %732 = vmatprep.mubr.f32.mxu1 %v291_v16  ;;  %1632 = vmatpush3.bf16.msra.mxu0 %v1631_v12  ;;  %v344_v58 = vld [vmem:[%s1815_s19 + $0x380] sm:$0xff]  ;;  %v346_v59 = vld [vmem:[%s1815_s19 + $0x390] sm:$0xff]  ;;  %v353_v60 = vld [vmem:[%s1815_s19 + $0x3c8] sm:$0xff] }
  0x50   : > { %1664 = vmatpush3.bf16.msra.mxu1 %v1663_v17  ;;  %1634 = vmatprep.subr.bf16.mxu0 %v1633_v24  ;;  %v355_v61 = vld [vmem:[%s1815_s19 + $0x3d8] sm:$0xff]  ;;  %v352_v62 = vld [vmem:[%s1815_s19 + $0x3c0] sm:$0xff]  ;;  %v354_v63 = vld [vmem:[%s1815_s19 + $0x3d0] sm:$0xff] }
  0x51   : > { %588 = vmatmul.mubr.f32.gmra.mrb[14].mxu0 %v288_v18  ;;  %1666 = vmatprep.subr.bf16.mxu1 %v1665_v30  ;;  %v237_v0 = vld [vmem:[%s1815_s19 + $0x28] sm:$0xff]  ;;  %v239_v1 = vld [vmem:[%s1815_s19 + $0x38] sm:$0xff]  ;;  %v236_v2 = vld [vmem:[%s1815_s19 + $0x20] sm:$0xff] }
  0x52   : > { %733 = vmatmul.mubr.f32.gmra.mrb[14].mxu1 %v290_v19  ;;  %592 = vmatprep.mubr.f32.mxu0 %v297_v20  ;;  %v238_v3 = vld [vmem:[%s1815_s19 + $0x30] sm:$0xff]  ;;  %v245_v4 = vld [vmem:[%s1815_s19 + $0x68] sm:$0xff]  ;;  %v247_v5 = vld [vmem:[%s1815_s19 + $0x78] sm:$0xff] }
  0x53   : > { %737 = vmatprep.mubr.f32.mxu1 %v299_v28  ;;  %1636 = vmatpush3.bf16.msra.mxu0 %v1635_v29  ;;  %v244_v6 = vld [vmem:[%s1815_s19 + $0x60] sm:$0xff]  ;;  %v246_v7 = vld [vmem:[%s1815_s19 + $0x70] sm:$0xff]  ;;  %v253_v8 = vld [vmem:[%s1815_s19 + $0xa8] sm:$0xff] }
  0x54   : > { %1668 = vmatpush3.bf16.msra.mxu1 %v1667_v34  ;;  %v255_v9 = vld [vmem:[%s1815_s19 + $0xb8] sm:$0xff]  ;;  %v252_v10 = vld [vmem:[%s1815_s19 + $0xa0] sm:$0xff]  ;;  %v254_v11 = vld [vmem:[%s1815_s19 + $0xb0] sm:$0xff] }
  0x55   : > { %593 = vmatmul.mubr.f32.gmra.mrb[16].mxu0 %v296_v33  ;;  %v261_v12 = vld [vmem:[%s1815_s19 + $0xe8] sm:$0xff]  ;;  %v263_v13 = vld [vmem:[%s1815_s19 + $0xf8] sm:$0xff]  ;;  %v260_v14 = vld [vmem:[%s1815_s19 + $0xe0] sm:$0xff] }
  0x56   : > { %738 = vmatmul.mubr.f32.gmra.mrb[16].mxu1 %v298_v35  ;;  %597 = vmatprep.mubr.f32.mxu0 %v305_v36  ;;  %v262_v15 = vld [vmem:[%s1815_s19 + $0xf0] sm:$0xff]  ;;  %v269_v16 = vld [vmem:[%s1815_s19 + $0x128] sm:$0xff]  ;;  %v271_v17 = vld [vmem:[%s1815_s19 + $0x138] sm:$0xff] }
  0x57   : > { %742 = vmatprep.mubr.f32.mxu1 %v307_v37  ;;  %v268_v18 = vld [vmem:[%s1815_s19 + $0x120] sm:$0xff]  ;;  %v270_v19 = vld [vmem:[%s1815_s19 + $0x130] sm:$0xff]  ;;  %v277_v20 = vld [vmem:[%s1815_s19 + $0x168] sm:$0xff] }
  0x58   : > { %v279_v21 = vld [vmem:[%s1815_s19 + $0x178] sm:$0xff]  ;;  %v276_v22 = vld [vmem:[%s1815_s19 + $0x160] sm:$0xff]  ;;  %v278_v23 = vld [vmem:[%s1815_s19 + $0x170] sm:$0xff] }
  0x59   : > { %598 = vmatmul.mubr.f32.gmra.mrb[18].mxu0 %v304_v38  ;;  %v285_v24 = vld [vmem:[%s1815_s19 + $0x1a8] sm:$0xff]  ;;  %v287_v25 = vld [vmem:[%s1815_s19 + $0x1b8] sm:$0xff]  ;;  %v284_v26 = vld [vmem:[%s1815_s19 + $0x1a0] sm:$0xff] }
  0x5a   : > { %743 = vmatmul.mubr.f32.gmra.mrb[18].mxu1 %v306_v39  ;;  %602 = vmatprep.mubr.f32.mxu0 %v313_v40  ;;  %v286_v27 = vld [vmem:[%s1815_s19 + $0x1b0] sm:$0xff]  ;;  %v293_v28 = vld [vmem:[%s1815_s19 + $0x1e8] sm:$0xff]  ;;  %v295_v29 = vld [vmem:[%s1815_s19 + $0x1f8] sm:$0xff] }
  0x5b   : > { %747 = vmatprep.mubr.f32.mxu1 %v315_v41  ;;  %v292_v30 = vld [vmem:[%s1815_s19 + $0x1e0] sm:$0xff]  ;;  %v294_v31 = vld [vmem:[%s1815_s19 + $0x1f0] sm:$0xff]  ;;  %v301_v32 = vld [vmem:[%s1815_s19 + $0x228] sm:$0xff] }
  0x5c   : > { %v303_v33 = vld [vmem:[%s1815_s19 + $0x238] sm:$0xff]  ;;  %v300_v34 = vld [vmem:[%s1815_s19 + $0x220] sm:$0xff]  ;;  %v302_v35 = vld [vmem:[%s1815_s19 + $0x230] sm:$0xff] }
  0x5d   : > { %603 = vmatmul.mubr.f32.gmra.mrb[20].mxu0 %v312_v42  ;;  %v309_v36 = vld [vmem:[%s1815_s19 + $0x268] sm:$0xff]  ;;  %v311_v37 = vld [vmem:[%s1815_s19 + $0x278] sm:$0xff]  ;;  %v308_v38 = vld [vmem:[%s1815_s19 + $0x260] sm:$0xff] }
  0x5e   : > { %748 = vmatmul.mubr.f32.gmra.mrb[20].mxu1 %v314_v43  ;;  %607 = vmatprep.mubr.f32.mxu0 %v321_v44  ;;  %v310_v39 = vld [vmem:[%s1815_s19 + $0x270] sm:$0xff]  ;;  %v317_v40 = vld [vmem:[%s1815_s19 + $0x2a8] sm:$0xff]  ;;  %v319_v41 = vld [vmem:[%s1815_s19 + $0x2b8] sm:$0xff] }
  0x5f   : > { %752 = vmatprep.mubr.f32.mxu1 %v323_v45  ;;  %v316_v42 = vld [vmem:[%s1815_s19 + $0x2a0] sm:$0xff]  ;;  %v318_v43 = vld [vmem:[%s1815_s19 + $0x2b0] sm:$0xff]  ;;  %v325_v44 = vld [vmem:[%s1815_s19 + $0x2e8] sm:$0xff] }
  0x60   : > { %v327_v45 = vld [vmem:[%s1815_s19 + $0x2f8] sm:$0xff] }
  0x61   : > { %608 = vmatmul.mubr.f32.gmra.mrb[22].mxu0 %v320_v46  ;;  %v324_v46 = vld [vmem:[%s1815_s19 + $0x2e0] sm:$0xff] }
  0x62   : > { %753 = vmatmul.mubr.f32.gmra.mrb[22].mxu1 %v322_v47  ;;  %612 = vmatprep.mubr.f32.mxu0 %v329_v48  ;;  %v326_v47 = vld [vmem:[%s1815_s19 + $0x2f0] sm:$0xff]  ;;  %v333_v48 = vld [vmem:[%s1815_s19 + $0x328] sm:$0xff] }
  0x63   : > { %757 = vmatprep.mubr.f32.mxu1 %v331_v49  ;;  %v335_v49 = vld [vmem:[%s1815_s19 + $0x338] sm:$0xff] }
  0x65   : > { %613 = vmatmul.mubr.f32.gmra.mrb[24].mxu0 %v328_v50  ;;  %v332_v50 = vld [vmem:[%s1815_s19 + $0x320] sm:$0xff] }
  0x66   : > { %758 = vmatmul.mubr.f32.gmra.mrb[24].mxu1 %v330_v51  ;;  %617 = vmatprep.mubr.f32.mxu0 %v337_v52  ;;  %v334_v51 = vld [vmem:[%s1815_s19 + $0x330] sm:$0xff]  ;;  %v341_v52 = vld [vmem:[%s1815_s19 + $0x368] sm:$0xff] }
  0x67   : > { %762 = vmatprep.mubr.f32.mxu1 %v339_v53  ;;  %v343_v53 = vld [vmem:[%s1815_s19 + $0x378] sm:$0xff] }
  0x69   : > { %618 = vmatmul.mubr.f32.gmra.mrb[26].mxu0 %v336_v54  ;;  %v340_v54 = vld [vmem:[%s1815_s19 + $0x360] sm:$0xff] }
  0x6a   : > { %763 = vmatmul.mubr.f32.gmra.mrb[26].mxu1 %v338_v55  ;;  %622 = vmatprep.mubr.f32.mxu0 %v345_v56  ;;  %v342_v55 = vld [vmem:[%s1815_s19 + $0x370] sm:$0xff]  ;;  %v349_v56 = vld [vmem:[%s1815_s19 + $0x3a8] sm:$0xff] }
  0x6b   : > { %767 = vmatprep.mubr.f32.mxu1 %v347_v57  ;;  %v351_v57 = vld [vmem:[%s1815_s19 + $0x3b8] sm:$0xff] }
  0x6d   : > { %623 = vmatmul.mubr.f32.gmra.mrb[28].mxu0 %v344_v58  ;;  %v348_v58 = vld [vmem:[%s1815_s19 + $0x3a0] sm:$0xff] }
  0x6e   : > { %768 = vmatmul.mubr.f32.gmra.mrb[28].mxu1 %v346_v59  ;;  %627 = vmatprep.mubr.f32.mxu0 %v353_v60  ;;  %v350_v59 = vld [vmem:[%s1815_s19 + $0x3b0] sm:$0xff]  ;;  %v357_v60 = vld [vmem:[%s1815_s19 + $0x3e8] sm:$0xff] }
  0x6f   : > { %772 = vmatprep.mubr.f32.mxu1 %v355_v61  ;;  %v359_v61 = vld [vmem:[%s1815_s19 + $0x3f8] sm:$0xff] }
  0x71   : > { %628 = vmatmul.mubr.f32.gmra.mrb[30].mxu0 %v352_v62  ;;  %v356_v62 = vld [vmem:[%s1815_s19 + $0x3e0] sm:$0xff] }
  0x72   : > { %773 = vmatmul.mubr.f32.gmra.mrb[30].mxu1 %v354_v63  ;;  %842 = vmatprep.mubr.f32.mxu0 %v237_v0  ;;  %v358_v63 = vld [vmem:[%s1815_s19 + $0x3f0] sm:$0xff] }
  0x73   : > { %987 = vmatprep.mubr.f32.mxu1 %v239_v1 }
  0x75   : > { %843 = vmatmul.mubr.f32.vlgmr.msra.gmra.mrb[32].mxu0 %v236_v2 }
  0x76   : > { %988 = vmatmul.mubr.f32.vlgmr.msra.gmra.mrb[32].mxu1 %v238_v3  ;;  %847 = vmatprep.mubr.f32.mxu0 %v245_v4 }
  0x77   : > { %992 = vmatprep.mubr.f32.mxu1 %v247_v5 }
  0x79   : > { %848 = vmatmul.mubr.f32.gmra.mrb[34].mxu0 %v244_v6 }
  0x7a   : > { %993 = vmatmul.mubr.f32.gmra.mrb[34].mxu1 %v246_v7  ;;  %852 = vmatprep.mubr.f32.mxu0 %v253_v8 }
  0x7b   : > { %997 = vmatprep.mubr.f32.mxu1 %v255_v9 }
  0x7d   : > { %853 = vmatmul.mubr.f32.gmra.mrb[36].mxu0 %v252_v10 }
  0x7e   : > { %998 = vmatmul.mubr.f32.gmra.mrb[36].mxu1 %v254_v11  ;;  %857 = vmatprep.mubr.f32.mxu0 %v261_v12 }
  0x7f   : > { %1002 = vmatprep.mubr.f32.mxu1 %v263_v13 }
  0x81   : > { %858 = vmatmul.mubr.f32.gmra.mrb[38].mxu0 %v260_v14 }
  0x82   : > { %1003 = vmatmul.mubr.f32.gmra.mrb[38].mxu1 %v262_v15  ;;  %862 = vmatprep.mubr.f32.mxu0 %v269_v16 }
  0x83   : > { %1007 = vmatprep.mubr.f32.mxu1 %v271_v17 }
  0x85   : > { %863 = vmatmul.mubr.f32.gmra.mrb[40].mxu0 %v268_v18 }
  0x86   : > { %1008 = vmatmul.mubr.f32.gmra.mrb[40].mxu1 %v270_v19  ;;  %867 = vmatprep.mubr.f32.mxu0 %v277_v20 }
  0x87   : > { %1012 = vmatprep.mubr.f32.mxu1 %v279_v21 }
  0x89   : > { %868 = vmatmul.mubr.f32.gmra.mrb[42].mxu0 %v276_v22 }
  0x8a   : > { %1013 = vmatmul.mubr.f32.gmra.mrb[42].mxu1 %v278_v23  ;;  %872 = vmatprep.mubr.f32.mxu0 %v285_v24 }
  0x8b   : > { %1017 = vmatprep.mubr.f32.mxu1 %v287_v25 }
  0x8d   : > { %873 = vmatmul.mubr.f32.gmra.mrb[44].mxu0 %v284_v26 }
  0x8e   : > { %1018 = vmatmul.mubr.f32.gmra.mrb[44].mxu1 %v286_v27  ;;  %877 = vmatprep.mubr.f32.mxu0 %v293_v28 }
  0x8f   : > { %1022 = vmatprep.mubr.f32.mxu1 %v295_v29 }
  0x91   : > { %878 = vmatmul.mubr.f32.gmra.mrb[46].mxu0 %v292_v30 }
  0x92   : > { %1023 = vmatmul.mubr.f32.gmra.mrb[46].mxu1 %v294_v31  ;;  %882 = vmatprep.mubr.f32.mxu0 %v301_v32 }
  0x93   : > { %1027 = vmatprep.mubr.f32.mxu1 %v303_v33 }
  0x95   : > { %883 = vmatmul.mubr.f32.gmra.mrb[48].mxu0 %v300_v34 }
  0x96   : > { %1028 = vmatmul.mubr.f32.gmra.mrb[48].mxu1 %v302_v35  ;;  %887 = vmatprep.mubr.f32.mxu0 %v309_v36 }
  0x97   : > { %1032 = vmatprep.mubr.f32.mxu1 %v311_v37 }
  0x99   : > { %888 = vmatmul.mubr.f32.gmra.mrb[50].mxu0 %v308_v38 }
  0x9a   : > { %1033 = vmatmul.mubr.f32.gmra.mrb[50].mxu1 %v310_v39  ;;  %892 = vmatprep.mubr.f32.mxu0 %v317_v40 }
  0x9b   : > { %1037 = vmatprep.mubr.f32.mxu1 %v319_v41 }
  0x9d   : > { %893 = vmatmul.mubr.f32.gmra.mrb[52].mxu0 %v316_v42 }
  0x9e   : > { %1038 = vmatmul.mubr.f32.gmra.mrb[52].mxu1 %v318_v43  ;;  %897 = vmatprep.mubr.f32.mxu0 %v325_v44 }
  0x9f   : > { %1042 = vmatprep.mubr.f32.mxu1 %v327_v45 }
  0xa1   : > { %898 = vmatmul.mubr.f32.gmra.mrb[54].mxu0 %v324_v46 }
  0xa2   : > { %1043 = vmatmul.mubr.f32.gmra.mrb[54].mxu1 %v326_v47  ;;  %902 = vmatprep.mubr.f32.mxu0 %v333_v48 }
  0xa3   : > { %1047 = vmatprep.mubr.f32.mxu1 %v335_v49 }
  0xa5   : > { %903 = vmatmul.mubr.f32.gmra.mrb[56].mxu0 %v332_v50 }
  0xa6   : > { %1048 = vmatmul.mubr.f32.gmra.mrb[56].mxu1 %v334_v51  ;;  %907 = vmatprep.mubr.f32.mxu0 %v341_v52 }
  0xa7   : > { %1052 = vmatprep.mubr.f32.mxu1 %v343_v53 }
  0xa9   : > { %908 = vmatmul.mubr.f32.gmra.mrb[58].mxu0 %v340_v54 }
  0xaa   : > { %1053 = vmatmul.mubr.f32.gmra.mrb[58].mxu1 %v342_v55  ;;  %912 = vmatprep.mubr.f32.mxu0 %v349_v56 }
  0xab   : > { %1057 = vmatprep.mubr.f32.mxu1 %v351_v57 }
  0xad   : > { %913 = vmatmul.mubr.f32.gmra.mrb[60].mxu0 %v348_v58 }
  0xae   : > { %1058 = vmatmul.mubr.f32.gmra.mrb[60].mxu1 %v350_v59  ;;  %917 = vmatprep.mubr.f32.mxu0 %v357_v60 }
  0xaf   : > { %1062 = vmatprep.mubr.f32.mxu1 %v359_v61 }
  0xb1   : > { %918 = vmatmul.mubr.f32.gmra.mrb[62].mxu0 %v356_v62 }
  0xb2   : > { %1063 = vmatmul.mubr.f32.gmra.mrb[62].mxu1 %v358_v63 }
 0x108   : > { %v1253_v0 = vpop.f32.mrb[0].mxu0 }
 0x109   : > { %v1333_v1 = vpop.f32.mrb[0].mxu1  ;;  %v1254_v2 = vpop.f32.mrb[1].mxu0 }
 0x10a   : > { %v1255_v3 = vadd.f32 %v1254_v2, %v1253_v0  ;;  %v1334_v4 = vpop.f32.mrb[1].mxu1 }
 0x10b   : > { %v1335_v5 = vadd.f32 %v1334_v4, %v1333_v1 }
 0x10c   : > { %v1256_v6 = vpop.f32.mrb[2].mxu0 }
 0x10d   : > { %v2023_v7 = vadd.f32 %v1335_v5, %v1255_v3  ;;  %v1336_v8 = vpop.f32.mrb[2].mxu1  ;;  %v1257_v9 = vpop.f32.mrb[3].mxu0 }
 0x10e   : > { %v1258_v10 = vadd.f32 %v1257_v9, %v1256_v6  ;;  %v1337_v11 = vpop.f32.mrb[3].mxu1 }
 0x10f   : > { %v1338_v12 = vadd.f32 %v1337_v11, %v1336_v8 }
 0x110   : > { %v1259_v13 = vpop.f32.mrb[4].mxu0 }
 0x111   : > { %v2025_v14 = vadd.f32 %v1338_v12, %v1258_v10  ;;  %v1339_v15 = vpop.f32.mrb[4].mxu1  ;;  %v1260_v16 = vpop.f32.mrb[5].mxu0 }
 0x112   : > { %v1261_v17 = vadd.f32 %v1260_v16, %v1259_v13  ;;  %v1340_v18 = vpop.f32.mrb[5].mxu1 }
 0x113   : > { %v1341_v19 = vadd.f32 %v1340_v18, %v1339_v15 }
 0x114   : > { %v1262_v20 = vpop.f32.mrb[6].mxu0 }
 0x115   : > { %v2027_v21 = vadd.f32 %v1341_v19, %v1261_v17  ;;  %v1342_v22 = vpop.f32.mrb[6].mxu1  ;;  %v1263_v23 = vpop.f32.mrb[7].mxu0 }
 0x116   : > { %v1264_v24 = vadd.f32 %v1263_v23, %v1262_v20  ;;  %v1343_v25 = vpop.f32.mrb[7].mxu1 }
 0x117   : > { %v1344_v26 = vadd.f32 %v1343_v25, %v1342_v22 }
 0x118   : > { %v1265_v27 = vpop.f32.mrb[8].mxu0 }
 0x119   : > { %v2029_v28 = vadd.f32 %v1344_v26, %v1264_v24  ;;  %v1345_v29 = vpop.f32.mrb[8].mxu1  ;;  %v1266_v30 = vpop.f32.mrb[9].mxu0 }
 0x11a   : > { %v1267_v31 = vadd.f32 %v1266_v30, %v1265_v27  ;;  %v1346_v32 = vpop.f32.mrb[9].mxu1 }
 0x11b   : > { %v1347_v33 = vadd.f32 %v1346_v32, %v1345_v29 }
 0x11c   : > { %v1268_v34 = vpop.f32.mrb[10].mxu0 }
 0x11d   : > { %v2031_v35 = vadd.f32 %v1347_v33, %v1267_v31  ;;  %v1348_v36 = vpop.f32.mrb[10].mxu1  ;;  %v1269_v37 = vpop.f32.mrb[11].mxu0 }
 0x11e   : > { %v1270_v38 = vadd.f32 %v1269_v37, %v1268_v34  ;;  %v1349_v39 = vpop.f32.mrb[11].mxu1 }
 0x11f   : > { %v1350_v40 = vadd.f32 %v1349_v39, %v1348_v36 }
 0x120   : > { %v1271_v41 = vpop.f32.mrb[12].mxu0 }
 0x121   : > { %v2033_v42 = vadd.f32 %v1350_v40, %v1270_v38  ;;  %v1351_v43 = vpop.f32.mrb[12].mxu1  ;;  %v1272_v44 = vpop.f32.mrb[13].mxu0 }
 0x122   : > { %v1273_v45 = vadd.f32 %v1272_v44, %v1271_v41  ;;  %v1352_v46 = vpop.f32.mrb[13].mxu1 }
 0x123   : > { %v1353_v47 = vadd.f32 %v1352_v46, %v1351_v43 }
 0x124   : > { %v1274_v48 = vpop.f32.mrb[14].mxu0 }
 0x125   : > { %v2035_v49 = vadd.f32 %v1353_v47, %v1273_v45  ;;  %v1354_v50 = vpop.f32.mrb[14].mxu1  ;;  %v1275_v51 = vpop.f32.mrb[15].mxu0 }
 0x126   : > { %v1276_v52 = vadd.f32 %v1275_v51, %v1274_v48  ;;  %v1355_v53 = vpop.f32.mrb[15].mxu1 }
 0x127   : > { %v1356_v54 = vadd.f32 %v1355_v53, %v1354_v50 }
 0x128   : > { %v1277_v55 = vpop.f32.mrb[16].mxu0 }
 0x129   : > { %v2037_v56 = vadd.f32 %v1356_v54, %v1276_v52  ;;  %v1357_v57 = vpop.f32.mrb[16].mxu1  ;;  %v1278_v58 = vpop.f32.mrb[17].mxu0 }
 0x12a   : > { %v1279_v59 = vadd.f32 %v1278_v58, %v1277_v55  ;;  %v1358_v60 = vpop.f32.mrb[17].mxu1 }
 0x12b   : > { %v1359_v61 = vadd.f32 %v1358_v60, %v1357_v57 }
 0x12c   : > { %v1280_v62 = vpop.f32.mrb[18].mxu0 }
 0x12d   : > { %v2039_v63 = vadd.f32 %v1359_v61, %v1279_v59  ;;  %v1360_v0 = vpop.f32.mrb[18].mxu1  ;;  %v1281_v1 = vpop.f32.mrb[19].mxu0 }
 0x12e   : > { %v1282_v2 = vadd.f32 %v1281_v1, %v1280_v62  ;;  %v1361_v3 = vpop.f32.mrb[19].mxu1 }
 0x12f   : > { %v1362_v4 = vadd.f32 %v1361_v3, %v1360_v0 }
 0x130   : > { %v1283_v5 = vpop.f32.mrb[20].mxu0 }
 0x131   : > { %v2041_v6 = vadd.f32 %v1362_v4, %v1282_v2  ;;  %v1363_v8 = vpop.f32.mrb[20].mxu1  ;;  %v1284_v9 = vpop.f32.mrb[21].mxu0 }
 0x132   : > { %v1285_v10 = vadd.f32 %v1284_v9, %v1283_v5  ;;  %v1364_v11 = vpop.f32.mrb[21].mxu1 }
 0x133   : > { %v1365_v12 = vadd.f32 %v1364_v11, %v1363_v8 }
 0x134   : > { %v1286_v13 = vpop.f32.mrb[22].mxu0 }
 0x135   : > { %v2043_v15 = vadd.f32 %v1365_v12, %v1285_v10  ;;  %v1366_v16 = vpop.f32.mrb[22].mxu1  ;;  %v1287_v17 = vpop.f32.mrb[23].mxu0 }
 0x136   : > { %v1288_v18 = vadd.f32 %v1287_v17, %v1286_v13  ;;  %v1367_v19 = vpop.f32.mrb[23].mxu1 }
 0x137   : > { %v1368_v20 = vadd.f32 %v1367_v19, %v1366_v16 }
 0x138   : > { %v1289_v22 = vpop.f32.mrb[24].mxu0 }
 0x139   : > { %v2045_v23 = vadd.f32 %v1368_v20, %v1288_v18  ;;  %v1369_v24 = vpop.f32.mrb[24].mxu1  ;;  %v1290_v25 = vpop.f32.mrb[25].mxu0 }
 0x13a   : > { %v1291_v26 = vadd.f32 %v1290_v25, %v1289_v22  ;;  %v1370_v27 = vpop.f32.mrb[25].mxu1 }
 0x13b   : > { %v1371_v29 = vadd.f32 %v1370_v27, %v1369_v24 }
 0x13c   : > { %v1292_v30 = vpop.f32.mrb[26].mxu0 }
 0x13d   : > { %v2047_v31 = vadd.f32 %v1371_v29, %v1291_v26  ;;  %v1372_v32 = vpop.f32.mrb[26].mxu1  ;;  %v1293_v33 = vpop.f32.mrb[27].mxu0 }
 0x13e   : > { %v1294_v34 = vadd.f32 %v1293_v33, %v1292_v30  ;;  %v1373_v36 = vpop.f32.mrb[27].mxu1 }
 0x13f   : > { %v1374_v37 = vadd.f32 %v1373_v36, %v1372_v32 }
 0x140   : > { %v1295_v38 = vpop.f32.mrb[28].mxu0 }
 0x141   : > { %v2049_v39 = vadd.f32 %v1374_v37, %v1294_v34  ;;  %v1375_v40 = vpop.f32.mrb[28].mxu1  ;;  %v1296_v41 = vpop.f32.mrb[29].mxu0 }
 0x142   : > { %v1297_v43 = vadd.f32 %v1296_v41, %v1295_v38  ;;  %v1376_v44 = vpop.f32.mrb[29].mxu1 }
 0x143   : > { %v1377_v45 = vadd.f32 %v1376_v44, %v1375_v40 }
 0x144   : > { %v1298_v46 = vpop.f32.mrb[30].mxu0 }
 0x145   : > { %v2051_v47 = vadd.f32 %v1377_v45, %v1297_v43  ;;  %v1378_v48 = vpop.f32.mrb[30].mxu1  ;;  %v1299_v50 = vpop.f32.mrb[31].mxu0 }
 0x146   : > { %v1300_v51 = vadd.f32 %v1299_v50, %v1298_v46  ;;  %v1379_v52 = vpop.f32.mrb[31].mxu1 }
 0x147   : > { %v1380_v53 = vadd.f32 %v1379_v52, %v1378_v48 }
 0x148   : > { %v1413_v54 = vpop.f32.mrb[32].mxu0 }
 0x149   : > { %v2053_v55 = vadd.f32 %v1380_v53, %v1300_v51  ;;  %v1414_v57 = vpop.f32.mrb[33].mxu0  ;;  %v1493_v58 = vpop.f32.mrb[32].mxu1 }
 0x14a   : > { %v1415_v59 = vadd.f32 %v1414_v57, %v1413_v54  ;;  %v1494_v60 = vpop.f32.mrb[33].mxu1 }
 0x14b   : > { %v1495_v61 = vadd.f32 %v1494_v60, %v1493_v58 }
 0x14c   : > { %v845_v62 = vadd.f32 %v1415_v59, %v2023_v7  ;;  %v1416_v0 = vpop.f32.mrb[34].mxu0 }
 0x14d   : > { %v1417_v1 = vpop.f32.mrb[35].mxu0  ;;  %v1496_v2 = vpop.f32.mrb[34].mxu1 }
 0x14e   : > { %v990_v3 = vadd.f32 %v1495_v61, %v845_v62  ;;  %v1418_v4 = vadd.f32 %v1417_v1, %v1416_v0  ;;  %v1497_v5 = vpop.f32.mrb[35].mxu1 }
 0x14f   : > { %v1498_v8 = vadd.f32 %v1497_v5, %v1496_v2 }
 0x150   : > { %1068 = vst [vmem:[%s2060_s23] sm:$0xff] %v990_v3  ;;  %v850_v9 = vadd.f32 %v1418_v4, %v2025_v14  ;;  %v1419_v10 = vpop.f32.mrb[36].mxu0 }
 0x151   : > { %v1420_v7 = vpop.f32.mrb[37].mxu0  ;;  %v1499_v11 = vpop.f32.mrb[36].mxu1 }
 0x152   : > { %v995_v12 = vadd.f32 %v1498_v8, %v850_v9  ;;  %v1421_v13 = vadd.f32 %v1420_v7, %v1419_v10  ;;  %v1500_v16 = vpop.f32.mrb[37].mxu1 }
 0x153   : > { %v1501_v17 = vadd.f32 %v1500_v16, %v1499_v11 }
 0x154   : > { %1069 = vst [vmem:[%s2060_s23 + $0x8] sm:$0xff] %v995_v12  ;;  %v855_v18 = vadd.f32 %v1421_v13, %v2027_v21  ;;  %v1422_v19 = vpop.f32.mrb[38].mxu0 }
 0x155   : > { %v1423_v20 = vpop.f32.mrb[39].mxu0  ;;  %v1502_v22 = vpop.f32.mrb[38].mxu1 }
 0x156   : > { %v1000_v24 = vadd.f32 %v1501_v17, %v855_v18  ;;  %v1424_v25 = vadd.f32 %v1423_v20, %v1422_v19  ;;  %v1503_v26 = vpop.f32.mrb[39].mxu1 }
 0x157   : > { %v1504_v27 = vadd.f32 %v1503_v26, %v1502_v22 }
 0x158   : > { %1070 = vst [vmem:[%s2060_s23 + $0x10] sm:$0xff] %v1000_v24  ;;  %v860_v14 = vadd.f32 %v1424_v25, %v2029_v28  ;;  %v1425_v29 = vpop.f32.mrb[40].mxu0 }
 0x159   : > { %v1426_v30 = vpop.f32.mrb[41].mxu0  ;;  %v1505_v32 = vpop.f32.mrb[40].mxu1 }
 0x15a   : > { %v1005_v33 = vadd.f32 %v1504_v27, %v860_v14  ;;  %v1427_v34 = vadd.f32 %v1426_v30, %v1425_v29  ;;  %v1506_v36 = vpop.f32.mrb[41].mxu1 }
 0x15b   : > { %v1507_v37 = vadd.f32 %v1506_v36, %v1505_v32 }
 0x15c   : > { %1071 = vst [vmem:[%s2060_s23 + $0x18] sm:$0xff] %v1005_v33  ;;  %v865_v21 = vadd.f32 %v1427_v34, %v2031_v35  ;;  %v1428_v38 = vpop.f32.mrb[42].mxu0 }
 0x15d   : > { %v1429_v40 = vpop.f32.mrb[43].mxu0  ;;  %v1508_v41 = vpop.f32.mrb[42].mxu1 }
 0x15e   : > { %v1010_v43 = vadd.f32 %v1507_v37, %v865_v21  ;;  %v1430_v44 = vadd.f32 %v1429_v40, %v1428_v38  ;;  %v1509_v45 = vpop.f32.mrb[43].mxu1 }
 0x15f   : > { %v1510_v46 = vadd.f32 %v1509_v45, %v1508_v41 }
 0x160   : > { %1072 = vst [vmem:[%s2060_s23 + $0x20] sm:$0xff] %v1010_v43  ;;  %v870_v28 = vadd.f32 %v1430_v44, %v2033_v42  ;;  %v1431_v48 = vpop.f32.mrb[44].mxu0 }
 0x161   : > { %v1432_v50 = vpop.f32.mrb[45].mxu0  ;;  %v1511_v51 = vpop.f32.mrb[44].mxu1 }
 0x162   : > { %v1015_v52 = vadd.f32 %v1510_v46, %v870_v28  ;;  %v1433_v53 = vadd.f32 %v1432_v50, %v1431_v48  ;;  %v1512_v54 = vpop.f32.mrb[45].mxu1 }
 0x163   : > { %v1513_v57 = vadd.f32 %v1512_v54, %v1511_v51 }
 0x164   : > { %1073 = vst [vmem:[%s2060_s23 + $0x28] sm:$0xff] %v1015_v52  ;;  %v875_v35 = vadd.f32 %v1433_v53, %v2035_v49  ;;  %v1434_v58 = vpop.f32.mrb[46].mxu0 }
 0x165   : > { %v1435_v59 = vpop.f32.mrb[47].mxu0  ;;  %v1514_v60 = vpop.f32.mrb[46].mxu1 }
 0x166   : > { %v1020_v61 = vadd.f32 %v1513_v57, %v875_v35  ;;  %v1436_v62 = vadd.f32 %v1435_v59, %v1434_v58  ;;  %v1515_v0 = vpop.f32.mrb[47].mxu1 }
 0x167   : > { %v1516_v1 = vadd.f32 %v1515_v0, %v1514_v60 }
 0x168   : > { %1074 = vst [vmem:[%s2060_s23 + $0x30] sm:$0xff] %v1020_v61  ;;  %v880_v42 = vadd.f32 %v1436_v62, %v2037_v56  ;;  %v1437_v2 = vpop.f32.mrb[48].mxu0 }
 0x169   : > { %v1438_v3 = vpop.f32.mrb[49].mxu0  ;;  %v1517_v4 = vpop.f32.mrb[48].mxu1 }
 0x16a   : > { %v1025_v5 = vadd.f32 %v1516_v1, %v880_v42  ;;  %v1439_v8 = vadd.f32 %v1438_v3, %v1437_v2  ;;  %v1518_v9 = vpop.f32.mrb[49].mxu1 }
 0x16b   : > { %v1519_v10 = vadd.f32 %v1518_v9, %v1517_v4 }
 0x16c   : > { %1075 = vst [vmem:[%s2060_s23 + $0x38] sm:$0xff] %v1025_v5  ;;  %v885_v49 = vadd.f32 %v1439_v8, %v2039_v63  ;;  %v1440_v7 = vpop.f32.mrb[50].mxu0 }
 0x16d   : > { %v1441_v11 = vpop.f32.mrb[51].mxu0  ;;  %v1520_v12 = vpop.f32.mrb[50].mxu1 }
 0x16e   : > { %v1030_v13 = vadd.f32 %v1519_v10, %v885_v49  ;;  %v1442_v16 = vadd.f32 %v1441_v11, %v1440_v7  ;;  %v1521_v17 = vpop.f32.mrb[51].mxu1 }
 0x16f   : > { %v1522_v18 = vadd.f32 %v1521_v17, %v1520_v12 }
 0x170   : > { %1076 = vst [vmem:[%s2060_s23 + $0x40] sm:$0xff] %v1030_v13  ;;  %v890_v56 = vadd.f32 %v1442_v16, %v2041_v6  ;;  %v1443_v19 = vpop.f32.mrb[52].mxu0 }
 0x171   : > { %v1444_v20 = vpop.f32.mrb[53].mxu0  ;;  %v1523_v22 = vpop.f32.mrb[52].mxu1 }
 0x172   : > { %v1035_v24 = vadd.f32 %v1522_v18, %v890_v56  ;;  %v1445_v25 = vadd.f32 %v1444_v20, %v1443_v19  ;;  %v1524_v26 = vpop.f32.mrb[53].mxu1 }
 0x173   : > { %v1525_v27 = vadd.f32 %v1524_v26, %v1523_v22 }
 0x174   : > { %1077 = vst [vmem:[%s2060_s23 + $0x48] sm:$0xff] %v1035_v24  ;;  %v895_v63 = vadd.f32 %v1445_v25, %v2043_v15  ;;  %v1446_v14 = vpop.f32.mrb[54].mxu0 }
 0x175   : > { %v1447_v29 = vpop.f32.mrb[55].mxu0  ;;  %v1526_v30 = vpop.f32.mrb[54].mxu1 }
 0x176   : > { %v1040_v32 = vadd.f32 %v1525_v27, %v895_v63  ;;  %v1448_v33 = vadd.f32 %v1447_v29, %v1446_v14  ;;  %v1527_v34 = vpop.f32.mrb[55].mxu1 }
 0x177   : > { %v1528_v36 = vadd.f32 %v1527_v34, %v1526_v30 }
 0x178   : > { %1078 = vst [vmem:[%s2060_s23 + $0x50] sm:$0xff] %v1040_v32  ;;  %v900_v6 = vadd.f32 %v1448_v33, %v2045_v23  ;;  %v1449_v37 = vpop.f32.mrb[56].mxu0 }
 0x179   : > { %v1450_v21 = vpop.f32.mrb[57].mxu0  ;;  %v1529_v38 = vpop.f32.mrb[56].mxu1 }
 0x17a   : > { %v1045_v40 = vadd.f32 %v1528_v36, %v900_v6  ;;  %v1451_v41 = vadd.f32 %v1450_v21, %v1449_v37  ;;  %v1530_v43 = vpop.f32.mrb[57].mxu1 }
 0x17b   : > { %v1531_v44 = vadd.f32 %v1530_v43, %v1529_v38 }
 0x17c   : > { %1079 = vst [vmem:[%s2060_s23 + $0x58] sm:$0xff] %v1045_v40  ;;  %v905_v15 = vadd.f32 %v1451_v41, %v2047_v31  ;;  %v1452_v45 = vpop.f32.mrb[58].mxu0 }
 0x17d   : > { %v1453_v46 = vpop.f32.mrb[59].mxu0  ;;  %v1532_v28 = vpop.f32.mrb[58].mxu1 }
 0x17e   : > { %v1050_v48 = vadd.f32 %v1531_v44, %v905_v15  ;;  %v1454_v50 = vadd.f32 %v1453_v46, %v1452_v45  ;;  %v1533_v51 = vpop.f32.mrb[59].mxu1 }
 0x17f   : > { %v1534_v52 = vadd.f32 %v1533_v51, %v1532_v28 }
 0x180   : > { %1080 = vst [vmem:[%s2060_s23 + $0x60] sm:$0xff] %v1050_v48  ;;  %v910_v23 = vadd.f32 %v1454_v50, %v2049_v39  ;;  %v1455_v53 = vpop.f32.mrb[60].mxu0 }
 0x181   : > { %v1456_v54 = vpop.f32.mrb[61].mxu0  ;;  %v1535_v57 = vpop.f32.mrb[60].mxu1 }
 0x182   : > { %v1055_v35 = vadd.f32 %v1534_v52, %v910_v23  ;;  %v1457_v58 = vadd.f32 %v1456_v54, %v1455_v53  ;;  %v1536_v59 = vpop.f32.mrb[61].mxu1 }
 0x183   : > { %v1537_v31 = vadd.f32 %v1536_v59, %v1535_v57 }
 0x184   : > { %1081 = vst [vmem:[%s2060_s23 + $0x68] sm:$0xff] %v1055_v35  ;;  %v915_v60 = vadd.f32 %v1457_v58, %v2051_v47  ;;  %v1458_v61 = vpop.f32.mrb[62].mxu0 }
 0x185   : > { %v1459_v62 = vpop.f32.mrb[63].mxu0  ;;  %v1538_v0 = vpop.f32.mrb[62].mxu1 }
 0x186   : > { %v1060_v1 = vadd.f32 %v1537_v31, %v915_v60  ;;  %v1460_v42 = vadd.f32 %v1459_v62, %v1458_v61  ;;  %v1539_v2 = vpop.f32.mrb[63].mxu1 }
 0x187   : > { %v1540_v3 = vadd.f32 %v1539_v2, %v1538_v0 }
 0x188   : > { %1082 = vst [vmem:[%s2060_s23 + $0x70] sm:$0xff] %v1060_v1  ;;  %v920_v39 = vadd.f32 %v1460_v42, %v2053_v55 }
 0x18a   : > { %v1065_v4 = vadd.f32 %v1540_v3, %v920_v39 }
 0x18c   : > { %1083 = vst [vmem:[%s2060_s23 + $0x78] sm:$0xff] %v1065_v4 }
 0x18d PF: > { %s12_s11 = sadd.s32 1, %s1715_s11   ;;  %s2105_s9 = smov %s1711_s10 }
 0x18e   : > { %p9_p5 = scmp.ge.s32.totalorder %s12_s11, 6   ;;  %s2106_s10 = smov %s2108_s12 }
 0x190   :  { %11 = sbr.rel (!%p9_p5) target bundleno = 2 (0x2), region = 61 }

// kernel: generator_forward.20
= control target key start
LH: loop header
LB: loop body
LE: loop exit
PB: predicated region body
PF: predicated region fallthrough
CT: control target
= control target key end

     0   :  { %v297_v0 = vmov 0.0   ;;  %s523_s0 = inlined_call_operand.vmem [shape: f32[512,128], index: 0, kind: input, shape index: {}]   ;;  %s524_s1 = inlined_call_operand.vmem [shape: f32[1,128], index: 1, kind: output, shape index: {0}]   ;;  %s525_s2 = inlined_call_operand.vmem [shape: f32[1,128], index: 2, kind: output, shape index: {1}]  }
   0x1   :  { %14 = vst [vmem:[%s524_s1] sm:$0x1] %v297_v0  ;;  %15 = vst [vmem:[%s525_s2] sm:$0x1] %v297_v0  ;;  %v16_v1 = vld [vmem:[%s523_s0] sm:$0xff]  ;;  %v17_v2 = vld [vmem:[%s523_s0 + $0x8] sm:$0xff] }
   0x2   :  { %v18_v3 = vld [vmem:[%s523_s0 + $0x10] sm:$0xff]  ;;  %v19_v4 = vld [vmem:[%s523_s0 + $0x18] sm:$0xff]  ;;  %v81_v5 = vadd.f32 %v17_v2, %v16_v1  ;;  %v153_v6 = vmul.f32 %v16_v1, %v16_v1  ;;  %v154_v7 = vmul.f32 %v17_v2, %v17_v2  ;;  %v20_v9 = vld [vmem:[%s523_s0 + $0x20] sm:$0xff] }
   0x3   :  { %v155_v8 = vmul.f32 %v18_v3, %v18_v3  ;;  %v156_v11 = vmul.f32 %v19_v4, %v19_v4  ;;  %v21_v13 = vld [vmem:[%s523_s0 + $0x28] sm:$0xff]  ;;  %v157_v15 = vmul.f32 %v20_v9, %v20_v9  ;;  %v22_v17 = vld [vmem:[%s523_s0 + $0x30] sm:$0xff]  ;;  %v23_v21 = vld [vmem:[%s523_s0 + $0x38] sm:$0xff] }
   0x4   :  { %v82_v10 = vadd.f32 %v81_v5, %v18_v3  ;;  %v217_v12 = vadd.f32 %v154_v7, %v153_v6  ;;  %v158_v19 = vmul.f32 %v21_v13, %v21_v13  ;;  %v159_v23 = vmul.f32 %v22_v17, %v22_v17  ;;  %v24_v25 = vld [vmem:[%s523_s0 + $0x40] sm:$0xff]  ;;  %v25_v29 = vld [vmem:[%s523_s0 + $0x48] sm:$0xff]  ;;  %v26_v33 = vld [vmem:[%s523_s0 + $0x50] sm:$0xff] }
   0x5   :  { %v160_v27 = vmul.f32 %v23_v21, %v23_v21  ;;  %v161_v31 = vmul.f32 %v24_v25, %v24_v25  ;;  %v162_v35 = vmul.f32 %v25_v29, %v25_v29  ;;  %v27_v37 = vld [vmem:[%s523_s0 + $0x58] sm:$0xff]  ;;  %v163_v39 = vmul.f32 %v26_v33, %v26_v33  ;;  %v28_v41 = vld [vmem:[%s523_s0 + $0x60] sm:$0xff]  ;;  %v29_v45 = vld [vmem:[%s523_s0 + $0x68] sm:$0xff] }
   0x6   :  { %v83_v14 = vadd.f32 %v82_v10, %v19_v4  ;;  %v218_v16 = vadd.f32 %v217_v12, %v155_v8  ;;  %v164_v43 = vmul.f32 %v27_v37, %v27_v37  ;;  %v165_v47 = vmul.f32 %v28_v41, %v28_v41  ;;  %v30_v49 = vld [vmem:[%s523_s0 + $0x70] sm:$0xff]  ;;  %v31_v53 = vld [vmem:[%s523_s0 + $0x78] sm:$0xff]  ;;  %v32_v57 = vld [vmem:[%s523_s0 + $0x80] sm:$0xff] }
   0x7   :  { %v166_v51 = vmul.f32 %v29_v45, %v29_v45  ;;  %v167_v55 = vmul.f32 %v30_v49, %v30_v49  ;;  %v168_v59 = vmul.f32 %v31_v53, %v31_v53  ;;  %v33_v61 = vld [vmem:[%s523_s0 + $0x88] sm:$0xff]  ;;  %v169_v63 = vmul.f32 %v32_v57, %v32_v57  ;;  %v34_v1 = vld [vmem:[%s523_s0 + $0x90] sm:$0xff]  ;;  %v35_v5 = vld [vmem:[%s523_s0 + $0x98] sm:$0xff] }
   0x8   :  { %v84_v18 = vadd.f32 %v83_v14, %v20_v9  ;;  %v219_v20 = vadd.f32 %v218_v16, %v156_v11  ;;  %v170_v3 = vmul.f32 %v33_v61, %v33_v61  ;;  %v171_v7 = vmul.f32 %v34_v1, %v34_v1  ;;  %v36_v9 = vld [vmem:[%s523_s0 + $0xa0] sm:$0xff] }
   0x9   :  { %v172_v11 = vmul.f32 %v35_v5, %v35_v5 }
   0xa   :  { %v85_v22 = vadd.f32 %v84_v18, %v21_v13  ;;  %v220_v24 = vadd.f32 %v219_v20, %v157_v15  ;;  %v37_v13 = vld [vmem:[%s523_s0 + $0xa8] sm:$0xff]  ;;  %v173_v15 = vmul.f32 %v36_v9, %v36_v9 }
   0xc   :  { %v86_v26 = vadd.f32 %v85_v22, %v22_v17  ;;  %v221_v28 = vadd.f32 %v220_v24, %v158_v19  ;;  %v38_v17 = vld [vmem:[%s523_s0 + $0xb0] sm:$0xff]  ;;  %v174_v19 = vmul.f32 %v37_v13, %v37_v13 }
   0xe   :  { %v87_v30 = vadd.f32 %v86_v26, %v23_v21  ;;  %v222_v32 = vadd.f32 %v221_v28, %v159_v23  ;;  %v39_v21 = vld [vmem:[%s523_s0 + $0xb8] sm:$0xff]  ;;  %v175_v23 = vmul.f32 %v38_v17, %v38_v17 }
  0x10   :  { %v88_v34 = vadd.f32 %v87_v30, %v24_v25  ;;  %v223_v36 = vadd.f32 %v222_v32, %v160_v27  ;;  %v40_v25 = vld [vmem:[%s523_s0 + $0xc0] sm:$0xff]  ;;  %v176_v27 = vmul.f32 %v39_v21, %v39_v21 }
  0x12   :  { %v89_v38 = vadd.f32 %v88_v34, %v25_v29  ;;  %v224_v40 = vadd.f32 %v223_v36, %v161_v31  ;;  %v41_v29 = vld [vmem:[%s523_s0 + $0xc8] sm:$0xff]  ;;  %v177_v31 = vmul.f32 %v40_v25, %v40_v25 }
  0x14   :  { %v90_v42 = vadd.f32 %v89_v38, %v26_v33  ;;  %v225_v44 = vadd.f32 %v224_v40, %v162_v35  ;;  %v42_v33 = vld [vmem:[%s523_s0 + $0xd0] sm:$0xff]  ;;  %v178_v35 = vmul.f32 %v41_v29, %v41_v29 }
  0x16   :  { %v91_v46 = vadd.f32 %v90_v42, %v27_v37  ;;  %v226_v48 = vadd.f32 %v225_v44, %v163_v39  ;;  %v43_v37 = vld [vmem:[%s523_s0 + $0xd8] sm:$0xff]  ;;  %v179_v39 = vmul.f32 %v42_v33, %v42_v33 }
  0x18   :  { %v92_v50 = vadd.f32 %v91_v46, %v28_v41  ;;  %v227_v52 = vadd.f32 %v226_v48, %v164_v43  ;;  %v44_v41 = vld [vmem:[%s523_s0 + $0xe0] sm:$0xff]  ;;  %v180_v43 = vmul.f32 %v43_v37, %v43_v37 }
  0x1a   :  { %v93_v54 = vadd.f32 %v92_v50, %v29_v45  ;;  %v228_v56 = vadd.f32 %v227_v52, %v165_v47  ;;  %v45_v45 = vld [vmem:[%s523_s0 + $0xe8] sm:$0xff]  ;;  %v181_v47 = vmul.f32 %v44_v41, %v44_v41 }
  0x1c   :  { %v94_v58 = vadd.f32 %v93_v54, %v30_v49  ;;  %v229_v60 = vadd.f32 %v228_v56, %v166_v51  ;;  %v46_v49 = vld [vmem:[%s523_s0 + $0xf0] sm:$0xff]  ;;  %v182_v51 = vmul.f32 %v45_v45, %v45_v45 }
  0x1e   :  { %v95_v62 = vadd.f32 %v94_v58, %v31_v53  ;;  %v230_v0 = vadd.f32 %v229_v60, %v167_v55  ;;  %v47_v53 = vld [vmem:[%s523_s0 + $0xf8] sm:$0xff]  ;;  %v183_v55 = vmul.f32 %v46_v49, %v46_v49 }
  0x20   :  { %v96_v2 = vadd.f32 %v95_v62, %v32_v57  ;;  %v231_v4 = vadd.f32 %v230_v0, %v168_v59  ;;  %v48_v57 = vld [vmem:[%s523_s0 + $0x100] sm:$0xff]  ;;  %v184_v59 = vmul.f32 %v47_v53, %v47_v53 }
  0x22   :  { %v97_v6 = vadd.f32 %v96_v2, %v33_v61  ;;  %v232_v8 = vadd.f32 %v231_v4, %v169_v63  ;;  %v49_v61 = vld [vmem:[%s523_s0 + $0x108] sm:$0xff]  ;;  %v185_v63 = vmul.f32 %v48_v57, %v48_v57 }
  0x24   :  { %v98_v10 = vadd.f32 %v97_v6, %v34_v1  ;;  %v233_v12 = vadd.f32 %v232_v8, %v170_v3  ;;  %v50_v1 = vld [vmem:[%s523_s0 + $0x110] sm:$0xff]  ;;  %v186_v3 = vmul.f32 %v49_v61, %v49_v61 }
  0x26   :  { %v99_v14 = vadd.f32 %v98_v10, %v35_v5  ;;  %v234_v16 = vadd.f32 %v233_v12, %v171_v7  ;;  %v51_v5 = vld [vmem:[%s523_s0 + $0x118] sm:$0xff]  ;;  %v187_v7 = vmul.f32 %v50_v1, %v50_v1 }
  0x28   :  { %v100_v18 = vadd.f32 %v99_v14, %v36_v9  ;;  %v235_v20 = vadd.f32 %v234_v16, %v172_v11  ;;  %v52_v9 = vld [vmem:[%s523_s0 + $0x120] sm:$0xff]  ;;  %v188_v11 = vmul.f32 %v51_v5, %v51_v5 }
  0x2a   :  { %v101_v22 = vadd.f32 %v100_v18, %v37_v13  ;;  %v236_v24 = vadd.f32 %v235_v20, %v173_v15  ;;  %v53_v13 = vld [vmem:[%s523_s0 + $0x128] sm:$0xff]  ;;  %v189_v15 = vmul.f32 %v52_v9, %v52_v9 }
  0x2c   :  { %v102_v26 = vadd.f32 %v101_v22, %v38_v17  ;;  %v237_v28 = vadd.f32 %v236_v24, %v174_v19  ;;  %v54_v17 = vld [vmem:[%s523_s0 + $0x130] sm:$0xff]  ;;  %v190_v19 = vmul.f32 %v53_v13, %v53_v13 }
  0x2e   :  { %v103_v30 = vadd.f32 %v102_v26, %v39_v21  ;;  %v238_v32 = vadd.f32 %v237_v28, %v175_v23  ;;  %v55_v21 = vld [vmem:[%s523_s0 + $0x138] sm:$0xff]  ;;  %v191_v23 = vmul.f32 %v54_v17, %v54_v17 }
  0x30   :  { %v104_v34 = vadd.f32 %v103_v30, %v40_v25  ;;  %v239_v36 = vadd.f32 %v238_v32, %v176_v27  ;;  %v56_v25 = vld [vmem:[%s523_s0 + $0x140] sm:$0xff]  ;;  %v192_v27 = vmul.f32 %v55_v21, %v55_v21 }
  0x32   :  { %v105_v38 = vadd.f32 %v104_v34, %v41_v29  ;;  %v240_v40 = vadd.f32 %v239_v36, %v177_v31  ;;  %v57_v29 = vld [vmem:[%s523_s0 + $0x148] sm:$0xff]  ;;  %v193_v31 = vmul.f32 %v56_v25, %v56_v25 }
  0x34   :  { %v106_v42 = vadd.f32 %v105_v38, %v42_v33  ;;  %v241_v44 = vadd.f32 %v240_v40, %v178_v35  ;;  %v58_v33 = vld [vmem:[%s523_s0 + $0x150] sm:$0xff]  ;;  %v194_v35 = vmul.f32 %v57_v29, %v57_v29 }
  0x36   :  { %v107_v46 = vadd.f32 %v106_v42, %v43_v37  ;;  %v242_v48 = vadd.f32 %v241_v44, %v179_v39  ;;  %v59_v37 = vld [vmem:[%s523_s0 + $0x158] sm:$0xff]  ;;  %v195_v39 = vmul.f32 %v58_v33, %v58_v33 }
  0x38   :  { %v108_v50 = vadd.f32 %v107_v46, %v44_v41  ;;  %v243_v52 = vadd.f32 %v242_v48, %v180_v43  ;;  %v60_v41 = vld [vmem:[%s523_s0 + $0x160] sm:$0xff]  ;;  %v196_v43 = vmul.f32 %v59_v37, %v59_v37 }
  0x3a   :  { %v109_v54 = vadd.f32 %v108_v50, %v45_v45  ;;  %v244_v56 = vadd.f32 %v243_v52, %v181_v47  ;;  %v61_v45 = vld [vmem:[%s523_s0 + $0x168] sm:$0xff]  ;;  %v197_v47 = vmul.f32 %v60_v41, %v60_v41 }
  0x3c   :  { %v110_v58 = vadd.f32 %v109_v54, %v46_v49  ;;  %v245_v60 = vadd.f32 %v244_v56, %v182_v51  ;;  %v62_v49 = vld [vmem:[%s523_s0 + $0x170] sm:$0xff]  ;;  %v198_v51 = vmul.f32 %v61_v45, %v61_v45 }
  0x3e   :  { %v111_v62 = vadd.f32 %v110_v58, %v47_v53  ;;  %v246_v0 = vadd.f32 %v245_v60, %v183_v55  ;;  %v63_v53 = vld [vmem:[%s523_s0 + $0x178] sm:$0xff]  ;;  %v199_v55 = vmul.f32 %v62_v49, %v62_v49 }
  0x40   :  { %v112_v2 = vadd.f32 %v111_v62, %v48_v57  ;;  %v247_v4 = vadd.f32 %v246_v0, %v184_v59  ;;  %v64_v57 = vld [vmem:[%s523_s0 + $0x180] sm:$0xff]  ;;  %v200_v59 = vmul.f32 %v63_v53, %v63_v53 }
  0x42   :  { %v113_v6 = vadd.f32 %v112_v2, %v49_v61  ;;  %v248_v8 = vadd.f32 %v247_v4, %v185_v63  ;;  %v65_v61 = vld [vmem:[%s523_s0 + $0x188] sm:$0xff]  ;;  %v201_v63 = vmul.f32 %v64_v57, %v64_v57 }
  0x44   :  { %v114_v10 = vadd.f32 %v113_v6, %v50_v1  ;;  %v249_v12 = vadd.f32 %v248_v8, %v186_v3  ;;  %v66_v1 = vld [vmem:[%s523_s0 + $0x190] sm:$0xff]  ;;  %v202_v3 = vmul.f32 %v65_v61, %v65_v61 }
  0x46   :  { %v115_v14 = vadd.f32 %v114_v10, %v51_v5  ;;  %v250_v16 = vadd.f32 %v249_v12, %v187_v7  ;;  %v67_v5 = vld [vmem:[%s523_s0 + $0x198] sm:$0xff]  ;;  %v203_v7 = vmul.f32 %v66_v1, %v66_v1 }
  0x48   :  { %v116_v18 = vadd.f32 %v115_v14, %v52_v9  ;;  %v251_v20 = vadd.f32 %v250_v16, %v188_v11  ;;  %v68_v9 = vld [vmem:[%s523_s0 + $0x1a0] sm:$0xff]  ;;  %v204_v11 = vmul.f32 %v67_v5, %v67_v5 }
  0x4a   :  { %v117_v22 = vadd.f32 %v116_v18, %v53_v13  ;;  %v252_v24 = vadd.f32 %v251_v20, %v189_v15  ;;  %v69_v13 = vld [vmem:[%s523_s0 + $0x1a8] sm:$0xff]  ;;  %v205_v15 = vmul.f32 %v68_v9, %v68_v9 }
  0x4c   :  { %v118_v26 = vadd.f32 %v117_v22, %v54_v17  ;;  %v253_v28 = vadd.f32 %v252_v24, %v190_v19  ;;  %v70_v17 = vld [vmem:[%s523_s0 + $0x1b0] sm:$0xff]  ;;  %v206_v19 = vmul.f32 %v69_v13, %v69_v13 }
  0x4e   :  { %v119_v30 = vadd.f32 %v118_v26, %v55_v21  ;;  %v254_v32 = vadd.f32 %v253_v28, %v191_v23  ;;  %v71_v21 = vld [vmem:[%s523_s0 + $0x1b8] sm:$0xff]  ;;  %v207_v23 = vmul.f32 %v70_v17, %v70_v17 }
  0x50   :  { %v120_v34 = vadd.f32 %v119_v30, %v56_v25  ;;  %v255_v36 = vadd.f32 %v254_v32, %v192_v27  ;;  %v72_v25 = vld [vmem:[%s523_s0 + $0x1c0] sm:$0xff]  ;;  %v208_v27 = vmul.f32 %v71_v21, %v71_v21 }
  0x52   :  { %v121_v38 = vadd.f32 %v120_v34, %v57_v29  ;;  %v256_v40 = vadd.f32 %v255_v36, %v193_v31  ;;  %v73_v29 = vld [vmem:[%s523_s0 + $0x1c8] sm:$0xff]  ;;  %v209_v31 = vmul.f32 %v72_v25, %v72_v25 }
  0x54   :  { %v122_v42 = vadd.f32 %v121_v38, %v58_v33  ;;  %v257_v44 = vadd.f32 %v256_v40, %v194_v35  ;;  %v74_v33 = vld [vmem:[%s523_s0 + $0x1d0] sm:$0xff]  ;;  %v210_v35 = vmul.f32 %v73_v29, %v73_v29 }
  0x56   :  { %v123_v46 = vadd.f32 %v122_v42, %v59_v37  ;;  %v258_v48 = vadd.f32 %v257_v44, %v195_v39  ;;  %v75_v37 = vld [vmem:[%s523_s0 + $0x1d8] sm:$0xff]  ;;  %v211_v39 = vmul.f32 %v74_v33, %v74_v33 }
  0x58   :  { %v124_v50 = vadd.f32 %v123_v46, %v60_v41  ;;  %v259_v52 = vadd.f32 %v258_v48, %v196_v43  ;;  %v76_v41 = vld [vmem:[%s523_s0 + $0x1e0] sm:$0xff]  ;;  %v212_v43 = vmul.f32 %v75_v37, %v75_v37 }
  0x5a   :  { %v125_v54 = vadd.f32 %v124_v50, %v61_v45  ;;  %v260_v56 = vadd.f32 %v259_v52, %v197_v47  ;;  %v77_v45 = vld [vmem:[%s523_s0 + $0x1e8] sm:$0xff]  ;;  %v213_v47 = vmul.f32 %v76_v41, %v76_v41 }
  0x5c   :  { %v126_v58 = vadd.f32 %v125_v54, %v62_v49  ;;  %v261_v60 = vadd.f32 %v260_v56, %v198_v51  ;;  %v78_v49 = vld [vmem:[%s523_s0 + $0x1f0] sm:$0xff]  ;;  %v214_v51 = vmul.f32 %v77_v45, %v77_v45 }
  0x5e   :  { %v127_v62 = vadd.f32 %v126_v58, %v63_v53  ;;  %v262_v0 = vadd.f32 %v261_v60, %v199_v55  ;;  %v79_v53 = vld [vmem:[%s523_s0 + $0x1f8] sm:$0xff]  ;;  %v215_v55 = vmul.f32 %v78_v49, %v78_v49 }
  0x5f   :  { %v216_v58 = vmul.f32 %v79_v53, %v79_v53 }
  0x60   :  { %v128_v2 = vadd.f32 %v127_v62, %v64_v57  ;;  %v263_v4 = vadd.f32 %v262_v0, %v200_v59 }
  0x62   :  { %v129_v6 = vadd.f32 %v128_v2, %v65_v61  ;;  %v264_v8 = vadd.f32 %v263_v4, %v201_v63 }
  0x64   :  { %v130_v10 = vadd.f32 %v129_v6, %v66_v1  ;;  %v265_v12 = vadd.f32 %v264_v8, %v202_v3 }
  0x66   :  { %v131_v14 = vadd.f32 %v130_v10, %v67_v5  ;;  %v266_v16 = vadd.f32 %v265_v12, %v203_v7  ;;  %v80_v7 = vld [vmem:[%s524_s1] sm:$0x1] }
  0x67   :  { %v152_v12 = vld [vmem:[%s525_s2] sm:$0x1] }
  0x68   :  { %v132_v18 = vadd.f32 %v131_v14, %v68_v9  ;;  %v267_v20 = vadd.f32 %v266_v16, %v204_v11 }
  0x6a   :  { %v133_v22 = vadd.f32 %v132_v18, %v69_v13  ;;  %v268_v24 = vadd.f32 %v267_v20, %v205_v15 }
  0x6c   :  { %v134_v26 = vadd.f32 %v133_v22, %v70_v17  ;;  %v269_v28 = vadd.f32 %v268_v24, %v206_v19 }
  0x6e   :  { %v135_v30 = vadd.f32 %v134_v26, %v71_v21  ;;  %v270_v32 = vadd.f32 %v269_v28, %v207_v23 }
  0x70   :  { %v136_v34 = vadd.f32 %v135_v30, %v72_v25  ;;  %v271_v36 = vadd.f32 %v270_v32, %v208_v27 }
  0x72   :  { %v137_v38 = vadd.f32 %v136_v34, %v73_v29  ;;  %v272_v40 = vadd.f32 %v271_v36, %v209_v31 }
  0x74   :  { %v138_v42 = vadd.f32 %v137_v38, %v74_v33  ;;  %v273_v44 = vadd.f32 %v272_v40, %v210_v35 }
  0x76   :  { %v139_v46 = vadd.f32 %v138_v42, %v75_v37  ;;  %v274_v48 = vadd.f32 %v273_v44, %v211_v39 }
  0x78   :  { %v140_v50 = vadd.f32 %v139_v46, %v76_v41  ;;  %v275_v52 = vadd.f32 %v274_v48, %v212_v43 }
  0x7a   :  { %v141_v54 = vadd.f32 %v140_v50, %v77_v45  ;;  %v276_v56 = vadd.f32 %v275_v52, %v213_v47 }
  0x7c   :  { %v142_v57 = vadd.f32 %v141_v54, %v78_v49  ;;  %v277_v59 = vadd.f32 %v276_v56, %v214_v51 }
  0x7e   :  { %v143_v60 = vadd.f32 %v142_v57, %v79_v53  ;;  %v278_v61 = vadd.f32 %v277_v59, %v215_v55 }
  0x80   :  { %v144_v62 = vrot.slane %v143_v60, 4  ;;  %v279_v63 = vadd.f32 %v278_v61, %v216_v58 }
  0x82   :  { %v145_v0 = vadd.f32 %v144_v62, %v143_v60  ;;  %v280_v1 = vrot.slane %v279_v63, 4 }
  0x84   :  { %v146_v2 = vrot.slane %v145_v0, 2  ;;  %v281_v3 = vadd.f32 %v280_v1, %v279_v63 }
  0x86   :  { %v147_v4 = vadd.f32 %v146_v2, %v145_v0  ;;  %v282_v5 = vrot.slane %v281_v3, 2 }
  0x88   :  { %v148_v6 = vrot.slane %v147_v4, 1  ;;  %v283_v8 = vadd.f32 %v282_v5, %v281_v3 }
  0x8a   :  { %v149_v9 = vadd.f32 %v148_v6, %v147_v4  ;;  %v284_v10 = vrot.slane %v283_v8, 1 }
  0x8c   :  { %v150_v11 = vadd.f32 %v149_v9, %v80_v7  ;;  %v285_v13 = vadd.f32 %v284_v10, %v283_v8 }
  0x8e   :  { %151 = vst [vmem:[%s524_s1] sm:$0x1] %v150_v11  ;;  %v286_v14 = vadd.f32 %v285_v13, %v152_v12 }
  0x90   :  { %287 = vst [vmem:[%s525_s2] sm:$0x1] %v286_v14 }

// kernel: generator_forward.21
= control target key start
LH: loop header
LB: loop body
LE: loop exit
PB: predicated region body
PF: predicated region fallthrough
CT: control target
= control target key end

     0   :  { %v99_v8 = vlaneseq  ;;  %s930_s1 = inlined_call_operand.vmem [shape: f32[1,128], index: 1, kind: input, shape index: {}]   ;;  %s931_s2 = inlined_call_operand.vmem [shape: f32[1,128], index: 2, kind: input, shape index: {}]   ;;  %s932_s3 = inlined_call_operand.vmem [shape: f32[1,128], index: 3, kind: input, shape index: {}]   ;;  %s933_s0 = inlined_call_operand.vmem [shape: f32[512,128], index: 0, kind: input, shape index: {}]   ;;  %s934_s4 = inlined_call_operand.vmem [shape: f32[1,128], index: 4, kind: input, shape index: {}]   ;;  %s935_s5 = inlined_call_operand.vmem [shape: f32[512,128], index: 5, kind: output, shape index: {}]  }
   0x1   :  { %v20_v0 = vld [vmem:[%s930_s1] sm:$0x1]  ;;  %v35_v16 = vld [vmem:[%s933_s0 + $0x8] sm:$0xff]  ;;  %v36_v17 = vld [vmem:[%s933_s0 + $0x10] sm:$0xff] }
   0x2   :  { %v22_v1 = vld [vmem:[%s931_s2] sm:$0x1]  ;;  %v21_v2 = vmul.f32 0.001953125, %v20_v0  ;;  %v100_v9 = vshrl.u32 %v99_v8, 7  ;;  %v37_v18 = vld [vmem:[%s933_s0 + $0x18] sm:$0xff]  ;;  %v39_v22 = vld [vmem:[%s933_s0 + $0x28] sm:$0xff] }
   0x3   :  { %v23_v3 = vmul.f32 0.001953125, %v22_v1  ;;  %v27_v10 = vld [vmem:[%s932_s3] sm:$0x1]  ;;  %v40_v23 = vld [vmem:[%s933_s0 + $0x30] sm:$0xff]  ;;  %v41_v24 = vld [vmem:[%s933_s0 + $0x38] sm:$0xff] }
   0x4   :  { %v24_v4 = vmul.f32 %v21_v2, %v21_v2  ;;  %v101_v11 = vsub.s32 0, %v100_v9  ;;  %v31_v14 = vld [vmem:[%s934_s4] sm:$0x1]  ;;  %v43_v26 = vld [vmem:[%s933_s0 + $0x48] sm:$0xff]  ;;  %v44_v27 = vld [vmem:[%s933_s0 + $0x50] sm:$0xff] }
   0x5   :  { %v34_v15 = vld [vmem:[%s933_s0] sm:$0xff]  ;;  %v45_v32 = vld [vmem:[%s933_s0 + $0x58] sm:$0xff]  ;;  %v47_v34 = vld [vmem:[%s933_s0 + $0x68] sm:$0xff] }
   0x6   :  { %v25_v5 = vsub.f32 %v23_v3, %v24_v4  ;;  %v38_v19 = vld [vmem:[%s933_s0 + $0x20] sm:$0xff]  ;;  %v48_v59 = vld [vmem:[%s933_s0 + $0x70] sm:$0xff]  ;;  %v49_v60 = vld [vmem:[%s933_s0 + $0x78] sm:$0xff] }
   0x7   :  { %v42_v25 = vld [vmem:[%s933_s0 + $0x40] sm:$0xff] }
   0x8   :  { %v26_v6 = vmax.f32 %v25_v5, 0.0  ;;  %v46_v33 = vld [vmem:[%s933_s0 + $0x60] sm:$0xff] }
   0x9   :  { %v50_v5 = vld [vmem:[%s933_s0 + $0x80] sm:$0xff] }
   0xa   :  { %v28_v7 = vadd.f32 1e-05, %v26_v6 }
   0xc   :  { %370 = vrsqrt.f32 %v28_v7 }
  0x16   :  { %v371_v12 = vpop.eup %370 }
  0x17   :  { %v30_v13 = vmul.f32 %v371_v12, %v27_v10  ;;  %v51_v10 = vld [vmem:[%s933_s0 + $0x88] sm:$0xff]  ;;  %v53_v12 = vld [vmem:[%s933_s0 + $0x98] sm:$0xff] }
  0x19   :  { %v32_v20 = vmul.f32 %v30_v13, %v21_v2  ;;  %v429_v21 = vrot.slane %v30_v13, %v101_v11 }
  0x1b   :  { %v33_v28 = vsub.f32 %v31_v14, %v32_v20  ;;  %v104_v29 = vmul.f32 %v429_v21, %v34_v15  ;;  %v105_v30 = vmul.f32 %v429_v21, %v35_v16  ;;  %v106_v31 = vmul.f32 %v429_v21, %v36_v17  ;;  %v54_v17 = vld [vmem:[%s933_s0 + $0xa0] sm:$0xff] }
  0x1c   :  { %v107_v35 = vmul.f32 %v429_v21, %v37_v18  ;;  %v108_v36 = vmul.f32 %v429_v21, %v38_v19  ;;  %v109_v37 = vmul.f32 %v429_v21, %v39_v22  ;;  %v110_v38 = vmul.f32 %v429_v21, %v40_v23  ;;  %v55_v18 = vld [vmem:[%s933_s0 + $0xa8] sm:$0xff] }
  0x1d   :  { %v465_v39 = vrot.slane %v33_v28, %v101_v11  ;;  %v111_v40 = vmul.f32 %v429_v21, %v41_v24  ;;  %v112_v41 = vmul.f32 %v429_v21, %v42_v25  ;;  %v113_v42 = vmul.f32 %v429_v21, %v43_v26  ;;  %v52_v11 = vld [vmem:[%s933_s0 + $0x90] sm:$0xff] }
  0x1e   :  { %v114_v43 = vmul.f32 %v429_v21, %v44_v27  ;;  %v115_v44 = vmul.f32 %v429_v21, %v45_v32  ;;  %v116_v45 = vmul.f32 %v429_v21, %v46_v33  ;;  %v117_v46 = vmul.f32 %v429_v21, %v47_v34  ;;  %v56_v28 = vld [vmem:[%s933_s0 + $0xb0] sm:$0xff] }
  0x1f   :  { %v174_v47 = vadd.f32 %v465_v39, %v104_v29  ;;  %v175_v48 = vadd.f32 %v465_v39, %v105_v30  ;;  %v176_v49 = vadd.f32 %v465_v39, %v106_v31  ;;  %v177_v50 = vadd.f32 %v465_v39, %v107_v35  ;;  %v57_v29 = vld [vmem:[%s933_s0 + $0xb8] sm:$0xff] }
  0x20   :  { %v178_v51 = vadd.f32 %v465_v39, %v108_v36  ;;  %v179_v52 = vadd.f32 %v465_v39, %v109_v37  ;;  %v180_v53 = vadd.f32 %v465_v39, %v110_v38  ;;  %v181_v54 = vadd.f32 %v465_v39, %v111_v40  ;;  %v58_v38 = vld [vmem:[%s933_s0 + $0xc0] sm:$0xff] }
  0x21   :  { %v238_v55 = vmax.f32 %v174_v47, 0.0  ;;  %v239_v56 = vmax.f32 %v175_v48, 0.0  ;;  %v240_v57 = vmax.f32 %v176_v49, 0.0  ;;  %v241_v58 = vmax.f32 %v177_v50, 0.0 }
  0x22   :  { %v242_v61 = vmax.f32 %v178_v51, 0.0  ;;  %v243_v62 = vmax.f32 %v179_v52, 0.0  ;;  %v244_v63 = vmax.f32 %v180_v53, 0.0  ;;  %v245_v0 = vmax.f32 %v181_v54, 0.0  ;;  %v62_v51 = vld [vmem:[%s933_s0 + $0xe0] sm:$0xff]  ;;  %v63_v52 = vld [vmem:[%s933_s0 + $0xe8] sm:$0xff] }
  0x23   :  { %302 = vst [vmem:[%s935_s5] sm:$0xff] %v238_v55  ;;  %303 = vst [vmem:[%s935_s5 + $0x8] sm:$0xff] %v239_v56  ;;  %v182_v1 = vadd.f32 %v465_v39, %v112_v41  ;;  %v183_v2 = vadd.f32 %v465_v39, %v113_v42  ;;  %v184_v3 = vadd.f32 %v465_v39, %v114_v43 }
  0x24   :  { %304 = vst [vmem:[%s935_s5 + $0x10] sm:$0xff] %v240_v57  ;;  %305 = vst [vmem:[%s935_s5 + $0x18] sm:$0xff] %v241_v58  ;;  %v185_v4 = vadd.f32 %v465_v39, %v115_v44  ;;  %v186_v6 = vadd.f32 %v465_v39, %v116_v45  ;;  %v187_v7 = vadd.f32 %v465_v39, %v117_v46  ;;  %v59_v44 = vld [vmem:[%s933_s0 + $0xc8] sm:$0xff]  ;;  %v60_v45 = vld [vmem:[%s933_s0 + $0xd0] sm:$0xff] }
  0x25   :  { %306 = vst [vmem:[%s935_s5 + $0x20] sm:$0xff] %v242_v61  ;;  %307 = vst [vmem:[%s935_s5 + $0x28] sm:$0xff] %v243_v62  ;;  %v118_v8 = vmul.f32 %v429_v21, %v48_v59  ;;  %v119_v9 = vmul.f32 %v429_v21, %v49_v60  ;;  %v246_v13 = vmax.f32 %v182_v1, 0.0  ;;  %v247_v14 = vmax.f32 %v183_v2, 0.0  ;;  %v61_v46 = vld [vmem:[%s933_s0 + $0xd8] sm:$0xff]  ;;  %v64_v61 = vld [vmem:[%s933_s0 + $0xf0] sm:$0xff] }
  0x26   :  { %308 = vst [vmem:[%s935_s5 + $0x30] sm:$0xff] %v244_v63  ;;  %309 = vst [vmem:[%s935_s5 + $0x38] sm:$0xff] %v245_v0  ;;  %v248_v15 = vmax.f32 %v184_v3, 0.0  ;;  %v249_v16 = vmax.f32 %v185_v4, 0.0  ;;  %v250_v19 = vmax.f32 %v186_v6, 0.0  ;;  %v251_v20 = vmax.f32 %v187_v7, 0.0 }
  0x27   :  { %v188_v22 = vadd.f32 %v465_v39, %v118_v8  ;;  %v189_v23 = vadd.f32 %v465_v39, %v119_v9  ;;  %310 = vst [vmem:[%s935_s5 + $0x40] sm:$0xff] %v246_v13  ;;  %311 = vst [vmem:[%s935_s5 + $0x48] sm:$0xff] %v247_v14  ;;  %v120_v24 = vmul.f32 %v429_v21, %v50_v5  ;;  %v65_v62 = vld [vmem:[%s933_s0 + $0xf8] sm:$0xff]  ;;  %v66_v7 = vld [vmem:[%s933_s0 + $0x100] sm:$0xff] }
  0x28   :  { %312 = vst [vmem:[%s935_s5 + $0x50] sm:$0xff] %v248_v15  ;;  %313 = vst [vmem:[%s935_s5 + $0x58] sm:$0xff] %v249_v16  ;;  %v121_v25 = vmul.f32 %v429_v21, %v51_v10  ;;  %v122_v26 = vmul.f32 %v429_v21, %v52_v11  ;;  %v123_v27 = vmul.f32 %v429_v21, %v53_v12  ;;  %v67_v12 = vld [vmem:[%s933_s0 + $0x108] sm:$0xff]  ;;  %v68_v13 = vld [vmem:[%s933_s0 + $0x110] sm:$0xff] }
  0x29   :  { %314 = vst [vmem:[%s935_s5 + $0x60] sm:$0xff] %v250_v19  ;;  %315 = vst [vmem:[%s935_s5 + $0x68] sm:$0xff] %v251_v20  ;;  %v252_v30 = vmax.f32 %v188_v22, 0.0  ;;  %v253_v31 = vmax.f32 %v189_v23, 0.0  ;;  %v124_v32 = vmul.f32 %v429_v21, %v54_v17  ;;  %v125_v33 = vmul.f32 %v429_v21, %v55_v18  ;;  %v69_v14 = vld [vmem:[%s933_s0 + $0x118] sm:$0xff]  ;;  %v70_v19 = vld [vmem:[%s933_s0 + $0x120] sm:$0xff] }
  0x2a   :  { %v190_v34 = vadd.f32 %v465_v39, %v120_v24  ;;  %v191_v35 = vadd.f32 %v465_v39, %v121_v25  ;;  %v192_v36 = vadd.f32 %v465_v39, %v122_v26  ;;  %v193_v37 = vadd.f32 %v465_v39, %v123_v27  ;;  %v71_v20 = vld [vmem:[%s933_s0 + $0x128] sm:$0xff] }
  0x2b   :  { %316 = vst [vmem:[%s935_s5 + $0x70] sm:$0xff] %v252_v30  ;;  %317 = vst [vmem:[%s935_s5 + $0x78] sm:$0xff] %v253_v31  ;;  %v194_v40 = vadd.f32 %v465_v39, %v124_v32  ;;  %v195_v41 = vadd.f32 %v465_v39, %v125_v33  ;;  %v126_v42 = vmul.f32 %v429_v21, %v56_v28  ;;  %v72_v30 = vld [vmem:[%s933_s0 + $0x130] sm:$0xff]  ;;  %v73_v31 = vld [vmem:[%s933_s0 + $0x138] sm:$0xff] }
  0x2c   :  { %v127_v43 = vmul.f32 %v429_v21, %v57_v29  ;;  %v254_v47 = vmax.f32 %v190_v34, 0.0  ;;  %v255_v48 = vmax.f32 %v191_v35, 0.0  ;;  %v256_v49 = vmax.f32 %v192_v36, 0.0 }
  0x2d   :  { %v257_v50 = vmax.f32 %v193_v37, 0.0  ;;  %v258_v53 = vmax.f32 %v194_v40, 0.0  ;;  %v259_v54 = vmax.f32 %v195_v41, 0.0  ;;  %v196_v55 = vadd.f32 %v465_v39, %v126_v42  ;;  %v74_v41 = vld [vmem:[%s933_s0 + $0x140] sm:$0xff] }
  0x2e   :  { %v197_v56 = vadd.f32 %v465_v39, %v127_v43  ;;  %318 = vst [vmem:[%s935_s5 + $0x80] sm:$0xff] %v254_v47  ;;  %319 = vst [vmem:[%s935_s5 + $0x88] sm:$0xff] %v255_v48  ;;  %v128_v57 = vmul.f32 %v429_v21, %v58_v38  ;;  %v129_v58 = vmul.f32 %v429_v21, %v59_v44  ;;  %v76_v47 = vld [vmem:[%s933_s0 + $0x150] sm:$0xff]  ;;  %v77_v48 = vld [vmem:[%s933_s0 + $0x158] sm:$0xff] }
  0x2f   :  { %320 = vst [vmem:[%s935_s5 + $0x90] sm:$0xff] %v256_v49  ;;  %321 = vst [vmem:[%s935_s5 + $0x98] sm:$0xff] %v257_v50  ;;  %v130_v59 = vmul.f32 %v429_v21, %v60_v45  ;;  %v131_v60 = vmul.f32 %v429_v21, %v61_v46  ;;  %v260_v63 = vmax.f32 %v196_v55, 0.0  ;;  %v132_v1 = vmul.f32 %v429_v21, %v62_v51  ;;  %v75_v46 = vld [vmem:[%s933_s0 + $0x148] sm:$0xff] }
  0x30   :  { %322 = vst [vmem:[%s935_s5 + $0xa0] sm:$0xff] %v258_v53  ;;  %323 = vst [vmem:[%s935_s5 + $0xa8] sm:$0xff] %v259_v54  ;;  %v261_v0 = vmax.f32 %v197_v56, 0.0  ;;  %v133_v2 = vmul.f32 %v429_v21, %v63_v52  ;;  %v198_v3 = vadd.f32 %v465_v39, %v128_v57  ;;  %v199_v4 = vadd.f32 %v465_v39, %v129_v58  ;;  %v78_v53 = vld [vmem:[%s933_s0 + $0x160] sm:$0xff]  ;;  %v79_v54 = vld [vmem:[%s933_s0 + $0x168] sm:$0xff] }
  0x31   :  { %v200_v5 = vadd.f32 %v465_v39, %v130_v59  ;;  %v201_v6 = vadd.f32 %v465_v39, %v131_v60  ;;  %324 = vst [vmem:[%s935_s5 + $0xb0] sm:$0xff] %v260_v63  ;;  %v202_v8 = vadd.f32 %v465_v39, %v132_v1  ;;  %v134_v10 = vmul.f32 %v429_v21, %v64_v61  ;;  %v80_v63 = vld [vmem:[%s933_s0 + $0x170] sm:$0xff] }
  0x32   :  { %325 = vst [vmem:[%s935_s5 + $0xb8] sm:$0xff] %v261_v0  ;;  %v203_v9 = vadd.f32 %v465_v39, %v133_v2  ;;  %v135_v11 = vmul.f32 %v429_v21, %v65_v62  ;;  %v262_v15 = vmax.f32 %v198_v3, 0.0  ;;  %v263_v16 = vmax.f32 %v199_v4, 0.0  ;;  %v81_v0 = vld [vmem:[%s933_s0 + $0x178] sm:$0xff] }
  0x33   :  { %v264_v17 = vmax.f32 %v200_v5, 0.0  ;;  %v265_v18 = vmax.f32 %v201_v6, 0.0  ;;  %v266_v22 = vmax.f32 %v202_v8, 0.0  ;;  %v204_v24 = vadd.f32 %v465_v39, %v134_v10 }
  0x34   :  { %v267_v23 = vmax.f32 %v203_v9, 0.0  ;;  %v205_v25 = vadd.f32 %v465_v39, %v135_v11  ;;  %326 = vst [vmem:[%s935_s5 + $0xc0] sm:$0xff] %v262_v15  ;;  %327 = vst [vmem:[%s935_s5 + $0xc8] sm:$0xff] %v263_v16  ;;  %v136_v26 = vmul.f32 %v429_v21, %v66_v7  ;;  %v137_v27 = vmul.f32 %v429_v21, %v67_v12  ;;  %v82_v9 = vld [vmem:[%s933_s0 + $0x180] sm:$0xff]  ;;  %v84_v15 = vld [vmem:[%s933_s0 + $0x190] sm:$0xff] }
  0x35   :  { %328 = vst [vmem:[%s935_s5 + $0xd0] sm:$0xff] %v264_v17  ;;  %329 = vst [vmem:[%s935_s5 + $0xd8] sm:$0xff] %v265_v18  ;;  %v138_v28 = vmul.f32 %v429_v21, %v68_v13  ;;  %v139_v29 = vmul.f32 %v429_v21, %v69_v14  ;;  %v268_v32 = vmax.f32 %v204_v24, 0.0  ;;  %v140_v34 = vmul.f32 %v429_v21, %v70_v19  ;;  %v83_v14 = vld [vmem:[%s933_s0 + $0x188] sm:$0xff]  ;;  %v85_v16 = vld [vmem:[%s933_s0 + $0x198] sm:$0xff] }
  0x36   :  { %330 = vst [vmem:[%s935_s5 + $0xe0] sm:$0xff] %v266_v22  ;;  %331 = vst [vmem:[%s935_s5 + $0xe8] sm:$0xff] %v267_v23  ;;  %v269_v33 = vmax.f32 %v205_v25, 0.0  ;;  %v141_v35 = vmul.f32 %v429_v21, %v71_v20  ;;  %v206_v36 = vadd.f32 %v465_v39, %v136_v26  ;;  %v207_v37 = vadd.f32 %v465_v39, %v137_v27  ;;  %v86_v22 = vld [vmem:[%s933_s0 + $0x1a0] sm:$0xff]  ;;  %v87_v23 = vld [vmem:[%s933_s0 + $0x1a8] sm:$0xff] }
  0x37   :  { %v208_v38 = vadd.f32 %v465_v39, %v138_v28  ;;  %v209_v40 = vadd.f32 %v465_v39, %v139_v29  ;;  %332 = vst [vmem:[%s935_s5 + $0xf0] sm:$0xff] %v268_v32  ;;  %v210_v42 = vadd.f32 %v465_v39, %v140_v34  ;;  %v142_v44 = vmul.f32 %v429_v21, %v72_v30  ;;  %v88_v32 = vld [vmem:[%s933_s0 + $0x1b0] sm:$0xff] }
  0x38   :  { %333 = vst [vmem:[%s935_s5 + $0xf8] sm:$0xff] %v269_v33  ;;  %v211_v43 = vadd.f32 %v465_v39, %v141_v35  ;;  %v143_v45 = vmul.f32 %v429_v21, %v73_v31  ;;  %v270_v49 = vmax.f32 %v206_v36, 0.0  ;;  %v271_v50 = vmax.f32 %v207_v37, 0.0  ;;  %v89_v33 = vld [vmem:[%s933_s0 + $0x1b8] sm:$0xff] }
  0x39   :  { %v272_v51 = vmax.f32 %v208_v38, 0.0  ;;  %v273_v52 = vmax.f32 %v209_v40, 0.0  ;;  %v274_v55 = vmax.f32 %v210_v42, 0.0  ;;  %v212_v57 = vadd.f32 %v465_v39, %v142_v44 }
  0x3a   :  { %v275_v56 = vmax.f32 %v211_v43, 0.0  ;;  %v213_v58 = vadd.f32 %v465_v39, %v143_v45  ;;  %334 = vst [vmem:[%s935_s5 + $0x100] sm:$0xff] %v270_v49  ;;  %335 = vst [vmem:[%s935_s5 + $0x108] sm:$0xff] %v271_v50  ;;  %v144_v59 = vmul.f32 %v429_v21, %v74_v41  ;;  %v145_v60 = vmul.f32 %v429_v21, %v75_v46  ;;  %v90_v43 = vld [vmem:[%s933_s0 + $0x1c0] sm:$0xff]  ;;  %v92_v49 = vld [vmem:[%s933_s0 + $0x1d0] sm:$0xff] }
  0x3b   :  { %336 = vst [vmem:[%s935_s5 + $0x110] sm:$0xff] %v272_v51  ;;  %337 = vst [vmem:[%s935_s5 + $0x118] sm:$0xff] %v273_v52  ;;  %v146_v61 = vmul.f32 %v429_v21, %v76_v47  ;;  %v147_v62 = vmul.f32 %v429_v21, %v77_v48  ;;  %v276_v1 = vmax.f32 %v212_v57, 0.0  ;;  %v148_v3 = vmul.f32 %v429_v21, %v78_v53  ;;  %v91_v48 = vld [vmem:[%s933_s0 + $0x1c8] sm:$0xff]  ;;  %v93_v50 = vld [vmem:[%s933_s0 + $0x1d8] sm:$0xff] }
  0x3c   :  { %338 = vst [vmem:[%s935_s5 + $0x120] sm:$0xff] %v274_v55  ;;  %339 = vst [vmem:[%s935_s5 + $0x128] sm:$0xff] %v275_v56  ;;  %v277_v2 = vmax.f32 %v213_v58, 0.0  ;;  %v149_v4 = vmul.f32 %v429_v21, %v79_v54  ;;  %v214_v5 = vadd.f32 %v465_v39, %v144_v59  ;;  %v215_v6 = vadd.f32 %v465_v39, %v145_v60  ;;  %v94_v55 = vld [vmem:[%s933_s0 + $0x1e0] sm:$0xff]  ;;  %v95_v56 = vld [vmem:[%s933_s0 + $0x1e8] sm:$0xff] }
  0x3d   :  { %v216_v7 = vadd.f32 %v465_v39, %v146_v61  ;;  %v217_v8 = vadd.f32 %v465_v39, %v147_v62  ;;  %340 = vst [vmem:[%s935_s5 + $0x130] sm:$0xff] %v276_v1  ;;  %v218_v10 = vadd.f32 %v465_v39, %v148_v3  ;;  %v150_v12 = vmul.f32 %v429_v21, %v80_v63  ;;  %v96_v1 = vld [vmem:[%s933_s0 + $0x1f0] sm:$0xff] }
  0x3e   :  { %341 = vst [vmem:[%s935_s5 + $0x138] sm:$0xff] %v277_v2  ;;  %v219_v11 = vadd.f32 %v465_v39, %v149_v4  ;;  %v151_v13 = vmul.f32 %v429_v21, %v81_v0  ;;  %v278_v17 = vmax.f32 %v214_v5, 0.0  ;;  %v279_v18 = vmax.f32 %v215_v6, 0.0  ;;  %v97_v2 = vld [vmem:[%s933_s0 + $0x1f8] sm:$0xff] }
  0x3f   :  { %v280_v19 = vmax.f32 %v216_v7, 0.0  ;;  %v281_v20 = vmax.f32 %v217_v8, 0.0  ;;  %v282_v24 = vmax.f32 %v218_v10, 0.0  ;;  %v220_v26 = vadd.f32 %v465_v39, %v150_v12 }
  0x40   :  { %v283_v25 = vmax.f32 %v219_v11, 0.0  ;;  %v221_v27 = vadd.f32 %v465_v39, %v151_v13  ;;  %342 = vst [vmem:[%s935_s5 + $0x140] sm:$0xff] %v278_v17  ;;  %343 = vst [vmem:[%s935_s5 + $0x148] sm:$0xff] %v279_v18  ;;  %v152_v28 = vmul.f32 %v429_v21, %v82_v9  ;;  %v153_v29 = vmul.f32 %v429_v21, %v83_v14 }
  0x41   :  { %344 = vst [vmem:[%s935_s5 + $0x150] sm:$0xff] %v280_v19  ;;  %345 = vst [vmem:[%s935_s5 + $0x158] sm:$0xff] %v281_v20  ;;  %v154_v30 = vmul.f32 %v429_v21, %v84_v15  ;;  %v155_v31 = vmul.f32 %v429_v21, %v85_v16  ;;  %v284_v34 = vmax.f32 %v220_v26, 0.0  ;;  %v156_v36 = vmul.f32 %v429_v21, %v86_v22 }
  0x42   :  { %346 = vst [vmem:[%s935_s5 + $0x160] sm:$0xff] %v282_v24  ;;  %347 = vst [vmem:[%s935_s5 + $0x168] sm:$0xff] %v283_v25  ;;  %v285_v35 = vmax.f32 %v221_v27, 0.0  ;;  %v157_v37 = vmul.f32 %v429_v21, %v87_v23  ;;  %v222_v38 = vadd.f32 %v465_v39, %v152_v28  ;;  %v223_v40 = vadd.f32 %v465_v39, %v153_v29 }
  0x43   :  { %v224_v41 = vadd.f32 %v465_v39, %v154_v30  ;;  %v225_v42 = vadd.f32 %v465_v39, %v155_v31  ;;  %348 = vst [vmem:[%s935_s5 + $0x170] sm:$0xff] %v284_v34  ;;  %v226_v44 = vadd.f32 %v465_v39, %v156_v36  ;;  %v158_v46 = vmul.f32 %v429_v21, %v88_v32 }
  0x44   :  { %349 = vst [vmem:[%s935_s5 + $0x178] sm:$0xff] %v285_v35  ;;  %v227_v45 = vadd.f32 %v465_v39, %v157_v37  ;;  %v159_v47 = vmul.f32 %v429_v21, %v89_v33  ;;  %v286_v51 = vmax.f32 %v222_v38, 0.0  ;;  %v287_v52 = vmax.f32 %v223_v40, 0.0 }
  0x45   :  { %v288_v53 = vmax.f32 %v224_v41, 0.0  ;;  %v289_v54 = vmax.f32 %v225_v42, 0.0  ;;  %v290_v57 = vmax.f32 %v226_v44, 0.0  ;;  %v228_v59 = vadd.f32 %v465_v39, %v158_v46 }
  0x46   :  { %v291_v58 = vmax.f32 %v227_v45, 0.0  ;;  %v229_v60 = vadd.f32 %v465_v39, %v159_v47  ;;  %350 = vst [vmem:[%s935_s5 + $0x180] sm:$0xff] %v286_v51  ;;  %351 = vst [vmem:[%s935_s5 + $0x188] sm:$0xff] %v287_v52  ;;  %v160_v61 = vmul.f32 %v429_v21, %v90_v43  ;;  %v161_v62 = vmul.f32 %v429_v21, %v91_v48 }
  0x47   :  { %352 = vst [vmem:[%s935_s5 + $0x190] sm:$0xff] %v288_v53  ;;  %353 = vst [vmem:[%s935_s5 + $0x198] sm:$0xff] %v289_v54  ;;  %v162_v63 = vmul.f32 %v429_v21, %v92_v49  ;;  %v163_v0 = vmul.f32 %v429_v21, %v93_v50  ;;  %v292_v3 = vmax.f32 %v228_v59, 0.0  ;;  %v164_v5 = vmul.f32 %v429_v21, %v94_v55 }
  0x48   :  { %354 = vst [vmem:[%s935_s5 + $0x1a0] sm:$0xff] %v290_v57  ;;  %355 = vst [vmem:[%s935_s5 + $0x1a8] sm:$0xff] %v291_v58  ;;  %v293_v4 = vmax.f32 %v229_v60, 0.0  ;;  %v165_v6 = vmul.f32 %v429_v21, %v95_v56  ;;  %v230_v7 = vadd.f32 %v465_v39, %v160_v61  ;;  %v231_v8 = vadd.f32 %v465_v39, %v161_v62 }
  0x49   :  { %v232_v9 = vadd.f32 %v465_v39, %v162_v63  ;;  %v233_v10 = vadd.f32 %v465_v39, %v163_v0  ;;  %356 = vst [vmem:[%s935_s5 + $0x1b0] sm:$0xff] %v292_v3  ;;  %v234_v11 = vadd.f32 %v465_v39, %v164_v5  ;;  %v166_v13 = vmul.f32 %v429_v21, %v96_v1 }
  0x4a   :  { %357 = vst [vmem:[%s935_s5 + $0x1b8] sm:$0xff] %v293_v4  ;;  %v235_v12 = vadd.f32 %v465_v39, %v165_v6  ;;  %v167_v14 = vmul.f32 %v429_v21, %v97_v2  ;;  %v294_v15 = vmax.f32 %v230_v7, 0.0  ;;  %v295_v16 = vmax.f32 %v231_v8, 0.0 }
  0x4b   :  { %v296_v17 = vmax.f32 %v232_v9, 0.0  ;;  %v297_v18 = vmax.f32 %v233_v10, 0.0  ;;  %v298_v19 = vmax.f32 %v234_v11, 0.0  ;;  %v236_v22 = vadd.f32 %v465_v39, %v166_v13 }
  0x4c   :  { %v299_v20 = vmax.f32 %v235_v12, 0.0  ;;  %v237_v23 = vadd.f32 %v465_v39, %v167_v14  ;;  %358 = vst [vmem:[%s935_s5 + $0x1c0] sm:$0xff] %v294_v15  ;;  %359 = vst [vmem:[%s935_s5 + $0x1c8] sm:$0xff] %v295_v16 }
  0x4d   :  { %360 = vst [vmem:[%s935_s5 + $0x1d0] sm:$0xff] %v296_v17  ;;  %361 = vst [vmem:[%s935_s5 + $0x1d8] sm:$0xff] %v297_v18  ;;  %v300_v21 = vmax.f32 %v236_v22, 0.0 }
  0x4e   :  { %362 = vst [vmem:[%s935_s5 + $0x1e0] sm:$0xff] %v298_v19  ;;  %363 = vst [vmem:[%s935_s5 + $0x1e8] sm:$0xff] %v299_v20  ;;  %v301_v39 = vmax.f32 %v237_v23, 0.0 }
  0x4f   :  { %364 = vst [vmem:[%s935_s5 + $0x1f0] sm:$0xff] %v300_v21 }
  0x50   :  { %365 = vst [vmem:[%s935_s5 + $0x1f8] sm:$0xff] %v301_v39 }

// kernel: generator_forward.22
= control target key start
LH: loop header
LB: loop body
LE: loop exit
PB: predicated region body
PF: predicated region fallthrough
CT: control target
= control target key end

     0   :  { %s1272_s9 = smov 0   ;;  %s1274_s10 = smov 0   ;;  %s1606_s0 = inlined_call_operand.vmem [shape: f32[4,512,512], index: 0, kind: input, shape index: {}]   ;;  %s1607_s1 = inlined_call_operand.vmem [shape: f32[4,512,128], index: 1, kind: input, shape index: {}]   ;;  %s1608_s2 = inlined_call_operand.vmem [shape: f32[4,512,128], index: 2, kind: output, shape index: {}]  }
   0x1   :  { %s1276_s11 = smov 0   ;;  %s1278_s12 = smov 0  }
   0x2   :  { %s1280_s13 = smov 0  }
   0x3 LB: > { %s27_s14 = sadd.s32 1, %s1246_s11  ;;  %s31_s15 = sadd.s32 1, %s1250_s12  ;;  %s1254_s13 = sphi %s1280_s13, %s12_s13   ;;  %s1250_s12 = sphi %s1278_s12, %s1613_s12   ;;  %s1246_s11 = sphi %s1276_s11, %s1612_s11   ;;  %s1242_s10 = sphi %s1274_s10, %s1611_s10   ;;  %s1238_s9 = sphi %s1272_s9, %s1610_s9  }
   0x4   : > { %p29_p0 = scmp.ge.s32.totalorder %s27_s14, 2  ;;  %p1034_p1 = scmp.ge.s32.totalorder %s1254_s13, 1 }
   0x5   : > { %p158_p2 = scmp.lt.s32.totalorder %s1254_s13, 9 }
   0x6   : > { %s1615_s14 = smov (%p29_p0, %s27_s14), 0  ;;  %s1617_s15 = smov (!%p29_p0, %s31_s15), %s1250_s12 }
   0x7   : > { %p159_p3 = pnand %p1034_p1, %p158_p2  ;;  %p33_p4 = scmp.ge.s32.totalorder %s1617_s15, 4 }
   0x8   : > { %p201_p5 = scmp.lt.s32.totalorder (!%p159_p3), %s1242_s10, 3  ;;  %v1256_v0 = vmov (!%p159_p3), 0.0|0.0   ;;  %s1035_s17 = sshll.u32 (!%p159_p3), %s1238_s9, 5 }
   0x9   : > { %s1619_s15 = smov (%p33_p4, %s1617_s15), 0  ;;  %162 = sbr.rel (%p159_p3) target bundleno = 425 (0x1a9), region = 28 }
   0xa   : > { %1047 = vmatprep.subr.bf16.mxu1 (!%p159_p3), %v1256_v0  ;;  %1095 = vmatprep.subr.bf16.mxu0 (!%p159_p3), %v1256_v0  ;;  %p1321_p6 = scmp.lt.s32.totalorder (!%p159_p3), %s1035_s17, 63 }
  0x10   : > { %s1621_s10 = smov (!%p201_p5, %s1242_s10), 3  ;;  %s1623_s17 = smov (!%p1321_p6, %s1035_s17), 63 }
  0x11   : > { %s1046_s16 = sshll.u32 %s1621_s10, 9  ;;  %s1036_s22 = sshll.u32 %s1623_s17, 2 }
  0x12   : > { %s1313_s20 = scalar_lea.vmem %s1607_s1, %s1046_s16  ;;  %s1037_s23 = sshll.u32 %s1621_s10, 8 }
  0x13   : > { %v360_v1 = vld [vmem:[%s1313_s20] sm:$0xff]  ;;  %v361_v2 = vld [vmem:[%s1313_s20 + $0x8] sm:$0xff]  ;;  %v362_v6 = vld [vmem:[%s1313_s20 + $0x10] sm:$0xff]  ;;  %s207_s24 = sadd.s32 %s1037_s23, %s1036_s22  ;;  %s1042_s29 = sshll.u32 %s1621_s10, 6 }
  0x14   : > { %v392_v3 = vld [vmem:[%s1313_s20 + $0x100] sm:$0xff]  ;;  %v1048_v4 = vpack.c.bf16 %v361_v2, %v360_v1  ;;  %v393_v5 = vld [vmem:[%s1313_s20 + $0x108] sm:$0xff]  ;;  %v363_v7 = vld [vmem:[%s1313_s20 + $0x18] sm:$0xff]  ;;  %s1038_s25 = sshll.u32 %s207_s24, 3  ;;  %s228_s30 = sadd.s32 %s1042_s29, %s1623_s17 }
  0x15   : > { %v1096_v8 = vpack.c.bf16 %v393_v5, %v392_v3  ;;  %v394_v9 = vld [vmem:[%s1313_s20 + $0x110] sm:$0xff]  ;;  %v395_v10 = vld [vmem:[%s1313_s20 + $0x118] sm:$0xff]  ;;  %v1051_v11 = vpack.c.bf16 %v363_v7, %v362_v6  ;;  %v364_v13 = vld [vmem:[%s1313_s20 + $0x20] sm:$0xff]  ;;  %s1360_s28 = scalar_lea.vmem %s1606_s0, %s1038_s25  ;;  %s1043_s3 = sshll.u32 %s228_s30, 3 }
  0x16   : > { %1049 = vmatpush1.bf16.msra.mxu1 %v1048_v4  ;;  %v1099_v12 = vpack.c.bf16 %v395_v10, %v394_v9  ;;  %v365_v14 = vld [vmem:[%s1313_s20 + $0x28] sm:$0xff]  ;;  %v396_v15 = vld [vmem:[%s1313_s20 + $0x120] sm:$0xff]  ;;  %v366_v19 = vld [vmem:[%s1313_s20 + $0x30] sm:$0xff]  ;;  %s1557_s6 = scalar_lea.vmem %s1608_s2, %s1043_s3 }
  0x17   : > { %1097 = vmatpush1.bf16.msra.mxu0 %v1096_v8  ;;  %1050 = vmatprep.subr.bf16.mxu1 %v1256_v0  ;;  %v397_v16 = vld [vmem:[%s1313_s20 + $0x128] sm:$0xff]  ;;  %v1054_v17 = vpack.c.bf16 %v365_v14, %v364_v13  ;;  %v367_v20 = vld [vmem:[%s1313_s20 + $0x38] sm:$0xff]  ;;  %v398_v21 = vld [vmem:[%s1313_s20 + $0x130] sm:$0xff] }
  0x18   : > { %1098 = vmatprep.subr.bf16.mxu0 %v1256_v0  ;;  %v1102_v18 = vpack.c.bf16 %v397_v16, %v396_v15  ;;  %v399_v22 = vld [vmem:[%s1313_s20 + $0x138] sm:$0xff]  ;;  %v1057_v23 = vpack.c.bf16 %v367_v20, %v366_v19  ;;  %v368_v25 = vld [vmem:[%s1313_s20 + $0x40] sm:$0xff]  ;;  %v369_v26 = vld [vmem:[%s1313_s20 + $0x48] sm:$0xff] }
  0x19   : > { %v1105_v24 = vpack.c.bf16 %v399_v22, %v398_v21  ;;  %v400_v27 = vld [vmem:[%s1313_s20 + $0x140] sm:$0xff]  ;;  %v401_v28 = vld [vmem:[%s1313_s20 + $0x148] sm:$0xff]  ;;  %v1060_v29 = vpack.c.bf16 %v369_v26, %v368_v25  ;;  %v370_v31 = vld [vmem:[%s1313_s20 + $0x50] sm:$0xff] }
  0x1a   : > { %1052 = vmatpush1.bf16.msra.mxu1 %v1051_v11  ;;  %v1108_v30 = vpack.c.bf16 %v401_v28, %v400_v27  ;;  %v371_v32 = vld [vmem:[%s1313_s20 + $0x58] sm:$0xff]  ;;  %v402_v33 = vld [vmem:[%s1313_s20 + $0x150] sm:$0xff]  ;;  %v372_v37 = vld [vmem:[%s1313_s20 + $0x60] sm:$0xff] }
  0x1b   : > { %1100 = vmatpush1.bf16.msra.mxu0 %v1099_v12  ;;  %1053 = vmatprep.subr.bf16.mxu1 %v1256_v0  ;;  %v403_v34 = vld [vmem:[%s1313_s20 + $0x158] sm:$0xff]  ;;  %v1063_v35 = vpack.c.bf16 %v371_v32, %v370_v31  ;;  %v373_v38 = vld [vmem:[%s1313_s20 + $0x68] sm:$0xff]  ;;  %v404_v39 = vld [vmem:[%s1313_s20 + $0x160] sm:$0xff] }
  0x1c   : > { %1101 = vmatprep.subr.bf16.mxu0 %v1256_v0  ;;  %v1111_v36 = vpack.c.bf16 %v403_v34, %v402_v33  ;;  %v405_v40 = vld [vmem:[%s1313_s20 + $0x168] sm:$0xff]  ;;  %v235_v42 = vld [vmem:[%s1360_s28 + $0x18] sm:$0xff]  ;;  %v1066_v43 = vpack.c.bf16 %v373_v38, %v372_v37  ;;  %v374_v45 = vld [vmem:[%s1313_s20 + $0x70] sm:$0xff] }
  0x1d   : > { %v233_v41 = vld [vmem:[%s1360_s28 + $0x8] sm:$0xff]  ;;  %713 = vmatprep.mubr.f32.mxu0 %v235_v42  ;;  %v1114_v44 = vpack.c.bf16 %v405_v40, %v404_v39  ;;  %v375_v46 = vld [vmem:[%s1313_s20 + $0x78] sm:$0xff]  ;;  %v406_v47 = vld [vmem:[%s1313_s20 + $0x170] sm:$0xff] }
  0x1e   : > { %1055 = vmatpush1.bf16.msra.mxu1 %v1054_v17  ;;  %488 = vmatprep.mubr.f32.mxu1 %v233_v41  ;;  %v407_v48 = vld [vmem:[%s1313_s20 + $0x178] sm:$0xff]  ;;  %v1069_v49 = vpack.c.bf16 %v375_v46, %v374_v45  ;;  %v376_v51 = vld [vmem:[%s1313_s20 + $0x80] sm:$0xff]  ;;  %v377_v52 = vld [vmem:[%s1313_s20 + $0x88] sm:$0xff] }
  0x1f   : > { %1103 = vmatpush1.bf16.msra.mxu0 %v1102_v18  ;;  %1056 = vmatprep.subr.bf16.mxu1 %v1256_v0  ;;  %v1117_v50 = vpack.c.bf16 %v407_v48, %v406_v47  ;;  %v408_v53 = vld [vmem:[%s1313_s20 + $0x180] sm:$0xff]  ;;  %v409_v54 = vld [vmem:[%s1313_s20 + $0x188] sm:$0xff]  ;;  %v1072_v55 = vpack.c.bf16 %v377_v52, %v376_v51  ;;  %v378_v57 = vld [vmem:[%s1313_s20 + $0x90] sm:$0xff] }
  0x20   : > { %1104 = vmatprep.subr.bf16.mxu0 %v1256_v0  ;;  %v1120_v56 = vpack.c.bf16 %v409_v54, %v408_v53  ;;  %v379_v58 = vld [vmem:[%s1313_s20 + $0x98] sm:$0xff]  ;;  %v410_v59 = vld [vmem:[%s1313_s20 + $0x190] sm:$0xff]  ;;  %v380_v63 = vld [vmem:[%s1313_s20 + $0xa0] sm:$0xff] }
  0x21   : > { %v411_v60 = vld [vmem:[%s1313_s20 + $0x198] sm:$0xff]  ;;  %v1075_v61 = vpack.c.bf16 %v379_v58, %v378_v57  ;;  %v381_v1 = vld [vmem:[%s1313_s20 + $0xa8] sm:$0xff]  ;;  %v412_v2 = vld [vmem:[%s1313_s20 + $0x1a0] sm:$0xff] }
  0x22   : > { %1058 = vmatpush1.bf16.msra.mxu1 %v1057_v23  ;;  %v1123_v62 = vpack.c.bf16 %v411_v60, %v410_v59  ;;  %v413_v3 = vld [vmem:[%s1313_s20 + $0x1a8] sm:$0xff]  ;;  %v1078_v4 = vpack.c.bf16 %v381_v1, %v380_v63  ;;  %v382_v6 = vld [vmem:[%s1313_s20 + $0xb0] sm:$0xff]  ;;  %v383_v7 = vld [vmem:[%s1313_s20 + $0xb8] sm:$0xff] }
  0x23   : > { %1106 = vmatpush1.bf16.msra.mxu0 %v1105_v24  ;;  %1059 = vmatprep.subr.bf16.mxu1 %v1256_v0  ;;  %v1126_v5 = vpack.c.bf16 %v413_v3, %v412_v2  ;;  %v414_v8 = vld [vmem:[%s1313_s20 + $0x1b0] sm:$0xff]  ;;  %v415_v9 = vld [vmem:[%s1313_s20 + $0x1b8] sm:$0xff]  ;;  %v1081_v10 = vpack.c.bf16 %v383_v7, %v382_v6  ;;  %v384_v12 = vld [vmem:[%s1313_s20 + $0xc0] sm:$0xff] }
  0x24   : > { %1107 = vmatprep.subr.bf16.mxu0 %v1256_v0  ;;  %v1129_v11 = vpack.c.bf16 %v415_v9, %v414_v8  ;;  %v385_v13 = vld [vmem:[%s1313_s20 + $0xc8] sm:$0xff]  ;;  %v416_v14 = vld [vmem:[%s1313_s20 + $0x1c0] sm:$0xff]  ;;  %v386_v18 = vld [vmem:[%s1313_s20 + $0xd0] sm:$0xff] }
  0x25   : > { %v417_v15 = vld [vmem:[%s1313_s20 + $0x1c8] sm:$0xff]  ;;  %v1084_v16 = vpack.c.bf16 %v385_v13, %v384_v12  ;;  %v387_v19 = vld [vmem:[%s1313_s20 + $0xd8] sm:$0xff]  ;;  %v418_v20 = vld [vmem:[%s1313_s20 + $0x1d0] sm:$0xff] }
  0x26   : > { %1061 = vmatpush1.bf16.msra.mxu1 %v1060_v29  ;;  %v1132_v17 = vpack.c.bf16 %v417_v15, %v416_v14  ;;  %v419_v21 = vld [vmem:[%s1313_s20 + $0x1d8] sm:$0xff]  ;;  %v1087_v22 = vpack.c.bf16 %v387_v19, %v386_v18  ;;  %v388_v24 = vld [vmem:[%s1313_s20 + $0xe0] sm:$0xff]  ;;  %v389_v25 = vld [vmem:[%s1313_s20 + $0xe8] sm:$0xff] }
  0x27   : > { %1109 = vmatpush1.bf16.msra.mxu0 %v1108_v30  ;;  %1062 = vmatprep.subr.bf16.mxu1 %v1256_v0  ;;  %v1135_v23 = vpack.c.bf16 %v419_v21, %v418_v20  ;;  %v420_v26 = vld [vmem:[%s1313_s20 + $0x1e0] sm:$0xff]  ;;  %v421_v27 = vld [vmem:[%s1313_s20 + $0x1e8] sm:$0xff]  ;;  %v1090_v28 = vpack.c.bf16 %v389_v25, %v388_v24  ;;  %v390_v30 = vld [vmem:[%s1313_s20 + $0xf0] sm:$0xff] }
  0x28   : > { %1110 = vmatprep.subr.bf16.mxu0 %v1256_v0  ;;  %v1138_v29 = vpack.c.bf16 %v421_v27, %v420_v26  ;;  %v391_v31 = vld [vmem:[%s1313_s20 + $0xf8] sm:$0xff]  ;;  %v422_v32 = vld [vmem:[%s1313_s20 + $0x1f0] sm:$0xff]  ;;  %v237_v38 = vld [vmem:[%s1360_s28 + $0x28] sm:$0xff] }
  0x29   : > { %v423_v33 = vld [vmem:[%s1313_s20 + $0x1f8] sm:$0xff]  ;;  %v1093_v34 = vpack.c.bf16 %v391_v31, %v390_v30  ;;  %v234_v37 = vld [vmem:[%s1360_s28 + $0x10] sm:$0xff]  ;;  %v236_v40 = vld [vmem:[%s1360_s28 + $0x20] sm:$0xff] }
  0x2a   : > { %1064 = vmatpush1.bf16.msra.mxu1 %v1063_v35  ;;  %v1141_v35 = vpack.c.bf16 %v423_v33, %v422_v32  ;;  %v239_v39 = vld [vmem:[%s1360_s28 + $0x38] sm:$0xff]  ;;  %v238_v41 = vld [vmem:[%s1360_s28 + $0x30] sm:$0xff]  ;;  %v241_v42 = vld [vmem:[%s1360_s28 + $0x48] sm:$0xff] }
  0x2b   : > { %1112 = vmatpush1.bf16.msra.mxu0 %v1111_v36  ;;  %1065 = vmatprep.subr.bf16.mxu1 %v1256_v0  ;;  %v232_v36 = vld [vmem:[%s1360_s28] sm:$0xff]  ;;  %v245_v45 = vld [vmem:[%s1360_s28 + $0x68] sm:$0xff]  ;;  %v247_v46 = vld [vmem:[%s1360_s28 + $0x78] sm:$0xff] }
  0x2c   : > { %1113 = vmatprep.subr.bf16.mxu0 %v1256_v0  ;;  %v244_v47 = vld [vmem:[%s1360_s28 + $0x60] sm:$0xff]  ;;  %v246_v48 = vld [vmem:[%s1360_s28 + $0x70] sm:$0xff]  ;;  %v253_v53 = vld [vmem:[%s1360_s28 + $0xa8] sm:$0xff] }
  0x2d   : > { %v248_v51 = vld [vmem:[%s1360_s28 + $0x80] sm:$0xff]  ;;  %v250_v52 = vld [vmem:[%s1360_s28 + $0x90] sm:$0xff]  ;;  %v255_v54 = vld [vmem:[%s1360_s28 + $0xb8] sm:$0xff] }
  0x2e   : > { %1067 = vmatpush1.bf16.msra.mxu1 %v1066_v43  ;;  %v240_v43 = vld [vmem:[%s1360_s28 + $0x40] sm:$0xff]  ;;  %v257_v57 = vld [vmem:[%s1360_s28 + $0xc8] sm:$0xff]  ;;  %v259_v58 = vld [vmem:[%s1360_s28 + $0xd8] sm:$0xff] }
  0x2f   : > { %1115 = vmatpush1.bf16.msra.mxu0 %v1114_v44  ;;  %1068 = vmatprep.subr.bf16.mxu1 %v1256_v0  ;;  %v242_v44 = vld [vmem:[%s1360_s28 + $0x50] sm:$0xff]  ;;  %v256_v59 = vld [vmem:[%s1360_s28 + $0xc0] sm:$0xff]  ;;  %v265_v2 = vld [vmem:[%s1360_s28 + $0x108] sm:$0xff] }
  0x30   : > { %1116 = vmatprep.subr.bf16.mxu0 %v1256_v0  ;;  %v258_v60 = vld [vmem:[%s1360_s28 + $0xd0] sm:$0xff]  ;;  %v260_v63 = vld [vmem:[%s1360_s28 + $0xe0] sm:$0xff]  ;;  %v267_v3 = vld [vmem:[%s1360_s28 + $0x118] sm:$0xff] }
  0x31   : > { %v262_v1 = vld [vmem:[%s1360_s28 + $0xf0] sm:$0xff]  ;;  %v269_v6 = vld [vmem:[%s1360_s28 + $0x128] sm:$0xff]  ;;  %v271_v7 = vld [vmem:[%s1360_s28 + $0x138] sm:$0xff] }
  0x32   : > { %1070 = vmatpush1.bf16.msra.mxu1 %v1069_v49  ;;  %v249_v49 = vld [vmem:[%s1360_s28 + $0x88] sm:$0xff]  ;;  %v268_v8 = vld [vmem:[%s1360_s28 + $0x120] sm:$0xff]  ;;  %v270_v9 = vld [vmem:[%s1360_s28 + $0x130] sm:$0xff] }
  0x33   : > { %1118 = vmatpush1.bf16.msra.mxu0 %v1117_v50  ;;  %1071 = vmatprep.subr.bf16.mxu1 %v1256_v0  ;;  %v251_v50 = vld [vmem:[%s1360_s28 + $0x98] sm:$0xff]  ;;  %v272_v12 = vld [vmem:[%s1360_s28 + $0x140] sm:$0xff]  ;;  %v274_v13 = vld [vmem:[%s1360_s28 + $0x150] sm:$0xff] }
  0x34   : > { %1119 = vmatprep.subr.bf16.mxu0 %v1256_v0  ;;  %v277_v14 = vld [vmem:[%s1360_s28 + $0x168] sm:$0xff]  ;;  %v279_v15 = vld [vmem:[%s1360_s28 + $0x178] sm:$0xff]  ;;  %v280_v20 = vld [vmem:[%s1360_s28 + $0x180] sm:$0xff] }
  0x35   : > { %v281_v18 = vld [vmem:[%s1360_s28 + $0x188] sm:$0xff]  ;;  %v283_v19 = vld [vmem:[%s1360_s28 + $0x198] sm:$0xff]  ;;  %v282_v21 = vld [vmem:[%s1360_s28 + $0x190] sm:$0xff] }
  0x36   : > { %1073 = vmatpush1.bf16.msra.mxu1 %v1072_v55  ;;  %v252_v55 = vld [vmem:[%s1360_s28 + $0xa0] sm:$0xff]  ;;  %v286_v25 = vld [vmem:[%s1360_s28 + $0x1b0] sm:$0xff]  ;;  %v289_v26 = vld [vmem:[%s1360_s28 + $0x1c8] sm:$0xff] }
  0x37   : > { %1121 = vmatpush1.bf16.msra.mxu0 %v1120_v56  ;;  %1074 = vmatprep.subr.bf16.mxu1 %v1256_v0  ;;  %v254_v56 = vld [vmem:[%s1360_s28 + $0xb0] sm:$0xff]  ;;  %v284_v24 = vld [vmem:[%s1360_s28 + $0x1a0] sm:$0xff]  ;;  %v291_v27 = vld [vmem:[%s1360_s28 + $0x1d8] sm:$0xff] }
  0x38   : > { %1122 = vmatprep.subr.bf16.mxu0 %v1256_v0  ;;  %v293_v30 = vld [vmem:[%s1360_s28 + $0x1e8] sm:$0xff]  ;;  %v295_v31 = vld [vmem:[%s1360_s28 + $0x1f8] sm:$0xff]  ;;  %v292_v32 = vld [vmem:[%s1360_s28 + $0x1e0] sm:$0xff] }
  0x39   : > { %v294_v33 = vld [vmem:[%s1360_s28 + $0x1f0] sm:$0xff] }
  0x3a   : > { %1076 = vmatpush1.bf16.msra.mxu1 %v1075_v61  ;;  %v261_v61 = vld [vmem:[%s1360_s28 + $0xe8] sm:$0xff] }
  0x3b   : > { %1124 = vmatpush1.bf16.msra.mxu0 %v1123_v62  ;;  %1077 = vmatprep.subr.bf16.mxu1 %v1256_v0  ;;  %v263_v62 = vld [vmem:[%s1360_s28 + $0xf8] sm:$0xff] }
  0x3c   : > { %1125 = vmatprep.subr.bf16.mxu0 %v1256_v0 }
  0x3e   : > { %1079 = vmatpush1.bf16.msra.mxu1 %v1078_v4  ;;  %v264_v4 = vld [vmem:[%s1360_s28 + $0x100] sm:$0xff] }
  0x3f   : > { %1127 = vmatpush1.bf16.msra.mxu0 %v1126_v5  ;;  %1080 = vmatprep.subr.bf16.mxu1 %v1256_v0  ;;  %v266_v5 = vld [vmem:[%s1360_s28 + $0x110] sm:$0xff] }
  0x40   : > { %1128 = vmatprep.subr.bf16.mxu0 %v1256_v0 }
  0x42   : > { %1082 = vmatpush1.bf16.msra.mxu1 %v1081_v10  ;;  %v273_v10 = vld [vmem:[%s1360_s28 + $0x148] sm:$0xff] }
  0x43   : > { %1130 = vmatpush1.bf16.msra.mxu0 %v1129_v11  ;;  %1083 = vmatprep.subr.bf16.mxu1 %v1256_v0  ;;  %v275_v11 = vld [vmem:[%s1360_s28 + $0x158] sm:$0xff] }
  0x44   : > { %1131 = vmatprep.subr.bf16.mxu0 %v1256_v0 }
  0x46   : > { %1085 = vmatpush1.bf16.msra.mxu1 %v1084_v16  ;;  %v276_v16 = vld [vmem:[%s1360_s28 + $0x160] sm:$0xff] }
  0x47   : > { %1133 = vmatpush1.bf16.msra.mxu0 %v1132_v17  ;;  %1086 = vmatprep.subr.bf16.mxu1 %v1256_v0  ;;  %v278_v17 = vld [vmem:[%s1360_s28 + $0x170] sm:$0xff] }
  0x48   : > { %1134 = vmatprep.subr.bf16.mxu0 %v1256_v0 }
  0x4a   : > { %1088 = vmatpush1.bf16.msra.mxu1 %v1087_v22  ;;  %v285_v22 = vld [vmem:[%s1360_s28 + $0x1a8] sm:$0xff] }
  0x4b   : > { %1136 = vmatpush1.bf16.msra.mxu0 %v1135_v23  ;;  %1089 = vmatprep.subr.bf16.mxu1 %v1256_v0  ;;  %v287_v23 = vld [vmem:[%s1360_s28 + $0x1b8] sm:$0xff] }
  0x4c   : > { %1137 = vmatprep.subr.bf16.mxu0 %v1256_v0 }
  0x4e   : > { %1091 = vmatpush1.bf16.msra.mxu1 %v1090_v28  ;;  %v288_v28 = vld [vmem:[%s1360_s28 + $0x1c0] sm:$0xff] }
  0x4f   : > { %1139 = vmatpush1.bf16.msra.mxu0 %v1138_v29  ;;  %1092 = vmatprep.subr.bf16.mxu1 %v1256_v0  ;;  %v290_v29 = vld [vmem:[%s1360_s28 + $0x1d0] sm:$0xff] }
  0x50   : > { %1140 = vmatprep.subr.bf16.mxu0 %v1256_v0  ;;  %v243_v0 = vld [vmem:[%s1360_s28 + $0x58] sm:$0xff] }
  0x52   : > { %1094 = vmatpush1.bf16.msra.mxu1 %v1093_v34  ;;  %v297_v34 = vld [vmem:[%s1360_s28 + $0x208] sm:$0xff] }
  0x53   : > { %1142 = vmatpush1.bf16.msra.mxu0 %v1141_v35  ;;  %v299_v35 = vld [vmem:[%s1360_s28 + $0x218] sm:$0xff] }
  0x55   : > { %489 = vmatmul.mubr.f32.vlgmr.msra.gmra.mrb[0].mxu1 %v232_v36  ;;  %v296_v36 = vld [vmem:[%s1360_s28 + $0x200] sm:$0xff] }
  0x56   : > { %714 = vmatmul.mubr.f32.vlgmr.msra.gmra.mrb[0].mxu0 %v234_v37  ;;  %493 = vmatprep.mubr.f32.mxu1 %v237_v38  ;;  %v298_v37 = vld [vmem:[%s1360_s28 + $0x210] sm:$0xff]  ;;  %v301_v38 = vld [vmem:[%s1360_s28 + $0x228] sm:$0xff] }
  0x57   : > { %718 = vmatprep.mubr.f32.mxu0 %v239_v39  ;;  %v303_v39 = vld [vmem:[%s1360_s28 + $0x238] sm:$0xff] }
  0x59   : > { %494 = vmatmul.mubr.f32.gmra.mrb[2].mxu1 %v236_v40  ;;  %v300_v40 = vld [vmem:[%s1360_s28 + $0x220] sm:$0xff] }
  0x5a   : > { %719 = vmatmul.mubr.f32.gmra.mrb[2].mxu0 %v238_v41  ;;  %498 = vmatprep.mubr.f32.mxu1 %v241_v42  ;;  %v302_v41 = vld [vmem:[%s1360_s28 + $0x230] sm:$0xff]  ;;  %v305_v42 = vld [vmem:[%s1360_s28 + $0x248] sm:$0xff] }
  0x5b   : > { %723 = vmatprep.mubr.f32.mxu0 %v243_v0  ;;  %v307_v0 = vld [vmem:[%s1360_s28 + $0x258] sm:$0xff] }
  0x5d   : > { %499 = vmatmul.mubr.f32.gmra.mrb[4].mxu1 %v240_v43  ;;  %v304_v43 = vld [vmem:[%s1360_s28 + $0x240] sm:$0xff] }
  0x5e   : > { %724 = vmatmul.mubr.f32.gmra.mrb[4].mxu0 %v242_v44  ;;  %503 = vmatprep.mubr.f32.mxu1 %v245_v45  ;;  %v306_v44 = vld [vmem:[%s1360_s28 + $0x250] sm:$0xff]  ;;  %v309_v45 = vld [vmem:[%s1360_s28 + $0x268] sm:$0xff] }
  0x5f   : > { %728 = vmatprep.mubr.f32.mxu0 %v247_v46  ;;  %v311_v46 = vld [vmem:[%s1360_s28 + $0x278] sm:$0xff] }
  0x61   : > { %504 = vmatmul.mubr.f32.gmra.mrb[6].mxu1 %v244_v47  ;;  %v308_v47 = vld [vmem:[%s1360_s28 + $0x260] sm:$0xff] }
  0x62   : > { %729 = vmatmul.mubr.f32.gmra.mrb[6].mxu0 %v246_v48  ;;  %508 = vmatprep.mubr.f32.mxu1 %v249_v49  ;;  %v310_v48 = vld [vmem:[%s1360_s28 + $0x270] sm:$0xff]  ;;  %v313_v49 = vld [vmem:[%s1360_s28 + $0x288] sm:$0xff] }
  0x63   : > { %733 = vmatprep.mubr.f32.mxu0 %v251_v50  ;;  %v315_v50 = vld [vmem:[%s1360_s28 + $0x298] sm:$0xff] }
  0x65   : > { %509 = vmatmul.mubr.f32.gmra.mrb[8].mxu1 %v248_v51  ;;  %v312_v51 = vld [vmem:[%s1360_s28 + $0x280] sm:$0xff] }
  0x66   : > { %734 = vmatmul.mubr.f32.gmra.mrb[8].mxu0 %v250_v52  ;;  %513 = vmatprep.mubr.f32.mxu1 %v253_v53  ;;  %v314_v52 = vld [vmem:[%s1360_s28 + $0x290] sm:$0xff]  ;;  %v317_v53 = vld [vmem:[%s1360_s28 + $0x2a8] sm:$0xff] }
  0x67   : > { %738 = vmatprep.mubr.f32.mxu0 %v255_v54  ;;  %v319_v54 = vld [vmem:[%s1360_s28 + $0x2b8] sm:$0xff] }
  0x69   : > { %514 = vmatmul.mubr.f32.gmra.mrb[10].mxu1 %v252_v55  ;;  %v316_v55 = vld [vmem:[%s1360_s28 + $0x2a0] sm:$0xff] }
  0x6a   : > { %739 = vmatmul.mubr.f32.gmra.mrb[10].mxu0 %v254_v56  ;;  %518 = vmatprep.mubr.f32.mxu1 %v257_v57  ;;  %v318_v56 = vld [vmem:[%s1360_s28 + $0x2b0] sm:$0xff]  ;;  %v321_v57 = vld [vmem:[%s1360_s28 + $0x2c8] sm:$0xff] }
  0x6b   : > { %743 = vmatprep.mubr.f32.mxu0 %v259_v58  ;;  %v323_v58 = vld [vmem:[%s1360_s28 + $0x2d8] sm:$0xff] }
  0x6d   : > { %519 = vmatmul.mubr.f32.gmra.mrb[12].mxu1 %v256_v59  ;;  %v320_v59 = vld [vmem:[%s1360_s28 + $0x2c0] sm:$0xff] }
  0x6e   : > { %744 = vmatmul.mubr.f32.gmra.mrb[12].mxu0 %v258_v60  ;;  %523 = vmatprep.mubr.f32.mxu1 %v261_v61  ;;  %v322_v60 = vld [vmem:[%s1360_s28 + $0x2d0] sm:$0xff]  ;;  %v325_v61 = vld [vmem:[%s1360_s28 + $0x2e8] sm:$0xff] }
  0x6f   : > { %748 = vmatprep.mubr.f32.mxu0 %v263_v62  ;;  %v327_v62 = vld [vmem:[%s1360_s28 + $0x2f8] sm:$0xff] }
  0x71   : > { %524 = vmatmul.mubr.f32.gmra.mrb[14].mxu1 %v260_v63  ;;  %v324_v63 = vld [vmem:[%s1360_s28 + $0x2e0] sm:$0xff] }
  0x72   : > { %749 = vmatmul.mubr.f32.gmra.mrb[14].mxu0 %v262_v1  ;;  %528 = vmatprep.mubr.f32.mxu1 %v265_v2  ;;  %v326_v1 = vld [vmem:[%s1360_s28 + $0x2f0] sm:$0xff]  ;;  %v329_v2 = vld [vmem:[%s1360_s28 + $0x308] sm:$0xff] }
  0x73   : > { %753 = vmatprep.mubr.f32.mxu0 %v267_v3  ;;  %v331_v3 = vld [vmem:[%s1360_s28 + $0x318] sm:$0xff] }
  0x75   : > { %529 = vmatmul.mubr.f32.gmra.mrb[16].mxu1 %v264_v4  ;;  %v328_v4 = vld [vmem:[%s1360_s28 + $0x300] sm:$0xff] }
  0x76   : > { %754 = vmatmul.mubr.f32.gmra.mrb[16].mxu0 %v266_v5  ;;  %533 = vmatprep.mubr.f32.mxu1 %v269_v6  ;;  %v330_v5 = vld [vmem:[%s1360_s28 + $0x310] sm:$0xff]  ;;  %v333_v6 = vld [vmem:[%s1360_s28 + $0x328] sm:$0xff] }
  0x77   : > { %758 = vmatprep.mubr.f32.mxu0 %v271_v7  ;;  %v335_v7 = vld [vmem:[%s1360_s28 + $0x338] sm:$0xff] }
  0x79   : > { %534 = vmatmul.mubr.f32.gmra.mrb[18].mxu1 %v268_v8  ;;  %v332_v8 = vld [vmem:[%s1360_s28 + $0x320] sm:$0xff] }
  0x7a   : > { %759 = vmatmul.mubr.f32.gmra.mrb[18].mxu0 %v270_v9  ;;  %538 = vmatprep.mubr.f32.mxu1 %v273_v10  ;;  %v334_v9 = vld [vmem:[%s1360_s28 + $0x330] sm:$0xff]  ;;  %v337_v10 = vld [vmem:[%s1360_s28 + $0x348] sm:$0xff] }
  0x7b   : > { %763 = vmatprep.mubr.f32.mxu0 %v275_v11  ;;  %v339_v11 = vld [vmem:[%s1360_s28 + $0x358] sm:$0xff] }
  0x7d   : > { %539 = vmatmul.mubr.f32.gmra.mrb[20].mxu1 %v272_v12  ;;  %v336_v12 = vld [vmem:[%s1360_s28 + $0x340] sm:$0xff] }
  0x7e   : > { %764 = vmatmul.mubr.f32.gmra.mrb[20].mxu0 %v274_v13  ;;  %543 = vmatprep.mubr.f32.mxu1 %v277_v14  ;;  %v338_v13 = vld [vmem:[%s1360_s28 + $0x350] sm:$0xff]  ;;  %v341_v14 = vld [vmem:[%s1360_s28 + $0x368] sm:$0xff] }
  0x7f   : > { %768 = vmatprep.mubr.f32.mxu0 %v279_v15  ;;  %v343_v15 = vld [vmem:[%s1360_s28 + $0x378] sm:$0xff] }
  0x81   : > { %544 = vmatmul.mubr.f32.gmra.mrb[22].mxu1 %v276_v16  ;;  %v340_v16 = vld [vmem:[%s1360_s28 + $0x360] sm:$0xff] }
  0x82   : > { %769 = vmatmul.mubr.f32.gmra.mrb[22].mxu0 %v278_v17  ;;  %548 = vmatprep.mubr.f32.mxu1 %v281_v18  ;;  %v342_v17 = vld [vmem:[%s1360_s28 + $0x370] sm:$0xff]  ;;  %v345_v18 = vld [vmem:[%s1360_s28 + $0x388] sm:$0xff] }
  0x83   : > { %773 = vmatprep.mubr.f32.mxu0 %v283_v19  ;;  %v347_v19 = vld [vmem:[%s1360_s28 + $0x398] sm:$0xff] }
  0x85   : > { %549 = vmatmul.mubr.f32.gmra.mrb[24].mxu1 %v280_v20  ;;  %v344_v20 = vld [vmem:[%s1360_s28 + $0x380] sm:$0xff] }
  0x86   : > { %774 = vmatmul.mubr.f32.gmra.mrb[24].mxu0 %v282_v21  ;;  %553 = vmatprep.mubr.f32.mxu1 %v285_v22  ;;  %v346_v21 = vld [vmem:[%s1360_s28 + $0x390] sm:$0xff]  ;;  %v349_v22 = vld [vmem:[%s1360_s28 + $0x3a8] sm:$0xff] }
  0x87   : > { %778 = vmatprep.mubr.f32.mxu0 %v287_v23  ;;  %v351_v23 = vld [vmem:[%s1360_s28 + $0x3b8] sm:$0xff] }
  0x89   : > { %554 = vmatmul.mubr.f32.gmra.mrb[26].mxu1 %v284_v24  ;;  %v348_v24 = vld [vmem:[%s1360_s28 + $0x3a0] sm:$0xff] }
  0x8a   : > { %779 = vmatmul.mubr.f32.gmra.mrb[26].mxu0 %v286_v25  ;;  %558 = vmatprep.mubr.f32.mxu1 %v289_v26  ;;  %v350_v25 = vld [vmem:[%s1360_s28 + $0x3b0] sm:$0xff]  ;;  %v353_v26 = vld [vmem:[%s1360_s28 + $0x3c8] sm:$0xff] }
  0x8b   : > { %783 = vmatprep.mubr.f32.mxu0 %v291_v27  ;;  %v355_v27 = vld [vmem:[%s1360_s28 + $0x3d8] sm:$0xff] }
  0x8d   : > { %559 = vmatmul.mubr.f32.gmra.mrb[28].mxu1 %v288_v28  ;;  %v352_v28 = vld [vmem:[%s1360_s28 + $0x3c0] sm:$0xff] }
  0x8e   : > { %784 = vmatmul.mubr.f32.gmra.mrb[28].mxu0 %v290_v29  ;;  %563 = vmatprep.mubr.f32.mxu1 %v293_v30  ;;  %v354_v29 = vld [vmem:[%s1360_s28 + $0x3d0] sm:$0xff]  ;;  %v357_v30 = vld [vmem:[%s1360_s28 + $0x3e8] sm:$0xff] }
  0x8f   : > { %788 = vmatprep.mubr.f32.mxu0 %v295_v31  ;;  %v359_v31 = vld [vmem:[%s1360_s28 + $0x3f8] sm:$0xff] }
  0x91   : > { %564 = vmatmul.mubr.f32.gmra.mrb[30].mxu1 %v292_v32  ;;  %v356_v32 = vld [vmem:[%s1360_s28 + $0x3e0] sm:$0xff] }
  0x92   : > { %789 = vmatmul.mubr.f32.gmra.mrb[30].mxu0 %v294_v33  ;;  %568 = vmatprep.mubr.f32.mxu1 %v297_v34  ;;  %v358_v33 = vld [vmem:[%s1360_s28 + $0x3f0] sm:$0xff] }
  0x93   : > { %793 = vmatprep.mubr.f32.mxu0 %v299_v35 }
  0x95   : > { %569 = vmatmul.mubr.f32.gmra.mrb[32].mxu1 %v296_v36 }
  0x96   : > { %794 = vmatmul.mubr.f32.gmra.mrb[32].mxu0 %v298_v37  ;;  %573 = vmatprep.mubr.f32.mxu1 %v301_v38 }
  0x97   : > { %798 = vmatprep.mubr.f32.mxu0 %v303_v39 }
  0x99   : > { %574 = vmatmul.mubr.f32.gmra.mrb[34].mxu1 %v300_v40 }
  0x9a   : > { %799 = vmatmul.mubr.f32.gmra.mrb[34].mxu0 %v302_v41  ;;  %578 = vmatprep.mubr.f32.mxu1 %v305_v42 }
  0x9b   : > { %803 = vmatprep.mubr.f32.mxu0 %v307_v0 }
  0x9d   : > { %579 = vmatmul.mubr.f32.gmra.mrb[36].mxu1 %v304_v43 }
  0x9e   : > { %804 = vmatmul.mubr.f32.gmra.mrb[36].mxu0 %v306_v44  ;;  %583 = vmatprep.mubr.f32.mxu1 %v309_v45 }
  0x9f   : > { %808 = vmatprep.mubr.f32.mxu0 %v311_v46 }
  0xa1   : > { %584 = vmatmul.mubr.f32.gmra.mrb[38].mxu1 %v308_v47 }
  0xa2   : > { %809 = vmatmul.mubr.f32.gmra.mrb[38].mxu0 %v310_v48  ;;  %588 = vmatprep.mubr.f32.mxu1 %v313_v49 }
  0xa3   : > { %813 = vmatprep.mubr.f32.mxu0 %v315_v50 }
  0xa5   : > { %589 = vmatmul.mubr.f32.gmra.mrb[40].mxu1 %v312_v51 }
  0xa6   : > { %814 = vmatmul.mubr.f32.gmra.mrb[40].mxu0 %v314_v52  ;;  %593 = vmatprep.mubr.f32.mxu1 %v317_v53 }
  0xa7   : > { %818 = vmatprep.mubr.f32.mxu0 %v319_v54 }
  0xa9   : > { %594 = vmatmul.mubr.f32.gmra.mrb[42].mxu1 %v316_v55 }
  0xaa   : > { %819 = vmatmul.mubr.f32.gmra.mrb[42].mxu0 %v318_v56  ;;  %598 = vmatprep.mubr.f32.mxu1 %v321_v57 }
  0xab   : > { %823 = vmatprep.mubr.f32.mxu0 %v323_v58 }
  0xad   : > { %599 = vmatmul.mubr.f32.gmra.mrb[44].mxu1 %v320_v59 }
  0xae   : > { %824 = vmatmul.mubr.f32.gmra.mrb[44].mxu0 %v322_v60  ;;  %603 = vmatprep.mubr.f32.mxu1 %v325_v61 }
  0xaf   : > { %828 = vmatprep.mubr.f32.mxu0 %v327_v62 }
  0xb1   : > { %604 = vmatmul.mubr.f32.gmra.mrb[46].mxu1 %v324_v63 }
  0xb2   : > { %829 = vmatmul.mubr.f32.gmra.mrb[46].mxu0 %v326_v1  ;;  %608 = vmatprep.mubr.f32.mxu1 %v329_v2 }
  0xb3   : > { %833 = vmatprep.mubr.f32.mxu0 %v331_v3 }
  0xb5   : > { %609 = vmatmul.mubr.f32.gmra.mrb[48].mxu1 %v328_v4 }
  0xb6   : > { %834 = vmatmul.mubr.f32.gmra.mrb[48].mxu0 %v330_v5  ;;  %613 = vmatprep.mubr.f32.mxu1 %v333_v6 }
  0xb7   : > { %838 = vmatprep.mubr.f32.mxu0 %v335_v7 }
  0xb9   : > { %614 = vmatmul.mubr.f32.gmra.mrb[50].mxu1 %v332_v8 }
  0xba   : > { %839 = vmatmul.mubr.f32.gmra.mrb[50].mxu0 %v334_v9  ;;  %618 = vmatprep.mubr.f32.mxu1 %v337_v10 }
  0xbb   : > { %843 = vmatprep.mubr.f32.mxu0 %v339_v11 }
  0xbd   : > { %619 = vmatmul.mubr.f32.gmra.mrb[52].mxu1 %v336_v12 }
  0xbe   : > { %844 = vmatmul.mubr.f32.gmra.mrb[52].mxu0 %v338_v13  ;;  %623 = vmatprep.mubr.f32.mxu1 %v341_v14 }
  0xbf   : > { %848 = vmatprep.mubr.f32.mxu0 %v343_v15 }
  0xc1   : > { %624 = vmatmul.mubr.f32.gmra.mrb[54].mxu1 %v340_v16 }
  0xc2   : > { %849 = vmatmul.mubr.f32.gmra.mrb[54].mxu0 %v342_v17  ;;  %628 = vmatprep.mubr.f32.mxu1 %v345_v18 }
  0xc3   : > { %853 = vmatprep.mubr.f32.mxu0 %v347_v19 }
  0xc5   : > { %629 = vmatmul.mubr.f32.gmra.mrb[56].mxu1 %v344_v20 }
  0xc6   : > { %854 = vmatmul.mubr.f32.gmra.mrb[56].mxu0 %v346_v21  ;;  %633 = vmatprep.mubr.f32.mxu1 %v349_v22 }
  0xc7   : > { %858 = vmatprep.mubr.f32.mxu0 %v351_v23 }
  0xc9   : > { %634 = vmatmul.mubr.f32.gmra.mrb[58].mxu1 %v348_v24 }
  0xca   : > { %859 = vmatmul.mubr.f32.gmra.mrb[58].mxu0 %v350_v25  ;;  %638 = vmatprep.mubr.f32.mxu1 %v353_v26 }
  0xcb   : > { %863 = vmatprep.mubr.f32.mxu0 %v355_v27 }
  0xcd   : > { %639 = vmatmul.mubr.f32.gmra.mrb[60].mxu1 %v352_v28 }
  0xce   : > { %864 = vmatmul.mubr.f32.gmra.mrb[60].mxu0 %v354_v29  ;;  %643 = vmatprep.mubr.f32.mxu1 %v357_v30 }
  0xcf   : > { %868 = vmatprep.mubr.f32.mxu0 %v359_v31 }
  0xd1   : > { %644 = vmatmul.mubr.f32.gmra.mrb[62].mxu1 %v356_v32 }
  0xd2   : > { %869 = vmatmul.mubr.f32.gmra.mrb[62].mxu0 %v358_v33 }
 0x128   : > { %v490_v34 = vpop.f32.mrb[0].mxu1 }
 0x129   : > { %v715_v35 = vpop.f32.mrb[0].mxu0  ;;  %v492_v36 = vpop.f32.mrb[1].mxu1 }
 0x12a   : > { %v716_v37 = vadd.f32 %v715_v35, %v490_v34  ;;  %v717_v38 = vpop.f32.mrb[1].mxu0 }
 0x12c   : > { %874 = vst [vmem:[%s1557_s6] sm:$0xff] %v716_v37  ;;  %v495_v39 = vpop.f32.mrb[2].mxu1 }
 0x12d   : > { %v720_v40 = vpop.f32.mrb[2].mxu0  ;;  %v497_v41 = vpop.f32.mrb[3].mxu1 }
 0x12e   : > { %v721_v42 = vadd.f32 %v720_v40, %v495_v39  ;;  %v722_v0 = vpop.f32.mrb[3].mxu0 }
 0x130   : > { %875 = vst [vmem:[%s1557_s6 + $0x8] sm:$0xff] %v721_v42  ;;  %v500_v43 = vpop.f32.mrb[4].mxu1 }
 0x131   : > { %v725_v44 = vpop.f32.mrb[4].mxu0  ;;  %v502_v45 = vpop.f32.mrb[5].mxu1 }
 0x132   : > { %v726_v46 = vadd.f32 %v725_v44, %v500_v43  ;;  %v727_v47 = vpop.f32.mrb[5].mxu0 }
 0x134   : > { %876 = vst [vmem:[%s1557_s6 + $0x10] sm:$0xff] %v726_v46  ;;  %v505_v48 = vpop.f32.mrb[6].mxu1 }
 0x135   : > { %v730_v49 = vpop.f32.mrb[6].mxu0  ;;  %v507_v50 = vpop.f32.mrb[7].mxu1 }
 0x136   : > { %v731_v51 = vadd.f32 %v730_v49, %v505_v48  ;;  %v732_v52 = vpop.f32.mrb[7].mxu0 }
 0x138   : > { %877 = vst [vmem:[%s1557_s6 + $0x18] sm:$0xff] %v731_v51  ;;  %v510_v53 = vpop.f32.mrb[8].mxu1 }
 0x139   : > { %v735_v54 = vpop.f32.mrb[8].mxu0  ;;  %v512_v55 = vpop.f32.mrb[9].mxu1 }
 0x13a   : > { %v736_v56 = vadd.f32 %v735_v54, %v510_v53  ;;  %v737_v57 = vpop.f32.mrb[9].mxu0 }
 0x13c   : > { %878 = vst [vmem:[%s1557_s6 + $0x20] sm:$0xff] %v736_v56  ;;  %v515_v58 = vpop.f32.mrb[10].mxu1 }
 0x13d   : > { %v740_v59 = vpop.f32.mrb[10].mxu0  ;;  %v517_v60 = vpop.f32.mrb[11].mxu1 }
 0x13e   : > { %v741_v61 = vadd.f32 %v740_v59, %v515_v58  ;;  %v742_v62 = vpop.f32.mrb[11].mxu0 }
 0x140   : > { %879 = vst [vmem:[%s1557_s6 + $0x28] sm:$0xff] %v741_v61  ;;  %v520_v63 = vpop.f32.mrb[12].mxu1 }
 0x141   : > { %v745_v1 = vpop.f32.mrb[12].mxu0  ;;  %v522_v2 = vpop.f32.mrb[13].mxu1 }
 0x142   : > { %v746_v3 = vadd.f32 %v745_v1, %v520_v63  ;;  %v747_v4 = vpop.f32.mrb[13].mxu0 }
 0x144   : > { %880 = vst [vmem:[%s1557_s6 + $0x30] sm:$0xff] %v746_v3  ;;  %v525_v5 = vpop.f32.mrb[14].mxu1 }
 0x145   : > { %v750_v6 = vpop.f32.mrb[14].mxu0  ;;  %v527_v7 = vpop.f32.mrb[15].mxu1 }
 0x146   : > { %v751_v8 = vadd.f32 %v750_v6, %v525_v5  ;;  %v752_v9 = vpop.f32.mrb[15].mxu0 }
 0x148   : > { %881 = vst [vmem:[%s1557_s6 + $0x38] sm:$0xff] %v751_v8  ;;  %v530_v10 = vpop.f32.mrb[16].mxu1 }
 0x149   : > { %v755_v11 = vpop.f32.mrb[16].mxu0  ;;  %v532_v12 = vpop.f32.mrb[17].mxu1 }
 0x14a   : > { %v756_v13 = vadd.f32 %v755_v11, %v530_v10  ;;  %v757_v14 = vpop.f32.mrb[17].mxu0 }
 0x14c   : > { %882 = vst [vmem:[%s1557_s6 + $0x40] sm:$0xff] %v756_v13  ;;  %v535_v15 = vpop.f32.mrb[18].mxu1 }
 0x14d   : > { %v760_v16 = vpop.f32.mrb[18].mxu0  ;;  %v537_v17 = vpop.f32.mrb[19].mxu1 }
 0x14e   : > { %v761_v18 = vadd.f32 %v760_v16, %v535_v15  ;;  %v762_v19 = vpop.f32.mrb[19].mxu0 }
 0x150   : > { %883 = vst [vmem:[%s1557_s6 + $0x48] sm:$0xff] %v761_v18  ;;  %v540_v20 = vpop.f32.mrb[20].mxu1 }
 0x151   : > { %v765_v21 = vpop.f32.mrb[20].mxu0  ;;  %v542_v22 = vpop.f32.mrb[21].mxu1 }
 0x152   : > { %v766_v23 = vadd.f32 %v765_v21, %v540_v20  ;;  %v767_v24 = vpop.f32.mrb[21].mxu0 }
 0x154   : > { %884 = vst [vmem:[%s1557_s6 + $0x50] sm:$0xff] %v766_v23  ;;  %v545_v25 = vpop.f32.mrb[22].mxu1 }
 0x155   : > { %v770_v26 = vpop.f32.mrb[22].mxu0  ;;  %v547_v27 = vpop.f32.mrb[23].mxu1 }
 0x156   : > { %v771_v28 = vadd.f32 %v770_v26, %v545_v25  ;;  %v772_v29 = vpop.f32.mrb[23].mxu0 }
 0x158   : > { %885 = vst [vmem:[%s1557_s6 + $0x58] sm:$0xff] %v771_v28  ;;  %v550_v30 = vpop.f32.mrb[24].mxu1 }
 0x159   : > { %v775_v31 = vpop.f32.mrb[24].mxu0  ;;  %v552_v32 = vpop.f32.mrb[25].mxu1 }
 0x15a   : > { %v776_v33 = vadd.f32 %v775_v31, %v550_v30  ;;  %v777_v34 = vpop.f32.mrb[25].mxu0 }
 0x15c   : > { %886 = vst [vmem:[%s1557_s6 + $0x60] sm:$0xff] %v776_v33  ;;  %v555_v35 = vpop.f32.mrb[26].mxu1 }
 0x15d   : > { %v780_v36 = vpop.f32.mrb[26].mxu0  ;;  %v557_v37 = vpop.f32.mrb[27].mxu1 }
 0x15e   : > { %v781_v38 = vadd.f32 %v780_v36, %v555_v35  ;;  %v782_v39 = vpop.f32.mrb[27].mxu0 }
 0x160   : > { %887 = vst [vmem:[%s1557_s6 + $0x68] sm:$0xff] %v781_v38  ;;  %v560_v40 = vpop.f32.mrb[28].mxu1 }
 0x161   : > { %v785_v41 = vpop.f32.mrb[28].mxu0  ;;  %v562_v42 = vpop.f32.mrb[29].mxu1 }
 0x162   : > { %v786_v0 = vadd.f32 %v785_v41, %v560_v40  ;;  %v787_v43 = vpop.f32.mrb[29].mxu0 }
 0x164   : > { %888 = vst [vmem:[%s1557_s6 + $0x70] sm:$0xff] %v786_v0  ;;  %v565_v44 = vpop.f32.mrb[30].mxu1 }
 0x165   : > { %v790_v45 = vpop.f32.mrb[30].mxu0  ;;  %v567_v46 = vpop.f32.mrb[31].mxu1 }
 0x166   : > { %v791_v47 = vadd.f32 %v790_v45, %v565_v44  ;;  %v792_v48 = vpop.f32.mrb[31].mxu0 }
 0x168   : > { %889 = vst [vmem:[%s1557_s6 + $0x78] sm:$0xff] %v791_v47  ;;  %v570_v49 = vpop.f32.mrb[32].mxu1 }
 0x169   : > { %v795_v50 = vpop.f32.mrb[32].mxu0  ;;  %v572_v51 = vpop.f32.mrb[33].mxu1 }
 0x16a   : > { %v796_v52 = vadd.f32 %v795_v50, %v570_v49  ;;  %v797_v53 = vpop.f32.mrb[33].mxu0 }
 0x16c   : > { %890 = vst [vmem:[%s1557_s6 + $0x80] sm:$0xff] %v796_v52  ;;  %v575_v54 = vpop.f32.mrb[34].mxu1 }
 0x16d   : > { %v800_v55 = vpop.f32.mrb[34].mxu0  ;;  %v577_v56 = vpop.f32.mrb[35].mxu1 }
 0x16e   : > { %v801_v57 = vadd.f32 %v800_v55, %v575_v54  ;;  %v802_v58 = vpop.f32.mrb[35].mxu0 }
 0x170   : > { %891 = vst [vmem:[%s1557_s6 + $0x88] sm:$0xff] %v801_v57  ;;  %v580_v59 = vpop.f32.mrb[36].mxu1 }
 0x171   : > { %v805_v60 = vpop.f32.mrb[36].mxu0  ;;  %v582_v61 = vpop.f32.mrb[37].mxu1 }
 0x172   : > { %v806_v62 = vadd.f32 %v805_v60, %v580_v59  ;;  %v807_v63 = vpop.f32.mrb[37].mxu0 }
 0x174   : > { %892 = vst [vmem:[%s1557_s6 + $0x90] sm:$0xff] %v806_v62  ;;  %v585_v1 = vpop.f32.mrb[38].mxu1 }
 0x175   : > { %v810_v2 = vpop.f32.mrb[38].mxu0  ;;  %v587_v3 = vpop.f32.mrb[39].mxu1 }
 0x176   : > { %v811_v4 = vadd.f32 %v810_v2, %v585_v1  ;;  %v812_v5 = vpop.f32.mrb[39].mxu0 }
 0x178   : > { %893 = vst [vmem:[%s1557_s6 + $0x98] sm:$0xff] %v811_v4  ;;  %v590_v6 = vpop.f32.mrb[40].mxu1 }
 0x179   : > { %v815_v7 = vpop.f32.mrb[40].mxu0  ;;  %v592_v8 = vpop.f32.mrb[41].mxu1 }
 0x17a   : > { %v816_v9 = vadd.f32 %v815_v7, %v590_v6  ;;  %v817_v10 = vpop.f32.mrb[41].mxu0 }
 0x17c   : > { %894 = vst [vmem:[%s1557_s6 + $0xa0] sm:$0xff] %v816_v9  ;;  %v595_v11 = vpop.f32.mrb[42].mxu1 }
 0x17d   : > { %v820_v12 = vpop.f32.mrb[42].mxu0  ;;  %v597_v13 = vpop.f32.mrb[43].mxu1 }
 0x17e   : > { %v821_v14 = vadd.f32 %v820_v12, %v595_v11  ;;  %v822_v15 = vpop.f32.mrb[43].mxu0 }
 0x180   : > { %895 = vst [vmem:[%s1557_s6 + $0xa8] sm:$0xff] %v821_v14  ;;  %v600_v16 = vpop.f32.mrb[44].mxu1 }
 0x181   : > { %v825_v17 = vpop.f32.mrb[44].mxu0  ;;  %v602_v18 = vpop.f32.mrb[45].mxu1 }
 0x182   : > { %v826_v19 = vadd.f32 %v825_v17, %v600_v16  ;;  %v827_v20 = vpop.f32.mrb[45].mxu0 }
 0x184   : > { %896 = vst [vmem:[%s1557_s6 + $0xb0] sm:$0xff] %v826_v19  ;;  %v605_v21 = vpop.f32.mrb[46].mxu1 }
 0x185   : > { %v830_v22 = vpop.f32.mrb[46].mxu0  ;;  %v607_v23 = vpop.f32.mrb[47].mxu1 }
 0x186   : > { %v831_v24 = vadd.f32 %v830_v22, %v605_v21  ;;  %v832_v25 = vpop.f32.mrb[47].mxu0 }
 0x188   : > { %897 = vst [vmem:[%s1557_s6 + $0xb8] sm:$0xff] %v831_v24  ;;  %v610_v26 = vpop.f32.mrb[48].mxu1 }
 0x189   : > { %v835_v27 = vpop.f32.mrb[48].mxu0  ;;  %v612_v28 = vpop.f32.mrb[49].mxu1 }
 0x18a   : > { %v836_v29 = vadd.f32 %v835_v27, %v610_v26  ;;  %v837_v30 = vpop.f32.mrb[49].mxu0 }
 0x18c   : > { %898 = vst [vmem:[%s1557_s6 + $0xc0] sm:$0xff] %v836_v29  ;;  %v615_v31 = vpop.f32.mrb[50].mxu1 }
 0x18d   : > { %v840_v32 = vpop.f32.mrb[50].mxu0  ;;  %v617_v33 = vpop.f32.mrb[51].mxu1 }
 0x18e   : > { %v841_v34 = vadd.f32 %v840_v32, %v615_v31  ;;  %v842_v35 = vpop.f32.mrb[51].mxu0 }
 0x190   : > { %899 = vst [vmem:[%s1557_s6 + $0xc8] sm:$0xff] %v841_v34  ;;  %v620_v36 = vpop.f32.mrb[52].mxu1 }
 0x191   : > { %v845_v37 = vpop.f32.mrb[52].mxu0  ;;  %v622_v38 = vpop.f32.mrb[53].mxu1 }
 0x192   : > { %v846_v39 = vadd.f32 %v845_v37, %v620_v36  ;;  %v847_v40 = vpop.f32.mrb[53].mxu0 }
 0x194   : > { %900 = vst [vmem:[%s1557_s6 + $0xd0] sm:$0xff] %v846_v39  ;;  %v625_v41 = vpop.f32.mrb[54].mxu1 }
 0x195   : > { %v850_v42 = vpop.f32.mrb[54].mxu0  ;;  %v627_v0 = vpop.f32.mrb[55].mxu1 }
 0x196   : > { %v851_v43 = vadd.f32 %v850_v42, %v625_v41  ;;  %v852_v44 = vpop.f32.mrb[55].mxu0 }
 0x198   : > { %901 = vst [vmem:[%s1557_s6 + $0xd8] sm:$0xff] %v851_v43  ;;  %v630_v45 = vpop.f32.mrb[56].mxu1 }
 0x199   : > { %v855_v46 = vpop.f32.mrb[56].mxu0  ;;  %v632_v47 = vpop.f32.mrb[57].mxu1 }
 0x19a   : > { %v856_v48 = vadd.f32 %v855_v46, %v630_v45  ;;  %v857_v49 = vpop.f32.mrb[57].mxu0 }
 0x19c   : > { %902 = vst [vmem:[%s1557_s6 + $0xe0] sm:$0xff] %v856_v48  ;;  %v635_v50 = vpop.f32.mrb[58].mxu1 }
 0x19d   : > { %v860_v51 = vpop.f32.mrb[58].mxu0  ;;  %v637_v52 = vpop.f32.mrb[59].mxu1 }
 0x19e   : > { %v861_v53 = vadd.f32 %v860_v51, %v635_v50  ;;  %v862_v54 = vpop.f32.mrb[59].mxu0 }
 0x1a0   : > { %903 = vst [vmem:[%s1557_s6 + $0xe8] sm:$0xff] %v861_v53  ;;  %v640_v55 = vpop.f32.mrb[60].mxu1 }
 0x1a1   : > { %v865_v56 = vpop.f32.mrb[60].mxu0  ;;  %v642_v57 = vpop.f32.mrb[61].mxu1 }
 0x1a2   : > { %v866_v58 = vadd.f32 %v865_v56, %v640_v55  ;;  %v867_v59 = vpop.f32.mrb[61].mxu0 }
 0x1a4   : > { %904 = vst [vmem:[%s1557_s6 + $0xf0] sm:$0xff] %v866_v58  ;;  %v645_v60 = vpop.f32.mrb[62].mxu1 }
 0x1a5   : > { %v870_v61 = vpop.f32.mrb[62].mxu0  ;;  %v647_v62 = vpop.f32.mrb[63].mxu1 }
 0x1a6   : > { %v871_v63 = vadd.f32 %v870_v61, %v645_v60  ;;  %v872_v1 = vpop.f32.mrb[63].mxu0 }
 0x1a8   : > { %905 = vst [vmem:[%s1557_s6 + $0xf8] sm:$0xff] %v871_v63 }
 0x1a9 PF: > { %s12_s13 = sadd.s32 1, %s1254_s13   ;;  %s1610_s9 = smov %s1246_s11 }
 0x1aa   : > { %p9_p7 = scmp.ge.s32.totalorder %s12_s13, 10   ;;  %s1611_s10 = smov %s1250_s12 }
 0x1ab   : > { %s1612_s11 = smov %s1615_s14  ;;  %s1613_s12 = smov %s1619_s15 }
 0x1ac   :  { %11 = sbr.rel (!%p9_p7) target bundleno = 3 (0x3), region = 61 }

// kernel: generator_forward.23
= control target key start
LH: loop header
LB: loop body
LE: loop exit
PB: predicated region body
PF: predicated region fallthrough
CT: control target
= control target key end

     0   :  { %s606_s9 = smov 0   ;;  %s608_s10 = smov 0   ;;  %s720_s0 = inlined_call_operand.vmem [shape: f32[2048,128], index: 0, kind: input, shape index: {}]   ;;  %s721_s1 = inlined_call_operand.vmem [shape: f32[1,128], index: 1, kind: output, shape index: {0}]   ;;  %s722_s2 = inlined_call_operand.vmem [shape: f32[1,128], index: 2, kind: output, shape index: {1}]  }
   0x1   :  { %s610_s11 = smov 0  }
   0x2 LB: > { %s22_s12 = sadd.s32 1, %s584_s10  ;;  %p533_p0 = scmp.ge.s32.totalorder %s588_s11, 1  ;;  %s588_s11 = sphi %s610_s11, %s13_s11   ;;  %s584_s10 = sphi %s608_s10, %s724_s10   ;;  %s580_s9 = sphi %s606_s9, %s723_s9  }
   0x3   : > { %p23_p1 = scmp.ge.s32.totalorder %s22_s12, 4  ;;  %p133_p2 = scmp.lt.s32.totalorder %s588_s11, 5 }
   0x5   : > { %s726_s12 = smov (%p23_p1, %s22_s12), 0  ;;  %p134_p3 = pnand %p533_p0, %p133_p2 }
   0x6   : > { %s534_s13 = sshll.u32 (!%p134_p3), %s580_s9, 6  ;;  %p536_p5 = scmp.ne.s32.totalorder (!%p134_p3), %s580_s9, 0 }
   0x7   : > { %137 = sbr.rel (%p134_p3) target bundleno = 165 (0xa5), region = 24  ;;  %p160_p4 = scmp.lt.s32.totalorder (!%p134_p3), %s534_s13, 255 }
   0xe   : > { %s728_s13 = smov (!%p160_p4, %s534_s13), 255  ;;  %177 = sbr.rel (%p536_p5) target bundleno = 21 (0x15), region = 28 }
   0xf   : > { %s535_s14 = sshll.u32 %s728_s13, 3  ;;  %v590_v0 = vmov (!%p536_p5), 0.0  }
  0x10   : > { %s627_s17 = scalar_lea.vmem %s720_s0, %s535_s14  ;;  %178 = vst [vmem:[%s721_s1] sm:$0x1] (!%p536_p5), %v590_v0  ;;  %179 = vst [vmem:[%s722_s2] sm:$0x1] (!%p536_p5), %v590_v0 }
  0x15 PF: > { %v180_v1 = vld [vmem:[%s627_s17] sm:$0xff]  ;;  %v181_v2 = vld [vmem:[%s627_s17 + $0x8] sm:$0xff]  ;;  %v182_v3 = vld [vmem:[%s627_s17 + $0x10] sm:$0xff] }
  0x16   : > { %v183_v4 = vld [vmem:[%s627_s17 + $0x18] sm:$0xff]  ;;  %v245_v5 = vadd.f32 %v181_v2, %v180_v1  ;;  %v317_v6 = vmul.f32 %v180_v1, %v180_v1  ;;  %v318_v7 = vmul.f32 %v181_v2, %v181_v2  ;;  %v319_v8 = vmul.f32 %v182_v3, %v182_v3  ;;  %v184_v9 = vld [vmem:[%s627_s17 + $0x20] sm:$0xff]  ;;  %v185_v13 = vld [vmem:[%s627_s17 + $0x28] sm:$0xff] }
  0x17   : > { %v320_v11 = vmul.f32 %v183_v4, %v183_v4  ;;  %v321_v15 = vmul.f32 %v184_v9, %v184_v9  ;;  %v186_v17 = vld [vmem:[%s627_s17 + $0x30] sm:$0xff]  ;;  %v322_v19 = vmul.f32 %v185_v13, %v185_v13  ;;  %v187_v21 = vld [vmem:[%s627_s17 + $0x38] sm:$0xff]  ;;  %v188_v25 = vld [vmem:[%s627_s17 + $0x40] sm:$0xff] }
  0x18   : > { %v246_v10 = vadd.f32 %v245_v5, %v182_v3  ;;  %v381_v12 = vadd.f32 %v318_v7, %v317_v6  ;;  %v323_v23 = vmul.f32 %v186_v17, %v186_v17  ;;  %v324_v27 = vmul.f32 %v187_v21, %v187_v21  ;;  %v189_v29 = vld [vmem:[%s627_s17 + $0x48] sm:$0xff]  ;;  %v190_v33 = vld [vmem:[%s627_s17 + $0x50] sm:$0xff]  ;;  %v191_v37 = vld [vmem:[%s627_s17 + $0x58] sm:$0xff] }
  0x19   : > { %v325_v31 = vmul.f32 %v188_v25, %v188_v25  ;;  %v326_v35 = vmul.f32 %v189_v29, %v189_v29  ;;  %v327_v39 = vmul.f32 %v190_v33, %v190_v33  ;;  %v192_v41 = vld [vmem:[%s627_s17 + $0x60] sm:$0xff]  ;;  %v328_v43 = vmul.f32 %v191_v37, %v191_v37  ;;  %v193_v45 = vld [vmem:[%s627_s17 + $0x68] sm:$0xff]  ;;  %v194_v49 = vld [vmem:[%s627_s17 + $0x70] sm:$0xff] }
  0x1a   : > { %v247_v14 = vadd.f32 %v246_v10, %v183_v4  ;;  %v382_v16 = vadd.f32 %v381_v12, %v319_v8  ;;  %v329_v47 = vmul.f32 %v192_v41, %v192_v41  ;;  %v330_v51 = vmul.f32 %v193_v45, %v193_v45  ;;  %v195_v53 = vld [vmem:[%s627_s17 + $0x78] sm:$0xff]  ;;  %v196_v57 = vld [vmem:[%s627_s17 + $0x80] sm:$0xff]  ;;  %v197_v61 = vld [vmem:[%s627_s17 + $0x88] sm:$0xff] }
  0x1b   : > { %v331_v55 = vmul.f32 %v194_v49, %v194_v49  ;;  %v332_v59 = vmul.f32 %v195_v53, %v195_v53  ;;  %v333_v63 = vmul.f32 %v196_v57, %v196_v57  ;;  %v198_v1 = vld [vmem:[%s627_s17 + $0x90] sm:$0xff]  ;;  %v334_v3 = vmul.f32 %v197_v61, %v197_v61  ;;  %v199_v5 = vld [vmem:[%s627_s17 + $0x98] sm:$0xff] }
  0x1c   : > { %v248_v18 = vadd.f32 %v247_v14, %v184_v9  ;;  %v383_v20 = vadd.f32 %v382_v16, %v320_v11  ;;  %v335_v7 = vmul.f32 %v198_v1, %v198_v1  ;;  %v200_v9 = vld [vmem:[%s627_s17 + $0xa0] sm:$0xff]  ;;  %v336_v11 = vmul.f32 %v199_v5, %v199_v5 }
  0x1e   : > { %v249_v22 = vadd.f32 %v248_v18, %v185_v13  ;;  %v384_v24 = vadd.f32 %v383_v20, %v321_v15  ;;  %v201_v13 = vld [vmem:[%s627_s17 + $0xa8] sm:$0xff]  ;;  %v337_v15 = vmul.f32 %v200_v9, %v200_v9 }
  0x20   : > { %v250_v26 = vadd.f32 %v249_v22, %v186_v17  ;;  %v385_v28 = vadd.f32 %v384_v24, %v322_v19  ;;  %v202_v17 = vld [vmem:[%s627_s17 + $0xb0] sm:$0xff]  ;;  %v338_v19 = vmul.f32 %v201_v13, %v201_v13 }
  0x22   : > { %v251_v30 = vadd.f32 %v250_v26, %v187_v21  ;;  %v386_v32 = vadd.f32 %v385_v28, %v323_v23  ;;  %v203_v21 = vld [vmem:[%s627_s17 + $0xb8] sm:$0xff]  ;;  %v339_v23 = vmul.f32 %v202_v17, %v202_v17 }
  0x24   : > { %v252_v34 = vadd.f32 %v251_v30, %v188_v25  ;;  %v387_v36 = vadd.f32 %v386_v32, %v324_v27  ;;  %v204_v25 = vld [vmem:[%s627_s17 + $0xc0] sm:$0xff]  ;;  %v340_v27 = vmul.f32 %v203_v21, %v203_v21 }
  0x26   : > { %v253_v38 = vadd.f32 %v252_v34, %v189_v29  ;;  %v388_v40 = vadd.f32 %v387_v36, %v325_v31  ;;  %v205_v29 = vld [vmem:[%s627_s17 + $0xc8] sm:$0xff]  ;;  %v341_v31 = vmul.f32 %v204_v25, %v204_v25 }
  0x28   : > { %v254_v42 = vadd.f32 %v253_v38, %v190_v33  ;;  %v389_v44 = vadd.f32 %v388_v40, %v326_v35  ;;  %v206_v33 = vld [vmem:[%s627_s17 + $0xd0] sm:$0xff]  ;;  %v342_v35 = vmul.f32 %v205_v29, %v205_v29 }
  0x2a   : > { %v255_v46 = vadd.f32 %v254_v42, %v191_v37  ;;  %v390_v48 = vadd.f32 %v389_v44, %v327_v39  ;;  %v207_v37 = vld [vmem:[%s627_s17 + $0xd8] sm:$0xff]  ;;  %v343_v39 = vmul.f32 %v206_v33, %v206_v33 }
  0x2c   : > { %v256_v50 = vadd.f32 %v255_v46, %v192_v41  ;;  %v391_v52 = vadd.f32 %v390_v48, %v328_v43  ;;  %v208_v41 = vld [vmem:[%s627_s17 + $0xe0] sm:$0xff]  ;;  %v344_v43 = vmul.f32 %v207_v37, %v207_v37 }
  0x2e   : > { %v257_v54 = vadd.f32 %v256_v50, %v193_v45  ;;  %v392_v56 = vadd.f32 %v391_v52, %v329_v47  ;;  %v209_v45 = vld [vmem:[%s627_s17 + $0xe8] sm:$0xff]  ;;  %v345_v47 = vmul.f32 %v208_v41, %v208_v41 }
  0x30   : > { %v258_v58 = vadd.f32 %v257_v54, %v194_v49  ;;  %v393_v60 = vadd.f32 %v392_v56, %v330_v51  ;;  %v210_v49 = vld [vmem:[%s627_s17 + $0xf0] sm:$0xff]  ;;  %v346_v51 = vmul.f32 %v209_v45, %v209_v45 }
  0x32   : > { %v259_v62 = vadd.f32 %v258_v58, %v195_v53  ;;  %v394_v0 = vadd.f32 %v393_v60, %v331_v55  ;;  %v211_v53 = vld [vmem:[%s627_s17 + $0xf8] sm:$0xff]  ;;  %v347_v55 = vmul.f32 %v210_v49, %v210_v49 }
  0x34   : > { %v260_v2 = vadd.f32 %v259_v62, %v196_v57  ;;  %v395_v4 = vadd.f32 %v394_v0, %v332_v59  ;;  %v212_v57 = vld [vmem:[%s627_s17 + $0x100] sm:$0xff]  ;;  %v348_v59 = vmul.f32 %v211_v53, %v211_v53 }
  0x36   : > { %v261_v6 = vadd.f32 %v260_v2, %v197_v61  ;;  %v396_v8 = vadd.f32 %v395_v4, %v333_v63  ;;  %v213_v61 = vld [vmem:[%s627_s17 + $0x108] sm:$0xff]  ;;  %v349_v63 = vmul.f32 %v212_v57, %v212_v57 }
  0x38   : > { %v262_v10 = vadd.f32 %v261_v6, %v198_v1  ;;  %v397_v12 = vadd.f32 %v396_v8, %v334_v3  ;;  %v214_v1 = vld [vmem:[%s627_s17 + $0x110] sm:$0xff]  ;;  %v350_v3 = vmul.f32 %v213_v61, %v213_v61 }
  0x3a   : > { %v263_v14 = vadd.f32 %v262_v10, %v199_v5  ;;  %v398_v16 = vadd.f32 %v397_v12, %v335_v7  ;;  %v215_v5 = vld [vmem:[%s627_s17 + $0x118] sm:$0xff]  ;;  %v351_v7 = vmul.f32 %v214_v1, %v214_v1 }
  0x3c   : > { %v264_v18 = vadd.f32 %v263_v14, %v200_v9  ;;  %v399_v20 = vadd.f32 %v398_v16, %v336_v11  ;;  %v216_v9 = vld [vmem:[%s627_s17 + $0x120] sm:$0xff]  ;;  %v352_v11 = vmul.f32 %v215_v5, %v215_v5 }
  0x3e   : > { %v265_v22 = vadd.f32 %v264_v18, %v201_v13  ;;  %v400_v24 = vadd.f32 %v399_v20, %v337_v15  ;;  %v217_v13 = vld [vmem:[%s627_s17 + $0x128] sm:$0xff]  ;;  %v353_v15 = vmul.f32 %v216_v9, %v216_v9 }
  0x40   : > { %v266_v26 = vadd.f32 %v265_v22, %v202_v17  ;;  %v401_v28 = vadd.f32 %v400_v24, %v338_v19  ;;  %v218_v17 = vld [vmem:[%s627_s17 + $0x130] sm:$0xff]  ;;  %v354_v19 = vmul.f32 %v217_v13, %v217_v13 }
  0x42   : > { %v267_v30 = vadd.f32 %v266_v26, %v203_v21  ;;  %v402_v32 = vadd.f32 %v401_v28, %v339_v23  ;;  %v219_v21 = vld [vmem:[%s627_s17 + $0x138] sm:$0xff]  ;;  %v355_v23 = vmul.f32 %v218_v17, %v218_v17 }
  0x44   : > { %v268_v34 = vadd.f32 %v267_v30, %v204_v25  ;;  %v403_v36 = vadd.f32 %v402_v32, %v340_v27  ;;  %v220_v25 = vld [vmem:[%s627_s17 + $0x140] sm:$0xff]  ;;  %v356_v27 = vmul.f32 %v219_v21, %v219_v21 }
  0x46   : > { %v269_v38 = vadd.f32 %v268_v34, %v205_v29  ;;  %v404_v40 = vadd.f32 %v403_v36, %v341_v31  ;;  %v221_v29 = vld [vmem:[%s627_s17 + $0x148] sm:$0xff]  ;;  %v357_v31 = vmul.f32 %v220_v25, %v220_v25 }
  0x48   : > { %v270_v42 = vadd.f32 %v269_v38, %v206_v33  ;;  %v405_v44 = vadd.f32 %v404_v40, %v342_v35  ;;  %v222_v33 = vld [vmem:[%s627_s17 + $0x150] sm:$0xff]  ;;  %v358_v35 = vmul.f32 %v221_v29, %v221_v29 }
  0x4a   : > { %v271_v46 = vadd.f32 %v270_v42, %v207_v37  ;;  %v406_v48 = vadd.f32 %v405_v44, %v343_v39  ;;  %v223_v37 = vld [vmem:[%s627_s17 + $0x158] sm:$0xff]  ;;  %v359_v39 = vmul.f32 %v222_v33, %v222_v33 }
  0x4c   : > { %v272_v50 = vadd.f32 %v271_v46, %v208_v41  ;;  %v407_v52 = vadd.f32 %v406_v48, %v344_v43  ;;  %v224_v41 = vld [vmem:[%s627_s17 + $0x160] sm:$0xff]  ;;  %v360_v43 = vmul.f32 %v223_v37, %v223_v37 }
  0x4e   : > { %v273_v54 = vadd.f32 %v272_v50, %v209_v45  ;;  %v408_v56 = vadd.f32 %v407_v52, %v345_v47  ;;  %v225_v45 = vld [vmem:[%s627_s17 + $0x168] sm:$0xff]  ;;  %v361_v47 = vmul.f32 %v224_v41, %v224_v41 }
  0x50   : > { %v274_v58 = vadd.f32 %v273_v54, %v210_v49  ;;  %v409_v60 = vadd.f32 %v408_v56, %v346_v51  ;;  %v226_v49 = vld [vmem:[%s627_s17 + $0x170] sm:$0xff]  ;;  %v362_v51 = vmul.f32 %v225_v45, %v225_v45 }
  0x52   : > { %v275_v62 = vadd.f32 %v274_v58, %v211_v53  ;;  %v410_v0 = vadd.f32 %v409_v60, %v347_v55  ;;  %v227_v53 = vld [vmem:[%s627_s17 + $0x178] sm:$0xff]  ;;  %v363_v55 = vmul.f32 %v226_v49, %v226_v49 }
  0x54   : > { %v276_v2 = vadd.f32 %v275_v62, %v212_v57  ;;  %v411_v4 = vadd.f32 %v410_v0, %v348_v59  ;;  %v228_v57 = vld [vmem:[%s627_s17 + $0x180] sm:$0xff]  ;;  %v364_v59 = vmul.f32 %v227_v53, %v227_v53 }
  0x56   : > { %v277_v6 = vadd.f32 %v276_v2, %v213_v61  ;;  %v412_v8 = vadd.f32 %v411_v4, %v349_v63  ;;  %v229_v61 = vld [vmem:[%s627_s17 + $0x188] sm:$0xff]  ;;  %v365_v63 = vmul.f32 %v228_v57, %v228_v57 }
  0x58   : > { %v278_v10 = vadd.f32 %v277_v6, %v214_v1  ;;  %v413_v12 = vadd.f32 %v412_v8, %v350_v3  ;;  %v230_v1 = vld [vmem:[%s627_s17 + $0x190] sm:$0xff]  ;;  %v366_v3 = vmul.f32 %v229_v61, %v229_v61 }
  0x5a   : > { %v279_v14 = vadd.f32 %v278_v10, %v215_v5  ;;  %v414_v16 = vadd.f32 %v413_v12, %v351_v7  ;;  %v231_v5 = vld [vmem:[%s627_s17 + $0x198] sm:$0xff]  ;;  %v367_v7 = vmul.f32 %v230_v1, %v230_v1 }
  0x5c   : > { %v280_v18 = vadd.f32 %v279_v14, %v216_v9  ;;  %v415_v20 = vadd.f32 %v414_v16, %v352_v11  ;;  %v232_v9 = vld [vmem:[%s627_s17 + $0x1a0] sm:$0xff]  ;;  %v368_v11 = vmul.f32 %v231_v5, %v231_v5 }
  0x5e   : > { %v281_v22 = vadd.f32 %v280_v18, %v217_v13  ;;  %v416_v24 = vadd.f32 %v415_v20, %v353_v15  ;;  %v233_v13 = vld [vmem:[%s627_s17 + $0x1a8] sm:$0xff]  ;;  %v369_v15 = vmul.f32 %v232_v9, %v232_v9 }
  0x60   : > { %v282_v26 = vadd.f32 %v281_v22, %v218_v17  ;;  %v417_v28 = vadd.f32 %v416_v24, %v354_v19  ;;  %v234_v17 = vld [vmem:[%s627_s17 + $0x1b0] sm:$0xff]  ;;  %v370_v19 = vmul.f32 %v233_v13, %v233_v13 }
  0x62   : > { %v283_v30 = vadd.f32 %v282_v26, %v219_v21  ;;  %v418_v32 = vadd.f32 %v417_v28, %v355_v23  ;;  %v235_v21 = vld [vmem:[%s627_s17 + $0x1b8] sm:$0xff]  ;;  %v371_v23 = vmul.f32 %v234_v17, %v234_v17 }
  0x64   : > { %v284_v34 = vadd.f32 %v283_v30, %v220_v25  ;;  %v419_v36 = vadd.f32 %v418_v32, %v356_v27  ;;  %v236_v25 = vld [vmem:[%s627_s17 + $0x1c0] sm:$0xff]  ;;  %v372_v27 = vmul.f32 %v235_v21, %v235_v21 }
  0x66   : > { %v285_v38 = vadd.f32 %v284_v34, %v221_v29  ;;  %v420_v40 = vadd.f32 %v419_v36, %v357_v31  ;;  %v237_v29 = vld [vmem:[%s627_s17 + $0x1c8] sm:$0xff]  ;;  %v373_v31 = vmul.f32 %v236_v25, %v236_v25 }
  0x68   : > { %v286_v42 = vadd.f32 %v285_v38, %v222_v33  ;;  %v421_v44 = vadd.f32 %v420_v40, %v358_v35  ;;  %v238_v33 = vld [vmem:[%s627_s17 + $0x1d0] sm:$0xff]  ;;  %v374_v35 = vmul.f32 %v237_v29, %v237_v29 }
  0x6a   : > { %v287_v46 = vadd.f32 %v286_v42, %v223_v37  ;;  %v422_v48 = vadd.f32 %v421_v44, %v359_v39  ;;  %v239_v37 = vld [vmem:[%s627_s17 + $0x1d8] sm:$0xff]  ;;  %v375_v39 = vmul.f32 %v238_v33, %v238_v33 }
  0x6c   : > { %v288_v50 = vadd.f32 %v287_v46, %v224_v41  ;;  %v423_v52 = vadd.f32 %v422_v48, %v360_v43  ;;  %v240_v41 = vld [vmem:[%s627_s17 + $0x1e0] sm:$0xff]  ;;  %v376_v43 = vmul.f32 %v239_v37, %v239_v37 }
  0x6e   : > { %v289_v54 = vadd.f32 %v288_v50, %v225_v45  ;;  %v424_v56 = vadd.f32 %v423_v52, %v361_v47  ;;  %v241_v45 = vld [vmem:[%s627_s17 + $0x1e8] sm:$0xff]  ;;  %v377_v47 = vmul.f32 %v240_v41, %v240_v41 }
  0x70   : > { %v290_v58 = vadd.f32 %v289_v54, %v226_v49  ;;  %v425_v60 = vadd.f32 %v424_v56, %v362_v51  ;;  %v242_v49 = vld [vmem:[%s627_s17 + $0x1f0] sm:$0xff]  ;;  %v378_v51 = vmul.f32 %v241_v45, %v241_v45 }
  0x72   : > { %v291_v62 = vadd.f32 %v290_v58, %v227_v53  ;;  %v426_v0 = vadd.f32 %v425_v60, %v363_v55  ;;  %v243_v53 = vld [vmem:[%s627_s17 + $0x1f8] sm:$0xff]  ;;  %v379_v55 = vmul.f32 %v242_v49, %v242_v49 }
  0x73   : > { %v380_v58 = vmul.f32 %v243_v53, %v243_v53 }
  0x74   : > { %v292_v2 = vadd.f32 %v291_v62, %v228_v57  ;;  %v427_v4 = vadd.f32 %v426_v0, %v364_v59 }
  0x76   : > { %v293_v6 = vadd.f32 %v292_v2, %v229_v61  ;;  %v428_v8 = vadd.f32 %v427_v4, %v365_v63 }
  0x78   : > { %v294_v10 = vadd.f32 %v293_v6, %v230_v1  ;;  %v429_v12 = vadd.f32 %v428_v8, %v366_v3 }
  0x7a   : > { %v295_v14 = vadd.f32 %v294_v10, %v231_v5  ;;  %v430_v16 = vadd.f32 %v429_v12, %v367_v7  ;;  %v244_v7 = vld [vmem:[%s721_s1] sm:$0x1] }
  0x7b   : > { %v316_v12 = vld [vmem:[%s722_s2] sm:$0x1] }
  0x7c   : > { %v296_v18 = vadd.f32 %v295_v14, %v232_v9  ;;  %v431_v20 = vadd.f32 %v430_v16, %v368_v11 }
  0x7e   : > { %v297_v22 = vadd.f32 %v296_v18, %v233_v13  ;;  %v432_v24 = vadd.f32 %v431_v20, %v369_v15 }
  0x80   : > { %v298_v26 = vadd.f32 %v297_v22, %v234_v17  ;;  %v433_v28 = vadd.f32 %v432_v24, %v370_v19 }
  0x82   : > { %v299_v30 = vadd.f32 %v298_v26, %v235_v21  ;;  %v434_v32 = vadd.f32 %v433_v28, %v371_v23 }
  0x84   : > { %v300_v34 = vadd.f32 %v299_v30, %v236_v25  ;;  %v435_v36 = vadd.f32 %v434_v32, %v372_v27 }
  0x86   : > { %v301_v38 = vadd.f32 %v300_v34, %v237_v29  ;;  %v436_v40 = vadd.f32 %v435_v36, %v373_v31 }
  0x88   : > { %v302_v42 = vadd.f32 %v301_v38, %v238_v33  ;;  %v437_v44 = vadd.f32 %v436_v40, %v374_v35 }
  0x8a   : > { %v303_v46 = vadd.f32 %v302_v42, %v239_v37  ;;  %v438_v48 = vadd.f32 %v437_v44, %v375_v39 }
  0x8c   : > { %v304_v50 = vadd.f32 %v303_v46, %v240_v41  ;;  %v439_v52 = vadd.f32 %v438_v48, %v376_v43 }
  0x8e   : > { %v305_v54 = vadd.f32 %v304_v50, %v241_v45  ;;  %v440_v56 = vadd.f32 %v439_v52, %v377_v47 }
  0x90   : > { %v306_v57 = vadd.f32 %v305_v54, %v242_v49  ;;  %v441_v59 = vadd.f32 %v440_v56, %v378_v51 }
  0x92   : > { %v307_v60 = vadd.f32 %v306_v57, %v243_v53  ;;  %v442_v61 = vadd.f32 %v441_v59, %v379_v55 }
  0x94   : > { %v308_v62 = vrot.slane %v307_v60, 4  ;;  %v443_v63 = vadd.f32 %v442_v61, %v380_v58 }
  0x96   : > { %v309_v0 = vadd.f32 %v308_v62, %v307_v60  ;;  %v444_v1 = vrot.slane %v443_v63, 4 }
  0x98   : > { %v310_v2 = vrot.slane %v309_v0, 2  ;;  %v445_v3 = vadd.f32 %v444_v1, %v443_v63 }
  0x9a   : > { %v311_v4 = vadd.f32 %v310_v2, %v309_v0  ;;  %v446_v5 = vrot.slane %v445_v3, 2 }
  0x9c   : > { %v312_v6 = vrot.slane %v311_v4, 1  ;;  %v447_v8 = vadd.f32 %v446_v5, %v445_v3 }
  0x9e   : > { %v313_v9 = vadd.f32 %v312_v6, %v311_v4  ;;  %v448_v10 = vrot.slane %v447_v8, 1 }
  0xa0   : > { %v314_v11 = vadd.f32 %v313_v9, %v244_v7  ;;  %v449_v13 = vadd.f32 %v448_v10, %v447_v8 }
  0xa2   : > { %315 = vst [vmem:[%s721_s1] sm:$0x1] %v314_v11  ;;  %v450_v14 = vadd.f32 %v449_v13, %v316_v12 }
  0xa4   : > { %451 = vst [vmem:[%s722_s2] sm:$0x1] %v450_v14 }
  0xa5 PF: > { %s13_s11 = sadd.s32 1, %s588_s11   ;;  %s723_s9 = smov %s584_s10 }
  0xa6   : > { %p10_p6 = scmp.ge.s32.totalorder %s13_s11, 6   ;;  %s724_s10 = smov %s726_s12 }
  0xa8   :  { %12 = sbr.rel (!%p10_p6) target bundleno = 2 (0x2), region = 70 }

// kernel: generator_forward.24
= control target key start
LH: loop header
LB: loop body
LE: loop exit
PB: predicated region body
PF: predicated region fallthrough
CT: control target
= control target key end

     0   :  { %s882_s18 = smov 0   ;;  %s884_s19 = smov 0   ;;  %s1198_s0 = inlined_call_operand.vmem [shape: f32[2048,128], index: 0, kind: input, shape index: {}]   ;;  %s1199_s1 = inlined_call_operand.vmem [shape: f32[1,128], index: 1, kind: input, shape index: {}]   ;;  %s1200_s2 = inlined_call_operand.vmem [shape: f32[1,128], index: 2, kind: input, shape index: {}]   ;;  %s1201_s3 = inlined_call_operand.vmem [shape: f32[1,128], index: 3, kind: input, shape index: {}]   ;;  %s1202_s4 = inlined_call_operand.vmem [shape: f32[1,128], index: 4, kind: input, shape index: {}]   ;;  %s1203_s5 = inlined_call_operand.vmem [shape: f32[2048,128], index: 5, kind: output, shape index: {}]  }
   0x1   :  { %s886_s20 = smov 0  }
   0x2 LB: > { %s27_s21 = sadd.s32 1, %s846_s19  ;;  %p795_p0 = scmp.ge.s32.totalorder %s850_s20, 1  ;;  %s850_s20 = sphi %s886_s20, %s15_s20   ;;  %s846_s19 = sphi %s884_s19, %s1205_s19   ;;  %s842_s18 = sphi %s882_s18, %s1204_s18  }
   0x3   : > { %p29_p1 = scmp.ge.s32.totalorder %s27_s21, 4  ;;  %p239_p2 = scmp.lt.s32.totalorder %s850_s20, 5 }
   0x5   : > { %s1207_s21 = smov (%p29_p1, %s27_s21), 0  ;;  %p240_p3 = pnand %p795_p0, %p239_p2 }
   0x6   : > { %v315_v0 = vld [vmem:[%s1199_s1] sm:$0x1] (!%p240_p3)  ;;  %s796_s26 = sshll.u32 (!%p240_p3), %s842_s18, 6  ;;  %v394_v8 = vlaneseq (!%p240_p3) }
   0x7   : > { %243 = sbr.rel (%p240_p3) target bundleno = 86 (0x56), region = 40  ;;  %v317_v1 = vld [vmem:[%s1200_s2] sm:$0x1] (!%p240_p3)  ;;  %v316_v2 = vmul.f32 (!%p240_p3), 0.00048828125, %v315_v0  ;;  %p286_p4 = scmp.lt.s32.totalorder (!%p240_p3), %s796_s26, 255 }
   0x8   : > { %v318_v3 = vmul.f32 (!%p240_p3), 0.00048828125, %v317_v1  ;;  %v395_v9 = vshrl.u32 (!%p240_p3), %v394_v8, 7  ;;  %v322_v10 = vld [vmem:[%s1201_s3] sm:$0x1] (!%p240_p3) }
   0x9   : > { %v319_v4 = vmul.f32 (!%p240_p3), %v316_v2, %v316_v2  ;;  %v326_v14 = vld [vmem:[%s1202_s4] sm:$0x1] (!%p240_p3) }
   0xa   : > { %v396_v11 = vsub.s32 (!%p240_p3), 0, %v395_v9 }
   0xb   : > { %v320_v5 = vsub.f32 (!%p240_p3), %v318_v3, %v319_v4 }
   0xd   : > { %v321_v6 = vmax.f32 (!%p240_p3), %v320_v5, 0.0 }
   0xe   : > { %s1209_s26 = smov (!%p286_p4, %s796_s26), 255 }
   0xf   : > { %v323_v7 = vadd.f32 1e-05, %v321_v6  ;;  %s797_s27 = sshll.u32 %s1209_s26, 3 }
  0x10   : > { %s914_s30 = scalar_lea.vmem %s1198_s0, %s797_s27  ;;  %s963_s12 = scalar_lea.vmem %s1203_s5, %s797_s27 }
  0x11   : > { %826 = vrsqrt.f32 %v323_v7  ;;  %v329_v15 = vld [vmem:[%s914_s30] sm:$0xff]  ;;  %v330_v16 = vld [vmem:[%s914_s30 + $0x8] sm:$0xff]  ;;  %v331_v17 = vld [vmem:[%s914_s30 + $0x10] sm:$0xff] }
  0x12   : > { %v332_v18 = vld [vmem:[%s914_s30 + $0x18] sm:$0xff]  ;;  %v333_v19 = vld [vmem:[%s914_s30 + $0x20] sm:$0xff]  ;;  %v334_v22 = vld [vmem:[%s914_s30 + $0x28] sm:$0xff] }
  0x13   : > { %v335_v23 = vld [vmem:[%s914_s30 + $0x30] sm:$0xff]  ;;  %v336_v24 = vld [vmem:[%s914_s30 + $0x38] sm:$0xff]  ;;  %v337_v25 = vld [vmem:[%s914_s30 + $0x40] sm:$0xff] }
  0x14   : > { %v338_v26 = vld [vmem:[%s914_s30 + $0x48] sm:$0xff]  ;;  %v339_v27 = vld [vmem:[%s914_s30 + $0x50] sm:$0xff]  ;;  %v340_v32 = vld [vmem:[%s914_s30 + $0x58] sm:$0xff] }
  0x15   : > { %v341_v33 = vld [vmem:[%s914_s30 + $0x60] sm:$0xff]  ;;  %v342_v34 = vld [vmem:[%s914_s30 + $0x68] sm:$0xff]  ;;  %v343_v59 = vld [vmem:[%s914_s30 + $0x70] sm:$0xff] }
  0x16   : > { %v344_v60 = vld [vmem:[%s914_s30 + $0x78] sm:$0xff]  ;;  %v345_v5 = vld [vmem:[%s914_s30 + $0x80] sm:$0xff] }
  0x1b   : > { %v827_v12 = vpop.eup %826 }
  0x1c   : > { %v325_v13 = vmul.f32 %v827_v12, %v322_v10  ;;  %v346_v10 = vld [vmem:[%s914_s30 + $0x88] sm:$0xff]  ;;  %v348_v12 = vld [vmem:[%s914_s30 + $0x98] sm:$0xff] }
  0x1e   : > { %v327_v20 = vmul.f32 %v325_v13, %v316_v2  ;;  %v927_v21 = vrot.slane %v325_v13, %v396_v11 }
  0x20   : > { %v328_v28 = vsub.f32 %v326_v14, %v327_v20  ;;  %v399_v29 = vmul.f32 %v927_v21, %v329_v15  ;;  %v400_v30 = vmul.f32 %v927_v21, %v330_v16  ;;  %v401_v31 = vmul.f32 %v927_v21, %v331_v17  ;;  %v349_v17 = vld [vmem:[%s914_s30 + $0xa0] sm:$0xff] }
  0x21   : > { %v402_v35 = vmul.f32 %v927_v21, %v332_v18  ;;  %v403_v36 = vmul.f32 %v927_v21, %v333_v19  ;;  %v404_v37 = vmul.f32 %v927_v21, %v334_v22  ;;  %v405_v38 = vmul.f32 %v927_v21, %v335_v23  ;;  %v350_v18 = vld [vmem:[%s914_s30 + $0xa8] sm:$0xff] }
  0x22   : > { %v945_v39 = vrot.slane %v328_v28, %v396_v11  ;;  %v406_v40 = vmul.f32 %v927_v21, %v336_v24  ;;  %v407_v41 = vmul.f32 %v927_v21, %v337_v25  ;;  %v408_v42 = vmul.f32 %v927_v21, %v338_v26  ;;  %v347_v11 = vld [vmem:[%s914_s30 + $0x90] sm:$0xff] }
  0x23   : > { %v409_v43 = vmul.f32 %v927_v21, %v339_v27  ;;  %v410_v44 = vmul.f32 %v927_v21, %v340_v32  ;;  %v411_v45 = vmul.f32 %v927_v21, %v341_v33  ;;  %v412_v46 = vmul.f32 %v927_v21, %v342_v34  ;;  %v351_v28 = vld [vmem:[%s914_s30 + $0xb0] sm:$0xff] }
  0x24   : > { %v469_v47 = vadd.f32 %v945_v39, %v399_v29  ;;  %v470_v48 = vadd.f32 %v945_v39, %v400_v30  ;;  %v471_v49 = vadd.f32 %v945_v39, %v401_v31  ;;  %v472_v50 = vadd.f32 %v945_v39, %v402_v35  ;;  %v352_v29 = vld [vmem:[%s914_s30 + $0xb8] sm:$0xff] }
  0x25   : > { %v473_v51 = vadd.f32 %v945_v39, %v403_v36  ;;  %v474_v52 = vadd.f32 %v945_v39, %v404_v37  ;;  %v475_v53 = vadd.f32 %v945_v39, %v405_v38  ;;  %v476_v54 = vadd.f32 %v945_v39, %v406_v40  ;;  %v353_v38 = vld [vmem:[%s914_s30 + $0xc0] sm:$0xff] }
  0x26   : > { %v533_v55 = vmax.f32 %v469_v47, 0.0  ;;  %v534_v56 = vmax.f32 %v470_v48, 0.0  ;;  %v535_v57 = vmax.f32 %v471_v49, 0.0  ;;  %v536_v58 = vmax.f32 %v472_v50, 0.0 }
  0x27   : > { %v537_v61 = vmax.f32 %v473_v51, 0.0  ;;  %v538_v62 = vmax.f32 %v474_v52, 0.0  ;;  %v539_v63 = vmax.f32 %v475_v53, 0.0  ;;  %v540_v0 = vmax.f32 %v476_v54, 0.0  ;;  %v357_v51 = vld [vmem:[%s914_s30 + $0xe0] sm:$0xff]  ;;  %v358_v52 = vld [vmem:[%s914_s30 + $0xe8] sm:$0xff] }
  0x28   : > { %597 = vst [vmem:[%s963_s12] sm:$0xff] %v533_v55  ;;  %598 = vst [vmem:[%s963_s12 + $0x8] sm:$0xff] %v534_v56  ;;  %v477_v1 = vadd.f32 %v945_v39, %v407_v41  ;;  %v478_v2 = vadd.f32 %v945_v39, %v408_v42  ;;  %v479_v3 = vadd.f32 %v945_v39, %v409_v43 }
  0x29   : > { %599 = vst [vmem:[%s963_s12 + $0x10] sm:$0xff] %v535_v57  ;;  %600 = vst [vmem:[%s963_s12 + $0x18] sm:$0xff] %v536_v58  ;;  %v480_v4 = vadd.f32 %v945_v39, %v410_v44  ;;  %v481_v6 = vadd.f32 %v945_v39, %v411_v45  ;;  %v482_v7 = vadd.f32 %v945_v39, %v412_v46  ;;  %v354_v44 = vld [vmem:[%s914_s30 + $0xc8] sm:$0xff]  ;;  %v355_v45 = vld [vmem:[%s914_s30 + $0xd0] sm:$0xff] }
  0x2a   : > { %601 = vst [vmem:[%s963_s12 + $0x20] sm:$0xff] %v537_v61  ;;  %602 = vst [vmem:[%s963_s12 + $0x28] sm:$0xff] %v538_v62  ;;  %v413_v8 = vmul.f32 %v927_v21, %v343_v59  ;;  %v414_v9 = vmul.f32 %v927_v21, %v344_v60  ;;  %v541_v13 = vmax.f32 %v477_v1, 0.0  ;;  %v542_v14 = vmax.f32 %v478_v2, 0.0  ;;  %v356_v46 = vld [vmem:[%s914_s30 + $0xd8] sm:$0xff]  ;;  %v359_v61 = vld [vmem:[%s914_s30 + $0xf0] sm:$0xff] }
  0x2b   : > { %603 = vst [vmem:[%s963_s12 + $0x30] sm:$0xff] %v539_v63  ;;  %604 = vst [vmem:[%s963_s12 + $0x38] sm:$0xff] %v540_v0  ;;  %v543_v15 = vmax.f32 %v479_v3, 0.0  ;;  %v544_v16 = vmax.f32 %v480_v4, 0.0  ;;  %v545_v19 = vmax.f32 %v481_v6, 0.0  ;;  %v546_v20 = vmax.f32 %v482_v7, 0.0 }
  0x2c   : > { %v483_v22 = vadd.f32 %v945_v39, %v413_v8  ;;  %v484_v23 = vadd.f32 %v945_v39, %v414_v9  ;;  %605 = vst [vmem:[%s963_s12 + $0x40] sm:$0xff] %v541_v13  ;;  %606 = vst [vmem:[%s963_s12 + $0x48] sm:$0xff] %v542_v14  ;;  %v415_v24 = vmul.f32 %v927_v21, %v345_v5  ;;  %v360_v62 = vld [vmem:[%s914_s30 + $0xf8] sm:$0xff]  ;;  %v361_v7 = vld [vmem:[%s914_s30 + $0x100] sm:$0xff] }
  0x2d   : > { %607 = vst [vmem:[%s963_s12 + $0x50] sm:$0xff] %v543_v15  ;;  %608 = vst [vmem:[%s963_s12 + $0x58] sm:$0xff] %v544_v16  ;;  %v416_v25 = vmul.f32 %v927_v21, %v346_v10  ;;  %v417_v26 = vmul.f32 %v927_v21, %v347_v11  ;;  %v418_v27 = vmul.f32 %v927_v21, %v348_v12  ;;  %v362_v12 = vld [vmem:[%s914_s30 + $0x108] sm:$0xff]  ;;  %v363_v13 = vld [vmem:[%s914_s30 + $0x110] sm:$0xff] }
  0x2e   : > { %609 = vst [vmem:[%s963_s12 + $0x60] sm:$0xff] %v545_v19  ;;  %610 = vst [vmem:[%s963_s12 + $0x68] sm:$0xff] %v546_v20  ;;  %v547_v30 = vmax.f32 %v483_v22, 0.0  ;;  %v548_v31 = vmax.f32 %v484_v23, 0.0  ;;  %v419_v32 = vmul.f32 %v927_v21, %v349_v17  ;;  %v420_v33 = vmul.f32 %v927_v21, %v350_v18  ;;  %v364_v14 = vld [vmem:[%s914_s30 + $0x118] sm:$0xff]  ;;  %v365_v19 = vld [vmem:[%s914_s30 + $0x120] sm:$0xff] }
  0x2f   : > { %v485_v34 = vadd.f32 %v945_v39, %v415_v24  ;;  %v486_v35 = vadd.f32 %v945_v39, %v416_v25  ;;  %v487_v36 = vadd.f32 %v945_v39, %v417_v26  ;;  %v488_v37 = vadd.f32 %v945_v39, %v418_v27  ;;  %v366_v20 = vld [vmem:[%s914_s30 + $0x128] sm:$0xff] }
  0x30   : > { %611 = vst [vmem:[%s963_s12 + $0x70] sm:$0xff] %v547_v30  ;;  %612 = vst [vmem:[%s963_s12 + $0x78] sm:$0xff] %v548_v31  ;;  %v489_v40 = vadd.f32 %v945_v39, %v419_v32  ;;  %v490_v41 = vadd.f32 %v945_v39, %v420_v33  ;;  %v421_v42 = vmul.f32 %v927_v21, %v351_v28  ;;  %v367_v30 = vld [vmem:[%s914_s30 + $0x130] sm:$0xff]  ;;  %v368_v31 = vld [vmem:[%s914_s30 + $0x138] sm:$0xff] }
  0x31   : > { %v422_v43 = vmul.f32 %v927_v21, %v352_v29  ;;  %v549_v47 = vmax.f32 %v485_v34, 0.0  ;;  %v550_v48 = vmax.f32 %v486_v35, 0.0  ;;  %v551_v49 = vmax.f32 %v487_v36, 0.0 }
  0x32   : > { %v552_v50 = vmax.f32 %v488_v37, 0.0  ;;  %v553_v53 = vmax.f32 %v489_v40, 0.0  ;;  %v554_v54 = vmax.f32 %v490_v41, 0.0  ;;  %v491_v55 = vadd.f32 %v945_v39, %v421_v42  ;;  %v369_v41 = vld [vmem:[%s914_s30 + $0x140] sm:$0xff] }
  0x33   : > { %v492_v56 = vadd.f32 %v945_v39, %v422_v43  ;;  %613 = vst [vmem:[%s963_s12 + $0x80] sm:$0xff] %v549_v47  ;;  %614 = vst [vmem:[%s963_s12 + $0x88] sm:$0xff] %v550_v48  ;;  %v423_v57 = vmul.f32 %v927_v21, %v353_v38  ;;  %v424_v58 = vmul.f32 %v927_v21, %v354_v44  ;;  %v371_v47 = vld [vmem:[%s914_s30 + $0x150] sm:$0xff]  ;;  %v372_v48 = vld [vmem:[%s914_s30 + $0x158] sm:$0xff] }
  0x34   : > { %615 = vst [vmem:[%s963_s12 + $0x90] sm:$0xff] %v551_v49  ;;  %616 = vst [vmem:[%s963_s12 + $0x98] sm:$0xff] %v552_v50  ;;  %v425_v59 = vmul.f32 %v927_v21, %v355_v45  ;;  %v426_v60 = vmul.f32 %v927_v21, %v356_v46  ;;  %v555_v63 = vmax.f32 %v491_v55, 0.0  ;;  %v427_v1 = vmul.f32 %v927_v21, %v357_v51  ;;  %v370_v46 = vld [vmem:[%s914_s30 + $0x148] sm:$0xff] }
  0x35   : > { %617 = vst [vmem:[%s963_s12 + $0xa0] sm:$0xff] %v553_v53  ;;  %618 = vst [vmem:[%s963_s12 + $0xa8] sm:$0xff] %v554_v54  ;;  %v556_v0 = vmax.f32 %v492_v56, 0.0  ;;  %v428_v2 = vmul.f32 %v927_v21, %v358_v52  ;;  %v493_v3 = vadd.f32 %v945_v39, %v423_v57  ;;  %v494_v4 = vadd.f32 %v945_v39, %v424_v58  ;;  %v373_v53 = vld [vmem:[%s914_s30 + $0x160] sm:$0xff]  ;;  %v374_v54 = vld [vmem:[%s914_s30 + $0x168] sm:$0xff] }
  0x36   : > { %v495_v5 = vadd.f32 %v945_v39, %v425_v59  ;;  %v496_v6 = vadd.f32 %v945_v39, %v426_v60  ;;  %619 = vst [vmem:[%s963_s12 + $0xb0] sm:$0xff] %v555_v63  ;;  %v497_v8 = vadd.f32 %v945_v39, %v427_v1  ;;  %v429_v10 = vmul.f32 %v927_v21, %v359_v61  ;;  %v375_v63 = vld [vmem:[%s914_s30 + $0x170] sm:$0xff] }
  0x37   : > { %620 = vst [vmem:[%s963_s12 + $0xb8] sm:$0xff] %v556_v0  ;;  %v498_v9 = vadd.f32 %v945_v39, %v428_v2  ;;  %v430_v11 = vmul.f32 %v927_v21, %v360_v62  ;;  %v557_v15 = vmax.f32 %v493_v3, 0.0  ;;  %v558_v16 = vmax.f32 %v494_v4, 0.0  ;;  %v376_v0 = vld [vmem:[%s914_s30 + $0x178] sm:$0xff] }
  0x38   : > { %v559_v17 = vmax.f32 %v495_v5, 0.0  ;;  %v560_v18 = vmax.f32 %v496_v6, 0.0  ;;  %v561_v22 = vmax.f32 %v497_v8, 0.0  ;;  %v499_v24 = vadd.f32 %v945_v39, %v429_v10 }
  0x39   : > { %v562_v23 = vmax.f32 %v498_v9, 0.0  ;;  %v500_v25 = vadd.f32 %v945_v39, %v430_v11  ;;  %621 = vst [vmem:[%s963_s12 + $0xc0] sm:$0xff] %v557_v15  ;;  %622 = vst [vmem:[%s963_s12 + $0xc8] sm:$0xff] %v558_v16  ;;  %v431_v26 = vmul.f32 %v927_v21, %v361_v7  ;;  %v432_v27 = vmul.f32 %v927_v21, %v362_v12  ;;  %v377_v9 = vld [vmem:[%s914_s30 + $0x180] sm:$0xff]  ;;  %v379_v15 = vld [vmem:[%s914_s30 + $0x190] sm:$0xff] }
  0x3a   : > { %623 = vst [vmem:[%s963_s12 + $0xd0] sm:$0xff] %v559_v17  ;;  %624 = vst [vmem:[%s963_s12 + $0xd8] sm:$0xff] %v560_v18  ;;  %v433_v28 = vmul.f32 %v927_v21, %v363_v13  ;;  %v434_v29 = vmul.f32 %v927_v21, %v364_v14  ;;  %v563_v32 = vmax.f32 %v499_v24, 0.0  ;;  %v435_v34 = vmul.f32 %v927_v21, %v365_v19  ;;  %v378_v14 = vld [vmem:[%s914_s30 + $0x188] sm:$0xff]  ;;  %v380_v16 = vld [vmem:[%s914_s30 + $0x198] sm:$0xff] }
  0x3b   : > { %625 = vst [vmem:[%s963_s12 + $0xe0] sm:$0xff] %v561_v22  ;;  %626 = vst [vmem:[%s963_s12 + $0xe8] sm:$0xff] %v562_v23  ;;  %v564_v33 = vmax.f32 %v500_v25, 0.0  ;;  %v436_v35 = vmul.f32 %v927_v21, %v366_v20  ;;  %v501_v36 = vadd.f32 %v945_v39, %v431_v26  ;;  %v502_v37 = vadd.f32 %v945_v39, %v432_v27  ;;  %v381_v22 = vld [vmem:[%s914_s30 + $0x1a0] sm:$0xff]  ;;  %v382_v23 = vld [vmem:[%s914_s30 + $0x1a8] sm:$0xff] }
  0x3c   : > { %v503_v38 = vadd.f32 %v945_v39, %v433_v28  ;;  %v504_v40 = vadd.f32 %v945_v39, %v434_v29  ;;  %627 = vst [vmem:[%s963_s12 + $0xf0] sm:$0xff] %v563_v32  ;;  %v505_v42 = vadd.f32 %v945_v39, %v435_v34  ;;  %v437_v44 = vmul.f32 %v927_v21, %v367_v30  ;;  %v383_v32 = vld [vmem:[%s914_s30 + $0x1b0] sm:$0xff] }
  0x3d   : > { %628 = vst [vmem:[%s963_s12 + $0xf8] sm:$0xff] %v564_v33  ;;  %v506_v43 = vadd.f32 %v945_v39, %v436_v35  ;;  %v438_v45 = vmul.f32 %v927_v21, %v368_v31  ;;  %v565_v49 = vmax.f32 %v501_v36, 0.0  ;;  %v566_v50 = vmax.f32 %v502_v37, 0.0  ;;  %v384_v33 = vld [vmem:[%s914_s30 + $0x1b8] sm:$0xff] }
  0x3e   : > { %v567_v51 = vmax.f32 %v503_v38, 0.0  ;;  %v568_v52 = vmax.f32 %v504_v40, 0.0  ;;  %v569_v55 = vmax.f32 %v505_v42, 0.0  ;;  %v507_v57 = vadd.f32 %v945_v39, %v437_v44 }
  0x3f   : > { %v570_v56 = vmax.f32 %v506_v43, 0.0  ;;  %v508_v58 = vadd.f32 %v945_v39, %v438_v45  ;;  %629 = vst [vmem:[%s963_s12 + $0x100] sm:$0xff] %v565_v49  ;;  %630 = vst [vmem:[%s963_s12 + $0x108] sm:$0xff] %v566_v50  ;;  %v439_v59 = vmul.f32 %v927_v21, %v369_v41  ;;  %v440_v60 = vmul.f32 %v927_v21, %v370_v46  ;;  %v385_v43 = vld [vmem:[%s914_s30 + $0x1c0] sm:$0xff]  ;;  %v387_v49 = vld [vmem:[%s914_s30 + $0x1d0] sm:$0xff] }
  0x40   : > { %631 = vst [vmem:[%s963_s12 + $0x110] sm:$0xff] %v567_v51  ;;  %632 = vst [vmem:[%s963_s12 + $0x118] sm:$0xff] %v568_v52  ;;  %v441_v61 = vmul.f32 %v927_v21, %v371_v47  ;;  %v442_v62 = vmul.f32 %v927_v21, %v372_v48  ;;  %v571_v1 = vmax.f32 %v507_v57, 0.0  ;;  %v443_v3 = vmul.f32 %v927_v21, %v373_v53  ;;  %v386_v48 = vld [vmem:[%s914_s30 + $0x1c8] sm:$0xff]  ;;  %v388_v50 = vld [vmem:[%s914_s30 + $0x1d8] sm:$0xff] }
  0x41   : > { %633 = vst [vmem:[%s963_s12 + $0x120] sm:$0xff] %v569_v55  ;;  %634 = vst [vmem:[%s963_s12 + $0x128] sm:$0xff] %v570_v56  ;;  %v572_v2 = vmax.f32 %v508_v58, 0.0  ;;  %v444_v4 = vmul.f32 %v927_v21, %v374_v54  ;;  %v509_v5 = vadd.f32 %v945_v39, %v439_v59  ;;  %v510_v6 = vadd.f32 %v945_v39, %v440_v60  ;;  %v389_v55 = vld [vmem:[%s914_s30 + $0x1e0] sm:$0xff]  ;;  %v390_v56 = vld [vmem:[%s914_s30 + $0x1e8] sm:$0xff] }
  0x42   : > { %v511_v7 = vadd.f32 %v945_v39, %v441_v61  ;;  %v512_v8 = vadd.f32 %v945_v39, %v442_v62  ;;  %635 = vst [vmem:[%s963_s12 + $0x130] sm:$0xff] %v571_v1  ;;  %v513_v10 = vadd.f32 %v945_v39, %v443_v3  ;;  %v445_v12 = vmul.f32 %v927_v21, %v375_v63  ;;  %v391_v1 = vld [vmem:[%s914_s30 + $0x1f0] sm:$0xff] }
  0x43   : > { %636 = vst [vmem:[%s963_s12 + $0x138] sm:$0xff] %v572_v2  ;;  %v514_v11 = vadd.f32 %v945_v39, %v444_v4  ;;  %v446_v13 = vmul.f32 %v927_v21, %v376_v0  ;;  %v573_v17 = vmax.f32 %v509_v5, 0.0  ;;  %v574_v18 = vmax.f32 %v510_v6, 0.0  ;;  %v392_v2 = vld [vmem:[%s914_s30 + $0x1f8] sm:$0xff] }
  0x44   : > { %v575_v19 = vmax.f32 %v511_v7, 0.0  ;;  %v576_v20 = vmax.f32 %v512_v8, 0.0  ;;  %v577_v24 = vmax.f32 %v513_v10, 0.0  ;;  %v515_v26 = vadd.f32 %v945_v39, %v445_v12 }
  0x45   : > { %v578_v25 = vmax.f32 %v514_v11, 0.0  ;;  %v516_v27 = vadd.f32 %v945_v39, %v446_v13  ;;  %637 = vst [vmem:[%s963_s12 + $0x140] sm:$0xff] %v573_v17  ;;  %638 = vst [vmem:[%s963_s12 + $0x148] sm:$0xff] %v574_v18  ;;  %v447_v28 = vmul.f32 %v927_v21, %v377_v9  ;;  %v448_v29 = vmul.f32 %v927_v21, %v378_v14 }
  0x46   : > { %639 = vst [vmem:[%s963_s12 + $0x150] sm:$0xff] %v575_v19  ;;  %640 = vst [vmem:[%s963_s12 + $0x158] sm:$0xff] %v576_v20  ;;  %v449_v30 = vmul.f32 %v927_v21, %v379_v15  ;;  %v450_v31 = vmul.f32 %v927_v21, %v380_v16  ;;  %v579_v34 = vmax.f32 %v515_v26, 0.0  ;;  %v451_v36 = vmul.f32 %v927_v21, %v381_v22 }
  0x47   : > { %641 = vst [vmem:[%s963_s12 + $0x160] sm:$0xff] %v577_v24  ;;  %642 = vst [vmem:[%s963_s12 + $0x168] sm:$0xff] %v578_v25  ;;  %v580_v35 = vmax.f32 %v516_v27, 0.0  ;;  %v452_v37 = vmul.f32 %v927_v21, %v382_v23  ;;  %v517_v38 = vadd.f32 %v945_v39, %v447_v28  ;;  %v518_v40 = vadd.f32 %v945_v39, %v448_v29 }
  0x48   : > { %v519_v41 = vadd.f32 %v945_v39, %v449_v30  ;;  %v520_v42 = vadd.f32 %v945_v39, %v450_v31  ;;  %643 = vst [vmem:[%s963_s12 + $0x170] sm:$0xff] %v579_v34  ;;  %v521_v44 = vadd.f32 %v945_v39, %v451_v36  ;;  %v453_v46 = vmul.f32 %v927_v21, %v383_v32 }
  0x49   : > { %644 = vst [vmem:[%s963_s12 + $0x178] sm:$0xff] %v580_v35  ;;  %v522_v45 = vadd.f32 %v945_v39, %v452_v37  ;;  %v454_v47 = vmul.f32 %v927_v21, %v384_v33  ;;  %v581_v51 = vmax.f32 %v517_v38, 0.0  ;;  %v582_v52 = vmax.f32 %v518_v40, 0.0 }
  0x4a   : > { %v583_v53 = vmax.f32 %v519_v41, 0.0  ;;  %v584_v54 = vmax.f32 %v520_v42, 0.0  ;;  %v585_v57 = vmax.f32 %v521_v44, 0.0  ;;  %v523_v59 = vadd.f32 %v945_v39, %v453_v46 }
  0x4b   : > { %v586_v58 = vmax.f32 %v522_v45, 0.0  ;;  %v524_v60 = vadd.f32 %v945_v39, %v454_v47  ;;  %645 = vst [vmem:[%s963_s12 + $0x180] sm:$0xff] %v581_v51  ;;  %646 = vst [vmem:[%s963_s12 + $0x188] sm:$0xff] %v582_v52  ;;  %v455_v61 = vmul.f32 %v927_v21, %v385_v43  ;;  %v456_v62 = vmul.f32 %v927_v21, %v386_v48 }
  0x4c   : > { %647 = vst [vmem:[%s963_s12 + $0x190] sm:$0xff] %v583_v53  ;;  %648 = vst [vmem:[%s963_s12 + $0x198] sm:$0xff] %v584_v54  ;;  %v457_v63 = vmul.f32 %v927_v21, %v387_v49  ;;  %v458_v0 = vmul.f32 %v927_v21, %v388_v50  ;;  %v587_v3 = vmax.f32 %v523_v59, 0.0  ;;  %v459_v5 = vmul.f32 %v927_v21, %v389_v55 }
  0x4d   : > { %649 = vst [vmem:[%s963_s12 + $0x1a0] sm:$0xff] %v585_v57  ;;  %650 = vst [vmem:[%s963_s12 + $0x1a8] sm:$0xff] %v586_v58  ;;  %v588_v4 = vmax.f32 %v524_v60, 0.0  ;;  %v460_v6 = vmul.f32 %v927_v21, %v390_v56  ;;  %v525_v7 = vadd.f32 %v945_v39, %v455_v61  ;;  %v526_v8 = vadd.f32 %v945_v39, %v456_v62 }
  0x4e   : > { %v527_v9 = vadd.f32 %v945_v39, %v457_v63  ;;  %v528_v10 = vadd.f32 %v945_v39, %v458_v0  ;;  %651 = vst [vmem:[%s963_s12 + $0x1b0] sm:$0xff] %v587_v3  ;;  %v529_v11 = vadd.f32 %v945_v39, %v459_v5  ;;  %v461_v13 = vmul.f32 %v927_v21, %v391_v1 }
  0x4f   : > { %652 = vst [vmem:[%s963_s12 + $0x1b8] sm:$0xff] %v588_v4  ;;  %v530_v12 = vadd.f32 %v945_v39, %v460_v6  ;;  %v462_v14 = vmul.f32 %v927_v21, %v392_v2  ;;  %v589_v15 = vmax.f32 %v525_v7, 0.0  ;;  %v590_v16 = vmax.f32 %v526_v8, 0.0 }
  0x50   : > { %v591_v17 = vmax.f32 %v527_v9, 0.0  ;;  %v592_v18 = vmax.f32 %v528_v10, 0.0  ;;  %v593_v19 = vmax.f32 %v529_v11, 0.0  ;;  %v531_v22 = vadd.f32 %v945_v39, %v461_v13 }
  0x51   : > { %v594_v20 = vmax.f32 %v530_v12, 0.0  ;;  %v532_v23 = vadd.f32 %v945_v39, %v462_v14  ;;  %653 = vst [vmem:[%s963_s12 + $0x1c0] sm:$0xff] %v589_v15  ;;  %654 = vst [vmem:[%s963_s12 + $0x1c8] sm:$0xff] %v590_v16 }
  0x52   : > { %655 = vst [vmem:[%s963_s12 + $0x1d0] sm:$0xff] %v591_v17  ;;  %656 = vst [vmem:[%s963_s12 + $0x1d8] sm:$0xff] %v592_v18  ;;  %v595_v24 = vmax.f32 %v531_v22, 0.0 }
  0x53   : > { %657 = vst [vmem:[%s963_s12 + $0x1e0] sm:$0xff] %v593_v19  ;;  %658 = vst [vmem:[%s963_s12 + $0x1e8] sm:$0xff] %v594_v20  ;;  %v596_v21 = vmax.f32 %v532_v23, 0.0 }
  0x54   : > { %659 = vst [vmem:[%s963_s12 + $0x1f0] sm:$0xff] %v595_v24 }
  0x55   : > { %660 = vst [vmem:[%s963_s12 + $0x1f8] sm:$0xff] %v596_v21 }
  0x56 PF: > { %s15_s20 = sadd.s32 1, %s850_s20   ;;  %s1204_s18 = smov %s846_s19 }
  0x57   : > { %p12_p5 = scmp.ge.s32.totalorder %s15_s20, 6   ;;  %s1205_s19 = smov %s1207_s21 }
  0x59   :  { %14 = sbr.rel (!%p12_p5) target bundleno = 2 (0x2), region = 82 }

// kernel: generator_forward.25
= control target key start
LH: loop header
LB: loop body
LE: loop exit
PB: predicated region body
PF: predicated region fallthrough
CT: control target
= control target key end

     0   :  { %s1999_s12 = smov 0   ;;  %s2001_s13 = smov 0   ;;  %s2731_s0 = inlined_call_operand.vmem [shape: f32[1,2048,576], index: 0, kind: input, shape index: {}]   ;;  %s2732_s1 = inlined_call_operand.vmem [shape: f32[1,576,128], index: 1, kind: input, shape index: {}]   ;;  %s2733_s2 = inlined_call_operand.vmem [shape: f32[1,1,128], index: 2, kind: input, shape index: {}]   ;;  %s2734_s3 = inlined_call_operand.vmem [shape: f32[1,2048,128], index: 3, kind: output, shape index: {}]  }
   0x1   :  { %s2003_s14 = smov 0  }
   0x2 LB: > { %s28_s15 = sadd.s32 1, %s1972_s13  ;;  %p1504_p0 = scmp.ge.s32.totalorder %s1976_s14, 1  ;;  %s1976_s14 = sphi %s2003_s14, %s13_s14   ;;  %s1972_s13 = sphi %s2001_s13, %s2736_s13   ;;  %s1968_s12 = sphi %s1999_s12, %s2735_s12  }
   0x3   : > { %p30_p1 = scmp.ge.s32.totalorder %s28_s15, 8  ;;  %p196_p2 = scmp.lt.s32.totalorder %s1976_s14, 9 }
   0x5   : > { %s2738_s15 = smov (%p30_p1, %s28_s15), 0  ;;  %p197_p3 = pnand %p1504_p0, %p196_p2 }
   0x6   : > { %v444_v0 = vld [vmem:[%s2732_s1] sm:$0xff] (!%p197_p3)  ;;  %v445_v1 = vld [vmem:[%s2732_s1 + $0x8] sm:$0xff] (!%p197_p3)  ;;  %v1978_v3 = vmov (!%p197_p3), 0.0|0.0   ;;  %v446_v6 = vld [vmem:[%s2732_s1 + $0x10] sm:$0xff] (!%p197_p3)  ;;  %s1505_s5 = sshll.u32 (!%p197_p3), %s1968_s12, 5  ;;  %vm523_vm0 = vcmask (!%p197_p3), 523264  }
   0x7   : > { %200 = sbr.rel (%p197_p3) target bundleno = 457 (0x1c9), region = 32  ;;  %v476_v2 = vld [vmem:[%s2732_s1 + $0x100] sm:$0xff] (!%p197_p3)  ;;  %1648 = vmatprep.subr.bf16.mxu0 (!%p197_p3), %v1978_v3  ;;  %1760 = vmatprep.subr.bf16.mxu1 (!%p197_p3), %v1978_v3  ;;  %v1649_v4 = vpack.c.bf16 (!%p197_p3), %v445_v1, %v444_v0  ;;  %v477_v5 = vld [vmem:[%s2732_s1 + $0x108] sm:$0xff] (!%p197_p3)  ;;  %v447_v7 = vld [vmem:[%s2732_s1 + $0x18] sm:$0xff] (!%p197_p3)  ;;  %p249_p4 = scmp.lt.s32.totalorder (!%p197_p3), %s1505_s5, 255 }
   0x8   : > { %v2039_v8 = vpack.c.bf16 (!%p197_p3), %v477_v5, %v476_v2  ;;  %v478_v9 = vld [vmem:[%s2732_s1 + $0x110] sm:$0xff] (!%p197_p3)  ;;  %v479_v10 = vld [vmem:[%s2732_s1 + $0x118] sm:$0xff] (!%p197_p3)  ;;  %v1652_v11 = vpack.c.bf16 (!%p197_p3), %v447_v7, %v446_v6  ;;  %v448_v13 = vld [vmem:[%s2732_s1 + $0x20] sm:$0xff] (!%p197_p3) }
   0x9   : > { %1650 = vmatpush1.bf16.msra.mxu0 (!%p197_p3), %v1649_v4  ;;  %v2050_v12 = vpack.c.bf16 (!%p197_p3), %v479_v10, %v478_v9  ;;  %v449_v14 = vld [vmem:[%s2732_s1 + $0x28] sm:$0xff] (!%p197_p3)  ;;  %v480_v15 = vld [vmem:[%s2732_s1 + $0x120] sm:$0xff] (!%p197_p3)  ;;  %v450_v19 = vld [vmem:[%s2732_s1 + $0x30] sm:$0xff] (!%p197_p3) }
   0xa   : > { %1776 = vmatpush1.bf16.msra.mxu1 (!%p197_p3), %v2039_v8  ;;  %1651 = vmatprep.subr.bf16.mxu0 (!%p197_p3), %v1978_v3  ;;  %v481_v16 = vld [vmem:[%s2732_s1 + $0x128] sm:$0xff] (!%p197_p3)  ;;  %v1655_v17 = vpack.c.bf16 (!%p197_p3), %v449_v14, %v448_v13  ;;  %v451_v20 = vld [vmem:[%s2732_s1 + $0x38] sm:$0xff] (!%p197_p3)  ;;  %v482_v21 = vld [vmem:[%s2732_s1 + $0x130] sm:$0xff] (!%p197_p3) }
   0xb   : > { %1761 = vmatprep.subr.bf16.mxu1 (!%p197_p3), %v1978_v3  ;;  %v2067_v18 = vpack.c.bf16 (!%p197_p3), %v481_v16, %v480_v15  ;;  %v483_v22 = vld [vmem:[%s2732_s1 + $0x138] sm:$0xff] (!%p197_p3)  ;;  %v1658_v23 = vpack.c.bf16 (!%p197_p3), %v451_v20, %v450_v19  ;;  %v452_v25 = vld [vmem:[%s2732_s1 + $0x40] sm:$0xff] (!%p197_p3)  ;;  %v453_v26 = vld [vmem:[%s2732_s1 + $0x48] sm:$0xff] (!%p197_p3) }
   0xc   : > { %v2086_v24 = vpack.c.bf16 (!%p197_p3), %v483_v22, %v482_v21  ;;  %v484_v27 = vld [vmem:[%s2732_s1 + $0x140] sm:$0xff] (!%p197_p3)  ;;  %v485_v28 = vld [vmem:[%s2732_s1 + $0x148] sm:$0xff] (!%p197_p3)  ;;  %v1661_v29 = vpack.c.bf16 (!%p197_p3), %v453_v26, %v452_v25  ;;  %v454_v31 = vld [vmem:[%s2732_s1 + $0x50] sm:$0xff] (!%p197_p3) }
   0xd   : > { %1653 = vmatpush1.bf16.msra.mxu0 (!%p197_p3), %v1652_v11  ;;  %v2104_v30 = vpack.c.bf16 (!%p197_p3), %v485_v28, %v484_v27  ;;  %v455_v32 = vld [vmem:[%s2732_s1 + $0x58] sm:$0xff] (!%p197_p3)  ;;  %v486_v33 = vld [vmem:[%s2732_s1 + $0x150] sm:$0xff] (!%p197_p3)  ;;  %v456_v37 = vld [vmem:[%s2732_s1 + $0x60] sm:$0xff] (!%p197_p3) }
   0xe   : > { %1777 = vmatpush1.bf16.msra.mxu1 %v2050_v12  ;;  %1654 = vmatprep.subr.bf16.mxu0 %v1978_v3  ;;  %s2740_s5 = smov (!%p249_p4, %s1505_s5), 255  ;;  %v487_v34 = vld [vmem:[%s2732_s1 + $0x158] sm:$0xff]  ;;  %v1664_v35 = vpack.c.bf16 %v455_v32, %v454_v31  ;;  %v457_v38 = vld [vmem:[%s2732_s1 + $0x68] sm:$0xff]  ;;  %v488_v39 = vld [vmem:[%s2732_s1 + $0x160] sm:$0xff] }
   0xf   : > { %1762 = vmatprep.subr.bf16.mxu1 %v1978_v3  ;;  %s1864_s7 = smul.u32 40, %s2740_s5  ;;  %v2126_v36 = vpack.c.bf16 %v487_v34, %v486_v33  ;;  %v489_v40 = vld [vmem:[%s2732_s1 + $0x168] sm:$0xff]  ;;  %v1667_v43 = vpack.c.bf16 %v457_v38, %v456_v37  ;;  %v458_v45 = vld [vmem:[%s2732_s1 + $0x70] sm:$0xff]  ;;  %v459_v46 = vld [vmem:[%s2732_s1 + $0x78] sm:$0xff]  ;;  %s1508_s4 = sshll.u32 %s2740_s5, 3 }
  0x10   : > { %v2145_v44 = vpack.c.bf16 %v489_v40, %v488_v39  ;;  %v490_v47 = vld [vmem:[%s2732_s1 + $0x170] sm:$0xff]  ;;  %v491_v48 = vld [vmem:[%s2732_s1 + $0x178] sm:$0xff]  ;;  %v1670_v49 = vpack.c.bf16 %v459_v46, %v458_v45  ;;  %v460_v51 = vld [vmem:[%s2732_s1 + $0x80] sm:$0xff]  ;;  %s2650_s8 = scalar_lea.vmem %s2734_s3, %s1508_s4 }
  0x11   : > { %1656 = vmatpush1.bf16.msra.mxu0 %v1655_v17  ;;  %s2122_s21 = scalar_lea.vmem %s2731_s0, %s1864_s7  ;;  %v2162_v50 = vpack.c.bf16 %v491_v48, %v490_v47  ;;  %v461_v52 = vld [vmem:[%s2732_s1 + $0x88] sm:$0xff]  ;;  %v492_v53 = vld [vmem:[%s2732_s1 + $0x180] sm:$0xff]  ;;  %v462_v57 = vld [vmem:[%s2732_s1 + $0x90] sm:$0xff] }
  0x12   : > { %1778 = vmatpush1.bf16.msra.mxu1 %v2067_v18  ;;  %1657 = vmatprep.subr.bf16.mxu0 %v1978_v3  ;;  %v285_v41 = vld [vmem:[%s2122_s21 + $0x8] sm:$0xff]  ;;  %v327_v42 = vld [vmem:[%s2122_s21 + $0x158] sm:$0xff]  ;;  %v1673_v55 = vpack.c.bf16 %v461_v52, %v460_v51  ;;  %v494_v59 = vld [vmem:[%s2732_s1 + $0x190] sm:$0xff] }
  0x13   : > { %1763 = vmatprep.subr.bf16.mxu1 %v1978_v3  ;;  %684 = vmatprep.mubr.f32.mxu0 %v285_v41  ;;  %v493_v54 = vld [vmem:[%s2732_s1 + $0x188] sm:$0xff]  ;;  %v463_v58 = vld [vmem:[%s2732_s1 + $0x98] sm:$0xff]  ;;  %v464_v63 = vld [vmem:[%s2732_s1 + $0xa0] sm:$0xff] }
  0x14   : > { %949 = vmatprep.mubr.f32.mxu1 %v327_v42  ;;  %v2179_v56 = vpack.c.bf16 %v493_v54, %v492_v53  ;;  %v495_v60 = vld [vmem:[%s2732_s1 + $0x198] sm:$0xff]  ;;  %v1676_v61 = vpack.c.bf16 %v463_v58, %v462_v57  ;;  %v465_v0 = vld [vmem:[%s2732_s1 + $0xa8] sm:$0xff]  ;;  %v496_v1 = vld [vmem:[%s2732_s1 + $0x1a0] sm:$0xff] }
  0x15   : > { %1659 = vmatpush1.bf16.msra.mxu0 %v1658_v23  ;;  %v2196_v62 = vpack.c.bf16 %v495_v60, %v494_v59  ;;  %v497_v2 = vld [vmem:[%s2732_s1 + $0x1a8] sm:$0xff]  ;;  %v1679_v4 = vpack.c.bf16 %v465_v0, %v464_v63  ;;  %v466_v6 = vld [vmem:[%s2732_s1 + $0xb0] sm:$0xff]  ;;  %v467_v7 = vld [vmem:[%s2732_s1 + $0xb8] sm:$0xff] }
  0x16   : > { %1779 = vmatpush1.bf16.msra.mxu1 %v2086_v24  ;;  %1660 = vmatprep.subr.bf16.mxu0 %v1978_v3  ;;  %v2213_v5 = vpack.c.bf16 %v497_v2, %v496_v1  ;;  %v498_v9 = vld [vmem:[%s2732_s1 + $0x1b0] sm:$0xff]  ;;  %v499_v10 = vld [vmem:[%s2732_s1 + $0x1b8] sm:$0xff]  ;;  %v1682_v11 = vpack.c.bf16 %v467_v7, %v466_v6  ;;  %v468_v14 = vld [vmem:[%s2732_s1 + $0xc0] sm:$0xff] }
  0x17   : > { %1764 = vmatprep.subr.bf16.mxu1 %v1978_v3  ;;  %v2230_v13 = vpack.c.bf16 %v499_v10, %v498_v9  ;;  %v469_v15 = vld [vmem:[%s2732_s1 + $0xc8] sm:$0xff]  ;;  %v500_v16 = vld [vmem:[%s2732_s1 + $0x1c0] sm:$0xff]  ;;  %v470_v21 = vld [vmem:[%s2732_s1 + $0xd0] sm:$0xff] }
  0x18   : > { %v501_v17 = vld [vmem:[%s2732_s1 + $0x1c8] sm:$0xff]  ;;  %v1685_v19 = vpack.c.bf16 %v469_v15, %v468_v14  ;;  %v471_v22 = vld [vmem:[%s2732_s1 + $0xd8] sm:$0xff]  ;;  %v502_v23 = vld [vmem:[%s2732_s1 + $0x1d0] sm:$0xff] }
  0x19   : > { %1662 = vmatpush1.bf16.msra.mxu0 %v1661_v29  ;;  %v2247_v20 = vpack.c.bf16 %v501_v17, %v500_v16  ;;  %v503_v25 = vld [vmem:[%s2732_s1 + $0x1d8] sm:$0xff]  ;;  %v1688_v26 = vpack.c.bf16 %v471_v22, %v470_v21  ;;  %v472_v28 = vld [vmem:[%s2732_s1 + $0xe0] sm:$0xff]  ;;  %v473_v29 = vld [vmem:[%s2732_s1 + $0xe8] sm:$0xff] }
  0x1a   : > { %1780 = vmatpush1.bf16.msra.mxu1 %v2104_v30  ;;  %1663 = vmatprep.subr.bf16.mxu0 %v1978_v3  ;;  %v2264_v27 = vpack.c.bf16 %v503_v25, %v502_v23  ;;  %v504_v31 = vld [vmem:[%s2732_s1 + $0x1e0] sm:$0xff]  ;;  %v505_v32 = vld [vmem:[%s2732_s1 + $0x1e8] sm:$0xff]  ;;  %v1691_v33 = vpack.c.bf16 %v473_v29, %v472_v28  ;;  %v475_v37 = vld [vmem:[%s2732_s1 + $0xf8] sm:$0xff] }
  0x1b   : > { %1765 = vmatprep.subr.bf16.mxu1 %v1978_v3  ;;  %v2281_v34 = vpack.c.bf16 %v505_v32, %v504_v31  ;;  %v506_v38 = vld [vmem:[%s2732_s1 + $0x1f0] sm:$0xff]  ;;  %v507_v39 = vld [vmem:[%s2732_s1 + $0x1f8] sm:$0xff]  ;;  %v508_v40 = vld [vmem:[%s2732_s1 + $0x200] sm:$0xff] }
  0x1c   : > { %v509_v41 = vld [vmem:[%s2732_s1 + $0x208] sm:$0xff]  ;;  %v284_v46 = vld [vmem:[%s2122_s21] sm:$0xff]  ;;  %v510_v47 = vld [vmem:[%s2732_s1 + $0x210] sm:$0xff] }
  0x1d   : > { %1665 = vmatpush1.bf16.msra.mxu0 %v1664_v35  ;;  %v474_v35 = vld [vmem:[%s2732_s1 + $0xf0] sm:$0xff]  ;;  %v1744_v45 = vpack.c.bf16 %v509_v41, %v508_v40  ;;  %v511_v48 = vld [vmem:[%s2732_s1 + $0x218] sm:$0xff]  ;;  %v332_v52 = vld [vmem:[%s2122_s21 + $0x180] sm:$0xff] }
  0x1e   : > { %1781 = vmatpush1.bf16.msra.mxu1 %v2126_v36  ;;  %1666 = vmatprep.subr.bf16.mxu0 %v1978_v3  ;;  %v1694_v42 = vpack.c.bf16 %v475_v37, %v474_v35  ;;  %v290_v51 = vld [vmem:[%s2122_s21 + $0x30] sm:$0xff]  ;;  %v1748_v53 = vpack.c.bf16 %v511_v48, %v510_v47  ;;  %v289_v54 = vld [vmem:[%s2122_s21 + $0x28] sm:$0xff]  ;;  %v331_v58 = vld [vmem:[%s2122_s21 + $0x178] sm:$0xff] }
  0x1f   : > { %1766 = vmatprep.subr.bf16.mxu1 %v1978_v3  ;;  %v513_v57 = vld [vmem:[%s2732_s1 + $0x228] sm:$0xff]  ;;  %v295_v59 = vld [vmem:[%s2122_s21 + $0x58] sm:$0xff]  ;;  %v514_v63 = vld [vmem:[%s2732_s1 + $0x230] sm:$0xff] }
  0x20   : > { %v337_v60 = vld [vmem:[%s2122_s21 + $0x1a8] sm:$0xff]  ;;  %v515_v0 = vld [vmem:[%s2732_s1 + $0x238] sm:$0xff]  ;;  %v336_v1 = vld [vmem:[%s2122_s21 + $0x1a0] sm:$0xff] }
  0x21   : > { %1668 = vmatpush1.bf16.msra.mxu0 %v1667_v43  ;;  %v2304_v43 = vpack.c.bf16 %v507_v39, %v506_v38  ;;  %v300_v2 = vld [vmem:[%s2122_s21 + $0x80] sm:$0xff]  ;;  %v1756_v6 = vpack.c.bf16 %v515_v0, %v514_v63  ;;  %v299_v7 = vld [vmem:[%s2122_s21 + $0x78] sm:$0xff]  ;;  %v341_v9 = vld [vmem:[%s2122_s21 + $0x1c8] sm:$0xff] }
  0x22   : > { %1782 = vmatpush1.bf16.msra.mxu1 %v2145_v44  ;;  %1669 = vmatprep.subr.bf16.mxu0 %v1978_v3  ;;  %v305_v10 = vld [vmem:[%s2122_s21 + $0xa8] sm:$0xff]  ;;  %v346_v14 = vld [vmem:[%s2122_s21 + $0x1f0] sm:$0xff]  ;;  %v352_v16 = vld [vmem:[%s2122_s21 + $0x220] sm:$0xff] }
  0x23   : > { %1767 = vmatprep.subr.bf16.mxu1 %v1978_v3  ;;  %v310_v15 = vld [vmem:[%s2122_s21 + $0xd0] sm:$0xff]  ;;  %v351_v17 = vld [vmem:[%s2122_s21 + $0x218] sm:$0xff]  ;;  %v357_v21 = vld [vmem:[%s2122_s21 + $0x248] sm:$0xff] }
  0x24   : > { %v356_v22 = vld [vmem:[%s2122_s21 + $0x240] sm:$0xff]  ;;  %v362_v25 = vld [vmem:[%s2122_s21 + $0x270] sm:$0xff]  ;;  %v325_v28 = vld [vmem:[%s2122_s21 + $0x148] sm:$0xff] }
  0x25   : > { %1671 = vmatpush1.bf16.msra.mxu0 %v1670_v49  ;;  %v326_v49 = vld [vmem:[%s2122_s21 + $0x150] sm:$0xff]  ;;  %v320_v23 = vld [vmem:[%s2122_s21 + $0x120] sm:$0xff]  ;;  %v367_v29 = vld [vmem:[%s2122_s21 + $0x298] sm:$0xff] }
  0x26   : > { %1783 = vmatpush1.bf16.msra.mxu1 %v2162_v50  ;;  %1672 = vmatprep.subr.bf16.mxu0 %v1978_v3  ;;  %v366_v31 = vld [vmem:[%s2122_s21 + $0x290] sm:$0xff]  ;;  %v371_v35 = vld [vmem:[%s2122_s21 + $0x2b8] sm:$0xff]  ;;  %v377_v38 = vld [vmem:[%s2122_s21 + $0x2e8] sm:$0xff] }
  0x27   : > { %1768 = vmatprep.subr.bf16.mxu1 %v1978_v3  ;;  %v330_v32 = vld [vmem:[%s2122_s21 + $0x170] sm:$0xff]  ;;  %v335_v37 = vld [vmem:[%s2122_s21 + $0x198] sm:$0xff]  ;;  %v376_v39 = vld [vmem:[%s2122_s21 + $0x2e0] sm:$0xff] }
  0x28   : > { %v340_v40 = vld [vmem:[%s2122_s21 + $0x1c0] sm:$0xff]  ;;  %v382_v41 = vld [vmem:[%s2122_s21 + $0x310] sm:$0xff]  ;;  %v375_v0 = vld [vmem:[%s2122_s21 + $0x2d8] sm:$0xff] }
  0x29   : > { %1674 = vmatpush1.bf16.msra.mxu0 %v1673_v55  ;;  %v512_v55 = vld [vmem:[%s2732_s1 + $0x220] sm:$0xff]  ;;  %v386_v47 = vld [vmem:[%s2122_s21 + $0x330] sm:$0xff] }
  0x2a   : > { %1784 = vmatpush1.bf16.msra.mxu1 %v2179_v56  ;;  %1675 = vmatprep.subr.bf16.mxu0 %v1978_v3  ;;  %v350_v48 = vld [vmem:[%s2122_s21 + $0x210] sm:$0xff]  ;;  %v412_v63 = vld [vmem:[%s2122_s21 + $0x400] sm:$0xff] }
  0x2b   : > { %1769 = vmatprep.subr.bf16.mxu1 %v1978_v3 }
  0x2d   : > { %1677 = vmatpush1.bf16.msra.mxu0 %v1676_v61  ;;  %v294_v61 = vld [vmem:[%s2122_s21 + $0x50] sm:$0xff] }
  0x2e   : > { %1785 = vmatpush1.bf16.msra.mxu1 %v2196_v62  ;;  %1678 = vmatprep.subr.bf16.mxu0 %v1978_v3 }
  0x2f   : > { %1770 = vmatprep.subr.bf16.mxu1 %v1978_v3 }
  0x31   : > { %1680 = vmatpush1.bf16.msra.mxu0 %v1679_v4  ;;  %v342_v4 = vld [vmem:[%s2122_s21 + $0x1d0] sm:$0xff] }
  0x32   : > { %1786 = vmatpush1.bf16.msra.mxu1 %v2213_v5  ;;  %1681 = vmatprep.subr.bf16.mxu0 %v1978_v3 }
  0x33   : > { %1771 = vmatprep.subr.bf16.mxu1 %v1978_v3 }
  0x35   : > { %1683 = vmatpush1.bf16.msra.mxu0 %v1682_v11  ;;  %v304_v11 = vld [vmem:[%s2122_s21 + $0xa0] sm:$0xff] }
  0x36   : > { %1787 = vmatpush1.bf16.msra.mxu1 %v2230_v13  ;;  %1684 = vmatprep.subr.bf16.mxu0 %v1978_v3 }
  0x37   : > { %1772 = vmatprep.subr.bf16.mxu1 %v1978_v3 }
  0x39   : > { %1686 = vmatpush1.bf16.msra.mxu0 %v1685_v19  ;;  %v315_v19 = vld [vmem:[%s2122_s21 + $0xf8] sm:$0xff] }
  0x3a   : > { %1788 = vmatpush1.bf16.msra.mxu1 %v2247_v20  ;;  %1687 = vmatprep.subr.bf16.mxu0 %v1978_v3 }
  0x3b   : > { %1773 = vmatprep.subr.bf16.mxu1 %v1978_v3 }
  0x3d   : > { %1689 = vmatpush1.bf16.msra.mxu0 %v1688_v26  ;;  %v361_v26 = vld [vmem:[%s2122_s21 + $0x268] sm:$0xff] }
  0x3e   : > { %1789 = vmatpush1.bf16.msra.mxu1 %v2264_v27  ;;  %1690 = vmatprep.subr.bf16.mxu0 %v1978_v3 }
  0x3f   : > { %1774 = vmatprep.subr.bf16.mxu1 %v1978_v3 }
  0x41   : > { %1692 = vmatpush1.bf16.msra.mxu0 %v1691_v33  ;;  %v372_v33 = vld [vmem:[%s2122_s21 + $0x2c0] sm:$0xff] }
  0x42   : > { %1790 = vmatpush1.bf16.msra.mxu1 %v2281_v34  ;;  %1693 = vmatprep.subr.bf16.mxu0 %v1978_v3 }
  0x43   : > { %1775 = vmatprep.subr.bf16.mxu1 %v1978_v3 }
  0x45   : > { %1695 = vmatpush1.bf16.msra.mxu0 %v1694_v42  ;;  %v381_v42 = vld [vmem:[%s2122_s21 + $0x308] sm:$0xff] }
  0x46   : > { %1791 = vmatpush1.bf16.msra.mxu1 %v2304_v43  ;;  %1696 = vmatprep.subr.bf16.mxu0 %v1978_v3 }
  0x47   : > { %1745 = vmatprep.subr.bf16.mxu1 %v1744_v45 }
  0x48   : > { %685 = vmatmul.mubr.f32.vlgmr.msra.gmra.mrb[0].mxu0 %v284_v46  ;;  %v387_v46 = vld [vmem:[%s2122_s21 + $0x338] sm:$0xff] }
  0x49   : > { %950 = vmatmul.mubr.f32.vlgmr.msra.gmra.mrb[0].mxu1 %v326_v49  ;;  %1698 = vmatpush1.bf16.msra.mxu0 %v2039_v8  ;;  %v1752_v8 = vpack.c.bf16 %v513_v57, %v512_v55  ;;  %v392_v49 = vld [vmem:[%s2122_s21 + $0x360] sm:$0xff]  ;;  %v402_v57 = vld [vmem:[%s2122_s21 + $0x3b0] sm:$0xff] }
  0x4a   : > { %1747 = vmatpush3.bf16.msra.mxu1 %v1744_v45  ;;  %689 = vmatprep.mubr.f32.mxu0 %v290_v51  ;;  %v345_v45 = vld [vmem:[%s2122_s21 + $0x1e8] sm:$0xff]  ;;  %v391_v51 = vld [vmem:[%s2122_s21 + $0x358] sm:$0xff]  ;;  %v360_v55 = vld [vmem:[%s2122_s21 + $0x260] sm:$0xff] }
  0x4b   : > { %954 = vmatprep.mubr.f32.mxu1 %v332_v52  ;;  %1699 = vmatprep.subr.bf16.mxu0 %v1978_v3  ;;  %v355_v52 = vld [vmem:[%s2122_s21 + $0x238] sm:$0xff] }
  0x4c   : > { %690 = vmatmul.mubr.f32.gmra.mrb[2].mxu0 %v289_v54  ;;  %1749 = vmatprep.subr.bf16.mxu1 %v1748_v53  ;;  %v396_v54 = vld [vmem:[%s2122_s21 + $0x380] sm:$0xff] }
  0x4d   : > { %955 = vmatmul.mubr.f32.gmra.mrb[2].mxu1 %v331_v58  ;;  %694 = vmatprep.mubr.f32.mxu0 %v295_v59  ;;  %v401_v58 = vld [vmem:[%s2122_s21 + $0x3a8] sm:$0xff] }
  0x4e   : > { %959 = vmatprep.mubr.f32.mxu1 %v337_v60  ;;  %1701 = vmatpush1.bf16.msra.mxu0 %v2050_v12  ;;  %v347_v12 = vld [vmem:[%s2122_s21 + $0x1f8] sm:$0xff]  ;;  %v365_v59 = vld [vmem:[%s2122_s21 + $0x288] sm:$0xff] }
  0x4f   : > { %1702 = vmatprep.subr.bf16.mxu0 %v1978_v3  ;;  %1751 = vmatpush3.bf16.msra.mxu1 %v1748_v53  ;;  %v397_v53 = vld [vmem:[%s2122_s21 + $0x388] sm:$0xff]  ;;  %v407_v60 = vld [vmem:[%s2122_s21 + $0x3d8] sm:$0xff] }
  0x50   : > { %695 = vmatmul.mubr.f32.gmra.mrb[4].mxu0 %v294_v61  ;;  %1753 = vmatprep.subr.bf16.mxu1 %v1752_v8  ;;  %v370_v61 = vld [vmem:[%s2122_s21 + $0x2b0] sm:$0xff] }
  0x51   : > { %960 = vmatmul.mubr.f32.gmra.mrb[4].mxu1 %v336_v1  ;;  %699 = vmatprep.mubr.f32.mxu0 %v300_v2  ;;  %v417_v1 = vld [vmem:[%s2122_s21 + $0x428] sm:$0xff]  ;;  %v374_v2 = vld [vmem:[%s2122_s21 + $0x2d0] sm:$0xff] }
  0x52   : > { %964 = vmatprep.mubr.f32.mxu1 %v342_v4  ;;  %1704 = vmatpush1.bf16.msra.mxu0 %v2067_v18  ;;  %v309_v18 = vld [vmem:[%s2122_s21 + $0xc8] sm:$0xff]  ;;  %v380_v4 = vld [vmem:[%s2122_s21 + $0x300] sm:$0xff] }
  0x53   : > { %1705 = vmatprep.subr.bf16.mxu0 %v1978_v3  ;;  %1755 = vmatpush3.bf16.msra.mxu1 %v1752_v8  ;;  %v406_v8 = vld [vmem:[%s2122_s21 + $0x3d0] sm:$0xff] }
  0x54   : > { %700 = vmatmul.mubr.f32.gmra.mrb[6].mxu0 %v299_v7  ;;  %1757 = vmatprep.subr.bf16.mxu1 %v1756_v6  ;;  %v379_v7 = vld [vmem:[%s2122_s21 + $0x2f8] sm:$0xff] }
  0x55   : > { %965 = vmatmul.mubr.f32.gmra.mrb[6].mxu1 %v341_v9  ;;  %704 = vmatprep.mubr.f32.mxu0 %v305_v10  ;;  %v421_v9 = vld [vmem:[%s2122_s21 + $0x448] sm:$0xff] }
  0x56   : > { %969 = vmatprep.mubr.f32.mxu1 %v347_v12  ;;  %1707 = vmatpush1.bf16.msra.mxu0 %v2086_v24  ;;  %v314_v24 = vld [vmem:[%s2122_s21 + $0xf0] sm:$0xff]  ;;  %v385_v10 = vld [vmem:[%s2122_s21 + $0x328] sm:$0xff]  ;;  %v427_v12 = vld [vmem:[%s2122_s21 + $0x478] sm:$0xff] }
  0x57   : > { %1708 = vmatprep.subr.bf16.mxu0 %v1978_v3  ;;  %1759 = vmatpush3.bf16.msra.mxu1 %v1756_v6  ;;  %v422_v6 = vld [vmem:[%s2122_s21 + $0x450] sm:$0xff] }
  0x58   : > { %705 = vmatmul.mubr.f32.gmra.mrb[8].mxu0 %v304_v11  ;;  %v384_v11 = vld [vmem:[%s2122_s21 + $0x320] sm:$0xff] }
  0x59   : > { %970 = vmatmul.mubr.f32.gmra.mrb[8].mxu1 %v346_v14  ;;  %709 = vmatprep.mubr.f32.mxu0 %v310_v15  ;;  %v426_v14 = vld [vmem:[%s2122_s21 + $0x470] sm:$0xff] }
  0x5a   : > { %974 = vmatprep.mubr.f32.mxu1 %v352_v16  ;;  %1710 = vmatpush1.bf16.msra.mxu0 %v2104_v30  ;;  %v319_v30 = vld [vmem:[%s2122_s21 + $0x118] sm:$0xff]  ;;  %v390_v15 = vld [vmem:[%s2122_s21 + $0x350] sm:$0xff]  ;;  %v432_v16 = vld [vmem:[%s2122_s21 + $0x4a0] sm:$0xff] }
  0x5b   : > { %1711 = vmatprep.subr.bf16.mxu0 %v1978_v3 }
  0x5c   : > { %710 = vmatmul.mubr.f32.gmra.mrb[10].mxu0 %v309_v18  ;;  %v389_v18 = vld [vmem:[%s2122_s21 + $0x348] sm:$0xff] }
  0x5d   : > { %975 = vmatmul.mubr.f32.gmra.mrb[10].mxu1 %v351_v17  ;;  %714 = vmatprep.mubr.f32.mxu0 %v315_v19  ;;  %v431_v17 = vld [vmem:[%s2122_s21 + $0x498] sm:$0xff] }
  0x5e   : > { %979 = vmatprep.mubr.f32.mxu1 %v357_v21  ;;  %1713 = vmatpush1.bf16.msra.mxu0 %v2126_v36  ;;  %v324_v36 = vld [vmem:[%s2122_s21 + $0x140] sm:$0xff]  ;;  %v395_v19 = vld [vmem:[%s2122_s21 + $0x378] sm:$0xff]  ;;  %v437_v21 = vld [vmem:[%s2122_s21 + $0x4c8] sm:$0xff] }
  0x5f   : > { %1714 = vmatprep.subr.bf16.mxu0 %v1978_v3 }
  0x60   : > { %715 = vmatmul.mubr.f32.gmra.mrb[12].mxu0 %v314_v24  ;;  %v394_v24 = vld [vmem:[%s2122_s21 + $0x370] sm:$0xff] }
  0x61   : > { %980 = vmatmul.mubr.f32.gmra.mrb[12].mxu1 %v356_v22  ;;  %719 = vmatprep.mubr.f32.mxu0 %v320_v23  ;;  %v436_v22 = vld [vmem:[%s2122_s21 + $0x4c0] sm:$0xff] }
  0x62   : > { %984 = vmatprep.mubr.f32.mxu1 %v362_v25  ;;  %1716 = vmatpush1.bf16.msra.mxu0 %v2145_v44  ;;  %v329_v44 = vld [vmem:[%s2122_s21 + $0x168] sm:$0xff]  ;;  %v400_v23 = vld [vmem:[%s2122_s21 + $0x3a0] sm:$0xff]  ;;  %v442_v25 = vld [vmem:[%s2122_s21 + $0x4f0] sm:$0xff] }
  0x63   : > { %1717 = vmatprep.subr.bf16.mxu0 %v1978_v3 }
  0x64   : > { %720 = vmatmul.mubr.f32.gmra.mrb[14].mxu0 %v319_v30  ;;  %v399_v30 = vld [vmem:[%s2122_s21 + $0x398] sm:$0xff] }
  0x65   : > { %985 = vmatmul.mubr.f32.gmra.mrb[14].mxu1 %v361_v26  ;;  %724 = vmatprep.mubr.f32.mxu0 %v325_v28  ;;  %v441_v26 = vld [vmem:[%s2122_s21 + $0x4e8] sm:$0xff] }
  0x66   : > { %989 = vmatprep.mubr.f32.mxu1 %v367_v29  ;;  %1719 = vmatpush1.bf16.msra.mxu0 %v2162_v50  ;;  %v334_v50 = vld [vmem:[%s2122_s21 + $0x190] sm:$0xff]  ;;  %v405_v28 = vld [vmem:[%s2122_s21 + $0x3c8] sm:$0xff]  ;;  %v288_v29 = vld [vmem:[%s2122_s21 + $0x20] sm:$0xff] }
  0x67   : > { %1720 = vmatprep.subr.bf16.mxu0 %v1978_v3 }
  0x68   : > { %725 = vmatmul.mubr.f32.gmra.mrb[16].mxu0 %v324_v36  ;;  %v404_v36 = vld [vmem:[%s2122_s21 + $0x3c0] sm:$0xff] }
  0x69   : > { %990 = vmatmul.mubr.f32.gmra.mrb[16].mxu1 %v366_v31  ;;  %729 = vmatprep.mubr.f32.mxu0 %v330_v32  ;;  %v293_v31 = vld [vmem:[%s2122_s21 + $0x48] sm:$0xff]  ;;  %v410_v32 = vld [vmem:[%s2122_s21 + $0x3f0] sm:$0xff] }
  0x6a   : > { %994 = vmatprep.mubr.f32.mxu1 %v372_v33  ;;  %1722 = vmatpush1.bf16.msra.mxu0 %v2179_v56  ;;  %v339_v56 = vld [vmem:[%s2122_s21 + $0x1b8] sm:$0xff]  ;;  %v298_v33 = vld [vmem:[%s2122_s21 + $0x70] sm:$0xff] }
  0x6b   : > { %1723 = vmatprep.subr.bf16.mxu0 %v1978_v3 }
  0x6c   : > { %730 = vmatmul.mubr.f32.gmra.mrb[18].mxu0 %v329_v44  ;;  %v409_v44 = vld [vmem:[%s2122_s21 + $0x3e8] sm:$0xff] }
  0x6d   : > { %995 = vmatmul.mubr.f32.gmra.mrb[18].mxu1 %v371_v35  ;;  %734 = vmatprep.mubr.f32.mxu0 %v335_v37  ;;  %v303_v35 = vld [vmem:[%s2122_s21 + $0x98] sm:$0xff] }
  0x6e   : > { %999 = vmatprep.mubr.f32.mxu1 %v377_v38  ;;  %1725 = vmatpush1.bf16.msra.mxu0 %v2196_v62  ;;  %v344_v62 = vld [vmem:[%s2122_s21 + $0x1e0] sm:$0xff]  ;;  %v415_v37 = vld [vmem:[%s2122_s21 + $0x418] sm:$0xff] }
  0x6f   : > { %1726 = vmatprep.subr.bf16.mxu0 %v1978_v3  ;;  %v308_v38 = vld [vmem:[%s2122_s21 + $0xc0] sm:$0xff] }
  0x70   : > { %735 = vmatmul.mubr.f32.gmra.mrb[20].mxu0 %v334_v50  ;;  %v414_v50 = vld [vmem:[%s2122_s21 + $0x410] sm:$0xff] }
  0x71   : > { %1000 = vmatmul.mubr.f32.gmra.mrb[20].mxu1 %v376_v39  ;;  %739 = vmatprep.mubr.f32.mxu0 %v340_v40  ;;  %v313_v39 = vld [vmem:[%s2122_s21 + $0xe8] sm:$0xff]  ;;  %v420_v40 = vld [vmem:[%s2122_s21 + $0x440] sm:$0xff] }
  0x72   : > { %1004 = vmatprep.mubr.f32.mxu1 %v382_v41  ;;  %1728 = vmatpush1.bf16.msra.mxu0 %v2213_v5  ;;  %v349_v5 = vld [vmem:[%s2122_s21 + $0x208] sm:$0xff]  ;;  %v318_v41 = vld [vmem:[%s2122_s21 + $0x110] sm:$0xff] }
  0x73   : > { %1729 = vmatprep.subr.bf16.mxu0 %v1978_v3 }
  0x74   : > { %740 = vmatmul.mubr.f32.gmra.mrb[22].mxu0 %v339_v56  ;;  %v419_v56 = vld [vmem:[%s2122_s21 + $0x438] sm:$0xff] }
  0x75   : > { %1005 = vmatmul.mubr.f32.gmra.mrb[22].mxu1 %v381_v42  ;;  %744 = vmatprep.mubr.f32.mxu0 %v345_v45  ;;  %v323_v42 = vld [vmem:[%s2122_s21 + $0x138] sm:$0xff]  ;;  %v425_v45 = vld [vmem:[%s2122_s21 + $0x468] sm:$0xff] }
  0x76   : > { %1009 = vmatprep.mubr.f32.mxu1 %v387_v46  ;;  %1731 = vmatpush1.bf16.msra.mxu0 %v2230_v13  ;;  %v354_v13 = vld [vmem:[%s2122_s21 + $0x230] sm:$0xff]  ;;  %v328_v46 = vld [vmem:[%s2122_s21 + $0x160] sm:$0xff] }
  0x77   : > { %1732 = vmatprep.subr.bf16.mxu0 %v1978_v3 }
  0x78   : > { %745 = vmatmul.mubr.f32.gmra.mrb[24].mxu0 %v344_v62  ;;  %v424_v62 = vld [vmem:[%s2122_s21 + $0x460] sm:$0xff] }
  0x79   : > { %1010 = vmatmul.mubr.f32.gmra.mrb[24].mxu1 %v386_v47  ;;  %749 = vmatprep.mubr.f32.mxu0 %v350_v48  ;;  %v333_v47 = vld [vmem:[%s2122_s21 + $0x188] sm:$0xff]  ;;  %v430_v48 = vld [vmem:[%s2122_s21 + $0x490] sm:$0xff] }
  0x7a   : > { %1014 = vmatprep.mubr.f32.mxu1 %v392_v49  ;;  %1734 = vmatpush1.bf16.msra.mxu0 %v2247_v20  ;;  %v359_v20 = vld [vmem:[%s2122_s21 + $0x258] sm:$0xff]  ;;  %v338_v49 = vld [vmem:[%s2122_s21 + $0x1b0] sm:$0xff] }
  0x7b   : > { %1735 = vmatprep.subr.bf16.mxu0 %v1978_v3 }
  0x7c   : > { %750 = vmatmul.mubr.f32.gmra.mrb[26].mxu0 %v349_v5  ;;  %v429_v5 = vld [vmem:[%s2122_s21 + $0x488] sm:$0xff] }
  0x7d   : > { %1015 = vmatmul.mubr.f32.gmra.mrb[26].mxu1 %v391_v51  ;;  %754 = vmatprep.mubr.f32.mxu0 %v355_v52  ;;  %v343_v51 = vld [vmem:[%s2122_s21 + $0x1d8] sm:$0xff] }
  0x7e   : > { %1019 = vmatprep.mubr.f32.mxu1 %v397_v53  ;;  %1737 = vmatpush1.bf16.msra.mxu0 %v2264_v27  ;;  %v364_v27 = vld [vmem:[%s2122_s21 + $0x280] sm:$0xff]  ;;  %v435_v52 = vld [vmem:[%s2122_s21 + $0x4b8] sm:$0xff] }
  0x7f   : > { %1738 = vmatprep.subr.bf16.mxu0 %v1978_v3  ;;  %v348_v53 = vld [vmem:[%s2122_s21 + $0x200] sm:$0xff] }
  0x80   : > { %755 = vmatmul.mubr.f32.gmra.mrb[28].mxu0 %v354_v13  ;;  %v434_v13 = vld [vmem:[%s2122_s21 + $0x4b0] sm:$0xff] }
  0x81   : > { %1020 = vmatmul.mubr.f32.gmra.mrb[28].mxu1 %v396_v54  ;;  %759 = vmatprep.mubr.f32.mxu0 %v360_v55  ;;  %v353_v54 = vld [vmem:[%s2122_s21 + $0x228] sm:$0xff]  ;;  %v440_v55 = vld [vmem:[%s2122_s21 + $0x4e0] sm:$0xff] }
  0x82   : > { %1024 = vmatprep.mubr.f32.mxu1 %v402_v57  ;;  %1740 = vmatpush1.bf16.msra.mxu0 %v2281_v34  ;;  %v411_v34 = vld [vmem:[%s2122_s21 + $0x3f8] sm:$0xff]  ;;  %v358_v57 = vld [vmem:[%s2122_s21 + $0x250] sm:$0xff] }
  0x83   : > { %1741 = vmatprep.subr.bf16.mxu0 %v1978_v3  ;;  %v369_v3 = vld [vmem:[%s2122_s21 + $0x2a8] sm:$0xff] }
  0x84   : > { %760 = vmatmul.mubr.f32.gmra.mrb[30].mxu0 %v359_v20  ;;  %v439_v20 = vld [vmem:[%s2122_s21 + $0x4d8] sm:$0xff] }
  0x85   : > { %1025 = vmatmul.mubr.f32.gmra.mrb[30].mxu1 %v401_v58  ;;  %764 = vmatprep.mubr.f32.mxu0 %v365_v59  ;;  %v363_v58 = vld [vmem:[%s2122_s21 + $0x278] sm:$0xff] }
  0x86   : > { %1029 = vmatprep.mubr.f32.mxu1 %v407_v60  ;;  %1743 = vmatpush1.bf16.msra.mxu0 %v2304_v43  ;;  %v416_v43 = vld [vmem:[%s2122_s21 + $0x420] sm:$0xff]  ;;  %v287_v59 = vld [vmem:[%s2122_s21 + $0x18] sm:$0xff] }
  0x87   : > { %v368_v60 = vld [vmem:[%s2122_s21 + $0x2a0] sm:$0xff] }
  0x88   : > { %765 = vmatmul.mubr.f32.gmra.mrb[32].mxu0 %v364_v27  ;;  %v286_v27 = vld [vmem:[%s2122_s21 + $0x10] sm:$0xff] }
  0x89   : > { %1030 = vmatmul.mubr.f32.gmra.mrb[32].mxu1 %v406_v8  ;;  %769 = vmatprep.mubr.f32.mxu0 %v370_v61  ;;  %v373_v8 = vld [vmem:[%s2122_s21 + $0x2c8] sm:$0xff]  ;;  %v292_v61 = vld [vmem:[%s2122_s21 + $0x40] sm:$0xff] }
  0x8a   : > { %1034 = vmatprep.mubr.f32.mxu1 %v412_v63  ;;  %v378_v63 = vld [vmem:[%s2122_s21 + $0x2f0] sm:$0xff] }
  0x8c   : > { %770 = vmatmul.mubr.f32.gmra.mrb[34].mxu0 %v369_v3  ;;  %v291_v3 = vld [vmem:[%s2122_s21 + $0x38] sm:$0xff] }
  0x8d   : > { %1035 = vmatmul.mubr.f32.gmra.mrb[34].mxu1 %v411_v34  ;;  %774 = vmatprep.mubr.f32.mxu0 %v375_v0  ;;  %v383_v34 = vld [vmem:[%s2122_s21 + $0x318] sm:$0xff]  ;;  %v297_v0 = vld [vmem:[%s2122_s21 + $0x68] sm:$0xff] }
  0x8e   : > { %1039 = vmatprep.mubr.f32.mxu1 %v417_v1  ;;  %v388_v1 = vld [vmem:[%s2122_s21 + $0x340] sm:$0xff] }
  0x90   : > { %775 = vmatmul.mubr.f32.gmra.mrb[36].mxu0 %v374_v2  ;;  %v296_v2 = vld [vmem:[%s2122_s21 + $0x60] sm:$0xff] }
  0x91   : > { %1040 = vmatmul.mubr.f32.gmra.mrb[36].mxu1 %v416_v43  ;;  %779 = vmatprep.mubr.f32.mxu0 %v380_v4  ;;  %v393_v43 = vld [vmem:[%s2122_s21 + $0x368] sm:$0xff]  ;;  %v302_v4 = vld [vmem:[%s2122_s21 + $0x90] sm:$0xff] }
  0x92   : > { %1044 = vmatprep.mubr.f32.mxu1 %v422_v6  ;;  %v398_v6 = vld [vmem:[%s2122_s21 + $0x390] sm:$0xff] }
  0x94   : > { %780 = vmatmul.mubr.f32.gmra.mrb[38].mxu0 %v379_v7  ;;  %v301_v7 = vld [vmem:[%s2122_s21 + $0x88] sm:$0xff] }
  0x95   : > { %1045 = vmatmul.mubr.f32.gmra.mrb[38].mxu1 %v421_v9  ;;  %784 = vmatprep.mubr.f32.mxu0 %v385_v10  ;;  %v403_v9 = vld [vmem:[%s2122_s21 + $0x3b8] sm:$0xff] }
  0x96   : > { %1049 = vmatprep.mubr.f32.mxu1 %v427_v12  ;;  %v307_v10 = vld [vmem:[%s2122_s21 + $0xb8] sm:$0xff]  ;;  %v408_v12 = vld [vmem:[%s2122_s21 + $0x3e0] sm:$0xff] }
  0x98   : > { %785 = vmatmul.mubr.f32.gmra.mrb[40].mxu0 %v384_v11  ;;  %v306_v11 = vld [vmem:[%s2122_s21 + $0xb0] sm:$0xff] }
  0x99   : > { %1050 = vmatmul.mubr.f32.gmra.mrb[40].mxu1 %v426_v14  ;;  %789 = vmatprep.mubr.f32.mxu0 %v390_v15  ;;  %v413_v14 = vld [vmem:[%s2122_s21 + $0x408] sm:$0xff]  ;;  %v312_v15 = vld [vmem:[%s2122_s21 + $0xe0] sm:$0xff] }
  0x9a   : > { %1054 = vmatprep.mubr.f32.mxu1 %v432_v16  ;;  %v418_v16 = vld [vmem:[%s2122_s21 + $0x430] sm:$0xff] }
  0x9c   : > { %790 = vmatmul.mubr.f32.gmra.mrb[42].mxu0 %v389_v18  ;;  %v311_v18 = vld [vmem:[%s2122_s21 + $0xd8] sm:$0xff] }
  0x9d   : > { %1055 = vmatmul.mubr.f32.gmra.mrb[42].mxu1 %v431_v17  ;;  %794 = vmatprep.mubr.f32.mxu0 %v395_v19  ;;  %v423_v17 = vld [vmem:[%s2122_s21 + $0x458] sm:$0xff]  ;;  %v317_v19 = vld [vmem:[%s2122_s21 + $0x108] sm:$0xff] }
  0x9e   : > { %1059 = vmatprep.mubr.f32.mxu1 %v437_v21  ;;  %v428_v21 = vld [vmem:[%s2122_s21 + $0x480] sm:$0xff] }
  0xa0   : > { %795 = vmatmul.mubr.f32.gmra.mrb[44].mxu0 %v394_v24  ;;  %v316_v24 = vld [vmem:[%s2122_s21 + $0x100] sm:$0xff] }
  0xa1   : > { %1060 = vmatmul.mubr.f32.gmra.mrb[44].mxu1 %v436_v22  ;;  %799 = vmatprep.mubr.f32.mxu0 %v400_v23  ;;  %v433_v22 = vld [vmem:[%s2122_s21 + $0x4a8] sm:$0xff]  ;;  %v322_v23 = vld [vmem:[%s2122_s21 + $0x130] sm:$0xff] }
  0xa2   : > { %1064 = vmatprep.mubr.f32.mxu1 %v442_v25  ;;  %v438_v25 = vld [vmem:[%s2122_s21 + $0x4d0] sm:$0xff] }
  0xa4   : > { %800 = vmatmul.mubr.f32.gmra.mrb[46].mxu0 %v399_v30  ;;  %v321_v30 = vld [vmem:[%s2122_s21 + $0x128] sm:$0xff] }
  0xa5   : > { %1065 = vmatmul.mubr.f32.gmra.mrb[46].mxu1 %v441_v26  ;;  %804 = vmatprep.mubr.f32.mxu0 %v405_v28  ;;  %v443_v26 = vld [vmem:[%s2122_s21 + $0x4f8] sm:$0xff] }
  0xa6   : > { %1600 = vmatprep.mubr.msk.f32.mxu1 %vm523_vm0, %v288_v29 }
  0xa8   : > { %805 = vmatmul.mubr.f32.gmra.mrb[48].mxu0 %v404_v36 }
  0xa9   : > { %1601 = vmatmul.mubr.msk.f32.vlgmr.msra.gmra.mrb[48].mxu1 %vm523_vm0, %v293_v31  ;;  %809 = vmatprep.mubr.f32.mxu0 %v410_v32 }
  0xaa   : > { %1603 = vmatprep.mubr.msk.f32.mxu1 %vm523_vm0, %v298_v33 }
  0xac   : > { %810 = vmatmul.mubr.f32.gmra.mrb[50].mxu0 %v409_v44 }
  0xad   : > { %1604 = vmatmul.mubr.msk.f32.gmra.mrb[50].mxu1 %vm523_vm0, %v303_v35  ;;  %814 = vmatprep.mubr.f32.mxu0 %v415_v37 }
  0xae   : > { %1606 = vmatprep.mubr.msk.f32.mxu1 %vm523_vm0, %v308_v38 }
  0xb0   : > { %815 = vmatmul.mubr.f32.gmra.mrb[52].mxu0 %v414_v50 }
  0xb1   : > { %1607 = vmatmul.mubr.msk.f32.gmra.mrb[52].mxu1 %vm523_vm0, %v313_v39  ;;  %819 = vmatprep.mubr.f32.mxu0 %v420_v40 }
  0xb2   : > { %1609 = vmatprep.mubr.msk.f32.mxu1 %vm523_vm0, %v318_v41 }
  0xb4   : > { %820 = vmatmul.mubr.f32.gmra.mrb[54].mxu0 %v419_v56 }
  0xb5   : > { %1610 = vmatmul.mubr.msk.f32.gmra.mrb[54].mxu1 %vm523_vm0, %v323_v42  ;;  %824 = vmatprep.mubr.f32.mxu0 %v425_v45  ;;  %v2551_v45 = vld [vmem:[%s2733_s2] ss:$0 sm:$0xff] }
  0xb6   : > { %1612 = vmatprep.mubr.msk.f32.mxu1 %vm523_vm0, %v328_v46 }
  0xb8   : > { %825 = vmatmul.mubr.f32.gmra.mrb[56].mxu0 %v424_v62 }
  0xb9   : > { %1613 = vmatmul.mubr.msk.f32.gmra.mrb[56].mxu1 %vm523_vm0, %v333_v47  ;;  %829 = vmatprep.mubr.f32.mxu0 %v430_v48 }
  0xba   : > { %1615 = vmatprep.mubr.msk.f32.mxu1 %vm523_vm0, %v338_v49 }
  0xbc   : > { %830 = vmatmul.mubr.f32.gmra.mrb[58].mxu0 %v429_v5 }
  0xbd   : > { %1616 = vmatmul.mubr.msk.f32.gmra.mrb[58].mxu1 %vm523_vm0, %v343_v51  ;;  %834 = vmatprep.mubr.f32.mxu0 %v435_v52 }
  0xbe   : > { %1618 = vmatprep.mubr.msk.f32.mxu1 %vm523_vm0, %v348_v53 }
  0xc0   : > { %835 = vmatmul.mubr.f32.gmra.mrb[60].mxu0 %v434_v13 }
  0xc1   : > { %1619 = vmatmul.mubr.msk.f32.gmra.mrb[60].mxu1 %vm523_vm0, %v353_v54  ;;  %839 = vmatprep.mubr.f32.mxu0 %v440_v55 }
  0xc2   : > { %1621 = vmatprep.mubr.msk.f32.mxu1 %vm523_vm0, %v358_v57 }
  0xc4   : > { %840 = vmatmul.mubr.f32.gmra.mrb[62].mxu0 %v439_v20 }
  0xc5   : > { %1622 = vmatmul.mubr.msk.f32.gmra.mrb[62].mxu1 %vm523_vm0, %v363_v58  ;;  %909 = vmatprep.mubr.f32.mxu0 %v287_v59 }
  0xc6   : > { %1624 = vmatprep.mubr.msk.f32.mxu1 %vm523_vm0, %v368_v60 }
  0xc8   : > { %910 = vmatmul.mubr.f32.vlgmr.msra.gmra.mrb[0].mxu0 %v286_v27 }
  0xc9   : > { %1625 = vmatmul.mubr.msk.f32.gmra.mrb[64].mxu1 %vm523_vm0, %v373_v8  ;;  %914 = vmatprep.mubr.f32.mxu0 %v292_v61 }
  0xca   : > { %1627 = vmatprep.mubr.msk.f32.mxu1 %vm523_vm0, %v378_v63 }
  0xcc   : > { %915 = vmatmul.mubr.f32.gmra.mrb[2].mxu0 %v291_v3 }
  0xcd   : > { %1628 = vmatmul.mubr.msk.f32.gmra.mrb[66].mxu1 %vm523_vm0, %v383_v34  ;;  %919 = vmatprep.mubr.f32.mxu0 %v297_v0 }
  0xce   : > { %1630 = vmatprep.mubr.msk.f32.mxu1 %vm523_vm0, %v388_v1 }
  0xd0   : > { %920 = vmatmul.mubr.f32.gmra.mrb[4].mxu0 %v296_v2 }
  0xd1   : > { %1631 = vmatmul.mubr.msk.f32.gmra.mrb[68].mxu1 %vm523_vm0, %v393_v43  ;;  %924 = vmatprep.mubr.f32.mxu0 %v302_v4 }
  0xd2   : > { %1633 = vmatprep.mubr.msk.f32.mxu1 %vm523_vm0, %v398_v6 }
  0xd4   : > { %925 = vmatmul.mubr.f32.gmra.mrb[6].mxu0 %v301_v7 }
  0xd5   : > { %1634 = vmatmul.mubr.msk.f32.gmra.mrb[70].mxu1 %vm523_vm0, %v403_v9  ;;  %929 = vmatprep.mubr.f32.mxu0 %v307_v10 }
  0xd6   : > { %1636 = vmatprep.mubr.msk.f32.mxu1 %vm523_vm0, %v408_v12 }
  0xd8   : > { %930 = vmatmul.mubr.f32.gmra.mrb[8].mxu0 %v306_v11 }
  0xd9   : > { %1637 = vmatmul.mubr.msk.f32.gmra.mrb[72].mxu1 %vm523_vm0, %v413_v14  ;;  %934 = vmatprep.mubr.f32.mxu0 %v312_v15 }
  0xda   : > { %1639 = vmatprep.mubr.msk.f32.mxu1 %vm523_vm0, %v418_v16 }
  0xdc   : > { %935 = vmatmul.mubr.f32.gmra.mrb[10].mxu0 %v311_v18 }
  0xdd   : > { %1640 = vmatmul.mubr.msk.f32.gmra.mrb[74].mxu1 %vm523_vm0, %v423_v17  ;;  %939 = vmatprep.mubr.f32.mxu0 %v317_v19 }
  0xde   : > { %1642 = vmatprep.mubr.msk.f32.mxu1 %vm523_vm0, %v428_v21 }
  0xe0   : > { %940 = vmatmul.mubr.f32.gmra.mrb[12].mxu0 %v316_v24 }
  0xe1   : > { %1643 = vmatmul.mubr.msk.f32.gmra.mrb[76].mxu1 %vm523_vm0, %v433_v22  ;;  %944 = vmatprep.mubr.f32.mxu0 %v322_v23 }
  0xe2   : > { %1645 = vmatprep.mubr.msk.f32.mxu1 %vm523_vm0, %v438_v25 }
  0xe4   : > { %945 = vmatmul.mubr.f32.gmra.mrb[14].mxu0 %v321_v30 }
  0xe5   : > { %1646 = vmatmul.mubr.msk.f32.gmra.mrb[78].mxu1 %vm523_vm0, %v443_v26 }
 0x11c   : > { %v951_v28 = vpop.f32.mrb[0].mxu1 }
 0x11d   : > { %v953_v29 = vpop.f32.mrb[1].mxu1 }
 0x120   : > { %v956_v36 = vpop.f32.mrb[2].mxu1 }
 0x121   : > { %v958_v31 = vpop.f32.mrb[3].mxu1 }
 0x124   : > { %v961_v32 = vpop.f32.mrb[4].mxu1 }
 0x125   : > { %v963_v33 = vpop.f32.mrb[5].mxu1 }
 0x128   : > { %v966_v44 = vpop.f32.mrb[6].mxu1 }
 0x129   : > { %v968_v35 = vpop.f32.mrb[7].mxu1 }
 0x12c   : > { %v971_v37 = vpop.f32.mrb[8].mxu1 }
 0x12d   : > { %v973_v38 = vpop.f32.mrb[9].mxu1 }
 0x130   : > { %v976_v50 = vpop.f32.mrb[10].mxu1 }
 0x131   : > { %v978_v39 = vpop.f32.mrb[11].mxu1 }
 0x134   : > { %v981_v40 = vpop.f32.mrb[12].mxu1 }
 0x135   : > { %v983_v41 = vpop.f32.mrb[13].mxu1 }
 0x138   : > { %v986_v56 = vpop.f32.mrb[14].mxu1 }
 0x139   : > { %v988_v42 = vpop.f32.mrb[15].mxu1 }
 0x13b   : > { %v726_v46 = vpop.f32.mrb[16].mxu0 }
 0x13c   : > { %v727_v62 = vadd.f32 %v2551_v45, %v726_v46  ;;  %v728_v47 = vpop.f32.mrb[17].mxu0  ;;  %v991_v48 = vpop.f32.mrb[16].mxu1 }
 0x13d   : > { %v993_v49 = vpop.f32.mrb[17].mxu1 }
 0x13e   : > { %v2554_v5 = vadd.f32 %v951_v28, %v727_v62 }
 0x13f   : > { %v731_v51 = vpop.f32.mrb[18].mxu0 }
 0x140   : > { %v732_v52 = vadd.f32 %v2551_v45, %v731_v51  ;;  %v733_v53 = vpop.f32.mrb[19].mxu0  ;;  %v996_v13 = vpop.f32.mrb[18].mxu1 }
 0x141   : > { %v998_v54 = vpop.f32.mrb[19].mxu1 }
 0x142   : > { %v2557_v55 = vadd.f32 %v956_v36, %v732_v52 }
 0x143   : > { %v736_v57 = vpop.f32.mrb[20].mxu0 }
 0x144   : > { %v737_v20 = vadd.f32 %v2551_v45, %v736_v57  ;;  %v738_v58 = vpop.f32.mrb[21].mxu0  ;;  %v1001_v59 = vpop.f32.mrb[20].mxu1 }
 0x145   : > { %v1003_v60 = vpop.f32.mrb[21].mxu1 }
 0x146   : > { %v2560_v27 = vadd.f32 %v961_v32, %v737_v20 }
 0x147   : > { %v741_v8 = vpop.f32.mrb[22].mxu0 }
 0x148   : > { %v742_v61 = vadd.f32 %v2551_v45, %v741_v8  ;;  %v743_v63 = vpop.f32.mrb[23].mxu0  ;;  %v1006_v3 = vpop.f32.mrb[22].mxu1 }
 0x149   : > { %v1008_v34 = vpop.f32.mrb[23].mxu1 }
 0x14a   : > { %v2563_v0 = vadd.f32 %v966_v44, %v742_v61 }
 0x14b   : > { %v746_v1 = vpop.f32.mrb[24].mxu0 }
 0x14c   : > { %v747_v2 = vadd.f32 %v2551_v45, %v746_v1  ;;  %v748_v43 = vpop.f32.mrb[25].mxu0  ;;  %v1011_v4 = vpop.f32.mrb[24].mxu1 }
 0x14d   : > { %v1013_v6 = vpop.f32.mrb[25].mxu1 }
 0x14e   : > { %v2566_v7 = vadd.f32 %v971_v37, %v747_v2 }
 0x14f   : > { %v751_v9 = vpop.f32.mrb[26].mxu0 }
 0x150   : > { %v752_v10 = vadd.f32 %v2551_v45, %v751_v9  ;;  %v753_v12 = vpop.f32.mrb[27].mxu0  ;;  %v1016_v11 = vpop.f32.mrb[26].mxu1 }
 0x151   : > { %v1018_v14 = vpop.f32.mrb[27].mxu1 }
 0x152   : > { %v2569_v15 = vadd.f32 %v976_v50, %v752_v10 }
 0x153   : > { %v756_v16 = vpop.f32.mrb[28].mxu0 }
 0x154   : > { %v757_v18 = vadd.f32 %v2551_v45, %v756_v16  ;;  %v758_v17 = vpop.f32.mrb[29].mxu0  ;;  %v1021_v19 = vpop.f32.mrb[28].mxu1 }
 0x155   : > { %v1023_v21 = vpop.f32.mrb[29].mxu1 }
 0x156   : > { %v2572_v24 = vadd.f32 %v981_v40, %v757_v18 }
 0x157   : > { %v761_v22 = vpop.f32.mrb[30].mxu0 }
 0x158   : > { %v762_v23 = vadd.f32 %v2551_v45, %v761_v22  ;;  %v763_v25 = vpop.f32.mrb[31].mxu0  ;;  %v1026_v30 = vpop.f32.mrb[30].mxu1 }
 0x159   : > { %v1028_v26 = vpop.f32.mrb[31].mxu1 }
 0x15a   : > { %v2575_v28 = vadd.f32 %v986_v56, %v762_v23 }
 0x15b   : > { %v766_v29 = vpop.f32.mrb[32].mxu0 }
 0x15c   : > { %v767_v36 = vadd.f32 %v2551_v45, %v766_v29  ;;  %v768_v31 = vpop.f32.mrb[33].mxu0  ;;  %v1031_v32 = vpop.f32.mrb[32].mxu1 }
 0x15d   : > { %v1033_v33 = vpop.f32.mrb[33].mxu1 }
 0x15e   : > { %v2578_v44 = vadd.f32 %v991_v48, %v767_v36 }
 0x15f   : > { %v771_v35 = vpop.f32.mrb[34].mxu0 }
 0x160   : > { %v772_v37 = vadd.f32 %v2551_v45, %v771_v35  ;;  %v773_v38 = vpop.f32.mrb[35].mxu0  ;;  %v1036_v50 = vpop.f32.mrb[34].mxu1 }
 0x161   : > { %v1038_v39 = vpop.f32.mrb[35].mxu1 }
 0x162   : > { %v2581_v40 = vadd.f32 %v996_v13, %v772_v37 }
 0x163   : > { %v776_v41 = vpop.f32.mrb[36].mxu0 }
 0x164   : > { %v777_v56 = vadd.f32 %v2551_v45, %v776_v41  ;;  %v778_v42 = vpop.f32.mrb[37].mxu0  ;;  %v1041_v46 = vpop.f32.mrb[36].mxu1 }
 0x165   : > { %v1043_v62 = vpop.f32.mrb[37].mxu1 }
 0x166   : > { %v2584_v47 = vadd.f32 %v1001_v59, %v777_v56 }
 0x167   : > { %v781_v49 = vpop.f32.mrb[38].mxu0 }
 0x168   : > { %v782_v48 = vadd.f32 %v2551_v45, %v781_v49  ;;  %v783_v51 = vpop.f32.mrb[39].mxu0  ;;  %v1046_v52 = vpop.f32.mrb[38].mxu1 }
 0x169   : > { %v1048_v53 = vpop.f32.mrb[39].mxu1 }
 0x16a   : > { %v2587_v54 = vadd.f32 %v1006_v3, %v782_v48 }
 0x16b   : > { %v786_v57 = vpop.f32.mrb[40].mxu0 }
 0x16c   : > { %v787_v13 = vadd.f32 %v2551_v45, %v786_v57  ;;  %v788_v20 = vpop.f32.mrb[41].mxu0  ;;  %v1051_v58 = vpop.f32.mrb[40].mxu1 }
 0x16d   : > { %v1053_v60 = vpop.f32.mrb[41].mxu1 }
 0x16e   : > { %v2590_v8 = vadd.f32 %v1011_v4, %v787_v13 }
 0x16f   : > { %v791_v61 = vpop.f32.mrb[42].mxu0 }
 0x170   : > { %v792_v59 = vadd.f32 %v2551_v45, %v791_v61  ;;  %v793_v63 = vpop.f32.mrb[43].mxu0  ;;  %v1056_v34 = vpop.f32.mrb[42].mxu1 }
 0x171   : > { %v1058_v1 = vpop.f32.mrb[43].mxu1 }
 0x172   : > { %v2593_v2 = vadd.f32 %v1016_v11, %v792_v59 }
 0x173   : > { %v796_v43 = vpop.f32.mrb[44].mxu0 }
 0x174   : > { %v797_v3 = vadd.f32 %v2551_v45, %v796_v43  ;;  %v798_v6 = vpop.f32.mrb[45].mxu0  ;;  %v1061_v9 = vpop.f32.mrb[44].mxu1 }
 0x175   : > { %v1063_v10 = vpop.f32.mrb[45].mxu1 }
 0x176   : > { %v2596_v12 = vadd.f32 %v1021_v19, %v797_v3 }
 0x177   : > { %v801_v14 = vpop.f32.mrb[46].mxu0 }
 0x178   : > { %v802_v4 = vadd.f32 %v2551_v45, %v801_v14  ;;  %v803_v16 = vpop.f32.mrb[47].mxu0  ;;  %v2599_v18 = vpop.f32.mrb[46].mxu1 }
 0x179   : > { %v1068_v17 = vpop.f32.mrb[47].mxu1 }
 0x17a   : > { %v2601_v21 = vadd.f32 %v1026_v30, %v802_v4 }
 0x17b   : > { %v806_v22 = vpop.f32.mrb[48].mxu0 }
 0x17c   : > { %v807_v11 = vadd.f32 %v2551_v45, %v806_v22  ;;  %v808_v23 = vpop.f32.mrb[49].mxu0  ;;  %v2604_v25 = vpop.f32.mrb[48].mxu1 }
 0x17d   : > { %v2606_v26 = vpop.f32.mrb[49].mxu1 }
 0x17e   : > { %v2608_v29 = vadd.f32 %v1031_v32, %v807_v11 }
 0x17f   : > { %v811_v19 = vpop.f32.mrb[50].mxu0 }
 0x180   : > { %v812_v36 = vadd.f32 %v2551_v45, %v811_v19  ;;  %v813_v31 = vpop.f32.mrb[51].mxu0  ;;  %v2611_v33 = vpop.f32.mrb[50].mxu1 }
 0x181   : > { %v2613_v35 = vpop.f32.mrb[51].mxu1 }
 0x182   : > { %v2615_v30 = vadd.f32 %v1036_v50, %v812_v36 }
 0x183   : > { %v816_v37 = vpop.f32.mrb[52].mxu0 }
 0x184   : > { %v817_v38 = vadd.f32 %v2551_v45, %v816_v37  ;;  %v818_v39 = vpop.f32.mrb[53].mxu0  ;;  %v2618_v41 = vpop.f32.mrb[52].mxu1 }
 0x185   : > { %v2620_v56 = vpop.f32.mrb[53].mxu1 }
 0x186   : > { %v2622_v32 = vadd.f32 %v1041_v46, %v817_v38 }
 0x187   : > { %v821_v42 = vpop.f32.mrb[54].mxu0 }
 0x188   : > { %v822_v62 = vadd.f32 %v2551_v45, %v821_v42  ;;  %v823_v49 = vpop.f32.mrb[55].mxu0  ;;  %v2625_v48 = vpop.f32.mrb[54].mxu1 }
 0x189   : > { %v2627_v51 = vpop.f32.mrb[55].mxu1 }
 0x18a   : > { %v2629_v50 = vadd.f32 %v1046_v52, %v822_v62 }
 0x18b   : > { %v826_v53 = vpop.f32.mrb[56].mxu0 }
 0x18c   : > { %v827_v57 = vadd.f32 %v2551_v45, %v826_v53  ;;  %v1614_v13 = vpop.f32.mrb[56].mxu1  ;;  %v828_v20 = vpop.f32.mrb[57].mxu0 }
 0x18d   : > { %v1182_v60 = vadd.f32 %v1614_v13, %v2557_v55  ;;  %v1176_v46 = vpop.f32.mrb[57].mxu1 }
 0x18e   : > { %v1177_v61 = vadd.f32 %v1176_v46, %v2554_v5  ;;  %v2634_v59 = vadd.f32 %v1051_v58, %v827_v57 }
 0x18f   : > { %1890 = vtanh.f32 %v1182_v60  ;;  %v831_v63 = vpop.f32.mrb[58].mxu0 }
 0x190   : > { %1892 = vtanh.f32 %v1177_v61  ;;  %v832_v1 = vadd.f32 %v2551_v45, %v831_v63  ;;  %v1617_v52 = vpop.f32.mrb[58].mxu1  ;;  %v833_v43 = vpop.f32.mrb[59].mxu0 }
 0x191   : > { %v1192_v3 = vadd.f32 %v1617_v52, %v2563_v0  ;;  %v1186_v6 = vpop.f32.mrb[59].mxu1 }
 0x192   : > { %v1187_v10 = vadd.f32 %v1186_v6, %v2560_v27  ;;  %v2639_v14 = vadd.f32 %v1056_v34, %v832_v1 }
 0x193   : > { %1894 = vtanh.f32 %v1192_v3  ;;  %v836_v55 = vpop.f32.mrb[60].mxu0 }
 0x194   : > { %1896 = vtanh.f32 %v1187_v10  ;;  %v837_v5 = vadd.f32 %v2551_v45, %v836_v55  ;;  %v1620_v58 = vpop.f32.mrb[60].mxu1  ;;  %v838_v4 = vpop.f32.mrb[61].mxu0 }
 0x195   : > { %v1202_v16 = vadd.f32 %v1620_v58, %v2569_v15  ;;  %v1196_v17 = vpop.f32.mrb[61].mxu1 }
 0x196   : > { %v1197_v22 = vadd.f32 %v1196_v17, %v2566_v7  ;;  %v2645_v11 = vadd.f32 %v1061_v9, %v837_v5 }
 0x197   : > { %1898 = vtanh.f32 %v1202_v16  ;;  %v841_v27 = vpop.f32.mrb[62].mxu0 }
 0x198   : > { %1900 = vtanh.f32 %v1197_v22  ;;  %v842_v0 = vadd.f32 %v2551_v45, %v841_v27  ;;  %v1623_v34 = vpop.f32.mrb[62].mxu1  ;;  %v843_v23 = vpop.f32.mrb[63].mxu0 }
 0x199   : > { %v1891_v15 = vpop.eup %1890  ;;  %v1212_v19 = vadd.f32 %v1623_v34, %v2575_v28  ;;  %v1206_v7 = vpop.f32.mrb[63].mxu1 }
 0x19a   : > { %v1893_v9 = vpop.eup %1892  ;;  %1336 = vst [vmem:[%s2650_s8 + $0x48] sm:$0xff] %v1891_v15  ;;  %v1207_v36 = vadd.f32 %v1206_v7, %v2572_v24  ;;  %v2657_v31 = vadd.f32 %v2599_v18, %v842_v0 }
 0x19b   : > { %1335 = vst [vmem:[%s2650_s8 + $0x40] sm:$0xff] %v1893_v9  ;;  %1902 = vtanh.f32 %v1212_v19  ;;  %v911_v37 = vpop.f32.mrb[0].mxu0 }
 0x19c   : > { %1904 = vtanh.f32 %v1207_v36  ;;  %v1792_v38 = vadd.f32 %v2551_v45, %v911_v37  ;;  %v1626_v39 = vpop.f32.mrb[64].mxu1  ;;  %v913_v42 = vpop.f32.mrb[1].mxu0 }
 0x19d   : > { %v1895_v62 = vpop.eup %1894  ;;  %v1222_v28 = vadd.f32 %v1626_v39, %v2581_v40  ;;  %v1216_v49 = vpop.f32.mrb[65].mxu1 }
 0x19e   : > { %v1897_v53 = vpop.eup %1896  ;;  %1338 = vst [vmem:[%s2650_s8 + $0x58] sm:$0xff] %v1895_v62  ;;  %v1137_v24 = vadd.f32 %v1792_v38, %v2606_v26  ;;  %v1217_v18 = vadd.f32 %v1216_v49, %v2578_v44 }
 0x19f   : > { %1337 = vst [vmem:[%s2650_s8 + $0x50] sm:$0xff] %v1897_v53  ;;  %1906 = vtanh.f32 %v1222_v28  ;;  %v916_v57 = vpop.f32.mrb[2].mxu0 }
 0x1a0   : > { %1908 = vtanh.f32 %v1137_v24  ;;  %v1793_v13 = vadd.f32 %v2551_v45, %v916_v57  ;;  %v1629_v20 = vpop.f32.mrb[66].mxu1  ;;  %v918_v60 = vpop.f32.mrb[3].mxu0 }
 0x1a1   : > { %v1899_v46 = vpop.eup %1898  ;;  %1910 = vtanh.f32 %v1217_v18  ;;  %v1232_v40 = vadd.f32 %v1629_v20, %v2587_v54  ;;  %v1226_v61 = vpop.f32.mrb[67].mxu1 }
 0x1a2   : > { %v1901_v63 = vpop.eup %1900  ;;  %1340 = vst [vmem:[%s2650_s8 + $0x68] sm:$0xff] %v1899_v46  ;;  %v1142_v26 = vadd.f32 %v1793_v13, %v2604_v25  ;;  %v1227_v44 = vadd.f32 %v1226_v61, %v2584_v47 }
 0x1a3   : > { %1339 = vst [vmem:[%s2650_s8 + $0x60] sm:$0xff] %v1901_v63  ;;  %1912 = vtanh.f32 %v1232_v40  ;;  %v921_v1 = vpop.f32.mrb[4].mxu0 }
 0x1a4   : > { %1914 = vtanh.f32 %v1142_v26  ;;  %v1794_v52 = vadd.f32 %v2551_v45, %v921_v1  ;;  %v1632_v43 = vpop.f32.mrb[68].mxu1  ;;  %v923_v3 = vpop.f32.mrb[5].mxu0 }
 0x1a5   : > { %v1903_v6 = vpop.eup %1902  ;;  %1916 = vtanh.f32 %v1227_v44  ;;  %v1242_v54 = vadd.f32 %v1632_v43, %v2593_v2  ;;  %v1236_v10 = vpop.f32.mrb[69].mxu1 }
 0x1a6   : > { %v1905_v55 = vpop.eup %1904  ;;  %1342 = vst [vmem:[%s2650_s8 + $0x78] sm:$0xff] %v1903_v6  ;;  %v1147_v25 = vadd.f32 %v1794_v52, %v2613_v35  ;;  %v1237_v47 = vadd.f32 %v1236_v10, %v2590_v8 }
 0x1a7   : > { %1341 = vst [vmem:[%s2650_s8 + $0x70] sm:$0xff] %v1905_v55  ;;  %1918 = vtanh.f32 %v1242_v54  ;;  %v926_v5 = vpop.f32.mrb[6].mxu0 }
 0x1a8   : > { %1920 = vtanh.f32 %v1147_v25  ;;  %v1795_v58 = vadd.f32 %v2551_v45, %v926_v5  ;;  %v1635_v4 = vpop.f32.mrb[70].mxu1  ;;  %v928_v16 = vpop.f32.mrb[7].mxu0 }
 0x1a9   : > { %v1907_v17 = vpop.eup %1906  ;;  %1922 = vtanh.f32 %v1237_v47  ;;  %v1252_v2 = vadd.f32 %v1635_v4, %v2601_v21  ;;  %v1246_v22 = vpop.f32.mrb[71].mxu1 }
 0x1aa   : > { %v1909_v27 = vpop.eup %1908  ;;  %1344 = vst [vmem:[%s2650_s8 + $0x88] sm:$0xff] %v1907_v17  ;;  %v1152_v35 = vadd.f32 %v1795_v58, %v2611_v33  ;;  %v1247_v8 = vadd.f32 %v1246_v22, %v2596_v12 }
 0x1ab   : > { %v1911_v0 = vpop.eup %1910  ;;  %1327 = vst [vmem:[%s2650_s8] sm:$0xff] %v1909_v27  ;;  %1924 = vtanh.f32 %v1252_v2  ;;  %v931_v34 = vpop.f32.mrb[8].mxu0 }
 0x1ac   : > { %1343 = vst [vmem:[%s2650_s8 + $0x80] sm:$0xff] %v1911_v0  ;;  %1926 = vtanh.f32 %v1152_v35  ;;  %v1796_v23 = vadd.f32 %v2551_v45, %v931_v34  ;;  %v1638_v15 = vpop.f32.mrb[72].mxu1  ;;  %v933_v21 = vpop.f32.mrb[9].mxu0 }
 0x1ad   : > { %v1913_v19 = vpop.eup %1912  ;;  %1928 = vtanh.f32 %v1247_v8  ;;  %v1262_v7 = vadd.f32 %v1638_v15, %v2615_v30  ;;  %v1256_v33 = vpop.f32.mrb[73].mxu1 }
 0x1ae   : > { %v1915_v9 = vpop.eup %1914  ;;  %1346 = vst [vmem:[%s2650_s8 + $0x98] sm:$0xff] %v1913_v19  ;;  %v1157_v12 = vadd.f32 %v1796_v23, %v2620_v56  ;;  %v1257_v36 = vadd.f32 %v1256_v33, %v2608_v29 }
 0x1af   : > { %v1917_v37 = vpop.eup %1916  ;;  %1328 = vst [vmem:[%s2650_s8 + $0x8] sm:$0xff] %v1915_v9  ;;  %1930 = vtanh.f32 %v1262_v7  ;;  %v936_v38 = vpop.f32.mrb[10].mxu0 }
 0x1b0   : > { %1345 = vst [vmem:[%s2650_s8 + $0x90] sm:$0xff] %v1917_v37  ;;  %1932 = vtanh.f32 %v1157_v12  ;;  %v1797_v39 = vadd.f32 %v2551_v45, %v936_v38  ;;  %v1641_v42 = vpop.f32.mrb[74].mxu1  ;;  %v938_v30 = vpop.f32.mrb[11].mxu0 }
 0x1b1   : > { %v1919_v62 = vpop.eup %1918  ;;  %1934 = vtanh.f32 %v1257_v36  ;;  %v1272_v28 = vadd.f32 %v1641_v42, %v2629_v50  ;;  %v1266_v56 = vpop.f32.mrb[75].mxu1 }
 0x1b2   : > { %v1921_v49 = vpop.eup %1920  ;;  %1348 = vst [vmem:[%s2650_s8 + $0xa8] sm:$0xff] %v1919_v62  ;;  %v1162_v29 = vadd.f32 %v1797_v39, %v2618_v41  ;;  %v1267_v53 = vadd.f32 %v1266_v56, %v2622_v32 }
 0x1b3   : > { %v1923_v24 = vpop.eup %1922  ;;  %1329 = vst [vmem:[%s2650_s8 + $0x10] sm:$0xff] %v1921_v49  ;;  %1936 = vtanh.f32 %v1272_v28  ;;  %v941_v18 = vpop.f32.mrb[12].mxu0 }
 0x1b4   : > { %1347 = vst [vmem:[%s2650_s8 + $0xa0] sm:$0xff] %v1923_v24  ;;  %1938 = vtanh.f32 %v1162_v29  ;;  %v1798_v57 = vadd.f32 %v2551_v45, %v941_v18  ;;  %v1644_v13 = vpop.f32.mrb[76].mxu1  ;;  %v943_v50 = vpop.f32.mrb[13].mxu0 }
 0x1b5   : > { %v1925_v20 = vpop.eup %1924  ;;  %1940 = vtanh.f32 %v1267_v53  ;;  %v1282_v60 = vadd.f32 %v1644_v13, %v2639_v14  ;;  %v1276_v41 = vpop.f32.mrb[77].mxu1 }
 0x1b6   : > { %v1927_v46 = vpop.eup %1926  ;;  %1350 = vst [vmem:[%s2650_s8 + $0xb8] sm:$0xff] %v1925_v20  ;;  %v1167_v32 = vadd.f32 %v1798_v57, %v2627_v51  ;;  %v1277_v40 = vadd.f32 %v1276_v41, %v2634_v59 }
 0x1b7   : > { %v1929_v61 = vpop.eup %1928  ;;  %1330 = vst [vmem:[%s2650_s8 + $0x18] sm:$0xff] %v1927_v46  ;;  %1942 = vtanh.f32 %v1282_v60  ;;  %v946_v63 = vpop.f32.mrb[14].mxu0 }
 0x1b8   : > { %1349 = vst [vmem:[%s2650_s8 + $0xb0] sm:$0xff] %v1929_v61  ;;  %1944 = vtanh.f32 %v1167_v32  ;;  %v1799_v26 = vadd.f32 %v2551_v45, %v946_v63  ;;  %v1647_v44 = vpop.f32.mrb[78].mxu1  ;;  %v948_v14 = vpop.f32.mrb[15].mxu0 }
 0x1b9   : > { %v1931_v1 = vpop.eup %1930  ;;  %1946 = vtanh.f32 %v1277_v40  ;;  %v1292_v51 = vadd.f32 %v1647_v44, %v2657_v31  ;;  %v1286_v52 = vpop.f32.mrb[79].mxu1 }
 0x1ba   : > { %v1933_v59 = vpop.eup %1932  ;;  %1352 = vst [vmem:[%s2650_s8 + $0xc8] sm:$0xff] %v1931_v1  ;;  %v1172_v43 = vadd.f32 %v1799_v26, %v2625_v48  ;;  %v1287_v3 = vadd.f32 %v1286_v52, %v2645_v11 }
 0x1bb   : > { %v1935_v6 = vpop.eup %1934  ;;  %1331 = vst [vmem:[%s2650_s8 + $0x20] sm:$0xff] %v1933_v59  ;;  %1948 = vtanh.f32 %v1292_v51 }
 0x1bc   : > { %1351 = vst [vmem:[%s2650_s8 + $0xc0] sm:$0xff] %v1935_v6  ;;  %1950 = vtanh.f32 %v1172_v43 }
 0x1bd   : > { %v1937_v45 = vpop.eup %1936  ;;  %1952 = vtanh.f32 %v1287_v3 }
 0x1be   : > { %v1939_v31 = vpop.eup %1938  ;;  %1354 = vst [vmem:[%s2650_s8 + $0xd8] sm:$0xff] %v1937_v45 }
 0x1bf   : > { %v1941_v54 = vpop.eup %1940  ;;  %1332 = vst [vmem:[%s2650_s8 + $0x28] sm:$0xff] %v1939_v31 }
 0x1c0   : > { %1353 = vst [vmem:[%s2650_s8 + $0xd0] sm:$0xff] %v1941_v54 }
 0x1c1   : > { %v1943_v48 = vpop.eup %1942 }
 0x1c2   : > { %v1945_v10 = vpop.eup %1944  ;;  %1356 = vst [vmem:[%s2650_s8 + $0xe8] sm:$0xff] %v1943_v48 }
 0x1c3   : > { %v1947_v11 = vpop.eup %1946  ;;  %1333 = vst [vmem:[%s2650_s8 + $0x30] sm:$0xff] %v1945_v10 }
 0x1c4   : > { %1355 = vst [vmem:[%s2650_s8 + $0xe0] sm:$0xff] %v1947_v11 }
 0x1c5   : > { %v1949_v55 = vpop.eup %1948 }
 0x1c6   : > { %v1951_v25 = vpop.eup %1950  ;;  %1358 = vst [vmem:[%s2650_s8 + $0xf8] sm:$0xff] %v1949_v55 }
 0x1c7   : > { %v1953_v47 = vpop.eup %1952  ;;  %1334 = vst [vmem:[%s2650_s8 + $0x38] sm:$0xff] %v1951_v25 }
 0x1c8   : > { %1357 = vst [vmem:[%s2650_s8 + $0xf0] sm:$0xff] %v1953_v47 }
 0x1c9 PF: > { %s13_s14 = sadd.s32 1, %s1976_s14   ;;  %s2735_s12 = smov %s1972_s13 }
 0x1ca   : > { %p10_p5 = scmp.ge.s32.totalorder %s13_s14, 10   ;;  %s2736_s13 = smov %s2738_s15 }
 0x1cc   :  { %12 = sbr.rel (!%p10_p5) target bundleno = 2 (0x2), region = 68 }

</bundles_post_ra>
